<compile_context>
chip_gen: v7x
topology: tpu7x:2x2x1
jax: 0.10.0
libtpu: 0.0.40
codegen_flags: <defaults>
</compile_context>

<pallas_src>
import functools
import math

import numpy as np
import jax
import jax.numpy as jnp
from jax import lax
from jax.experimental import pallas as pl
from jax.experimental.pallas import tpu as pltpu

# ---- Voxelization config (the module's __init__ arguments) -------------------
VOXEL_SIZE = (0.5, 0.5, 8.0)                         # (vx, vy, vz): nz == 1 -> pillars
POINT_CLOUD_RANGE = (0.0, 0.0, -4.0, 8.0, 8.0, 4.0)  # (x0, y0, z0, x1, y1, z1)
MAX_NUM_POINTS = 8                                   # max points per pillar
MAX_VOXELS = 32                                      # max pillars per sample

NX = int(round((POINT_CLOUD_RANGE[3] - POINT_CLOUD_RANGE[0]) / VOXEL_SIZE[0]))
NY = int(round((POINT_CLOUD_RANGE[4] - POINT_CLOUD_RANGE[1]) / VOXEL_SIZE[1]))
NZ = int(round((POINT_CLOUD_RANGE[5] - POINT_CLOUD_RANGE[2]) / VOXEL_SIZE[2]))

N_POINTS = 128                 # (static) points per sample
C = 4                          # point features (x, y, z, intensity)
C_PAD = ((C + 7) // 8) * 8     # pad feature axis to a full sublane tile
OUT_SLOTS = MAX_VOXELS * MAX_NUM_POINTS              # flat pillar slots (256)
OUT_PAD = ((OUT_SLOTS + 127) // 128) * 128           # keep output lane-dense
META_LANES = max(128, ((MAX_VOXELS + 127) // 128) * 128)
BATCH = 2

# meta row layout (int32, (8, META_LANES) per sample)
_ROW_Z, _ROW_Y, _ROW_X, _ROW_NPTS, _ROW_NV = 0, 1, 2, 3, 4


def _is_pow2(v):
    m, _ = math.frexp(float(v))
    return v > 0 and m == 0.5


# reciprocal-multiply is only bit-identical to divide for power-of-two voxel
# sizes; fall back to a true divide otherwise (correctness review).
_USE_RECIP = tuple(_is_pow2(v) for v in VOXEL_SIZE)


def _to_voxel_units(delta, axis):
    """(p - range_min) -> voxel units; works on jnp and np arrays alike."""
    if _USE_RECIP[axis]:
        return delta * (1.0 / VOXEL_SIZE[axis])
    return delta / VOXEL_SIZE[axis]


def _point_coords(x, y, z):
    """Per-point voxel coords + validity; x/y/z are (N,1) or (1,N) float32."""
    cx = jnp.floor(_to_voxel_units(x - POINT_CLOUD_RANGE[0], 0)).astype(jnp.int32)
    cy = jnp.floor(_to_voxel_units(y - POINT_CLOUD_RANGE[1], 1)).astype(jnp.int32)
    cz = jnp.floor(_to_voxel_units(z - POINT_CLOUD_RANGE[2], 2)).astype(jnp.int32)
    valid = ((cx >= 0) & (cx < NX) & (cy >= 0) & (cy < NY)
             & (cz >= 0) & (cz < NZ))
    vid = (cz * NY + cy) * NX + cx
    return vid, valid, cx, cy, cz


# ---- fused Pallas kernel ------------------------------------------------------
def _pillar_kernel(batch, pts_ref, pts_t_ref, feat_ref, meta_ref):
    """Fused hard voxelization for the whole (static) batch in ONE grid step.

    pts_ref   : (B, N, C_PAD)        f32  points (point index on sublanes)
    pts_t_ref : (B, C_PAD, N)        f32  points transposed (point index on lanes)
    feat_ref  : (B, C_PAD, OUT_PAD)  f32  gathered pillar features (lane dense)
    meta_ref  : (B, 8, META_LANES)   i32  rows: z, y, x, npoints, num_voxels
    """
    n = N_POINTS
    big = jnp.int32(n)
    col_j = lax.broadcasted_iota(jnp.int32, (n, n), 1)          # j along lanes
    row_i = lax.broadcasted_iota(jnp.int32, (n, n), 0)          # i along sublanes
    iota_col = lax.broadcasted_iota(jnp.int32, (n, 1), 0)
    iota_row = lax.broadcasted_iota(jnp.int32, (1, n), 1)
    slot_lane = lax.broadcasted_iota(jnp.int32, (n, OUT_PAD), 1)
    pillar_lane = lax.broadcasted_iota(jnp.int32, (n, META_LANES), 1)
    meta_row = lax.broadcasted_iota(jnp.int32, (8, META_LANES), 0)

    for b in range(batch):                     # static unroll; batch is tiny
        pts = pts_ref[b]                       # (N, C_PAD)
        pts_t = pts_t_ref[b]                   # (C_PAD, N)

        # per-point voxel ids in BOTH orientations (no in-kernel transposes)
        vid_c, valid_c, cx_c, cy_c, cz_c = _point_coords(
            pts[:, 0:1], pts[:, 1:2], pts[:, 2:3])               # (N, 1)
        vid_r, valid_r, _, _, _ = _point_coords(
            pts_t[0:1, :], pts_t[1:2, :], pts_t[2:3, :])         # (1, N)

        # same-voxel matrix and first-appearance bookkeeping
        eq = (vid_c == vid_r) & valid_c & valid_r                # (N, N)
        fo_c = jnp.min(jnp.where(eq, col_j, big), axis=1, keepdims=True)   # (N,1)
        fo_r = jnp.min(jnp.where(eq, row_i, big), axis=0, keepdims=True)   # (1,N)
        is_first_c = valid_c & (fo_c == iota_col)
        is_first_r = valid_r & (fo_r == iota_row)

        # rank = #voxels first-appearing before this point's voxel (allocation
        # order); slot = #earlier points of the same voxel
        rank = jnp.sum((is_first_r & (col_j < fo_c)).astype(jnp.int32),
                       axis=1, keepdims=True)                    # (N, 1)
        slot = jnp.sum((eq & (col_j < row_i)).astype(jnp.int32),
                       axis=1, keepdims=True)                    # (N, 1)
        keep = valid_c & (rank < MAX_VOXELS) & (slot < MAX_NUM_POINTS)
        flat_tgt = jnp.where(keep, rank * MAX_NUM_POINTS + slot, -1)

        # ---- feature gather: one-hot matmul on the MXU; empty slots come out
        # zero for free; HIGHEST precision keeps pass-through values exact ----
        onehot = (slot_lane == flat_tgt).astype(jnp.float32)     # (N, OUT_PAD)
        feat_ref[b] = jnp.dot(pts_t, onehot,
                              preferred_element_type=jnp.float32,
                              precision=lax.Precision.HIGHEST)

        # ---- per-pillar metadata (coords of first point, point count) -------
        on_pillar = rank == pillar_lane                          # (N, META_LANES)
        firstsel = is_first_c & on_pillar & (rank < MAX_VOXELS)
        keepsel = keep & on_pillar
        npts = jnp.sum(keepsel.astype(jnp.int32), axis=0, keepdims=True)
        cz_p = jnp.sum(jnp.where(firstsel, cz_c, 0), axis=0, keepdims=True)
        cy_p = jnp.sum(jnp.where(firstsel, cy_c, 0), axis=0, keepdims=True)
        cx_p = jnp.sum(jnp.where(firstsel, cx_c, 0), axis=0, keepdims=True)
        nv = jnp.minimum(
            jnp.sum(is_first_r.astype(jnp.int32), axis=1, keepdims=True),
            MAX_VOXELS)                                          # (1, 1)

        meta_ref[b] = (jnp.where(meta_row == _ROW_Z, cz_p, 0)
                       + jnp.where(meta_row == _ROW_Y, cy_p, 0)
                       + jnp.where(meta_row == _ROW_X, cx_p, 0)
                       + jnp.where(meta_row == _ROW_NPTS, npts, 0)
                       + jnp.where(meta_row == _ROW_NV, nv, 0))


@functools.lru_cache(maxsize=None)
def _make_pillar_call(batch):
    # Single grid step: everything (2 x ~100 KiB of blocks + a few (128,128)
    # intermediates) fits VMEM on every generation with huge headroom.
    # TODO(synk): for realistic point-cloud sizes (N >> 128), tile the point
    # axis as an "arbitrary" reduction grid dim with a VMEM accumulator.
    return pl.pallas_call(
        functools.partial(_pillar_kernel, batch),
        out_shape=(
            jax.ShapeDtypeStruct((batch, C_PAD, OUT_PAD), jnp.float32),
            jax.ShapeDtypeStruct((batch, 8, META_LANES), jnp.int32),
        ),
        grid=(1,),
        in_specs=[
            pl.BlockSpec((batch, N_POINTS, C_PAD), lambda i: (0, 0, 0)),
            pl.BlockSpec((batch, C_PAD, N_POINTS), lambda i: (0, 0, 0)),
        ],
        out_specs=(
            pl.BlockSpec((batch, C_PAD, OUT_PAD), lambda i: (0, 0, 0)),
            pl.BlockSpec((batch, 8, META_LANES), lambda i: (0, 0, 0)),
        ),
        compiler_params=pltpu.CompilerParams(
            dimension_semantics=("arbitrary",)),
    )


# ---- batched device-side forward (one launch, one transfer) -------------------
@jax.jit
def _pillar_forward_device(pts_stack):
    """pts_stack: (B, N_POINTS, C) float32 -> padded per-sample outputs."""
    batch = pts_stack.shape[0]
    pts_pad = jnp.pad(pts_stack, ((0, 0), (0, 0), (0, C_PAD - C)))
    pts_t = jnp.transpose(pts_pad, (0, 2, 1))
    feats_t, meta = _make_pillar_call(batch)(pts_pad, pts_t)

    pillars = jnp.transpose(feats_t[:, :C, :OUT_SLOTS], (0, 2, 1)).reshape(
        batch, MAX_VOXELS, MAX_NUM_POINTS, C)
    coors = jnp.stack([meta[:, _ROW_Z, :MAX_VOXELS],
                       meta[:, _ROW_Y, :MAX_VOXELS],
                       meta[:, _ROW_X, :MAX_VOXELS]], axis=-1)    # (B, V, 3) zyx
    npoints = meta[:, _ROW_NPTS, :MAX_VOXELS]
    num_voxels = meta[:, _ROW_NV, 0]
    return pillars, coors, npoints, num_voxels


# ---- PillarLayer.forward -------------------------------------------------------
def pillar_layer_forward(batched_pts):
    """batched_pts: list of (N_POINTS, C) float32 arrays (len == batch size).

    Returns numpy arrays (single device->host transfer, no re-upload):
        pillars            (p1+...+pb, max_num_points, C)  float32
        coors_batch        (p1+...+pb, 1 + 3)              int64  [b, z, y, x]
        npoints_per_pillar (p1+...+pb,)                     int32
    """
    # TODO(synk): ragged per-sample point counts would need padding to a common
    # N plus a validity mask before stacking; here N_POINTS is static.
    pts_stack = jnp.stack([jnp.asarray(p, jnp.float32) for p in batched_pts], 0)
    outs = _pillar_forward_device(pts_stack)
    pillars, coors, npoints, num_voxels = jax.device_get(outs)

    pillars_l, coors_l, npts_l = [], [], []
    for i in range(pillars.shape[0]):
        nv = int(num_voxels[i])
        pillars_l.append(pillars[i, :nv])
        # F.pad(cur_coors, (1, 0), value=i) + .long(): left-pad batch index, int64
        coors_l.append(np.concatenate(
            [np.full((nv, 1), i, np.int64), coors[i, :nv].astype(np.int64)],
            axis=1))
        npts_l.append(npoints[i, :nv])
    return (np.concatenate(pillars_l, axis=0),
            np.concatenate(coors_l, axis=0),
            np.concatenate(npts_l, axis=0))


# ---- pure-numpy reference (hard voxelization, same semantics) ------------------
def _voxelize_np(pts):
    pts = np.asarray(pts, np.float32)
    rel = pts[:, :3] - np.asarray(POINT_CLOUD_RANGE[:3], np.float32)
    units = np.stack([_to_voxel_units(rel[:, a], a) for a in range(3)], axis=1)
    cidx = np.floor(units).astype(np.int64)                      # (N, 3) x, y, z
    valid = np.all((cidx >= 0) & (cidx < np.array([NX, NY, NZ])), axis=1)

    voxels = np.zeros((MAX_VOXELS, MAX_NUM_POINTS, C), np.float32)
    coors = np.zeros((MAX_VOXELS, 3), np.int64)
    npts = np.zeros((MAX_VOXELS,), np.int32)
    table = {}
    for i in range(pts.shape[0]):
        if not valid[i]:
            continue
        key = (int(cidx[i, 2]), int(cidx[i, 1]), int(cidx[i, 0]))  # (z, y, x)
        v = table.get(key)
        if v is None:
            if len(table) >= MAX_VOXELS:
                continue
            v = len(table)
            table[key] = v
            coors[v] = key
        if npts[v] < MAX_NUM_POINTS:
            voxels[v, npts[v]] = pts[i]
            npts[v] += 1
    nv = len(table)
    return voxels[:nv], coors[:nv], npts[:nv]


def _pillar_reference_np(batched_pts):
    pillars_l, coors_l, npts_l = [], [], []
    for i, pts in enumerate(batched_pts):
        voxels, coors, npts = _voxelize_np(pts)
        pillars_l.append(voxels)
        coors_l.append(np.concatenate(
            [np.full((coors.shape[0], 1), i, np.int64), coors], axis=1))
        npts_l.append(npts)
    return (np.concatenate(pillars_l, axis=0),
            np.concatenate(coors_l, axis=0),
            np.concatenate(npts_l, axis=0))


if __name__ == "__main__":
    key = jax.random.PRNGKey(0)
    keys = jax.random.split(key, BATCH)
    batched_pts = []
    for k in keys:
        ka, kb, kc = jax.random.split(k, 3)
        xy = jax.random.uniform(ka, (N_POINTS, 2), minval=-1.0, maxval=5.0)
        z = jax.random.uniform(kb, (N_POINTS, 1), minval=-5.0, maxval=5.0)
        inten = jax.random.uniform(kc, (N_POINTS, 1))
        batched_pts.append(
            jnp.concatenate([xy, z, inten], axis=1).astype(jnp.float32))

    pillars, coors_batch, npoints = pillar_layer_forward(batched_pts)
    jax.block_until_ready((pillars, coors_batch, npoints))

    # sanity checks + correctness vs a pure-numpy hard-voxelization reference
    ref_pillars, ref_coors, ref_npts = _pillar_reference_np(
        [np.asarray(p) for p in batched_pts])

    P = pillars.shape[0]
    assert P == coors_batch.shape[0] == npoints.shape[0] and P > 0
    assert pillars.shape[1:] == (MAX_NUM_POINTS, C)
    assert coors_batch.shape[1] == 4
    assert int(npoints.min()) >= 1 and int(npoints.max()) <= MAX_NUM_POINTS
    np.testing.assert_array_equal(np.asarray(coors_batch), ref_coors)
    np.testing.assert_array_equal(np.asarray(npoints), ref_npts)
    np.testing.assert_allclose(np.asarray(pillars), ref_pillars,
                               rtol=1e-5, atol=1e-5)
    print("KERNEL_OK")
</pallas_src>

<mosaic_0001>
module attributes {stable_mosaic.version = 11 : i64} {
  func.func @_pillar_kernel(%arg0: i32, %arg1: memref<2x128x8xf32, #tpu.memory_space<vmem>>, %arg2: memref<2x8x128xf32, #tpu.memory_space<vmem>>, %arg3: memref<2x8x256xf32, #tpu.memory_space<vmem>>, %arg4: memref<2x8x128xi32, #tpu.memory_space<vmem>>) attributes {dimension_semantics = [#tpu.dimension_semantics<arbitrary>], iteration_bounds = array<i64: 1>, scalar_prefetch = 0 : i64, scratch_operands = 0 : i64, tpu.core_type = #tpu.core_type<tc>, window_params = [{pipeline_mode = #tpu.pipeline_mode<synchronous>, transform_indices = @transform_0, window_bounds = array<i64: 2, 128, 8>}, {pipeline_mode = #tpu.pipeline_mode<synchronous>, transform_indices = @transform_1, window_bounds = array<i64: 2, 8, 128>}, {pipeline_mode = #tpu.pipeline_mode<synchronous>, transform_indices = @transform_2, window_bounds = array<i64: 2, 8, 256>}, {pipeline_mode = #tpu.pipeline_mode<synchronous>, transform_indices = @transform_3, window_bounds = array<i64: 2, 8, 128>}]} {
    %0 = tpu.iota {dimensions = array<i32: 1>} : vector<128x128xi32>
    %1 = tpu.iota {dimensions = array<i32: 0>} : vector<128x128xi32>
    %2 = tpu.iota {dimensions = array<i32: 0>} : vector<128x1xi32>
    %3 = tpu.iota {dimensions = array<i32: 1>} : vector<1x128xi32>
    %4 = tpu.iota {dimensions = array<i32: 1>} : vector<128x256xi32>
    %5 = tpu.iota {dimensions = array<i32: 1>} : vector<128x128xi32>
    %6 = tpu.iota {dimensions = array<i32: 0>} : vector<8x128xi32>
    %c0 = arith.constant 0 : index
    %c0_0 = arith.constant 0 : index
    %c0_1 = arith.constant 0 : index
    %7 = vector.load %arg1[%c0, %c0_0, %c0_1] : memref<2x128x8xf32, #tpu.memory_space<vmem>>, vector<1x128x8xf32>
    %8 = vector.shape_cast %7 : vector<1x128x8xf32> to vector<128x8xf32>
    %c0_2 = arith.constant 0 : index
    %c0_3 = arith.constant 0 : index
    %c0_4 = arith.constant 0 : index
    %9 = vector.load %arg2[%c0_2, %c0_3, %c0_4] : memref<2x8x128xf32, #tpu.memory_space<vmem>>, vector<1x8x128xf32>
    %10 = vector.shape_cast %9 : vector<1x8x128xf32> to vector<8x128xf32>
    %11 = vector.extract_strided_slice %8 {offsets = [0, 0], sizes = [128, 1], strides = [1, 1]} : vector<128x8xf32> to vector<128x1xf32>
    %12 = vector.extract_strided_slice %8 {offsets = [0, 1], sizes = [128, 1], strides = [1, 1]} : vector<128x8xf32> to vector<128x1xf32>
    %13 = vector.extract_strided_slice %8 {offsets = [0, 2], sizes = [128, 1], strides = [1, 1]} : vector<128x8xf32> to vector<128x1xf32>
    %cst = arith.constant 0.000000e+00 : f32
    %14 = vector.broadcast %cst : f32 to vector<128x1xf32>
    %15 = arith.subf %11, %14 : vector<128x1xf32>
    %cst_5 = arith.constant 2.000000e+00 : f32
    %16 = vector.broadcast %cst_5 : f32 to vector<128x1xf32>
    %17 = arith.mulf %15, %16 : vector<128x1xf32>
    %18 = math.floor %17 : vector<128x1xf32>
    %19 = arith.fptosi %18 : vector<128x1xf32> to vector<128x1xi32>
    %cst_6 = arith.constant 0.000000e+00 : f32
    %20 = vector.broadcast %cst_6 : f32 to vector<128x1xf32>
    %21 = arith.subf %12, %20 : vector<128x1xf32>
    %cst_7 = arith.constant 2.000000e+00 : f32
    %22 = vector.broadcast %cst_7 : f32 to vector<128x1xf32>
    %23 = arith.mulf %21, %22 : vector<128x1xf32>
    %24 = math.floor %23 : vector<128x1xf32>
    %25 = arith.fptosi %24 : vector<128x1xf32> to vector<128x1xi32>
    %cst_8 = arith.constant -4.000000e+00 : f32
    %26 = vector.broadcast %cst_8 : f32 to vector<128x1xf32>
    %27 = arith.subf %13, %26 : vector<128x1xf32>
    %cst_9 = arith.constant 1.250000e-01 : f32
    %28 = vector.broadcast %cst_9 : f32 to vector<128x1xf32>
    %29 = arith.mulf %27, %28 : vector<128x1xf32>
    %30 = math.floor %29 : vector<128x1xf32>
    %31 = arith.fptosi %30 : vector<128x1xf32> to vector<128x1xi32>
    %c0_i32 = arith.constant 0 : i32
    %32 = vector.broadcast %c0_i32 : i32 to vector<128x1xi32>
    %33 = arith.cmpi sge, %19, %32 : vector<128x1xi32>
    %c16_i32 = arith.constant 16 : i32
    %34 = vector.broadcast %c16_i32 : i32 to vector<128x1xi32>
    %35 = arith.cmpi slt, %19, %34 : vector<128x1xi32>
    %36 = arith.andi %33, %35 : vector<128x1xi1>
    %c0_i32_10 = arith.constant 0 : i32
    %37 = vector.broadcast %c0_i32_10 : i32 to vector<128x1xi32>
    %38 = arith.cmpi sge, %25, %37 : vector<128x1xi32>
    %39 = arith.andi %36, %38 : vector<128x1xi1>
    %c16_i32_11 = arith.constant 16 : i32
    %40 = vector.broadcast %c16_i32_11 : i32 to vector<128x1xi32>
    %41 = arith.cmpi slt, %25, %40 : vector<128x1xi32>
    %42 = arith.andi %39, %41 : vector<128x1xi1>
    %c0_i32_12 = arith.constant 0 : i32
    %43 = vector.broadcast %c0_i32_12 : i32 to vector<128x1xi32>
    %44 = arith.cmpi sge, %31, %43 : vector<128x1xi32>
    %45 = arith.andi %42, %44 : vector<128x1xi1>
    %c1_i32 = arith.constant 1 : i32
    %46 = vector.broadcast %c1_i32 : i32 to vector<128x1xi32>
    %47 = arith.cmpi slt, %31, %46 : vector<128x1xi32>
    %48 = arith.andi %45, %47 : vector<128x1xi1>
    %c16_i32_13 = arith.constant 16 : i32
    %49 = vector.broadcast %c16_i32_13 : i32 to vector<128x1xi32>
    %50 = arith.muli %31, %49 : vector<128x1xi32>
    %51 = arith.addi %50, %25 : vector<128x1xi32>
    %c16_i32_14 = arith.constant 16 : i32
    %52 = vector.broadcast %c16_i32_14 : i32 to vector<128x1xi32>
    %53 = arith.muli %51, %52 : vector<128x1xi32>
    %54 = arith.addi %53, %19 : vector<128x1xi32>
    %55 = vector.extract_strided_slice %10 {offsets = [0, 0], sizes = [1, 128], strides = [1, 1]} : vector<8x128xf32> to vector<1x128xf32>
    %56 = vector.extract_strided_slice %10 {offsets = [1, 0], sizes = [1, 128], strides = [1, 1]} : vector<8x128xf32> to vector<1x128xf32>
    %57 = vector.extract_strided_slice %10 {offsets = [2, 0], sizes = [1, 128], strides = [1, 1]} : vector<8x128xf32> to vector<1x128xf32>
    %cst_15 = arith.constant 0.000000e+00 : f32
    %58 = vector.broadcast %cst_15 : f32 to vector<1x128xf32>
    %59 = arith.subf %55, %58 : vector<1x128xf32>
    %cst_16 = arith.constant 2.000000e+00 : f32
    %60 = vector.broadcast %cst_16 : f32 to vector<1x128xf32>
    %61 = arith.mulf %59, %60 : vector<1x128xf32>
    %62 = math.floor %61 : vector<1x128xf32>
    %63 = arith.fptosi %62 : vector<1x128xf32> to vector<1x128xi32>
    %cst_17 = arith.constant 0.000000e+00 : f32
    %64 = vector.broadcast %cst_17 : f32 to vector<1x128xf32>
    %65 = arith.subf %56, %64 : vector<1x128xf32>
    %cst_18 = arith.constant 2.000000e+00 : f32
    %66 = vector.broadcast %cst_18 : f32 to vector<1x128xf32>
    %67 = arith.mulf %65, %66 : vector<1x128xf32>
    %68 = math.floor %67 : vector<1x128xf32>
    %69 = arith.fptosi %68 : vector<1x128xf32> to vector<1x128xi32>
    %cst_19 = arith.constant -4.000000e+00 : f32
    %70 = vector.broadcast %cst_19 : f32 to vector<1x128xf32>
    %71 = arith.subf %57, %70 : vector<1x128xf32>
    %cst_20 = arith.constant 1.250000e-01 : f32
    %72 = vector.broadcast %cst_20 : f32 to vector<1x128xf32>
    %73 = arith.mulf %71, %72 : vector<1x128xf32>
    %74 = math.floor %73 : vector<1x128xf32>
    %75 = arith.fptosi %74 : vector<1x128xf32> to vector<1x128xi32>
    %c0_i32_21 = arith.constant 0 : i32
    %76 = vector.broadcast %c0_i32_21 : i32 to vector<1x128xi32>
    %77 = arith.cmpi sge, %63, %76 : vector<1x128xi32>
    %c16_i32_22 = arith.constant 16 : i32
    %78 = vector.broadcast %c16_i32_22 : i32 to vector<1x128xi32>
    %79 = arith.cmpi slt, %63, %78 : vector<1x128xi32>
    %80 = arith.andi %77, %79 : vector<1x128xi1>
    %c0_i32_23 = arith.constant 0 : i32
    %81 = vector.broadcast %c0_i32_23 : i32 to vector<1x128xi32>
    %82 = arith.cmpi sge, %69, %81 : vector<1x128xi32>
    %83 = arith.andi %80, %82 : vector<1x128xi1>
    %c16_i32_24 = arith.constant 16 : i32
    %84 = vector.broadcast %c16_i32_24 : i32 to vector<1x128xi32>
    %85 = arith.cmpi slt, %69, %84 : vector<1x128xi32>
    %86 = arith.andi %83, %85 : vector<1x128xi1>
    %c0_i32_25 = arith.constant 0 : i32
    %87 = vector.broadcast %c0_i32_25 : i32 to vector<1x128xi32>
    %88 = arith.cmpi sge, %75, %87 : vector<1x128xi32>
    %89 = arith.andi %86, %88 : vector<1x128xi1>
    %c1_i32_26 = arith.constant 1 : i32
    %90 = vector.broadcast %c1_i32_26 : i32 to vector<1x128xi32>
    %91 = arith.cmpi slt, %75, %90 : vector<1x128xi32>
    %92 = arith.andi %89, %91 : vector<1x128xi1>
    %c16_i32_27 = arith.constant 16 : i32
    %93 = vector.broadcast %c16_i32_27 : i32 to vector<1x128xi32>
    %94 = arith.muli %75, %93 : vector<1x128xi32>
    %95 = arith.addi %94, %69 : vector<1x128xi32>
    %c16_i32_28 = arith.constant 16 : i32
    %96 = vector.broadcast %c16_i32_28 : i32 to vector<1x128xi32>
    %97 = arith.muli %95, %96 : vector<1x128xi32>
    %98 = arith.addi %97, %63 : vector<1x128xi32>
    %99 = vector.broadcast %54 : vector<128x1xi32> to vector<128x128xi32>
    %100 = vector.broadcast %98 : vector<1x128xi32> to vector<128x128xi32>
    %101 = arith.cmpi eq, %99, %100 : vector<128x128xi32>
    %102 = vector.broadcast %48 : vector<128x1xi1> to vector<128x128xi1>
    %103 = arith.andi %101, %102 : vector<128x128xi1>
    %104 = vector.broadcast %92 : vector<1x128xi1> to vector<128x128xi1>
    %105 = arith.andi %103, %104 : vector<128x128xi1>
    %c128_i32 = arith.constant 128 : i32
    %106 = vector.broadcast %c128_i32 : i32 to vector<128x128xi32>
    %107 = arith.select %105, %0, %106 : vector<128x128xi1>, vector<128x128xi32>
    %cst_29 = arith.constant dense<2147483647> : vector<128xi32>
    %108 = vector.multi_reduction <minsi>, %107, %cst_29 [1] : vector<128x128xi32> to vector<128xi32>
    %109 = vector.shape_cast %108 : vector<128xi32> to vector<128x1xi32>
    %c128_i32_30 = arith.constant 128 : i32
    %110 = vector.broadcast %c128_i32_30 : i32 to vector<128x128xi32>
    %111 = arith.select %105, %1, %110 : vector<128x128xi1>, vector<128x128xi32>
    %cst_31 = arith.constant dense<2147483647> : vector<128xi32>
    %112 = vector.multi_reduction <minsi>, %111, %cst_31 [0] : vector<128x128xi32> to vector<128xi32>
    %113 = vector.shape_cast %112 : vector<128xi32> to vector<1x128xi32>
    %114 = arith.cmpi eq, %109, %2 : vector<128x1xi32>
    %115 = arith.andi %48, %114 : vector<128x1xi1>
    %116 = arith.cmpi eq, %113, %3 : vector<1x128xi32>
    %117 = arith.andi %92, %116 : vector<1x128xi1>
    %118 = vector.broadcast %109 : vector<128x1xi32> to vector<128x128xi32>
    %119 = arith.cmpi slt, %0, %118 : vector<128x128xi32>
    %120 = vector.broadcast %117 : vector<1x128xi1> to vector<128x128xi1>
    %121 = arith.andi %120, %119 : vector<128x128xi1>
    %122 = arith.extui %121 : vector<128x128xi1> to vector<128x128xi32>
    %cst_32 = arith.constant dense<0> : vector<128xi32>
    %123 = vector.multi_reduction <add>, %122, %cst_32 [1] : vector<128x128xi32> to vector<128xi32>
    %124 = vector.shape_cast %123 : vector<128xi32> to vector<128x1xi32>
    %125 = arith.cmpi slt, %0, %1 : vector<128x128xi32>
    %126 = arith.andi %105, %125 : vector<128x128xi1>
    %127 = arith.extui %126 : vector<128x128xi1> to vector<128x128xi32>
    %cst_33 = arith.constant dense<0> : vector<128xi32>
    %128 = vector.multi_reduction <add>, %127, %cst_33 [1] : vector<128x128xi32> to vector<128xi32>
    %129 = vector.shape_cast %128 : vector<128xi32> to vector<128x1xi32>
    %c32_i32 = arith.constant 32 : i32
    %130 = vector.broadcast %c32_i32 : i32 to vector<128x1xi32>
    %131 = arith.cmpi slt, %124, %130 : vector<128x1xi32>
    %132 = arith.andi %48, %131 : vector<128x1xi1>
    %c8_i32 = arith.constant 8 : i32
    %133 = vector.broadcast %c8_i32 : i32 to vector<128x1xi32>
    %134 = arith.cmpi slt, %129, %133 : vector<128x1xi32>
    %135 = arith.andi %132, %134 : vector<128x1xi1>
    %c8_i32_34 = arith.constant 8 : i32
    %136 = vector.broadcast %c8_i32_34 : i32 to vector<128x1xi32>
    %137 = arith.muli %124, %136 : vector<128x1xi32>
    %138 = arith.addi %137, %129 : vector<128x1xi32>
    %c-1_i32 = arith.constant -1 : i32
    %139 = vector.broadcast %c-1_i32 : i32 to vector<128x1xi32>
    %140 = arith.select %135, %138, %139 : vector<128x1xi1>, vector<128x1xi32>
    %141 = vector.broadcast %140 : vector<128x1xi32> to vector<128x256xi32>
    %142 = arith.cmpi eq, %4, %141 : vector<128x256xi32>
    %143 = arith.extui %142 : vector<128x256xi1> to vector<128x256xi32>
    %144 = arith.sitofp %143 : vector<128x256xi32> to vector<128x256xf32>
    %cst_35 = arith.constant dense<0.000000e+00> : vector<8x256xf32>
    %145 = tpu.matmul %10, %144, %cst_35 {dimension_numbers = #tpu.dot_dimension_numbers<[1], [0], [0], [1], [0, 0, 1, 1], [], []>, precision = #tpu.contract_precision<fp32>} : vector<8x128xf32>, vector<128x256xf32>, vector<8x256xf32> -> vector<8x256xf32>
    %c0_36 = arith.constant 0 : index
    %c0_37 = arith.constant 0 : index
    %c0_38 = arith.constant 0 : index
    %146 = vector.load %arg3[%c0_36, %c0_37, %c0_38] : memref<2x8x256xf32, #tpu.memory_space<vmem>>, vector<1x8x256xf32>
    %147 = vector.shape_cast %146 : vector<1x8x256xf32> to vector<8x256xf32>
    %148 = vector.shape_cast %145 : vector<8x256xf32> to vector<1x8x256xf32>
    tpu.vector_store %arg3[%c0_36, %c0_37, %c0_38], %148 {strides = array<i32>} : memref<2x8x256xf32, #tpu.memory_space<vmem>>, vector<1x8x256xf32>,
    %149 = vector.broadcast %124 : vector<128x1xi32> to vector<128x128xi32>
    %150 = arith.cmpi eq, %149, %5 : vector<128x128xi32>
    %151 = vector.broadcast %115 : vector<128x1xi1> to vector<128x128xi1>
    %152 = arith.andi %151, %150 : vector<128x128xi1>
    %c32_i32_39 = arith.constant 32 : i32
    %153 = vector.broadcast %c32_i32_39 : i32 to vector<128x1xi32>
    %154 = arith.cmpi slt, %124, %153 : vector<128x1xi32>
    %155 = vector.broadcast %154 : vector<128x1xi1> to vector<128x128xi1>
    %156 = arith.andi %152, %155 : vector<128x128xi1>
    %157 = vector.broadcast %135 : vector<128x1xi1> to vector<128x128xi1>
    %158 = arith.andi %157, %150 : vector<128x128xi1>
    %159 = arith.extui %158 : vector<128x128xi1> to vector<128x128xi32>
    %cst_40 = arith.constant dense<0> : vector<128xi32>
    %160 = vector.multi_reduction <add>, %159, %cst_40 [0] : vector<128x128xi32> to vector<128xi32>
    %161 = vector.shape_cast %160 : vector<128xi32> to vector<1x128xi32>
    %c0_i32_41 = arith.constant 0 : i32
    %162 = vector.shape_cast %31 : vector<128x1xi32> to vector<128x1xi32>
    %163 = vector.broadcast %162 : vector<128x1xi32> to vector<128x128xi32>
    %164 = vector.broadcast %c0_i32_41 : i32 to vector<128x128xi32>
    %165 = arith.select %156, %163, %164 : vector<128x128xi1>, vector<128x128xi32>
    %cst_42 = arith.constant dense<0> : vector<128xi32>
    %166 = vector.multi_reduction <add>, %165, %cst_42 [0] : vector<128x128xi32> to vector<128xi32>
    %167 = vector.shape_cast %166 : vector<128xi32> to vector<1x128xi32>
    %c0_i32_43 = arith.constant 0 : i32
    %168 = vector.shape_cast %25 : vector<128x1xi32> to vector<128x1xi32>
    %169 = vector.broadcast %168 : vector<128x1xi32> to vector<128x128xi32>
    %170 = vector.broadcast %c0_i32_43 : i32 to vector<128x128xi32>
    %171 = arith.select %156, %169, %170 : vector<128x128xi1>, vector<128x128xi32>
    %cst_44 = arith.constant dense<0> : vector<128xi32>
    %172 = vector.multi_reduction <add>, %171, %cst_44 [0] : vector<128x128xi32> to vector<128xi32>
    %173 = vector.shape_cast %172 : vector<128xi32> to vector<1x128xi32>
    %c0_i32_45 = arith.constant 0 : i32
    %174 = vector.shape_cast %19 : vector<128x1xi32> to vector<128x1xi32>
    %175 = vector.broadcast %174 : vector<128x1xi32> to vector<128x128xi32>
    %176 = vector.broadcast %c0_i32_45 : i32 to vector<128x128xi32>
    %177 = arith.select %156, %175, %176 : vector<128x128xi1>, vector<128x128xi32>
    %cst_46 = arith.constant dense<0> : vector<128xi32>
    %178 = vector.multi_reduction <add>, %177, %cst_46 [0] : vector<128x128xi32> to vector<128xi32>
    %179 = vector.shape_cast %178 : vector<128xi32> to vector<1x128xi32>
    %180 = arith.extui %117 : vector<1x128xi1> to vector<1x128xi32>
    %cst_47 = arith.constant dense<0> : vector<1xi32>
    %181 = vector.multi_reduction <add>, %180, %cst_47 [1] : vector<1x128xi32> to vector<1xi32>
    %182 = vector.shape_cast %181 : vector<1xi32> to vector<1x1xi32>
    %c32_i32_48 = arith.constant 32 : i32
    %183 = vector.broadcast %c32_i32_48 : i32 to vector<1x1xi32>
    %184 = arith.minsi %182, %183 : vector<1x1xi32>
    %c0_i32_49 = arith.constant 0 : i32
    %185 = vector.broadcast %c0_i32_49 : i32 to vector<8x128xi32>
    %186 = arith.cmpi eq, %6, %185 : vector<8x128xi32>
    %c0_i32_50 = arith.constant 0 : i32
    %187 = vector.shape_cast %167 : vector<1x128xi32> to vector<1x128xi32>
    %188 = vector.broadcast %187 : vector<1x128xi32> to vector<8x128xi32>
    %189 = vector.broadcast %c0_i32_50 : i32 to vector<8x128xi32>
    %190 = arith.select %186, %188, %189 : vector<8x128xi1>, vector<8x128xi32>
    %c1_i32_51 = arith.constant 1 : i32
    %191 = vector.broadcast %c1_i32_51 : i32 to vector<8x128xi32>
    %192 = arith.cmpi eq, %6, %191 : vector<8x128xi32>
    %c0_i32_52 = arith.constant 0 : i32
    %193 = vector.shape_cast %173 : vector<1x128xi32> to vector<1x128xi32>
    %194 = vector.broadcast %193 : vector<1x128xi32> to vector<8x128xi32>
    %195 = vector.broadcast %c0_i32_52 : i32 to vector<8x128xi32>
    %196 = arith.select %192, %194, %195 : vector<8x128xi1>, vector<8x128xi32>
    %197 = arith.addi %190, %196 : vector<8x128xi32>
    %c2_i32 = arith.constant 2 : i32
    %198 = vector.broadcast %c2_i32 : i32 to vector<8x128xi32>
    %199 = arith.cmpi eq, %6, %198 : vector<8x128xi32>
    %c0_i32_53 = arith.constant 0 : i32
    %200 = vector.shape_cast %179 : vector<1x128xi32> to vector<1x128xi32>
    %201 = vector.broadcast %200 : vector<1x128xi32> to vector<8x128xi32>
    %202 = vector.broadcast %c0_i32_53 : i32 to vector<8x128xi32>
    %203 = arith.select %199, %201, %202 : vector<8x128xi1>, vector<8x128xi32>
    %204 = arith.addi %197, %203 : vector<8x128xi32>
    %c3_i32 = arith.constant 3 : i32
    %205 = vector.broadcast %c3_i32 : i32 to vector<8x128xi32>
    %206 = arith.cmpi eq, %6, %205 : vector<8x128xi32>
    %c0_i32_54 = arith.constant 0 : i32
    %207 = vector.shape_cast %161 : vector<1x128xi32> to vector<1x128xi32>
    %208 = vector.broadcast %207 : vector<1x128xi32> to vector<8x128xi32>
    %209 = vector.broadcast %c0_i32_54 : i32 to vector<8x128xi32>
    %210 = arith.select %206, %208, %209 : vector<8x128xi1>, vector<8x128xi32>
    %211 = arith.addi %204, %210 : vector<8x128xi32>
    %c4_i32 = arith.constant 4 : i32
    %212 = vector.broadcast %c4_i32 : i32 to vector<8x128xi32>
    %213 = arith.cmpi eq, %6, %212 : vector<8x128xi32>
    %c0_i32_55 = arith.constant 0 : i32
    %214 = vector.shape_cast %184 : vector<1x1xi32> to vector<1x1xi32>
    %215 = vector.broadcast %214 : vector<1x1xi32> to vector<8x128xi32>
    %216 = vector.broadcast %c0_i32_55 : i32 to vector<8x128xi32>
    %217 = arith.select %213, %215, %216 : vector<8x128xi1>, vector<8x128xi32>
    %218 = arith.addi %211, %217 : vector<8x128xi32>
    %c0_56 = arith.constant 0 : index
    %c0_57 = arith.constant 0 : index
    %c0_58 = arith.constant 0 : index
    %219 = vector.load %arg4[%c0_56, %c0_57, %c0_58] : memref<2x8x128xi32, #tpu.memory_space<vmem>>, vector<1x8x128xi32>
    %220 = vector.shape_cast %219 : vector<1x8x128xi32> to vector<8x128xi32>
    %221 = vector.shape_cast %218 : vector<8x128xi32> to vector<1x8x128xi32>
    tpu.vector_store %arg4[%c0_56, %c0_57, %c0_58], %221 {strides = array<i32>} : memref<2x8x128xi32, #tpu.memory_space<vmem>>, vector<1x8x128xi32>,
    %c1 = arith.constant 1 : index
    %c0_59 = arith.constant 0 : index
    %c0_60 = arith.constant 0 : index
    %222 = vector.load %arg1[%c1, %c0_59, %c0_60] : memref<2x128x8xf32, #tpu.memory_space<vmem>>, vector<1x128x8xf32>
    %223 = vector.shape_cast %222 : vector<1x128x8xf32> to vector<128x8xf32>
    %c1_61 = arith.constant 1 : index
    %c0_62 = arith.constant 0 : index
    %c0_63 = arith.constant 0 : index
    %224 = vector.load %arg2[%c1_61, %c0_62, %c0_63] : memref<2x8x128xf32, #tpu.memory_space<vmem>>, vector<1x8x128xf32>
    %225 = vector.shape_cast %224 : vector<1x8x128xf32> to vector<8x128xf32>
    %226 = vector.extract_strided_slice %223 {offsets = [0, 0], sizes = [128, 1], strides = [1, 1]} : vector<128x8xf32> to vector<128x1xf32>
    %227 = vector.extract_strided_slice %223 {offsets = [0, 1], sizes = [128, 1], strides = [1, 1]} : vector<128x8xf32> to vector<128x1xf32>
    %228 = vector.extract_strided_slice %223 {offsets = [0, 2], sizes = [128, 1], strides = [1, 1]} : vector<128x8xf32> to vector<128x1xf32>
    %cst_64 = arith.constant 0.000000e+00 : f32
    %229 = vector.broadcast %cst_64 : f32 to vector<128x1xf32>
    %230 = arith.subf %226, %229 : vector<128x1xf32>
    %cst_65 = arith.constant 2.000000e+00 : f32
    %231 = vector.broadcast %cst_65 : f32 to vector<128x1xf32>
    %232 = arith.mulf %230, %231 : vector<128x1xf32>
    %233 = math.floor %232 : vector<128x1xf32>
    %234 = arith.fptosi %233 : vector<128x1xf32> to vector<128x1xi32>
    %cst_66 = arith.constant 0.000000e+00 : f32
    %235 = vector.broadcast %cst_66 : f32 to vector<128x1xf32>
    %236 = arith.subf %227, %235 : vector<128x1xf32>
    %cst_67 = arith.constant 2.000000e+00 : f32
    %237 = vector.broadcast %cst_67 : f32 to vector<128x1xf32>
    %238 = arith.mulf %236, %237 : vector<128x1xf32>
    %239 = math.floor %238 : vector<128x1xf32>
    %240 = arith.fptosi %239 : vector<128x1xf32> to vector<128x1xi32>
    %cst_68 = arith.constant -4.000000e+00 : f32
    %241 = vector.broadcast %cst_68 : f32 to vector<128x1xf32>
    %242 = arith.subf %228, %241 : vector<128x1xf32>
    %cst_69 = arith.constant 1.250000e-01 : f32
    %243 = vector.broadcast %cst_69 : f32 to vector<128x1xf32>
    %244 = arith.mulf %242, %243 : vector<128x1xf32>
    %245 = math.floor %244 : vector<128x1xf32>
    %246 = arith.fptosi %245 : vector<128x1xf32> to vector<128x1xi32>
    %c0_i32_70 = arith.constant 0 : i32
    %247 = vector.broadcast %c0_i32_70 : i32 to vector<128x1xi32>
    %248 = arith.cmpi sge, %234, %247 : vector<128x1xi32>
    %c16_i32_71 = arith.constant 16 : i32
    %249 = vector.broadcast %c16_i32_71 : i32 to vector<128x1xi32>
    %250 = arith.cmpi slt, %234, %249 : vector<128x1xi32>
    %251 = arith.andi %248, %250 : vector<128x1xi1>
    %c0_i32_72 = arith.constant 0 : i32
    %252 = vector.broadcast %c0_i32_72 : i32 to vector<128x1xi32>
    %253 = arith.cmpi sge, %240, %252 : vector<128x1xi32>
    %254 = arith.andi %251, %253 : vector<128x1xi1>
    %c16_i32_73 = arith.constant 16 : i32
    %255 = vector.broadcast %c16_i32_73 : i32 to vector<128x1xi32>
    %256 = arith.cmpi slt, %240, %255 : vector<128x1xi32>
    %257 = arith.andi %254, %256 : vector<128x1xi1>
    %c0_i32_74 = arith.constant 0 : i32
    %258 = vector.broadcast %c0_i32_74 : i32 to vector<128x1xi32>
    %259 = arith.cmpi sge, %246, %258 : vector<128x1xi32>
    %260 = arith.andi %257, %259 : vector<128x1xi1>
    %c1_i32_75 = arith.constant 1 : i32
    %261 = vector.broadcast %c1_i32_75 : i32 to vector<128x1xi32>
    %262 = arith.cmpi slt, %246, %261 : vector<128x1xi32>
    %263 = arith.andi %260, %262 : vector<128x1xi1>
    %c16_i32_76 = arith.constant 16 : i32
    %264 = vector.broadcast %c16_i32_76 : i32 to vector<128x1xi32>
    %265 = arith.muli %246, %264 : vector<128x1xi32>
    %266 = arith.addi %265, %240 : vector<128x1xi32>
    %c16_i32_77 = arith.constant 16 : i32
    %267 = vector.broadcast %c16_i32_77 : i32 to vector<128x1xi32>
    %268 = arith.muli %266, %267 : vector<128x1xi32>
    %269 = arith.addi %268, %234 : vector<128x1xi32>
    %270 = vector.extract_strided_slice %225 {offsets = [0, 0], sizes = [1, 128], strides = [1, 1]} : vector<8x128xf32> to vector<1x128xf32>
    %271 = vector.extract_strided_slice %225 {offsets = [1, 0], sizes = [1, 128], strides = [1, 1]} : vector<8x128xf32> to vector<1x128xf32>
    %272 = vector.extract_strided_slice %225 {offsets = [2, 0], sizes = [1, 128], strides = [1, 1]} : vector<8x128xf32> to vector<1x128xf32>
    %cst_78 = arith.constant 0.000000e+00 : f32
    %273 = vector.broadcast %cst_78 : f32 to vector<1x128xf32>
    %274 = arith.subf %270, %273 : vector<1x128xf32>
    %cst_79 = arith.constant 2.000000e+00 : f32
    %275 = vector.broadcast %cst_79 : f32 to vector<1x128xf32>
    %276 = arith.mulf %274, %275 : vector<1x128xf32>
    %277 = math.floor %276 : vector<1x128xf32>
    %278 = arith.fptosi %277 : vector<1x128xf32> to vector<1x128xi32>
    %cst_80 = arith.constant 0.000000e+00 : f32
    %279 = vector.broadcast %cst_80 : f32 to vector<1x128xf32>
    %280 = arith.subf %271, %279 : vector<1x128xf32>
    %cst_81 = arith.constant 2.000000e+00 : f32
    %281 = vector.broadcast %cst_81 : f32 to vector<1x128xf32>
    %282 = arith.mulf %280, %281 : vector<1x128xf32>
    %283 = math.floor %282 : vector<1x128xf32>
    %284 = arith.fptosi %283 : vector<1x128xf32> to vector<1x128xi32>
    %cst_82 = arith.constant -4.000000e+00 : f32
    %285 = vector.broadcast %cst_82 : f32 to vector<1x128xf32>
    %286 = arith.subf %272, %285 : vector<1x128xf32>
    %cst_83 = arith.constant 1.250000e-01 : f32
    %287 = vector.broadcast %cst_83 : f32 to vector<1x128xf32>
    %288 = arith.mulf %286, %287 : vector<1x128xf32>
    %289 = math.floor %288 : vector<1x128xf32>
    %290 = arith.fptosi %289 : vector<1x128xf32> to vector<1x128xi32>
    %c0_i32_84 = arith.constant 0 : i32
    %291 = vector.broadcast %c0_i32_84 : i32 to vector<1x128xi32>
    %292 = arith.cmpi sge, %278, %291 : vector<1x128xi32>
    %c16_i32_85 = arith.constant 16 : i32
    %293 = vector.broadcast %c16_i32_85 : i32 to vector<1x128xi32>
    %294 = arith.cmpi slt, %278, %293 : vector<1x128xi32>
    %295 = arith.andi %292, %294 : vector<1x128xi1>
    %c0_i32_86 = arith.constant 0 : i32
    %296 = vector.broadcast %c0_i32_86 : i32 to vector<1x128xi32>
    %297 = arith.cmpi sge, %284, %296 : vector<1x128xi32>
    %298 = arith.andi %295, %297 : vector<1x128xi1>
    %c16_i32_87 = arith.constant 16 : i32
    %299 = vector.broadcast %c16_i32_87 : i32 to vector<1x128xi32>
    %300 = arith.cmpi slt, %284, %299 : vector<1x128xi32>
    %301 = arith.andi %298, %300 : vector<1x128xi1>
    %c0_i32_88 = arith.constant 0 : i32
    %302 = vector.broadcast %c0_i32_88 : i32 to vector<1x128xi32>
    %303 = arith.cmpi sge, %290, %302 : vector<1x128xi32>
    %304 = arith.andi %301, %303 : vector<1x128xi1>
    %c1_i32_89 = arith.constant 1 : i32
    %305 = vector.broadcast %c1_i32_89 : i32 to vector<1x128xi32>
    %306 = arith.cmpi slt, %290, %305 : vector<1x128xi32>
    %307 = arith.andi %304, %306 : vector<1x128xi1>
    %c16_i32_90 = arith.constant 16 : i32
    %308 = vector.broadcast %c16_i32_90 : i32 to vector<1x128xi32>
    %309 = arith.muli %290, %308 : vector<1x128xi32>
    %310 = arith.addi %309, %284 : vector<1x128xi32>
    %c16_i32_91 = arith.constant 16 : i32
    %311 = vector.broadcast %c16_i32_91 : i32 to vector<1x128xi32>
    %312 = arith.muli %310, %311 : vector<1x128xi32>
    %313 = arith.addi %312, %278 : vector<1x128xi32>
    %314 = vector.broadcast %269 : vector<128x1xi32> to vector<128x128xi32>
    %315 = vector.broadcast %313 : vector<1x128xi32> to vector<128x128xi32>
    %316 = arith.cmpi eq, %314, %315 : vector<128x128xi32>
    %317 = vector.broadcast %263 : vector<128x1xi1> to vector<128x128xi1>
    %318 = arith.andi %316, %317 : vector<128x128xi1>
    %319 = vector.broadcast %307 : vector<1x128xi1> to vector<128x128xi1>
    %320 = arith.andi %318, %319 : vector<128x128xi1>
    %c128_i32_92 = arith.constant 128 : i32
    %321 = vector.broadcast %c128_i32_92 : i32 to vector<128x128xi32>
    %322 = arith.select %320, %0, %321 : vector<128x128xi1>, vector<128x128xi32>
    %cst_93 = arith.constant dense<2147483647> : vector<128xi32>
    %323 = vector.multi_reduction <minsi>, %322, %cst_93 [1] : vector<128x128xi32> to vector<128xi32>
    %324 = vector.shape_cast %323 : vector<128xi32> to vector<128x1xi32>
    %c128_i32_94 = arith.constant 128 : i32
    %325 = vector.broadcast %c128_i32_94 : i32 to vector<128x128xi32>
    %326 = arith.select %320, %1, %325 : vector<128x128xi1>, vector<128x128xi32>
    %cst_95 = arith.constant dense<2147483647> : vector<128xi32>
    %327 = vector.multi_reduction <minsi>, %326, %cst_95 [0] : vector<128x128xi32> to vector<128xi32>
    %328 = vector.shape_cast %327 : vector<128xi32> to vector<1x128xi32>
    %329 = arith.cmpi eq, %324, %2 : vector<128x1xi32>
    %330 = arith.andi %263, %329 : vector<128x1xi1>
    %331 = arith.cmpi eq, %328, %3 : vector<1x128xi32>
    %332 = arith.andi %307, %331 : vector<1x128xi1>
    %333 = vector.broadcast %324 : vector<128x1xi32> to vector<128x128xi32>
    %334 = arith.cmpi slt, %0, %333 : vector<128x128xi32>
    %335 = vector.broadcast %332 : vector<1x128xi1> to vector<128x128xi1>
    %336 = arith.andi %335, %334 : vector<128x128xi1>
    %337 = arith.extui %336 : vector<128x128xi1> to vector<128x128xi32>
    %cst_96 = arith.constant dense<0> : vector<128xi32>
    %338 = vector.multi_reduction <add>, %337, %cst_96 [1] : vector<128x128xi32> to vector<128xi32>
    %339 = vector.shape_cast %338 : vector<128xi32> to vector<128x1xi32>
    %340 = arith.cmpi slt, %0, %1 : vector<128x128xi32>
    %341 = arith.andi %320, %340 : vector<128x128xi1>
    %342 = arith.extui %341 : vector<128x128xi1> to vector<128x128xi32>
    %cst_97 = arith.constant dense<0> : vector<128xi32>
    %343 = vector.multi_reduction <add>, %342, %cst_97 [1] : vector<128x128xi32> to vector<128xi32>
    %344 = vector.shape_cast %343 : vector<128xi32> to vector<128x1xi32>
    %c32_i32_98 = arith.constant 32 : i32
    %345 = vector.broadcast %c32_i32_98 : i32 to vector<128x1xi32>
    %346 = arith.cmpi slt, %339, %345 : vector<128x1xi32>
    %347 = arith.andi %263, %346 : vector<128x1xi1>
    %c8_i32_99 = arith.constant 8 : i32
    %348 = vector.broadcast %c8_i32_99 : i32 to vector<128x1xi32>
    %349 = arith.cmpi slt, %344, %348 : vector<128x1xi32>
    %350 = arith.andi %347, %349 : vector<128x1xi1>
    %c8_i32_100 = arith.constant 8 : i32
    %351 = vector.broadcast %c8_i32_100 : i32 to vector<128x1xi32>
    %352 = arith.muli %339, %351 : vector<128x1xi32>
    %353 = arith.addi %352, %344 : vector<128x1xi32>
    %c-1_i32_101 = arith.constant -1 : i32
    %354 = vector.broadcast %c-1_i32_101 : i32 to vector<128x1xi32>
    %355 = arith.select %350, %353, %354 : vector<128x1xi1>, vector<128x1xi32>
    %356 = vector.broadcast %355 : vector<128x1xi32> to vector<128x256xi32>
    %357 = arith.cmpi eq, %4, %356 : vector<128x256xi32>
    %358 = arith.extui %357 : vector<128x256xi1> to vector<128x256xi32>
    %359 = arith.sitofp %358 : vector<128x256xi32> to vector<128x256xf32>
    %cst_102 = arith.constant dense<0.000000e+00> : vector<8x256xf32>
    %360 = tpu.matmul %225, %359, %cst_102 {dimension_numbers = #tpu.dot_dimension_numbers<[1], [0], [0], [1], [0, 0, 1, 1], [], []>, precision = #tpu.contract_precision<fp32>} : vector<8x128xf32>, vector<128x256xf32>, vector<8x256xf32> -> vector<8x256xf32>
    %c1_103 = arith.constant 1 : index
    %c0_104 = arith.constant 0 : index
    %c0_105 = arith.constant 0 : index
    %361 = vector.load %arg3[%c1_103, %c0_104, %c0_105] : memref<2x8x256xf32, #tpu.memory_space<vmem>>, vector<1x8x256xf32>
    %362 = vector.shape_cast %361 : vector<1x8x256xf32> to vector<8x256xf32>
    %363 = vector.shape_cast %360 : vector<8x256xf32> to vector<1x8x256xf32>
    tpu.vector_store %arg3[%c1_103, %c0_104, %c0_105], %363 {strides = array<i32>} : memref<2x8x256xf32, #tpu.memory_space<vmem>>, vector<1x8x256xf32>,
    %364 = vector.broadcast %339 : vector<128x1xi32> to vector<128x128xi32>
    %365 = arith.cmpi eq, %364, %5 : vector<128x128xi32>
    %366 = vector.broadcast %330 : vector<128x1xi1> to vector<128x128xi1>
    %367 = arith.andi %366, %365 : vector<128x128xi1>
    %c32_i32_106 = arith.constant 32 : i32
    %368 = vector.broadcast %c32_i32_106 : i32 to vector<128x1xi32>
    %369 = arith.cmpi slt, %339, %368 : vector<128x1xi32>
    %370 = vector.broadcast %369 : vector<128x1xi1> to vector<128x128xi1>
    %371 = arith.andi %367, %370 : vector<128x128xi1>
    %372 = vector.broadcast %350 : vector<128x1xi1> to vector<128x128xi1>
    %373 = arith.andi %372, %365 : vector<128x128xi1>
    %374 = arith.extui %373 : vector<128x128xi1> to vector<128x128xi32>
    %cst_107 = arith.constant dense<0> : vector<128xi32>
    %375 = vector.multi_reduction <add>, %374, %cst_107 [0] : vector<128x128xi32> to vector<128xi32>
    %376 = vector.shape_cast %375 : vector<128xi32> to vector<1x128xi32>
    %c0_i32_108 = arith.constant 0 : i32
    %377 = vector.shape_cast %246 : vector<128x1xi32> to vector<128x1xi32>
    %378 = vector.broadcast %377 : vector<128x1xi32> to vector<128x128xi32>
    %379 = vector.broadcast %c0_i32_108 : i32 to vector<128x128xi32>
    %380 = arith.select %371, %378, %379 : vector<128x128xi1>, vector<128x128xi32>
    %cst_109 = arith.constant dense<0> : vector<128xi32>
    %381 = vector.multi_reduction <add>, %380, %cst_109 [0] : vector<128x128xi32> to vector<128xi32>
    %382 = vector.shape_cast %381 : vector<128xi32> to vector<1x128xi32>
    %c0_i32_110 = arith.constant 0 : i32
    %383 = vector.shape_cast %240 : vector<128x1xi32> to vector<128x1xi32>
    %384 = vector.broadcast %383 : vector<128x1xi32> to vector<128x128xi32>
    %385 = vector.broadcast %c0_i32_110 : i32 to vector<128x128xi32>
    %386 = arith.select %371, %384, %385 : vector<128x128xi1>, vector<128x128xi32>
    %cst_111 = arith.constant dense<0> : vector<128xi32>
    %387 = vector.multi_reduction <add>, %386, %cst_111 [0] : vector<128x128xi32> to vector<128xi32>
    %388 = vector.shape_cast %387 : vector<128xi32> to vector<1x128xi32>
    %c0_i32_112 = arith.constant 0 : i32
    %389 = vector.shape_cast %234 : vector<128x1xi32> to vector<128x1xi32>
    %390 = vector.broadcast %389 : vector<128x1xi32> to vector<128x128xi32>
    %391 = vector.broadcast %c0_i32_112 : i32 to vector<128x128xi32>
    %392 = arith.select %371, %390, %391 : vector<128x128xi1>, vector<128x128xi32>
    %cst_113 = arith.constant dense<0> : vector<128xi32>
    %393 = vector.multi_reduction <add>, %392, %cst_113 [0] : vector<128x128xi32> to vector<128xi32>
    %394 = vector.shape_cast %393 : vector<128xi32> to vector<1x128xi32>
    %395 = arith.extui %332 : vector<1x128xi1> to vector<1x128xi32>
    %cst_114 = arith.constant dense<0> : vector<1xi32>
    %396 = vector.multi_reduction <add>, %395, %cst_114 [1] : vector<1x128xi32> to vector<1xi32>
    %397 = vector.shape_cast %396 : vector<1xi32> to vector<1x1xi32>
    %c32_i32_115 = arith.constant 32 : i32
    %398 = vector.broadcast %c32_i32_115 : i32 to vector<1x1xi32>
    %399 = arith.minsi %397, %398 : vector<1x1xi32>
    %c0_i32_116 = arith.constant 0 : i32
    %400 = vector.broadcast %c0_i32_116 : i32 to vector<8x128xi32>
    %401 = arith.cmpi eq, %6, %400 : vector<8x128xi32>
    %c0_i32_117 = arith.constant 0 : i32
    %402 = vector.shape_cast %382 : vector<1x128xi32> to vector<1x128xi32>
    %403 = vector.broadcast %402 : vector<1x128xi32> to vector<8x128xi32>
    %404 = vector.broadcast %c0_i32_117 : i32 to vector<8x128xi32>
    %405 = arith.select %401, %403, %404 : vector<8x128xi1>, vector<8x128xi32>
    %c1_i32_118 = arith.constant 1 : i32
    %406 = vector.broadcast %c1_i32_118 : i32 to vector<8x128xi32>
    %407 = arith.cmpi eq, %6, %406 : vector<8x128xi32>
    %c0_i32_119 = arith.constant 0 : i32
    %408 = vector.shape_cast %388 : vector<1x128xi32> to vector<1x128xi32>
    %409 = vector.broadcast %408 : vector<1x128xi32> to vector<8x128xi32>
    %410 = vector.broadcast %c0_i32_119 : i32 to vector<8x128xi32>
    %411 = arith.select %407, %409, %410 : vector<8x128xi1>, vector<8x128xi32>
    %412 = arith.addi %405, %411 : vector<8x128xi32>
    %c2_i32_120 = arith.constant 2 : i32
    %413 = vector.broadcast %c2_i32_120 : i32 to vector<8x128xi32>
    %414 = arith.cmpi eq, %6, %413 : vector<8x128xi32>
    %c0_i32_121 = arith.constant 0 : i32
    %415 = vector.shape_cast %394 : vector<1x128xi32> to vector<1x128xi32>
    %416 = vector.broadcast %415 : vector<1x128xi32> to vector<8x128xi32>
    %417 = vector.broadcast %c0_i32_121 : i32 to vector<8x128xi32>
    %418 = arith.select %414, %416, %417 : vector<8x128xi1>, vector<8x128xi32>
    %419 = arith.addi %412, %418 : vector<8x128xi32>
    %c3_i32_122 = arith.constant 3 : i32
    %420 = vector.broadcast %c3_i32_122 : i32 to vector<8x128xi32>
    %421 = arith.cmpi eq, %6, %420 : vector<8x128xi32>
    %c0_i32_123 = arith.constant 0 : i32
    %422 = vector.shape_cast %376 : vector<1x128xi32> to vector<1x128xi32>
    %423 = vector.broadcast %422 : vector<1x128xi32> to vector<8x128xi32>
    %424 = vector.broadcast %c0_i32_123 : i32 to vector<8x128xi32>
    %425 = arith.select %421, %423, %424 : vector<8x128xi1>, vector<8x128xi32>
    %426 = arith.addi %419, %425 : vector<8x128xi32>
    %c4_i32_124 = arith.constant 4 : i32
    %427 = vector.broadcast %c4_i32_124 : i32 to vector<8x128xi32>
    %428 = arith.cmpi eq, %6, %427 : vector<8x128xi32>
    %c0_i32_125 = arith.constant 0 : i32
    %429 = vector.shape_cast %399 : vector<1x1xi32> to vector<1x1xi32>
    %430 = vector.broadcast %429 : vector<1x1xi32> to vector<8x128xi32>
    %431 = vector.broadcast %c0_i32_125 : i32 to vector<8x128xi32>
    %432 = arith.select %428, %430, %431 : vector<8x128xi1>, vector<8x128xi32>
    %433 = arith.addi %426, %432 : vector<8x128xi32>
    %c1_126 = arith.constant 1 : index
    %c0_127 = arith.constant 0 : index
    %c0_128 = arith.constant 0 : index
    %434 = vector.load %arg4[%c1_126, %c0_127, %c0_128] : memref<2x8x128xi32, #tpu.memory_space<vmem>>, vector<1x8x128xi32>
    %435 = vector.shape_cast %434 : vector<1x8x128xi32> to vector<8x128xi32>
    %436 = vector.shape_cast %433 : vector<8x128xi32> to vector<1x8x128xi32>
    tpu.vector_store %arg4[%c1_126, %c0_127, %c0_128], %436 {strides = array<i32>} : memref<2x8x128xi32, #tpu.memory_space<vmem>>, vector<1x8x128xi32>,
    return
  }
  func.func @transform_0(%arg0: i32) -> (i32, i32, i32) {
    %c0_i32 = arith.constant 0 : i32
    %c0_i32_0 = arith.constant 0 : i32
    %c0_i32_1 = arith.constant 0 : i32
    %c0_i32_2 = arith.constant 0 : i32
    return %c0_i32, %c0_i32_0, %c0_i32_1 : i32, i32, i32
  }
  func.func @transform_1(%arg0: i32) -> (i32, i32, i32) {
    %c0_i32 = arith.constant 0 : i32
    %c0_i32_0 = arith.constant 0 : i32
    %c0_i32_1 = arith.constant 0 : i32
    %c0_i32_2 = arith.constant 0 : i32
    return %c0_i32, %c0_i32_0, %c0_i32_1 : i32, i32, i32
  }
  func.func @transform_2(%arg0: i32) -> (i32, i32, i32) {
    %c0_i32 = arith.constant 0 : i32
    %c0_i32_0 = arith.constant 0 : i32
    %c0_i32_1 = arith.constant 0 : i32
    %c0_i32_2 = arith.constant 0 : i32
    return %c0_i32, %c0_i32_0, %c0_i32_1 : i32, i32, i32
  }
  func.func @transform_3(%arg0: i32) -> (i32, i32, i32) {
    %c0_i32 = arith.constant 0 : i32
    %c0_i32_0 = arith.constant 0 : i32
    %c0_i32_1 = arith.constant 0 : i32
    %c0_i32_2 = arith.constant 0 : i32
    return %c0_i32, %c0_i32_0, %c0_i32_1 : i32, i32, i32
  }
}

</mosaic_0001>

<bundles_post_ra>
// kernel: _pillar_forward_device.1
= control target key start
LH: loop header
LB: loop body
LE: loop exit
PB: predicated region body
PF: predicated region fallthrough
CT: control target
= control target key end

     0   :  { %v15264_v40 = vmov 0   ;;  %s7694_s9 = smov 127   ;;  %s7695_s18 = smov 126   ;;  %s15238_s0 = inlined_call_operand.vmem [shape: f32[2,128,8], index: 0, kind: input, shape index: {}]   ;;  %s15239_s1 = inlined_call_operand.vmem [shape: f32[2,8,128], index: 1, kind: input, shape index: {}]   ;;  %s15240_s2 = inlined_call_operand.vmem [shape: f32[2,8,256], index: 2, kind: output, shape index: {0}]   ;;  %s15241_s3 = inlined_call_operand.vmem [shape: s32[2,8,128], index: 3, kind: output, shape index: {1}]  }
   0x1   :  { %v7725_v0 = vld [vmem:[%s15238_s0 + $0x10] sm:$0xff]  ;;  %v7730_v1 = vld [vmem:[%s15238_s0] sm:$0xff]  ;;  %v7735_v2 = vld [vmem:[%s15238_s0 + $0x18] sm:$0xff]  ;;  %s7696_s19 = smov 1   ;;  %s7698_s20 = smov 2  }
   0x2   :  { %v52_v3 = vmul.f32 2.0, %v7725_v0  ;;  %v50_v4 = vmul.f32 2.0, %v7730_v1  ;;  %v53_v5 = vmul.f32 2.0, %v7735_v2  ;;  %v7743_v6 = vld [vmem:[%s15238_s0 + $0x8] sm:$0xff]  ;;  %v7753_v8 = vld [vmem:[%s15238_s0 + $0x20] sm:$0xff]  ;;  %v7761_v12 = vld [vmem:[%s15238_s0 + $0x38] sm:$0xff] }
   0x3   :  { %v7748_v7 = vld [vmem:[%s15238_s0 + $0x28] sm:$0xff]  ;;  %v51_v9 = vmul.f32 2.0, %v7743_v6  ;;  %v54_v11 = vmul.f32 2.0, %v7753_v8  ;;  %v7766_v13 = vld [vmem:[%s15238_s0 + $0x30] sm:$0xff]  ;;  %v57_v17 = vmul.f32 2.0, %v7761_v12  ;;  %v7794_v39 = vld [vmem:[%s15238_s0 + $0x40] sm:$0xff] }
   0x4   :  { %v55_v10 = vmul.f32 2.0, %v7748_v7  ;;  %v68_v14 = vfloor.f32 %v52_v3  ;;  %v66_v15 = vfloor.f32 %v50_v4  ;;  %v69_v16 = vfloor.f32 %v53_v5  ;;  %v7789_v38 = vld [vmem:[%s15238_s0 + $0x48] sm:$0xff]  ;;  %v7811_v44 = vld [vmem:[%s15238_s0 + $0x58] sm:$0xff]  ;;  %v7816_v45 = vld [vmem:[%s15238_s0 + $0x50] sm:$0xff] }
   0x5   :  { %v67_v18 = vfloor.f32 %v51_v9  ;;  %v70_v20 = vfloor.f32 %v54_v11  ;;  %v56_v21 = vmul.f32 2.0, %v7766_v13  ;;  %v73_v25 = vfloor.f32 %v57_v17  ;;  %v7833_v47 = vld [vmem:[%s15238_s0 + $0x68] sm:$0xff]  ;;  %v7838_v48 = vld [vmem:[%s15238_s0 + $0x60] sm:$0xff]  ;;  %v7865_v61 = vld [vmem:[%s15238_s0 + $0x78] sm:$0xff] }
   0x6   :  { %v71_v19 = vfloor.f32 %v55_v10  ;;  %v7517_v22 = vtrunc.f32 %v68_v14  ;;  %v7513_v23 = vtrunc.f32 %v66_v15  ;;  %v7519_v24 = vtrunc.f32 %v69_v16  ;;  %v7870_v62 = vld [vmem:[%s15238_s0 + $0x70] sm:$0xff] }
   0x7   :  { %v7515_v26 = vtrunc.f32 %v67_v18  ;;  %v7521_v28 = vtrunc.f32 %v70_v20  ;;  %v72_v29 = vfloor.f32 %v56_v21  ;;  %v7527_v33 = vtrunc.f32 %v73_v25 }
   0x8   :  { %v7523_v27 = vtrunc.f32 %v71_v19  ;;  %v7770_v30 = vcvt.f32.s32 %v7517_v22  ;;  %v7772_v31 = vcvt.f32.s32 %v7513_v23  ;;  %v7774_v32 = vcvt.f32.s32 %v7519_v24 }
   0x9   :  { %v7776_v34 = vcvt.f32.s32 %v7515_v26  ;;  %v7780_v36 = vcvt.f32.s32 %v7521_v28  ;;  %v7525_v37 = vtrunc.f32 %v72_v29  ;;  %v7846_v51 = vcvt.f32.s32 %v7527_v33 }
   0xa   :  { %16096 = vst [vmem:[#allocation2_spill] sm:$0xff] %v7770_v30  ;;  %16097 = vst [vmem:[#allocation3_spill] sm:$0xff] %v7772_v31  ;;  %v7778_v35 = vcvt.f32.s32 %v7523_v27  ;;  %vm164_vm0 = vcmp.ge.s32.totalorder %v7770_v30, 0  ;;  %vm15242_vm1 = vcmp.lt.s32.totalorder %v7770_v30, 16  ;;  %vm162_vm2 = vcmp.ge.s32.totalorder %v7772_v31, 0 }
   0xb   :  { %16098 = vst [vmem:[#allocation4_spill] sm:$0xff] %v7774_v32  ;;  %16099 = vst [vmem:[#allocation5_spill] sm:$0xff] %v7776_v34  ;;  %vm15243_vm3 = vcmp.lt.s32.totalorder %v7772_v31, 16  ;;  %v212_v41 = vsel %vm164_vm0, 1, %v15264_v40  ;;  %v210_v43 = vsel %vm162_vm2, 1, %v15264_v40  ;;  %vm165_vm5 = vcmp.ge.s32.totalorder %v7774_v32, 0 }
   0xc   :  { %16100 = vst [vmem:[#allocation6_spill] sm:$0xff] %v7778_v35  ;;  %16101 = vst [vmem:[#allocation7_spill] sm:$0xff] %v7780_v36  ;;  %vm163_vm6 = vcmp.ge.s32.totalorder %v7776_v34, 0  ;;  %230 = vrot.lane.b32.xlu1 %v212_v41, %s7694_s9  ;;  %226 = vrot.lane.b32.xlu0 %v210_v43, %s7694_s9  ;;  %vm167_vm8 = vcmp.ge.s32.totalorder %v7778_v35, 0  ;;  %vm166_vm9 = vcmp.ge.s32.totalorder %v7780_v36, 0  ;;  %v213_v49 = vsel %vm165_vm5, 1, %v15264_v40 }
   0xd   :  { %vm7799_vm4 = vmand %vm164_vm0, %vm15242_vm1  ;;  %v211_v50 = vsel %vm163_vm6, 1, %v15264_v40  ;;  %16106 = vst [vmem:[#allocation8_spill] sm:$0xff] %v7846_v51  ;;  %v7848_v52 = vcvt.f32.s32 %v7525_v37  ;;  %v59_v53 = vmul.f32 2.0, %v7789_v38  ;;  %v58_v54 = vmul.f32 2.0, %v7794_v39 }
   0xe   :  { %vm7824_vm7 = vmand %vm162_vm2, %vm15243_vm3  ;;  %v61_v55 = vmul.f32 2.0, %v7811_v44  ;;  %v60_v56 = vmul.f32 2.0, %v7816_v45  ;;  %v215_v57 = vsel %vm167_vm8, 1, %v15264_v40  ;;  %v214_v58 = vsel %vm166_vm9, 1, %v15264_v40 }
   0xf   :  { %16107 = vst [vmem:[#allocation9_spill] sm:$0xff] %v7848_v52  ;;  %v63_v59 = vmul.f32 2.0, %v7833_v47  ;;  %v62_v60 = vmul.f32 2.0, %v7838_v48  ;;  %vm169_vm10 = vcmp.ge.s32.totalorder %v7846_v51, 0  ;;  %vm168_vm11 = vcmp.ge.s32.totalorder %v7848_v52, 0 }
  0x10   :  { %232 = vrot.lane.b32.xlu1 %v213_v49, %s7694_s9  ;;  %228 = vrot.lane.b32.xlu0 %v211_v50, %s7694_s9  ;;  %v75_v63 = vfloor.f32 %v59_v53  ;;  %v74_v3 = vfloor.f32 %v58_v54  ;;  %v77_v4 = vfloor.f32 %v61_v55  ;;  %v76_v5 = vfloor.f32 %v60_v56 }
  0x11   :  { %v79_v9 = vfloor.f32 %v63_v59  ;;  %v78_v10 = vfloor.f32 %v62_v60  ;;  %v65_v15 = vmul.f32 2.0, %v7865_v61  ;;  %v64_v16 = vmul.f32 2.0, %v7870_v62 }
  0x12   :  { %v7531_v11 = vtrunc.f32 %v75_v63  ;;  %v7529_v14 = vtrunc.f32 %v74_v3  ;;  %v7535_v17 = vtrunc.f32 %v77_v4  ;;  %v7533_v18 = vtrunc.f32 %v76_v5 }
  0x13   :  { %v217_v19 = vsel %vm169_vm10, 1, %v15264_v40  ;;  %v7539_v22 = vtrunc.f32 %v79_v9  ;;  %v216_v23 = vsel %vm168_vm11, 1, %v15264_v40  ;;  %v7537_v24 = vtrunc.f32 %v78_v10 }
  0x14   :  { %236 = vrot.lane.b32.xlu1 %v215_v57, %s7694_s9  ;;  %234 = vrot.lane.b32.xlu0 %v214_v58, %s7694_s9  ;;  %v7883_v20 = vcvt.f32.s32 %v7531_v11  ;;  %v7885_v21 = vcvt.f32.s32 %v7529_v14  ;;  %v81_v25 = vfloor.f32 %v65_v15  ;;  %v80_v26 = vfloor.f32 %v64_v16 }
  0x15   :  { %v7892_v27 = vcvt.f32.s32 %v7535_v17  ;;  %v7894_v28 = vcvt.f32.s32 %v7533_v18  ;;  %v7898_v29 = vcvt.f32.s32 %v7539_v22  ;;  %v7906_v41 = vcvt.f32.s32 %v7537_v24 }
  0x16   :  { %16108 = vst [vmem:[#allocation10_spill] sm:$0xff] %v7883_v20  ;;  %16109 = vst [vmem:[#allocation11_spill] sm:$0xff] %v7885_v21  ;;  %vm15250_vm12 = vcmp.ge.s32.totalorder %v7883_v20, 0  ;;  %vm15244_vm13 = vcmp.ge.s32.totalorder %v7885_v21, 0  ;;  %v7543_v43 = vtrunc.f32 %v81_v25  ;;  %v7541_v49 = vtrunc.f32 %v80_v26 }
  0x17   :  { %16110 = vst [vmem:[#allocation12_spill] sm:$0xff] %v7892_v27  ;;  %16111 = vst [vmem:[#allocation13_spill] sm:$0xff] %v7894_v28  ;;  %v219_v33 = vsel %vm15250_vm12, 1, %v15264_v40  ;;  %v218_v37 = vsel %vm15244_vm13, 1, %v15264_v40  ;;  %vm15248_vm14 = vcmp.ge.s32.totalorder %v7892_v27, 0  ;;  %vm15247_vm15 = vcmp.ge.s32.totalorder %v7894_v28, 0 }
  0x18   :  { %240 = vrot.lane.b32.xlu1 %v217_v19, %s7694_s9  ;;  %238 = vrot.lane.b32.xlu0 %v216_v23, %s7694_s9  ;;  %16112 = vst [vmem:[#allocation14_spill] sm:$0xff] %v7898_v29  ;;  %16113 = vst [vmem:[#allocation15_spill] sm:$0xff] %v7906_v41  ;;  %vm15245_vm0 = vcmp.lt.s32.totalorder %v7774_v32, 16  ;;  %vm15246_vm2 = vcmp.lt.s32.totalorder %v7776_v34, 16  ;;  %vm15249_vm3 = vcmp.lt.s32.totalorder %v7778_v35, 16  ;;  %v221_v54 = vsel %vm15248_vm14, 1, %v15264_v40 }
  0x19   :  { %vm7916_vm1 = vmand %vm165_vm5, %vm15245_vm0  ;;  %v220_v55 = vsel %vm15247_vm15, 1, %v15264_v40  ;;  %vm15254_vm5 = vcmp.ge.s32.totalorder %v7898_v29, 0  ;;  %vm15252_vm0 = vcmp.lt.s32.totalorder %v7780_v36, 16  ;;  %v7948_v57 = vcvt.f32.s32 %v7543_v43 }
  0x1a   :  { %vm7927_vm13 = vmand %vm163_vm6, %vm15246_vm2  ;;  %vm15255_vm2 = vcmp.ge.s32.totalorder %v7906_v41, 0  ;;  %v7950_v58 = vcvt.f32.s32 %v7541_v49  ;;  %vm15251_vm15 = vcmp.lt.s32.totalorder %v7846_v51, 16  ;;  %v16124_v60 = vmov 0 }
  0x1b   :  { %vm7943_vm6 = vmand %vm167_vm8, %vm15249_vm3  ;;  %16120 = vst [vmem:[#allocation16_spill] sm:$0xff] %v7948_v57  ;;  %vm15253_vm8 = vcmp.lt.s32.totalorder %v7848_v52, 16  ;;  %vm15256_vm12 = vcmp.lt.s32.totalorder %v7883_v20, 16  ;;  %v16127_v63 = vmov 0  ;;  %v223_v3 = vsel %vm15254_vm5, 1, %v15264_v40 }
  0x1c   :  { %244 = vrot.lane.b32.xlu1 %v219_v33, %s7694_s9  ;;  %242 = vrot.lane.b32.xlu0 %v218_v37, %s7694_s9  ;;  %16121 = vst [vmem:[#allocation17_spill] sm:$0xff] %v7950_v58  ;;  %vm7957_vm14 = vmand %vm166_vm9, %vm15252_vm0  ;;  %v222_v4 = vsel %vm15255_vm2, 1, %v15264_v40  ;;  %v16130_v5 = vmov 0  ;;  %vm15258_vm5 = vcmp.lt.s32.totalorder %v7892_v27, 16  ;;  %vm16133_vm2 = vcmp.ge.s32.totalorder %v7885_v21, 0 }
  0x1d   :  { %vm7966_vm3 = vmand %vm169_vm10, %vm15251_vm15  ;;  %vm15257_vm10 = vcmp.lt.s32.totalorder %v7885_v21, 16  ;;  %vm16129_vm15 = vcmp.ge.s32.totalorder %v7883_v20, 0  ;;  %v16134_v9 = vmov 0  ;;  %v16138_v10 = vmov 0 }
  0x1e   :  { %v16125_v60 = vsel %vm7966_vm3, 4294967295, %v16124_v60  ;;  %vm7977_vm9 = vmand %vm168_vm11, %vm15253_vm8  ;;  %vm15260_vm11 = vcmp.ge.s32.totalorder %v7948_v57, 0  ;;  %vm15262_vm8 = vcmp.lt.s32.totalorder %v7898_v29, 16  ;;  %v16142_v11 = vmov 0 }
  0x1f   :  { %16126 = vst [vmem:[#allocation18_spill] sm:$0xff] %v16125_v60  ;;  %v16128_v63 = vsel %vm7977_vm9, 4294967295, %v16127_v63  ;;  %vm7992_vm0 = vmand %vm16129_vm15, %vm15256_vm12  ;;  %vm15259_vm9 = vcmp.lt.s32.totalorder %v7894_v28, 16  ;;  %vm16137_vm15 = vcmp.ge.s32.totalorder %v7892_v27, 0  ;;  %v225_v14 = vsel %vm15260_vm11, 1, %v15264_v40 }
  0x20   :  { %248 = vrot.lane.b32.xlu1 %v221_v54, %s7694_s9  ;;  %246 = vrot.lane.b32.xlu0 %v220_v55, %s7694_s9  ;;  %v16131_v5 = vsel %vm7992_vm0, 4294967295, %v16130_v5  ;;  %vm8003_vm3 = vmand %vm16133_vm2, %vm15257_vm10  ;;  %vm16141_vm2 = vcmp.ge.s32.totalorder %v7894_v28, 0  ;;  %v16147_v16 = vmov 0  ;;  %v16151_v17 = vmov 0 }
  0x21   :  { %16132 = vst [vmem:[#allocation19_spill] sm:$0xff] %v16131_v5  ;;  %v16135_v9 = vsel %vm8003_vm3, 4294967295, %v16134_v9  ;;  %vm8012_vm12 = vmand %vm16137_vm15, %vm15258_vm5  ;;  %vm16145_vm15 = vcmp.ge.s32.totalorder %v7950_v58, 0  ;;  %vm15261_vm5 = vcmp.lt.s32.totalorder %v7906_v41, 16  ;;  %v16155_v18 = vmov 0 }
  0x22   :  { %16136 = vst [vmem:[#allocation20_spill] sm:$0xff] %v16135_v9  ;;  %v16139_v10 = vsel %vm8012_vm12, 4294967295, %v16138_v10  ;;  %vm8023_vm10 = vmand %vm16141_vm2, %vm15259_vm9  ;;  %v224_v15 = vsel %vm16145_vm15, 1, %v15264_v40  ;;  %vm16146_vm12 = vcmp.ge.s32.totalorder %v7898_v29, 0  ;;  %vm15263_vm2 = vcmp.lt.s32.totalorder %v7948_v57, 16 }
  0x23   :  { %16140 = vst [vmem:[#allocation21_spill] sm:$0xff] %v16139_v10  ;;  %v16143_v11 = vsel %vm8023_vm10, 4294967295, %v16142_v11  ;;  %vm8038_vm0 = vmand %vm16146_vm12, %vm15262_vm8  ;;  %vm16150_vm9 = vcmp.ge.s32.totalorder %v7906_v41, 0  ;;  %vm192_vm15 = vcmp.lt.s32.totalorder %v7950_v58, 16  ;;  %vm16154_vm10 = vcmp.ge.s32.totalorder %v7948_v57, 0 }
  0x24   :  { %252 = vrot.lane.b32.xlu1 %v223_v3, %s7694_s9  ;;  %250 = vrot.lane.b32.xlu0 %v222_v4, %s7694_s9  ;;  %16144 = vst [vmem:[#allocation22_spill] sm:$0xff] %v16143_v11  ;;  %v16148_v16 = vsel %vm8038_vm0, 4294967295, %v16147_v16  ;;  %vm8047_vm11 = vmand %vm16150_vm9, %vm15261_vm5  ;;  %vm16158_vm9 = vcmp.ge.s32.totalorder %v7950_v58, 0  ;;  %v16159_v19 = vmov 0  ;;  %vm16162_vm8 = vcmp.lt.s32.totalorder %v7776_v34, 16 }
  0x25   :  { %16149 = vst [vmem:[#allocation23_spill] sm:$0xff] %v16148_v16  ;;  %v16152_v17 = vsel %vm8047_vm11, 4294967295, %v16151_v17  ;;  %vm8056_vm12 = vmand %vm16154_vm10, %vm15263_vm2  ;;  %v291_v22 = vsel %vm16162_vm8, 1, %v15264_v40  ;;  %vm16163_vm10 = vcmp.lt.s32.totalorder %v7772_v31, 16  ;;  %vm16164_vm2 = vcmp.lt.s32.totalorder %v7774_v32, 16 }
  0x26   :  { %16153 = vst [vmem:[#allocation24_spill] sm:$0xff] %v16152_v17  ;;  %v16156_v18 = vsel %vm8056_vm12, 4294967295, %v16155_v18  ;;  %vm8066_vm5 = vmand %vm16158_vm9, %vm192_vm15  ;;  %v290_v23 = vsel %vm16163_vm10, 1, %v15264_v40  ;;  %v293_v24 = vsel %vm16164_vm2, 1, %v15264_v40  ;;  %vm16165_vm9 = vcmp.lt.s32.totalorder %v7770_v30, 16 }
  0x27   :  { %16157 = vst [vmem:[#allocation25_spill] sm:$0xff] %v16156_v18  ;;  %v16160_v19 = vsel %vm8066_vm5, 4294967295, %v16159_v19  ;;  %v292_v25 = vsel %vm16165_vm9, 1, %v15264_v40  ;;  %vm16166_vm8 = vcmp.lt.s32.totalorder %v7778_v35, 16  ;;  %vm16167_vm10 = vcmp.lt.s32.totalorder %v7780_v36, 16 }
  0x28   :  { %256 = vrot.lane.b32.xlu1 %v225_v14, %s7694_s9  ;;  %254 = vrot.lane.b32.xlu0 %v224_v15, %s7694_s9  ;;  %16161 = vst [vmem:[#allocation26_spill] sm:$0xff] %v16160_v19  ;;  %v295_v26 = vsel %vm16166_vm8, 1, %v15264_v40  ;;  %v294_v33 = vsel %vm16167_vm10, 1, %v15264_v40  ;;  %v6800_v37 = vadd.f32 4.0, %v7743_v6  ;;  %v6799_v43 = vadd.f32 4.0, %v7730_v1 }
  0x29   :  { %vm16168_vm2 = vcmp.lt.s32.totalorder %v7846_v51, 16  ;;  %vm16169_vm9 = vcmp.lt.s32.totalorder %v7848_v52, 16  ;;  %v6802_v4 = vadd.f32 4.0, %v7735_v2  ;;  %v6801_v6 = vadd.f32 4.0, %v7725_v0 }
  0x2a   :  { %v297_v49 = vsel %vm16168_vm2, 1, %v15264_v40  ;;  %v296_v54 = vsel %vm16169_vm9, 1, %v15264_v40  ;;  %v115_v55 = vmul.f32 0.125, %v6800_v37  ;;  %v114_v3 = vmul.f32 0.125, %v6799_v43 }
  0x2b   :  { %vm16170_vm8 = vcmp.lt.s32.totalorder %v7883_v20, 16  ;;  %vm16171_vm10 = vcmp.lt.s32.totalorder %v7885_v21, 16  ;;  %v6804_v15 = vadd.f32 4.0, %v7748_v7  ;;  %v116_v0 = vmul.f32 0.125, %v6801_v6 }
  0x2c   :  { %308 = vrot.lane.b32.xlu1 %v291_v22, %s7694_s9  ;;  %306 = vrot.lane.b32.xlu0 %v290_v23, %s7694_s9  ;;  %v299_v1 = vsel %vm16170_vm8, 1, %v15264_v40  ;;  %v298_v14 = vsel %vm16171_vm10, 1, %v15264_v40  ;;  %v6803_v22 = vadd.f32 4.0, %v7753_v8  ;;  %v131_v23 = vfloor.f32 %v115_v55 }
  0x2d   :  { %v130_v2 = vfloor.f32 %v114_v3  ;;  %vm16172_vm2 = vcmp.lt.s32.totalorder %v7892_v27, 16  ;;  %vm16173_vm9 = vcmp.lt.s32.totalorder %v7894_v28, 16  ;;  %v119_v8 = vmul.f32 0.125, %v6804_v15 }
  0x2e   :  { %v300_v7 = vsel %vm16173_vm9, 1, %v15264_v40  ;;  %v118_v37 = vmul.f32 0.125, %v6803_v22  ;;  %v7547_v43 = vtrunc.f32 %v131_v23  ;;  %vm16174_vm8 = vcmp.lt.s32.totalorder %v7898_v29, 16 }
  0x2f   :  { %v303_v3 = vsel %vm16174_vm8, 1, %v15264_v40  ;;  %vm16175_vm10 = vcmp.lt.s32.totalorder %v7906_v41, 16  ;;  %v135_v6 = vfloor.f32 %v119_v8  ;;  %v16255_v53 = vmov 0 }
  0x30   :  { %312 = vrot.lane.b32.xlu1 %v293_v24, %s7694_s9  ;;  %310 = vrot.lane.b32.xlu0 %v292_v25, %s7694_s9  ;;  %v117_v24 = vmul.f32 0.125, %v6802_v4  ;;  %v6806_v25 = vadd.f32 4.0, %v7761_v12  ;;  %v132_v12 = vfloor.f32 %v116_v0  ;;  %v302_v4 = vsel %vm16175_vm10, 1, %v15264_v40 }
  0x32   :  { %v121_v55 = vmul.f32 0.125, %v6806_v25  ;;  %v7549_v23 = vtrunc.f32 %v132_v12 }
  0x34   :  { %316 = vrot.lane.b32.xlu1 %v295_v26, %s7694_s9  ;;  %314 = vrot.lane.b32.xlu0 %v294_v33, %s7694_s9  ;;  %v6805_v26 = vadd.f32 4.0, %v7766_v13  ;;  %v301_v33 = vsel %vm16172_vm2, 1, %v15264_v40  ;;  %v137_v0 = vfloor.f32 %v121_v55  ;;  %vm16178_vm2 = vcmp.lt.s32.totalorder %v7948_v57, 16 }
  0x36   :  { %v120_v13 = vmul.f32 0.125, %v6805_v26  ;;  %v305_v26 = vsel %vm16178_vm2, 1, %v15264_v40  ;;  %v7559_v12 = vtrunc.f32 %v137_v0 }
  0x38   :  { %320 = vrot.lane.b32.xlu1 %v297_v49, %s7694_s9  ;;  %318 = vrot.lane.b32.xlu0 %v296_v54, %s7694_s9  ;;  %v7545_v49 = vtrunc.f32 %v130_v2  ;;  %v133_v54 = vfloor.f32 %v117_v24  ;;  %v6808_v2 = vadd.f32 4.0, %v7789_v38  ;;  %v6807_v24 = vadd.f32 4.0, %v7794_v39 }
  0x39   :  { %v136_v25 = vfloor.f32 %v120_v13  ;;  %v8150_v39 = vcvt.f32.s32 %v7549_v23 }
  0x3a   :  { %v8134_v15 = vcvt.f32.s32 %v7545_v49  ;;  %v7551_v22 = vtrunc.f32 %v133_v54  ;;  %v6810_v49 = vadd.f32 4.0, %v7811_v44  ;;  %v6809_v54 = vadd.f32 4.0, %v7816_v45 }
  0x3b   :  { %16180 = vst [vmem:[#allocation30_spill] sm:$0xff] %v8150_v39  ;;  %v7557_v55 = vtrunc.f32 %v136_v25  ;;  %vm372_vm10 = vcmp.ge.s32.totalorder %v8150_v39, 0  ;;  %v6812_v44 = vadd.f32 4.0, %v7833_v47  ;;  %v6811_v45 = vadd.f32 4.0, %v7838_v48 }
  0x3c   :  { %324 = vrot.lane.b32.xlu1 %v299_v1, %s7694_s9  ;;  %322 = vrot.lane.b32.xlu0 %v298_v14, %s7694_s9  ;;  %v134_v1 = vfloor.f32 %v118_v37  ;;  %v8132_v14 = vcvt.f32.s32 %v7547_v43  ;;  %16177 = vst [vmem:[#allocation28_spill] sm:$0xff] %v8134_v15  ;;  %vm370_vm8 = vcmp.ge.s32.totalorder %v8134_v15, 0  ;;  %v8148_v38 = vcvt.f32.s32 %v7551_v22 }
  0x3d   :  { %v123_v37 = vmul.f32 0.125, %v6808_v2  ;;  %v122_v43 = vmul.f32 0.125, %v6807_v24  ;;  %v125_v23 = vmul.f32 0.125, %v6810_v49  ;;  %v124_v2 = vmul.f32 0.125, %v6809_v54 }
  0x3e   :  { %16176 = vst [vmem:[#allocation27_spill] sm:$0xff] %v8132_v14  ;;  %v7553_v8 = vtrunc.f32 %v134_v1  ;;  %vm371_vm9 = vcmp.ge.s32.totalorder %v8132_v14, 0  ;;  %16179 = vst [vmem:[#allocation29_spill] sm:$0xff] %v8148_v38  ;;  %v8166_v24 = vcvt.f32.s32 %v7559_v12  ;;  %v8168_v0 = vcvt.f32.s32 %v7557_v55 }
  0x3f   :  { %v387_v13 = vsel %vm371_vm9, 1, %v15264_v40  ;;  %v139_v1 = vfloor.f32 %v123_v37  ;;  %v138_v22 = vfloor.f32 %v122_v43  ;;  %v127_v47 = vmul.f32 0.125, %v6812_v44 }
  0x40   :  { %328 = vrot.lane.b32.xlu1 %v301_v33, %s7694_s9  ;;  %326 = vrot.lane.b32.xlu0 %v300_v7, %s7694_s9  ;;  %v304_v33 = vsel %vm192_vm15, 1, %v15264_v40  ;;  %v7555_v7 = vtrunc.f32 %v135_v6  ;;  %v8160_v6 = vcvt.f32.s32 %v7553_v8  ;;  %vm373_vm15 = vcmp.ge.s32.totalorder %v8148_v38, 0  ;;  %16183 = vst [vmem:[#allocation33_spill] sm:$0xff] %v8166_v24 }
  0x41   :  { %v389_v25 = vsel %vm373_vm15, 1, %v15264_v40  ;;  %v126_v48 = vmul.f32 0.125, %v6811_v45  ;;  %v7563_v8 = vtrunc.f32 %v139_v1  ;;  %v7561_v37 = vtrunc.f32 %v138_v22 }
  0x42   :  { %16182 = vst [vmem:[#allocation32_spill] sm:$0xff] %v8160_v6  ;;  %vm374_vm9 = vcmp.ge.s32.totalorder %v8160_v6, 0  ;;  %v141_v43 = vfloor.f32 %v125_v23  ;;  %v140_v49 = vfloor.f32 %v124_v2  ;;  %vm376_vm15 = vcmp.ge.s32.totalorder %v8168_v0, 0 }
  0x43   :  { %v390_v12 = vsel %vm374_vm9, 1, %v15264_v40  ;;  %v143_v55 = vfloor.f32 %v127_v47  ;;  %v8186_v44 = vcvt.f32.s32 %v7561_v37  ;;  %v392_v23 = vsel %vm376_vm15, 1, %v15264_v40 }
  0x44   :  { %332 = vrot.lane.b32.xlu1 %v303_v3, %s7694_s9  ;;  %330 = vrot.lane.b32.xlu0 %v302_v4, %s7694_s9  ;;  %v386_v3 = vsel %vm370_vm8, 1, %v15264_v40  ;;  %v8158_v4 = vcvt.f32.s32 %v7555_v7  ;;  %v6813_v7 = vadd.f32 4.0, %v7870_v62  ;;  %vm377_vm8 = vcmp.ge.s32.totalorder %v8166_v24, 0 }
  0x45   :  { %v7567_v45 = vtrunc.f32 %v141_v43  ;;  %v7565_v1 = vtrunc.f32 %v140_v49  ;;  %v393_v22 = vsel %vm377_vm8, 1, %v15264_v40  ;;  %v7571_v2 = vtrunc.f32 %v143_v55 }
  0x46   :  { %16181 = vst [vmem:[#allocation31_spill] sm:$0xff] %v8158_v4  ;;  %vm375_vm2 = vcmp.ge.s32.totalorder %v8158_v4, 0  ;;  %v128_v62 = vmul.f32 0.125, %v6813_v7  ;;  %vm466_vm12 = vcmp.lt.s32.totalorder %v8134_v15, 1  ;;  %v564_v11 = vmul.u32 16, %v8150_v39 }
  0x47   :  { %v391_v54 = vsel %vm375_vm2, 1, %v15264_v40  ;;  %vm378_vm2 = vcmp.ge.s32.totalorder %v8186_v44, 0  ;;  %v8204_v49 = vcvt.f32.s32 %v7571_v2  ;;  %v482_v2 = vsel %vm466_vm12, 1, %v15264_v40 }
  0x48   :  { %336 = vrot.lane.b32.xlu1 %v305_v26, %s7694_s9  ;;  %334 = vrot.lane.b32.xlu0 %v304_v33, %s7694_s9  ;;  %v388_v26 = vsel %vm372_vm10, 1, %v15264_v40  ;;  %v6814_v33 = vadd.f32 4.0, %v7865_v61  ;;  %v142_v61 = vfloor.f32 %v126_v48  ;;  %v144_v47 = vfloor.f32 %v128_v62 }
  0x49   :  { %v8194_v48 = vcvt.f32.s32 %v7567_v45  ;;  %16186 = vst [vmem:[#allocation36_spill] sm:$0xff] %v8204_v49  ;;  %vm383_vm15 = vcmp.ge.s32.totalorder %v8204_v49, 0  ;;  %vm473_vm12 = vcmp.lt.s32.totalorder %v8166_v24, 1  ;;  %v567_v60 = vmul.u32 16, %v8158_v4 }
  0x4a   :  { %v7573_v43 = vtrunc.f32 %v144_v47  ;;  %v399_v62 = vsel %vm383_vm15, 1, %v15264_v40  ;;  %vm469_vm15 = vcmp.lt.s32.totalorder %v8148_v38, 1 }
  0x4b   :  { %16185 = vst [vmem:[#allocation35_spill] sm:$0xff] %v8194_v48  ;;  %vm381_vm9 = vcmp.ge.s32.totalorder %v8194_v48, 0 }
  0x4c   :  { %404 = vrot.lane.b32.xlu1 %v387_v13, %s7695_s18  ;;  %402 = vrot.lane.b32.xlu0 %v386_v3, %s7695_s18  ;;  %v129_v13 = vmul.f32 0.125, %v6814_v33  ;;  %v8184_v3 = vcvt.f32.s32 %v7563_v8  ;;  %v8196_v33 = vcvt.f32.s32 %v7565_v1  ;;  %v394_v8 = vsel %vm378_vm2, 1, %v15264_v40 }
  0x4e   :  { %16184 = vst [vmem:[#allocation34_spill] sm:$0xff] %v8184_v3  ;;  %vm379_vm10 = vcmp.ge.s32.totalorder %v8184_v3, 0  ;;  %vm380_vm8 = vcmp.ge.s32.totalorder %v8196_v33, 0 }
  0x4f   :  { %v395_v7 = vsel %vm379_vm10, 1, %v15264_v40  ;;  %v396_v55 = vsel %vm380_vm8, 1, %v15264_v40  ;;  %vm467_vm8 = vcmp.lt.s32.totalorder %v8132_v14, 1 }
  0x50   :  { %408 = vrot.lane.b32.xlu1 %v389_v25, %s7695_s18  ;;  %406 = vrot.lane.b32.xlu0 %v388_v26, %s7695_s18  ;;  %v7569_v25 = vtrunc.f32 %v142_v61  ;;  %v145_v26 = vfloor.f32 %v129_v13  ;;  %v8216_v13 = vcvt.f32.s32 %v7573_v43 }
  0x52   :  { %v7575_v37 = vtrunc.f32 %v145_v26  ;;  %16189 = vst [vmem:[#allocation39_spill] sm:$0xff] %v8216_v13 }
  0x54   :  { %412 = vrot.lane.b32.xlu1 %v391_v54, %s7695_s18  ;;  %410 = vrot.lane.b32.xlu0 %v390_v12, %s7695_s18  ;;  %v8206_v54 = vcvt.f32.s32 %v7569_v25  ;;  %v397_v12 = vsel %vm381_vm9, 1, %v15264_v40  ;;  %v8214_v61 = vcvt.f32.s32 %v7575_v37  ;;  %vm384_vm9 = vcmp.ge.s32.totalorder %v8216_v13, 0 }
  0x55   :  { %v485_v25 = vsel %vm469_vm15, 1, %v15264_v40  ;;  %vm475_vm15 = vcmp.lt.s32.totalorder %v8184_v3, 1 }
  0x56   :  { %16187 = vst [vmem:[#allocation37_spill] sm:$0xff] %v8206_v54  ;;  %vm382_vm10 = vcmp.ge.s32.totalorder %v8206_v54, 0  ;;  %16188 = vst [vmem:[#allocation38_spill] sm:$0xff] %v8214_v61  ;;  %vm385_vm2 = vcmp.ge.s32.totalorder %v8214_v61, 0  ;;  %v491_v43 = vsel %vm475_vm15, 1, %v15264_v40  ;;  %vm481_vm15 = vcmp.lt.s32.totalorder %v8214_v61, 1 }
  0x57   :  { %v398_v45 = vsel %vm382_vm10, 1, %v15264_v40  ;;  %v401_v1 = vsel %vm385_vm2, 1, %v15264_v40  ;;  %vm468_vm10 = vcmp.lt.s32.totalorder %v8150_v39, 1  ;;  %vm471_vm2 = vcmp.lt.s32.totalorder %v8158_v4, 1 }
  0x58   :  { %416 = vrot.lane.b32.xlu1 %v393_v22, %s7695_s18  ;;  %414 = vrot.lane.b32.xlu0 %v392_v23, %s7695_s18  ;;  %v400_v22 = vsel %vm384_vm9, 1, %v15264_v40  ;;  %v483_v23 = vsel %vm467_vm8, 1, %v15264_v40  ;;  %v484_v26 = vsel %vm468_vm10, 1, %v15264_v40  ;;  %vm470_vm9 = vcmp.lt.s32.totalorder %v8160_v6, 1 }
  0x59   :  { %v487_v47 = vsel %vm471_vm2, 1, %v15264_v40  ;;  %vm472_vm8 = vcmp.lt.s32.totalorder %v8168_v0, 1  ;;  %vm474_vm10 = vcmp.lt.s32.totalorder %v8186_v44, 1  ;;  %vm477_vm2 = vcmp.lt.s32.totalorder %v8194_v48, 1 }
  0x5a   :  { %v488_v37 = vsel %vm472_vm8, 1, %v15264_v40  ;;  %vm478_vm8 = vcmp.lt.s32.totalorder %v8206_v54, 1 }
  0x5c   :  { %420 = vrot.lane.b32.xlu1 %v395_v7, %s7695_s18  ;;  %418 = vrot.lane.b32.xlu0 %v394_v8, %s7695_s18  ;;  %v486_v7 = vsel %vm470_vm9, 1, %v15264_v40  ;;  %v489_v8 = vsel %vm473_vm12, 1, %v15264_v40  ;;  %vm476_vm9 = vcmp.lt.s32.totalorder %v8196_v33, 1  ;;  %vm479_vm12 = vcmp.lt.s32.totalorder %v8204_v49, 1 }
  0x60   :  { %424 = vrot.lane.b32.xlu1 %v397_v12, %s7695_s18  ;;  %422 = vrot.lane.b32.xlu0 %v396_v55, %s7695_s18  ;;  %v490_v12 = vsel %vm474_vm10, 1, %v15264_v40  ;;  %v493_v55 = vsel %vm477_vm2, 1, %v15264_v40  ;;  %vm480_vm10 = vcmp.lt.s32.totalorder %v8216_v13, 1 }
  0x64   :  { %428 = vrot.lane.b32.xlu1 %v399_v62, %s7695_s18  ;;  %426 = vrot.lane.b32.xlu0 %v398_v45, %s7695_s18  ;;  %v492_v62 = vsel %vm476_vm9, 1, %v15264_v40 }
  0x68   :  { %432 = vrot.lane.b32.xlu1 %v401_v1, %s7695_s18  ;;  %430 = vrot.lane.b32.xlu0 %v400_v22, %s7695_s18  ;;  %v495_v22 = vsel %vm479_vm12, 1, %v15264_v40 }
  0x6c   :  { %500 = vrot.lane.b32.xlu1 %v483_v23, %s7695_s18  ;;  %498 = vrot.lane.b32.xlu0 %v482_v2, %s7695_s18  ;;  %v494_v23 = vsel %vm478_vm8, 1, %v15264_v40 }
  0x70   :  { %504 = vrot.lane.b32.xlu1 %v485_v25, %s7695_s18  ;;  %502 = vrot.lane.b32.xlu0 %v484_v26, %s7695_s18  ;;  %v497_v26 = vsel %vm481_vm15, 1, %v15264_v40 }
  0x74   :  { %508 = vrot.lane.b32.xlu1 %v487_v47, %s7695_s18  ;;  %506 = vrot.lane.b32.xlu0 %v486_v7, %s7695_s18  ;;  %v496_v47 = vsel %vm480_vm10, 1, %v15264_v40 }
  0x78   :  { %512 = vrot.lane.b32.xlu1 %v489_v8, %s7695_s18  ;;  %510 = vrot.lane.b32.xlu0 %v488_v37, %s7695_s18 }
  0x7c   :  { %516 = vrot.lane.b32.xlu1 %v491_v43, %s7695_s18  ;;  %514 = vrot.lane.b32.xlu0 %v490_v12, %s7695_s18 }
  0x7e   :  { %v8264_v45 = vpop.permute.xlu1 %230  ;;  %v8266_v1 = vpop.permute.xlu0 %226 }
  0x7f   :  { %vm260_vm2 = vcmp.ne.s32.totalorder %v8264_v45, 0  ;;  %vm258_vm9 = vcmp.ne.s32.totalorder %v8266_v1, 0  ;;  %v576_v1 = vmul.u32 16, %v8216_v13 }
  0x80   :  { %520 = vrot.lane.b32.xlu1 %v493_v55, %s7695_s18  ;;  %518 = vrot.lane.b32.xlu0 %v492_v62, %s7695_s18  ;;  %vm8507_vm8 = vmand %vm7799_vm4, %vm260_vm2 }
  0x81   :  { %vm8517_vm12 = vmand %vm7824_vm7, %vm258_vm9 }
  0x82   :  { %v8274_v2 = vpop.permute.xlu1 %232  ;;  %v8276_v25 = vpop.permute.xlu0 %228 }
  0x83   :  { %vm259_vm15 = vcmp.ne.s32.totalorder %v8276_v25, 0  ;;  %vm16247_vm4 = vcmp.ne.s32.totalorder %v8274_v2, 0 }
  0x84   :  { %524 = vrot.lane.b32.xlu1 %v495_v22, %s7695_s18  ;;  %522 = vrot.lane.b32.xlu0 %v494_v23, %s7695_s18  ;;  %vm8527_vm2 = vmand %vm7916_vm1, %vm16247_vm4 }
  0x85   :  { %vm8537_vm10 = vmand %vm7927_vm13, %vm259_vm15  ;;  %vm16257_vm15 = vnez %v16128_v63  ;;  %v16262_v63 = vmov 0 }
  0x86   :  { %v8284_v7 = vpop.permute.xlu1 %236  ;;  %v8286_v8 = vpop.permute.xlu0 %234 }
  0x87   :  { %vm263_vm7 = vcmp.ne.s32.totalorder %v8284_v7, 0  ;;  %vm16252_vm1 = vcmp.ne.s32.totalorder %v8286_v8, 0 }
  0x88   :  { %528 = vrot.lane.b32.xlu1 %v497_v26, %s7695_s18  ;;  %526 = vrot.lane.b32.xlu0 %v496_v47, %s7695_s18  ;;  %vm8546_vm4 = vmand %vm7957_vm14, %vm16252_vm1 }
  0x89   :  { %vm8554_vm13 = vmand %vm7943_vm6, %vm263_vm7 }
  0x8a   :  { %v8290_v37 = vpop.permute.xlu1 %240  ;;  %v8292_v43 = vpop.permute.xlu0 %238  ;;  %v16256_v53 = vsel %vm8554_vm13, 4294967295, %v16255_v53 }
  0x8b   :  { %vm264_vm9 = vcmp.ne.s32.totalorder %v8292_v43, 0  ;;  %vm265_vm14 = vcmp.ne.s32.totalorder %v8290_v37, 0 }
  0x8c   :  { %580 = vrot.lane.b32.xlu1 %v7776_v34, %s7696_s19  ;;  %578 = vrot.lane.b32.xlu0 %v7772_v31, %s7696_s19  ;;  %vm8560_vm0 = vmand %vm16257_vm15, %vm264_vm9 }
  0x8e   :  { %v8298_v12 = vpop.permute.xlu1 %244  ;;  %v8300_v55 = vpop.permute.xlu0 %242 }
  0x8f   :  { %16190 = vst [vmem:[#allocation40_spill] sm:$0xff] %v8298_v12  ;;  %vm16260_vm6 = vcmp.ne.s32.totalorder %v8300_v55, 0 }
  0x90   :  { %584 = vrot.lane.b32.xlu1 %v7774_v32, %s7696_s19  ;;  %582 = vrot.lane.b32.xlu0 %v7770_v30, %s7696_s19  ;;  %vm8571_vm7 = vmand %vm8003_vm3, %vm16260_vm6 }
  0x91   :  { %v16263_v63 = vsel %vm8571_vm7, 4294967295, %v16262_v63 }
  0x92   :  { %v8306_v62 = vpop.permute.xlu1 %248  ;;  %v8308_v22 = vpop.permute.xlu0 %246 }
  0x93   :  { %16191 = vst [vmem:[#allocation41_spill] sm:$0xff] %v8306_v62  ;;  %16192 = vst [vmem:[#allocation42_spill] sm:$0xff] %v8308_v22 }
  0x94   :  { %588 = vrot.lane.b32.xlu1 %v7778_v35, %s7696_s19  ;;  %586 = vrot.lane.b32.xlu0 %v7780_v36, %s7696_s19 }
  0x96   :  { %v8314_v23 = vpop.permute.xlu1 %252  ;;  %v8316_v26 = vpop.permute.xlu0 %250 }
  0x97   :  { %16193 = vst [vmem:[#allocation43_spill] sm:$0xff] %v8314_v23  ;;  %16194 = vst [vmem:[#allocation44_spill] sm:$0xff] %v8316_v26  ;;  %v15271_v23 = vmov 2   ;;  %v565_v26 = vmul.u32 16, %v8148_v38 }
  0x98   :  { %592 = vrot.lane.b32.xlu1 %v7846_v51, %s7696_s19  ;;  %590 = vrot.lane.b32.xlu0 %v7848_v52, %s7696_s19 }
  0x99   :  { %7659 = vset.pattern.permute.xlu1 %v15271_v23  ;;  %7658 = vset.pattern.permute.xlu0 %v15271_v23 }
  0x9a   :  { %v8322_v47 = vpop.permute.xlu1 %256  ;;  %v8324_v40 = vpop.permute.xlu0 %254 }
  0x9b   :  { %16195 = vst [vmem:[#allocation45_spill] sm:$0xff] %v8322_v47  ;;  %16196 = vst [vmem:[#allocation46_spill] sm:$0xff] %v8324_v40 }
  0x9c   :  { %596 = vrot.lane.b32.xlu1 %v7883_v20, %s7696_s19  ;;  %594 = vrot.lane.b32.xlu0 %v7885_v21, %s7696_s19 }
  0x9e   :  { %v8330_v18 = vpop.permute.xlu1 %308  ;;  %v8332_v16 = vpop.permute.xlu0 %306 }
  0x9f   :  { %vm339_vm5 = vcmp.ne.s32.totalorder %v8330_v18, 0  ;;  %vm16270_vm6 = vcmp.ne.s32.totalorder %v8332_v16, 0  ;;  %v16371_v16 = vmov 0 }
  0xa0   :  { %600 = vrot.lane.b32.xlu1 %v7892_v27, %s7696_s19  ;;  %598 = vrot.lane.b32.xlu0 %v7894_v28, %s7696_s19  ;;  %vm8581_vm15 = vmand %vm8537_vm10, %vm339_vm5 }
  0xa1   :  { %vm8591_vm9 = vmand %vm8517_vm12, %vm16270_vm6 }
  0xa2   :  { %v8340_v47 = vpop.permute.xlu1 %312  ;;  %v8342_v19 = vpop.permute.xlu0 %310 }
  0xa3   :  { %16197 = vst [vmem:[#allocation47_spill] sm:$0xff] %v8340_v47  ;;  %16198 = vst [vmem:[#allocation48_spill] sm:$0xff] %v8342_v19 }
  0xa4   :  { %604 = vrot.lane.b32.xlu1 %v7898_v29, %s7696_s19  ;;  %602 = vrot.lane.b32.xlu0 %v7906_v41, %s7696_s19 }
  0xa6   :  { %v8348_v10 = vpop.permute.xlu1 %316  ;;  %v8350_v40 = vpop.permute.xlu0 %314 }
  0xa7   :  { %16199 = vst [vmem:[#allocation49_spill] sm:$0xff] %v8348_v10  ;;  %16200 = vst [vmem:[#allocation50_spill] sm:$0xff] %v8350_v40 }
  0xa8   :  { %608 = vrot.lane.b32.xlu1 %v7948_v57, %s7696_s19  ;;  %606 = vrot.lane.b32.xlu0 %v7950_v58, %s7696_s19 }
  0xaa   :  { %v8356_v23 = vpop.permute.xlu1 %320  ;;  %v8358_v17 = vpop.permute.xlu0 %318  ;;  %v16268_v37 = vld [vmem:[#allocation47_spill] sm:$0xff] }
  0xab   :  { %16201 = vst [vmem:[#allocation51_spill] sm:$0xff] %v8356_v23  ;;  %16202 = vst [vmem:[#allocation52_spill] sm:$0xff] %v8358_v17  ;;  %vm341_vm11 = vcmp.ne.s32.totalorder %v16268_v37, 0  ;;  %v16353_v37 = vmov 0 }
  0xac   :  { %644 = vrot.lane.b32.xlu1 %v7776_v34, %s7698_s20  ;;  %642 = vrot.lane.b32.xlu0 %v7772_v31, %s7698_s20 }
  0xae   :  { %v8364_v62 = vpop.permute.xlu1 %324  ;;  %v8366_v5 = vpop.permute.xlu0 %322  ;;  %v16269_v55 = vld [vmem:[#allocation50_spill] sm:$0xff] }
  0xaf   :  { %16203 = vst [vmem:[#allocation53_spill] sm:$0xff] %v8364_v62  ;;  %16204 = vst [vmem:[#allocation54_spill] sm:$0xff] %v8366_v5  ;;  %vm16291_vm6 = vcmp.ne.s32.totalorder %v16269_v55, 0 }
  0xb0   :  { %648 = vrot.lane.b32.xlu1 %v7774_v32, %s7698_s20  ;;  %646 = vrot.lane.b32.xlu0 %v7770_v30, %s7698_s20  ;;  %vm8632_vm12 = vmand %vm8546_vm4, %vm16291_vm6 }
  0xb2   :  { %v8372_v23 = vpop.permute.xlu1 %328  ;;  %v8374_v10 = vpop.permute.xlu0 %326  ;;  %v16273_v18 = vld [vmem:[#allocation52_spill] sm:$0xff]  ;;  %v16327_v2 = vld [vmem:[#allocation51_spill] sm:$0xff] }
  0xb3   :  { %16205 = vst [vmem:[#allocation55_spill] sm:$0xff] %v8372_v23  ;;  %16206 = vst [vmem:[#allocation56_spill] sm:$0xff] %v8374_v10  ;;  %vm344_vm7 = vcmp.ne.s32.totalorder %v16273_v18, 0 }
  0xb4   :  { %652 = vrot.lane.b32.xlu1 %v7778_v35, %s7698_s20  ;;  %650 = vrot.lane.b32.xlu0 %v7780_v36, %s7698_s20 }
  0xb6   :  { %v8380_v34 = vpop.permute.xlu1 %332  ;;  %v8382_v31 = vpop.permute.xlu0 %330 }
  0xb7   :  { %16207 = vst [vmem:[#allocation57_spill] sm:$0xff] %v8380_v34  ;;  %16208 = vst [vmem:[#allocation58_spill] sm:$0xff] %v8382_v31 }
  0xb8   :  { %656 = vrot.lane.b32.xlu1 %v7846_v51, %s7698_s20  ;;  %654 = vrot.lane.b32.xlu0 %v7848_v52, %s7698_s20 }
  0xba   :  { %v8388_v32 = vpop.permute.xlu1 %336  ;;  %v8390_v30 = vpop.permute.xlu0 %334 }
  0xbb   :  { %16209 = vst [vmem:[#allocation59_spill] sm:$0xff] %v8388_v32  ;;  %16210 = vst [vmem:[#allocation60_spill] sm:$0xff] %v8390_v30 }
  0xbc   :  { %660 = vrot.lane.b32.xlu1 %v7883_v20, %s7698_s20  ;;  %658 = vrot.lane.b32.xlu0 %v7885_v21, %s7698_s20 }
  0xbe   :  { %v8396_v36 = vpop.permute.xlu1 %404  ;;  %v8398_v35 = vpop.permute.xlu0 %402 }
  0xbf   :  { %16211 = vst [vmem:[#allocation61_spill] sm:$0xff] %v8396_v36  ;;  %16212 = vst [vmem:[#allocation62_spill] sm:$0xff] %v8398_v35 }
  0xc0   :  { %664 = vrot.lane.b32.xlu1 %v7892_v27, %s7698_s20  ;;  %662 = vrot.lane.b32.xlu0 %v7894_v28, %s7698_s20 }
  0xc2   :  { %v8404_v52 = vpop.permute.xlu1 %408  ;;  %v8406_v51 = vpop.permute.xlu0 %406 }
  0xc3   :  { %16213 = vst [vmem:[#allocation63_spill] sm:$0xff] %v8404_v52  ;;  %16214 = vst [vmem:[#allocation64_spill] sm:$0xff] %v8406_v51 }
  0xc4   :  { %668 = vrot.lane.b32.xlu1 %v7898_v29, %s7698_s20  ;;  %666 = vrot.lane.b32.xlu0 %v7906_v41, %s7698_s20 }
  0xc6   :  { %v8412_v21 = vpop.permute.xlu1 %412  ;;  %v8414_v20 = vpop.permute.xlu0 %410 }
  0xc7   :  { %16215 = vst [vmem:[#allocation65_spill] sm:$0xff] %v8412_v21  ;;  %16216 = vst [vmem:[#allocation66_spill] sm:$0xff] %v8414_v20 }
  0xc8   :  { %672 = vrot.lane.b32.xlu1 %v7948_v57, %s7698_s20  ;;  %670 = vrot.lane.b32.xlu0 %v7950_v58, %s7698_s20 }
  0xca   :  { %v8420_v28 = vpop.permute.xlu1 %416  ;;  %v8422_v27 = vpop.permute.xlu0 %414 }
  0xcb   :  { %16217 = vst [vmem:[#allocation67_spill] sm:$0xff] %v8420_v28  ;;  %16218 = vst [vmem:[#allocation68_spill] sm:$0xff] %v8422_v27 }
  0xce   :  { %v8424_v32 = vpop.permute.xlu1 %420  ;;  %v8426_v29 = vpop.permute.xlu0 %418 }
  0xcf   :  { %16219 = vst [vmem:[#allocation69_spill] sm:$0xff] %v8424_v32  ;;  %16220 = vst [vmem:[#allocation70_spill] sm:$0xff] %v8426_v29 }
  0xd2   :  { %v8428_v34 = vpop.permute.xlu1 %424  ;;  %v8430_v41 = vpop.permute.xlu0 %422  ;;  %v16340_v56 = vld [vmem:[#allocation68_spill] sm:$0xff] }
  0xd3   :  { %16221 = vst [vmem:[#allocation71_spill] sm:$0xff] %v8428_v34  ;;  %16222 = vst [vmem:[#allocation72_spill] sm:$0xff] %v8430_v41 }
  0xd6   :  { %v8432_v30 = vpop.permute.xlu1 %428  ;;  %v8434_v23 = vpop.permute.xlu0 %426 }
  0xd7   :  { %16223 = vst [vmem:[#allocation73_spill] sm:$0xff] %v8432_v30  ;;  %16224 = vst [vmem:[#allocation74_spill] sm:$0xff] %v8434_v23 }
  0xda   :  { %v8436_v57 = vpop.permute.xlu1 %432  ;;  %v8438_v21 = vpop.permute.xlu0 %430 }
  0xdb   :  { %16225 = vst [vmem:[#allocation75_spill] sm:$0xff] %v8436_v57  ;;  %16226 = vst [vmem:[#allocation76_spill] sm:$0xff] %v8438_v21 }
  0xde   :  { %v8440_v58 = vpop.permute.xlu1 %500  ;;  %v8442_v28 = vpop.permute.xlu0 %498 }
  0xdf   :  { %16227 = vst [vmem:[#allocation77_spill] sm:$0xff] %v8440_v58  ;;  %16228 = vst [vmem:[#allocation78_spill] sm:$0xff] %v8442_v28 }
  0xe2   :  { %v8444_v31 = vpop.permute.xlu1 %504  ;;  %v8446_v32 = vpop.permute.xlu0 %502 }
  0xe3   :  { %16229 = vst [vmem:[#allocation79_spill] sm:$0xff] %v8444_v31  ;;  %16230 = vst [vmem:[#allocation80_spill] sm:$0xff] %v8446_v32 }
  0xe6   :  { %v8448_v29 = vpop.permute.xlu1 %508  ;;  %v8450_v34 = vpop.permute.xlu0 %506 }
  0xe7   :  { %16231 = vst [vmem:[#allocation81_spill] sm:$0xff] %v8448_v29  ;;  %16232 = vst [vmem:[#allocation82_spill] sm:$0xff] %v8450_v34 }
  0xea   :  { %v8452_v41 = vpop.permute.xlu1 %512  ;;  %v8454_v30 = vpop.permute.xlu0 %510  ;;  %v16355_v55 = vld [vmem:[#allocation79_spill] sm:$0xff] }
  0xeb   :  { %16233 = vst [vmem:[#allocation83_spill] sm:$0xff] %v8452_v41  ;;  %16234 = vst [vmem:[#allocation84_spill] sm:$0xff] %v8454_v30 }
  0xee   :  { %v8456_v23 = vpop.permute.xlu1 %516  ;;  %v8458_v57 = vpop.permute.xlu0 %514  ;;  %v16332_v25 = vld [vmem:[#allocation82_spill] sm:$0xff] }
  0xef   :  { %16235 = vst [vmem:[#allocation85_spill] sm:$0xff] %v8456_v23  ;;  %16236 = vst [vmem:[#allocation86_spill] sm:$0xff] %v8458_v57 }
  0xf2   :  { %v8460_v21 = vpop.permute.xlu1 %520  ;;  %v8462_v62 = vpop.permute.xlu0 %518  ;;  %v16365_v18 = vld [vmem:[#allocation84_spill] sm:$0xff] }
  0xf3   :  { %16237 = vst [vmem:[#allocation87_spill] sm:$0xff] %v8460_v21  ;;  %16238 = vst [vmem:[#allocation88_spill] sm:$0xff] %v8462_v62 }
  0xf6   :  { %v8464_v27 = vpop.permute.xlu1 %524  ;;  %v8466_v31 = vpop.permute.xlu0 %522 }
  0xf7   :  { %16239 = vst [vmem:[#allocation89_spill] sm:$0xff] %v8464_v27  ;;  %16240 = vst [vmem:[#allocation90_spill] sm:$0xff] %v8466_v31  ;;  %v563_v27 = vmul.u32 16, %v8132_v14  ;;  %v566_v14 = vmul.u32 16, %v8160_v6 }
  0xfa   :  { %v8468_v52 = vpop.permute.xlu1 %528  ;;  %v8470_v29 = vpop.permute.xlu0 %526 }
  0xfb   :  { %16241 = vst [vmem:[#allocation91_spill] sm:$0xff] %v8468_v52  ;;  %16242 = vst [vmem:[#allocation92_spill] sm:$0xff] %v8470_v29  ;;  %v562_v52 = vmul.u32 16, %v8134_v15 }
  0xfe   :  { %v581_v10 = vpop.permute.xlu1 %580  ;;  %v579_v41 = vpop.permute.xlu0 %578 }
  0xff   :  { %v611_v28 = vadd.s32 %v581_v10, %v563_v27  ;;  %v610_v58 = vadd.s32 %v579_v41, %v562_v52  ;;  %v569_v41 = vmul.u32 16, %v8166_v24  ;;  %v568_v10 = vmul.u32 16, %v8168_v0 }
 0x101   :  { %v627_v36 = vmul.u32 16, %v611_v28  ;;  %v626_v15 = vmul.u32 16, %v610_v58 }
 0x102   :  { %v585_v34 = vpop.permute.xlu1 %584  ;;  %v583_v30 = vpop.permute.xlu0 %582 }
 0x103   :  { %v613_v17 = vadd.s32 %v585_v34, %v565_v26  ;;  %v612_v40 = vadd.s32 %v583_v30, %v564_v11  ;;  %v571_v30 = vmul.u32 16, %v8184_v3  ;;  %v570_v34 = vmul.u32 16, %v8186_v44 }
 0x104   :  { %v575_v26 = vmul.u32 16, %v8204_v49 }
 0x105   :  { %v629_v38 = vmul.u32 16, %v613_v17  ;;  %v628_v39 = vmul.u32 16, %v612_v40 }
 0x106   :  { %v589_v32 = vpop.permute.xlu1 %588  ;;  %v587_v23 = vpop.permute.xlu0 %586 }
 0x107   :  { %v615_v22 = vadd.s32 %v589_v32, %v567_v60  ;;  %v614_v9 = vadd.s32 %v587_v23, %v566_v14  ;;  %v573_v14 = vmul.u32 16, %v8194_v48  ;;  %v572_v23 = vmul.u32 16, %v8196_v33 }
 0x109   :  { %v630_v11 = vmul.u32 16, %v614_v9 }
 0x10a   :  { %v593_v20 = vpop.permute.xlu1 %592  ;;  %v591_v57 = vpop.permute.xlu0 %590 }
 0x10e   :  { %v597_v51 = vpop.permute.xlu1 %596  ;;  %v595_v21 = vpop.permute.xlu0 %594 }
 0x112   :  { %v8472_v5 = vpop.permute.xlu1 %600  ;;  %v8474_v62 = vpop.permute.xlu0 %598 }
 0x116   :  { %v8478_v31 = vpop.permute.xlu1 %604  ;;  %v8480_v29 = vpop.permute.xlu0 %602 }
 0x11a   :  { %v8484_v12 = vpop.permute.xlu1 %608  ;;  %v8486_v35 = vpop.permute.xlu0 %606 }
 0x11b   :  { %v624_v43 = vadd.s32 %v8486_v35, %v576_v1  ;;  %v16302_v1 = vld [vmem:[#allocation64_spill] sm:$0xff]  ;;  %v16349_v35 = vmov 0 }
 0x11e   :  { %v645_v47 = vpop.permute.xlu1 %644  ;;  %v643_v19 = vpop.permute.xlu0 %642 }
 0x11f   :  { %v675_v27 = vadd.s32 %v645_v47, %v627_v36  ;;  %v674_v52 = vadd.s32 %v643_v19, %v626_v15  ;;  %v631_v36 = vmul.u32 16, %v615_v22  ;;  %v617_v19 = vadd.s32 %v593_v20, %v569_v41 }
 0x120   :  { %v616_v15 = vadd.s32 %v591_v57, %v568_v10  ;;  %v574_v47 = vmul.u32 16, %v8206_v54  ;;  %v621_v41 = vadd.s32 %v8472_v5, %v573_v14  ;;  %v620_v10 = vadd.s32 %v8474_v62, %v572_v23  ;;  %v16274_v23 = vld [vmem:[#allocation61_spill] sm:$0xff]  ;;  %v16304_v62 = vld [vmem:[#allocation19_spill] sm:$0xff] }
 0x121   :  { %728 = vperm.xlu1 %7659, %v675_v27   ;;  %725 = vperm.xlu0 %7658, %v674_v52   ;;  %v577_v5 = vmul.u32 16, %v8214_v61  ;;  %v16361_v14 = vmov 0 }
 0x122   :  { %v649_v4 = vpop.permute.xlu1 %648  ;;  %v647_v6 = vpop.permute.xlu0 %646  ;;  %v637_v45 = vmul.u32 16, %v621_v41  ;;  %v636_v42 = vmul.u32 16, %v620_v10 }
 0x123   :  { %v677_v28 = vadd.s32 %v649_v4, %v629_v38  ;;  %v676_v58 = vadd.s32 %v647_v6, %v628_v39  ;;  %v633_v38 = vmul.u32 16, %v617_v19  ;;  %v632_v39 = vmul.u32 16, %v616_v15  ;;  %v16264_v15 = vld [vmem:[#allocation42_spill] sm:$0xff] }
 0x124   :  { %v619_v4 = vadd.s32 %v597_v51, %v571_v30  ;;  %v618_v6 = vadd.s32 %v595_v21, %v570_v34  ;;  %v623_v34 = vadd.s32 %v8478_v31, %v575_v26  ;;  %v625_v8 = vadd.s32 %v8484_v12, %v577_v5  ;;  %v16288_v26 = vld [vmem:[#allocation44_spill] sm:$0xff]  ;;  %v16300_v5 = vld [vmem:[#allocation54_spill] sm:$0xff] }
 0x125   :  { %734 = vperm.xlu0 %7658, %v677_v28   ;;  %731 = vperm.xlu1 %7659, %v676_v58   ;;  %vm16283_vm5 = vcmp.ne.s32.totalorder %v16264_v15, 0  ;;  %v16322_v31 = vmov 0  ;;  %v16344_v15 = vmov 0  }
 0x126   :  { %v653_v17 = vpop.permute.xlu1 %652  ;;  %v651_v40 = vpop.permute.xlu0 %650  ;;  %v635_v27 = vmul.u32 16, %v619_v4  ;;  %v634_v52 = vmul.u32 16, %v618_v6  ;;  %v16281_v4 = vld [vmem:[#allocation62_spill] sm:$0xff] }
 0x127   :  { %v679_v32 = vadd.s32 %v653_v17, %v631_v36  ;;  %v678_v60 = vadd.s32 %v651_v40, %v630_v11  ;;  %v622_v36 = vadd.s32 %v8480_v29, %v574_v47  ;;  %v639_v59 = vmul.u32 16, %v623_v34  ;;  %v16265_v17 = vld [vmem:[#allocation48_spill] sm:$0xff] }
 0x128   :  { %vm340_vm1 = vcmp.ne.s32.totalorder %v16265_v17, 0  ;;  %v641_v6 = vmul.u32 16, %v625_v8  ;;  %v16289_v47 = vmov 0  ;;  %v16309_v34 = vmov 0  ;;  %v16314_v11 = vld [vmem:[#allocation24_spill] sm:$0xff]  ;;  %v16336_v8 = vld [vmem:[#allocation21_spill] sm:$0xff] }
 0x129   :  { %740 = vperm.xlu0 %7658, %v679_v32   ;;  %737 = vperm.xlu1 %7659, %v678_v60   ;;  %v638_v7 = vmul.u32 16, %v622_v36  ;;  %vm8605_vm3 = vmand %vm8507_vm8, %vm340_vm1  ;;  %v16312_v36 = vld [vmem:[#allocation41_spill] sm:$0xff]  ;;  %vm16315_vm8 = vnez %v16314_v11 }
 0x12a   :  { %v657_v22 = vpop.permute.xlu1 %656  ;;  %v655_v9 = vpop.permute.xlu0 %654  ;;  %vm8624_vm1 = vmand %vm8527_vm2, %vm341_vm11  ;;  %vm16298_vm2 = vcmp.ne.s32.totalorder %v16274_v23, 0  ;;  %v16366_v23 = vld [vmem:[#allocation58_spill] sm:$0xff] }
 0x12b   :  { %v681_v20 = vadd.s32 %v657_v22, %v633_v38  ;;  %v680_v57 = vadd.s32 %v655_v9, %v632_v39  ;;  %v16275_v38 = vld [vmem:[#allocation18_spill] sm:$0xff]  ;;  %v16277_v39 = vmov 0  ;;  %v640_v22 = vmul.u32 16, %v624_v43  ;;  %v16282_v9 = vld [vmem:[#allocation40_spill] sm:$0xff]  ;;  %vm8642_vm11 = vmand %vm8560_vm0, %vm344_vm7 }
 0x12c   :  { %vm16276_vm10 = vnez %v16275_v38  ;;  %v16290_v47 = vsel %vm8624_vm1, 4294967295, %v16289_v47  ;;  %vm451_vm4 = vmand %vm8581_vm15, %vm16298_vm2  ;;  %vm436_vm0 = vcmp.ne.s32.totalorder %v16302_v1, 0  ;;  %vm16303_vm7 = vcmp.ne.s32.totalorder %v16282_v9, 0  ;;  %v16367_v38 = vld [vmem:[#allocation65_spill] sm:$0xff]  ;;  %v16407_v1 = vld [vmem:[#allocation88_spill] sm:$0xff] }
 0x12d   :  { %746 = vperm.xlu0 %7658, %v681_v20   ;;  %743 = vperm.xlu1 %7659, %v680_v57   ;;  %vm8599_vm13 = vmand %vm16276_vm10, %vm265_vm14  ;;  %v16284_v20 = vld [vmem:[#allocation22_spill] sm:$0xff]  ;;  %v16286_v57 = vmov 0  ;;  %v16338_v43 = vmov 0  ;;  %v16377_v9 = vld [vmem:[#allocation81_spill] sm:$0xff] }
 0x12e   :  { %v661_v51 = vpop.permute.xlu1 %660  ;;  %v659_v21 = vpop.permute.xlu0 %658  ;;  %v16278_v39 = vsel %vm8599_vm13, 4294967295, %v16277_v39  ;;  %vm16285_vm14 = vnez %v16284_v20  ;;  %v16378_v20 = vmov 0 }
 0x12f   :  { %v683_v28 = vadd.s32 %v661_v51, %v635_v27  ;;  %v682_v58 = vadd.s32 %v659_v21, %v634_v52  ;;  %vm8615_vm10 = vmand %vm16285_vm14, %vm16283_vm5  ;;  %v16294_v52 = vld [vmem:[#allocation77_spill] sm:$0xff]  ;;  %v16296_v21 = vmov 0  ;;  %vm16301_vm14 = vcmp.ne.s32.totalorder %v16281_v4, 0  ;;  %v16387_v27 = vld [vmem:[#allocation60_spill] sm:$0xff] }
 0x130   :  { %v16287_v57 = vsel %vm8615_vm10, 4294967295, %v16286_v57  ;;  %vm531_vm5 = vcmp.ne.s32.totalorder %v16294_v52, 0  ;;  %v16295_v51 = vld [vmem:[#allocation49_spill] sm:$0xff]  ;;  %v16297_v21 = vsel %vm8642_vm11, 4294967295, %v16296_v21  ;;  %vm450_vm1 = vmand %vm8591_vm9, %vm16301_vm14  ;;  %vm16305_vm11 = vnez %v16304_v62  ;;  %v16388_v52 = vld [vmem:[#allocation67_spill] sm:$0xff] }
 0x131   :  { %752 = vperm.xlu0 %7658, %v683_v28   ;;  %749 = vperm.xlu1 %7659, %v682_v58   ;;  %v16299_v28 = vld [vmem:[#allocation78_spill] sm:$0xff]  ;;  %vm8661_vm10 = vmand %vm16305_vm11, %vm16303_vm7  ;;  %vm269_vm9 = vcmp.ne.s32.totalorder %v16312_v36, 0  ;;  %vm16313_vm14 = vcmp.ne.s32.totalorder %v16288_v26, 0  ;;  %vm16318_vm11 = vcmp.ne.s32.totalorder %v16295_v51, 0  ;;  %vm16319_vm7 = vnez %v16256_v53  ;;  %v16408_v62 = vld [vmem:[#allocation69_spill] sm:$0xff] }
 0x132   :  { %v665_v46 = vpop.permute.xlu1 %664  ;;  %v663_v19 = vpop.permute.xlu0 %662  ;;  %vm530_vm6 = vcmp.ne.s32.totalorder %v16299_v28, 0  ;;  %vm8666_vm2 = vmand %vm451_vm4, %vm531_vm5  ;;  %v16330_v53 = vmov 0  ;;  %v16383_v26 = vmov 0  ;;  %v16397_v28 = vmov 0 }
 0x133   :  { %v685_v29 = vadd.s32 %v665_v46, %v637_v45  ;;  %v684_v50 = vadd.s32 %v663_v19, %v636_v42  ;;  %v16306_v45 = vmov 0  ;;  %v16308_v42 = vld [vmem:[#allocation66_spill] sm:$0xff]  ;;  %v16310_v34 = vsel %vm8666_vm2, 4294967295, %v16309_v34  ;;  %vm8675_vm13 = vmand %vm16315_vm8, %vm16313_vm14 }
 0x134   :  { %v16307_v45 = vsel %vm8661_vm10, 4294967295, %v16306_v45  ;;  %16311 = vst [vmem:[#allocation20_spill] sm:$0xff] %v16310_v34  ;;  %v16316_v46 = vmov 0  ;;  %vm8683_vm5 = vmand %vm16319_vm7, %vm16318_vm11  ;;  %v16320_v19 = vmov 0  ;;  %vm16328_vm14 = vcmp.ne.s32.totalorder %v16300_v5, 0 }
 0x135   :  { %758 = vperm.xlu0 %7658, %v685_v29   ;;  %755 = vperm.xlu1 %7659, %v684_v50   ;;  %v16317_v46 = vsel %vm8675_vm13, 4294967295, %v16316_v46  ;;  %v16321_v19 = vsel %vm8683_vm5, 4294967295, %v16320_v19  ;;  %vm8687_vm4 = vmand %vm450_vm1, %vm530_vm6  ;;  %v16325_v29 = vld [vmem:[#allocation80_spill] sm:$0xff]  ;;  %v16326_v50 = vld [vmem:[#allocation46_spill] sm:$0xff]  ;;  %vm16329_vm13 = vnez %v16263_v63  ;;  %vm534_vm6 = vcmp.ne.s32.totalorder %v16332_v25, 0 }
 0x136   :  { %v669_v40 = vpop.permute.xlu1 %668  ;;  %v667_v12 = vpop.permute.xlu0 %666  ;;  %v16323_v31 = vsel %vm8687_vm4, 4294967295, %v16322_v31  ;;  %vm532_vm15 = vcmp.ne.s32.totalorder %v16325_v29, 0  ;;  %vm8698_vm2 = vmand %vm16329_vm13, %vm16328_vm14  ;;  %vm16335_vm10 = vcmp.ne.s32.totalorder %v16308_v42, 0  ;;  %vm16337_vm5 = vnez %v16336_v8  ;;  %v16419_v29 = vld [vmem:[#allocation90_spill] sm:$0xff] }
 0x137   :  { %v687_v32 = vadd.s32 %v669_v40, %v639_v59  ;;  %v686_v60 = vadd.s32 %v667_v12, %v638_v7  ;;  %16324 = vst [vmem:[#allocation42_spill] sm:$0xff] %v16323_v31  ;;  %v16331_v53 = vsel %vm8698_vm2, 4294967295, %v16330_v53  ;;  %vm452_vm1 = vmand %vm8605_vm3, %vm436_vm0  ;;  %v16333_v59 = vld [vmem:[#allocation56_spill] sm:$0xff]  ;;  %v16334_v7 = vld [vmem:[#allocation63_spill] sm:$0xff]  ;;  %v16341_v63 = vmov 0 }
 0x138   :  { %vm348_vm11 = vcmp.ne.s32.totalorder %v16333_v59, 0  ;;  %vm454_vm8 = vmand %vm8632_vm12, %vm16335_vm10  ;;  %vm16345_vm0 = vnez %v16310_v34  ;;  %v792_v40 = vsel %vm8687_vm4, 1, %v16344_v15  ;;  %vm16346_vm12 = vcmp.ne.s32.totalorder %v16326_v50, 0  ;;  %v16347_v12 = vld [vmem:[#allocation26_spill] sm:$0xff]  ;;  %v16420_v50 = vld [vmem:[#allocation71_spill] sm:$0xff] }
 0x139   :  { %764 = vperm.xlu0 %7658, %v687_v32   ;;  %761 = vperm.xlu1 %7659, %v686_v60   ;;  %vm8713_vm13 = vmand %vm16337_vm5, %vm269_vm9  ;;  %v793_v17 = vsel %vm16345_vm0, 1, %v16344_v15  ;;  %vm16348_vm10 = vnez %v16347_v12  ;;  %vm16351_vm9 = vcmp.ne.s32.totalorder %v16327_v2, 0  ;;  %vm16352_vm5 = vnez %v16278_v39  ;;  %v16359_v60 = vld [vmem:[#allocation53_spill] sm:$0xff]  ;;  %v16370_v39 = vld [vmem:[#allocation70_spill] sm:$0xff] }
 0x13a   :  { %v673_v41 = vpop.permute.xlu1 %672  ;;  %v671_v10 = vpop.permute.xlu0 %670  ;;  %v16339_v43 = vsel %vm8713_vm13, 4294967295, %v16338_v43  ;;  %vm8718_vm3 = vmand %vm452_vm1, %vm532_vm15  ;;  %vm533_vm14 = vcmp.ne.s32.totalorder %v16355_v55, 0  ;;  %v16356_v32 = vmov 0  ;;  %vm350_vm0 = vcmp.ne.s32.totalorder %v16366_v23, 0  ;;  %v16422_v2 = vld [vmem:[#allocation76_spill] sm:$0xff]  ;;  %v16445_v23 = vld [vmem:[#allocation59_spill] sm:$0xff] }
 0x13b   :  { %v689_v58 = vadd.s32 %v673_v41, %v641_v6  ;;  %v688_v30 = vadd.s32 %v671_v10, %v640_v22  ;;  %v16342_v63 = vsel %vm8718_vm3, 4294967295, %v16341_v63  ;;  %vm8734_vm15 = vmand %vm16348_vm10, %vm16346_vm12  ;;  %vm347_vm12 = vcmp.ne.s32.totalorder %v16359_v60, 0  ;;  %v16391_v41 = vld [vmem:[#allocation72_spill] sm:$0xff]  ;;  %v16441_v60 = vld [vmem:[#allocation23_spill] sm:$0xff] }
 0x13c   :  { %16343 = vst [vmem:[#allocation48_spill] sm:$0xff] %v16342_v63  ;;  %v16350_v35 = vsel %vm8734_vm15, 4294967295, %v16349_v35  ;;  %vm8742_vm1 = vmand %vm16352_vm5, %vm16351_vm9  ;;  %vm16360_vm10 = vnez %v16287_v57  ;;  %vm16363_vm9 = vcmp.ne.s32.totalorder %v16334_v7, 0  ;;  %vm16364_vm5 = vnez %v16290_v47  ;;  %v16381_v57 = vld [vmem:[#allocation55_spill] sm:$0xff]  ;;  %v16386_v47 = vld [vmem:[#allocation86_spill] sm:$0xff] }
 0x13d   :  { %770 = vperm.xlu0 %7658, %v689_v58   ;;  %767 = vperm.xlu1 %7659, %v688_v30   ;;  %v16354_v37 = vsel %vm8742_vm1, 4294967295, %v16353_v37  ;;  %vm8747_vm7 = vmand %vm454_vm8, %vm534_vm6  ;;  %vm536_vm6 = vcmp.ne.s32.totalorder %v16365_v18, 0  ;;  %vm439_vm1 = vcmp.ne.s32.totalorder %v16367_v38, 0  ;;  %vm16368_vm15 = vcmp.ne.s32.totalorder %v16340_v56, 0  ;;  %v16399_v58 = vld [vmem:[#allocation83_spill] sm:$0xff]  ;;  %v16444_v18 = vld [vmem:[#allocation45_spill] sm:$0xff] }
 0x13e   :  { %v16357_v32 = vsel %vm8747_vm7, 4294967295, %v16356_v32  ;;  %vm8756_vm4 = vmand %vm16360_vm10, %vm348_vm11  ;;  %vm16369_vm13 = vnez %v16297_v21  ;;  %v796_v4 = vsel %vm8747_vm7, 1, %v16344_v15  ;;  %v794_v6 = vsel %vm8718_vm3, 1, %v16344_v15  ;;  %v16426_v7 = vld [vmem:[#allocation87_spill] sm:$0xff] }
 0x13f   :  { %16358 = vst [vmem:[#allocation47_spill] sm:$0xff] %v16357_v32  ;;  %v16362_v14 = vsel %vm8756_vm4, 4294967295, %v16361_v14  ;;  %vm453_vm8 = vmand %vm16364_vm5, %vm16363_vm9  ;;  %vm16374_vm9 = vnez %v16307_v45  ;;  %v16375_v22 = vmov 0  ;;  %vm538_vm3 = vcmp.ne.s32.totalorder %v16386_v47, 0  ;;  %v16410_v45 = vld [vmem:[#allocation74_spill] sm:$0xff]  ;;  %v16432_v56 = vld [vmem:[#allocation43_spill] sm:$0xff] }
 0x140   :  { %vm456_vm2 = vmand %vm16369_vm13, %vm16368_vm15  ;;  %vm535_vm13 = vcmp.ne.s32.totalorder %v16377_v9, 0  ;;  %vm349_vm15 = vcmp.ne.s32.totalorder %v16381_v57, 0  ;;  %vm16389_vm7 = vcmp.ne.s32.totalorder %v16370_v39, 0  ;;  %v16392_v10 = vmov 0  ;;  %v16452_v9 = vld [vmem:[#allocation91_spill] sm:$0xff] }
 0x141   :  { %7661 = vset.pattern.permute.xlu0 %v16344_v15  ;;  %7660 = vset.pattern.permute.xlu1 %v16344_v15  ;;  %vm8772_vm10 = vmand %vm453_vm8, %vm533_vm14  ;;  %vm16382_vm8 = vnez %v16317_v46  ;;  %v16400_v30 = vmov 0  ;;  %v16411_v42 = vmov 0  ;;  %v16414_v46 = vld [vmem:[#allocation85_spill] sm:$0xff]  ;;  %v16427_v8 = vmov 0 }
 0x142   :  { %812 = vperm.xlu0 %7661, %v793_v17   ;;  %809 = vperm.xlu1 %7660, %v792_v40   ;;  %v16372_v16 = vsel %vm8772_vm10, 4294967295, %v16371_v16  ;;  %vm8784_vm5 = vmand %vm16374_vm9, %vm347_vm12  ;;  %vm16385_vm12 = vnez %v16321_v19  ;;  %vm444_vm10 = vcmp.ne.s32.totalorder %v16391_v41, 0  ;;  %v16415_v19 = vmov 0  ;;  %v16433_v17 = vld [vmem:[#allocation57_spill] sm:$0xff] }
 0x143   :  { %16373 = vst [vmem:[#allocation50_spill] sm:$0xff] %v16372_v16  ;;  %v16376_v22 = vsel %vm8784_vm5, 4294967295, %v16375_v22  ;;  %vm8789_vm14 = vmand %vm456_vm2, %vm536_vm6  ;;  %vm352_vm2 = vcmp.ne.s32.totalorder %v16387_v27, 0  ;;  %vm441_vm6 = vcmp.ne.s32.totalorder %v16388_v52, 0  ;;  %vm16390_vm5 = vnez %v16331_v53  ;;  %v49_v52 = vld [vmem:[%s15239_s1] sm:$0xff] }
 0x144   :  { %v16379_v20 = vsel %vm8789_vm14, 4294967295, %v16378_v20  ;;  %vm8796_vm11 = vmand %vm16382_vm8, %vm350_vm0  ;;  %v798_v51 = vsel %vm8789_vm14, 1, %v16344_v15  ;;  %vm16396_vm8 = vnez %v16339_v43  ;;  %vm16406_vm14 = vnez %v16354_v37  ;;  %v16431_v43 = vld [vmem:[#allocation92_spill] sm:$0xff]  ;;  %v16437_v37 = vld [vmem:[#allocation73_spill] sm:$0xff] }
 0x145   :  { %16380 = vst [vmem:[#allocation52_spill] sm:$0xff] %v16379_v20  ;;  %v16384_v26 = vsel %vm8796_vm11, 4294967295, %v16383_v26  ;;  %vm455_vm9 = vmand %vm16385_vm12, %vm439_vm1  ;;  %vm16395_vm1 = vnez %v16372_v16  ;;  %v16423_v53 = vmov 0  ;;  %v16434_v40 = vmov 0 }
 0x146   :  { %821 = vperm.xlu0 %7661, %v796_v4   ;;  %815 = vperm.xlu1 %7660, %v794_v6   ;;  %vm458_vm4 = vmand %vm16390_vm5, %vm16389_vm7  ;;  %v795_v21 = vsel %vm16395_vm1, 1, %v16344_v15  ;;  %vm537_vm7 = vcmp.ne.s32.totalorder %v16399_v58, 0  ;;  %vm443_vm1 = vcmp.ne.s32.totalorder %v16408_v62, 0  ;;  %v16438_v55 = vmov 0  ;;  %v16446_v4 = vld [vmem:[#allocation75_spill] sm:$0xff] }
 0x147   :  { %vm8810_vm0 = vmand %vm455_vm9, %vm535_vm13  ;;  %vm16403_vm13 = vnez %v16350_v35  ;;  %v16447_v6 = vmov 0  ;;  %v16456_v27 = vmov 2   ;;  %v690_v41 = vmul.f32 2.0, %v49_v52 }
 0x148   :  { %v16393_v10 = vsel %vm8810_vm0, 4294967295, %v16392_v10  ;;  %vm8822_vm12 = vmand %vm16396_vm8, %vm349_vm15  ;;  %vm540_vm8 = vcmp.ne.s32.totalorder %v16407_v1, 0  ;;  %v797_v11 = vsel %vm8810_vm0, 1, %v16344_v15 }
 0x149   :  { %16394 = vst [vmem:[#allocation61_spill] sm:$0xff] %v16393_v10  ;;  %v16398_v28 = vsel %vm8822_vm12, 4294967295, %v16397_v28  ;;  %vm8827_vm5 = vmand %vm458_vm4, %vm538_vm3  ;;  %vm16409_vm4 = vnez %v16362_v14  ;;  %vm446_vm12 = vcmp.ne.s32.totalorder %v16410_v45, 0  ;;  %v16443_v14 = vld [vmem:[#allocation89_spill] sm:$0xff] }
 0x14a   :  { %v16401_v30 = vsel %vm8827_vm5, 4294967295, %v16400_v30  ;;  %827 = vperm.xlu0 %7661, %v798_v51   ;;  %818 = vperm.xlu1 %7660, %v795_v21   ;;  %vm8833_vm9 = vmand %vm16403_vm13, %vm352_vm2  ;;  %v800_v36 = vsel %vm8827_vm5, 1, %v16344_v15  ;;  %vm445_vm13 = vcmp.ne.s32.totalorder %v16420_v50, 0  ;;  %vm448_vm5 = vcmp.ne.s32.totalorder %v16422_v2, 0 }
 0x14b   :  { %16402 = vst [vmem:[#allocation18_spill] sm:$0xff] %v16401_v30  ;;  %vm457_vm15 = vmand %vm16406_vm14, %vm441_vm6  ;;  %vm539_vm14 = vcmp.ne.s32.totalorder %v16414_v46, 0  ;;  %v6815_v51 = vadd.f32 4.0, %v49_v52  ;;  %v691_v21 = vfloor.f32 %v690_v41 }
 0x14c   :  { %vm460_vm3 = vmand %vm16409_vm4, %vm444_vm10  ;;  %vm16418_vm10 = vnez %v16376_v22  ;;  %v16450_v22 = vld [vmem:[#allocation25_spill] sm:$0xff] }
 0x14d   :  { %vm8844_vm11 = vmand %vm457_vm15, %vm537_vm7  ;;  %vm542_vm7 = vcmp.ne.s32.totalorder %v16419_v29, 0  ;;  %vm16421_vm15 = vnez %v16384_v26  ;;  %v16453_v26 = vmov 0  ;;  %v7577_v58 = vtrunc.f32 %v691_v21 }
 0x14e   :  { %v16412_v42 = vsel %vm8844_vm11, 4294967295, %v16411_v42  ;;  %vm8855_vm2 = vmand %vm460_vm3, %vm540_vm8  ;;  %833 = vperm.xlu0 %7661, %v800_v36   ;;  %824 = vperm.xlu1 %7660, %v797_v11   ;;  %v799_v59 = vsel %vm8844_vm11, 1, %v16344_v15  ;;  %v16458_v21 = vmov 0 }
 0x14f   :  { %16413 = vst [vmem:[#allocation62_spill] sm:$0xff] %v16412_v42  ;;  %v16416_v19 = vsel %vm8855_vm2, 4294967295, %v16415_v19  ;;  %vm459_vm6 = vmand %vm16418_vm10, %vm443_vm1  ;;  %v802_v25 = vsel %vm8855_vm2, 1, %v16344_v15  ;;  %vm541_vm1 = vcmp.ne.s32.totalorder %v16426_v7, 0  ;;  %vm271_vm10 = vcmp.ne.s32.totalorder %v16432_v56, 0 }
 0x150   :  { %16417 = vst [vmem:[#allocation40_spill] sm:$0xff] %v16416_v19  ;;  %vm462_vm4 = vmand %vm16421_vm15, %vm446_vm12  ;;  %vm16430_vm12 = vnez %v16398_v28  ;;  %vm351_vm15 = vcmp.ne.s32.totalorder %v16433_v17, 0  ;;  %v694_v28 = vmul.f32 0.125, %v6815_v51  ;;  %v7578_v1 = vcvt.f32.s32 %v7577_v58 }
 0x151   :  { %vm8866_vm0 = vmand %vm459_vm6, %vm539_vm14  ;;  %vm544_vm14 = vcmp.ne.s32.totalorder %v16431_v43, 0 }
 0x152   :  { %v16424_v53 = vsel %vm8866_vm0, 4294967295, %v16423_v53  ;;  %vm8877_vm8 = vmand %vm462_vm4, %vm542_vm7  ;;  %839 = vperm.xlu0 %7661, %v802_v25   ;;  %830 = vperm.xlu1 %7660, %v799_v59   ;;  %v801_v35 = vsel %vm8866_vm0, 1, %v16344_v15  ;;  %vm447_vm7 = vcmp.ne.s32.totalorder %v16437_v37, 0  ;;  %vm543_vm4 = vcmp.ne.s32.totalorder %v16443_v14, 0 }
 0x153   :  { %16425 = vst [vmem:[#allocation22_spill] sm:$0xff] %v16424_v53  ;;  %v16428_v8 = vsel %vm8877_vm8, 4294967295, %v16427_v8  ;;  %vm461_vm3 = vmand %vm16430_vm12, %vm445_vm13  ;;  %v804_v12 = vsel %vm8877_vm8, 1, %v16344_v15  ;;  %v695_v5 = vfloor.f32 %v694_v28  ;;  %v719_v37 = vrot.slane %v7578_v1, 7 }
 0x154   :  { %16429 = vst [vmem:[#allocation44_spill] sm:$0xff] %v16428_v8  ;;  %vm464_vm6 = vmand %vm8833_vm9, %vm448_vm5  ;;  %vm16442_vm5 = vnez %v16441_v60  ;;  %v722_v52 = vrot.slane %v7578_v1, 6 }
 0x155   :  { %vm8888_vm2 = vmand %vm461_vm3, %vm541_vm1  ;;  %vm273_vm1 = vcmp.ne.s32.totalorder %v16444_v18, 0  ;;  %vm353_vm3 = vcmp.ne.s32.totalorder %v16445_v23, 0  ;;  %v7579_v36 = vtrunc.f32 %v695_v5 }
 0x156   :  { %v16435_v40 = vsel %vm8888_vm2, 4294967295, %v16434_v40  ;;  %vm8899_vm13 = vmand %vm464_vm6, %vm544_vm14  ;;  %845 = vperm.xlu0 %7661, %v804_v12   ;;  %836 = vperm.xlu1 %7660, %v801_v35   ;;  %v803_v39 = vsel %vm8888_vm2, 1, %v16344_v15  ;;  %vm449_vm14 = vcmp.ne.s32.totalorder %v16446_v4, 0 }
 0x157   :  { %16436 = vst [vmem:[#allocation77_spill] sm:$0xff] %v16435_v40  ;;  %v16439_v55 = vsel %vm8899_vm13, 4294967295, %v16438_v55  ;;  %vm287_vm9 = vmand %vm16442_vm5, %vm271_vm10  ;;  %v806_v38 = vsel %vm8899_vm13, 1, %v16344_v15  ;;  %vm16451_vm10 = vnez %v16450_v22  ;;  %v7580_v50 = vcvt.f32.s32 %v7579_v36 }
 0x158   :  { %16440 = vst [vmem:[#allocation49_spill] sm:$0xff] %v16439_v55  ;;  %vm367_vm12 = vmand %vm287_vm9, %vm351_vm15 }
 0x159   :  { %vm463_vm8 = vmand %vm367_vm12, %vm447_vm7  ;;  %vm545_vm7 = vcmp.ne.s32.totalorder %v16452_v9, 0  ;;  %v718_v35 = vmul.u32 16, %v7580_v50 }
 0x15a   :  { %vm8915_vm6 = vmand %vm463_vm8, %vm543_vm4  ;;  %851 = vperm.xlu0 %7661, %v806_v38   ;;  %842 = vperm.xlu1 %7660, %v803_v39   ;;  %vm697_vm8 = vcmp.ge.s32.totalorder %v7578_v1, 0  ;;  %vm698_vm4 = vcmp.lt.s32.totalorder %v7578_v1, 16  ;;  %v13_v39 = vlaneseq }
 0x15b   :  { %v16448_v6 = vsel %vm8915_vm6, 4294967295, %v16447_v6  ;;  %vm289_vm15 = vmand %vm16451_vm10, %vm273_vm1  ;;  %v805_v57 = vsel %vm8915_vm6, 1, %v16344_v15  ;;  %v700_v29 = vsel %vm697_vm8, 1, %v16344_v15  ;;  %v704_v7 = vsel %vm698_vm4, 1, %v16344_v15 }
 0x15c   :  { %16449 = vst [vmem:[#allocation78_spill] sm:$0xff] %v16448_v6  ;;  %vm369_vm5 = vmand %vm289_vm15, %vm353_vm3  ;;  %v701_v59 = vrot.slane %v700_v29, 1  ;;  %vm708_vm1 = vcmp.ge.s32.totalorder %v7580_v50, 0  ;;  %v705_v43 = vrot.slane %v704_v7, 1  ;;  %vm713_vm3 = vcmp.lt.s32.totalorder %v7580_v50, 1 }
 0x15d   :  { %vm465_vm9 = vmand %vm369_vm5, %vm449_vm14  ;;  %v709_v56 = vsel %vm708_vm1, 1, %v16344_v15  ;;  %v714_v14 = vsel %vm713_vm3, 1, %v16344_v15  ;;  %v720_v4 = vadd.s32 %v719_v37, %v718_v35  ;;  %v8990_v7 = vand.u32 127, %v13_v39 }
 0x15e   :  { %vm8925_vm12 = vmand %vm465_vm9, %vm545_vm7  ;;  %848 = vperm.xlu1 %7660, %v805_v57   ;;  %vm702_vm10 = vcmp.ne.s32.totalorder %v701_v59, 0  ;;  %v710_v60 = vrot.slane %v709_v56, 2  ;;  %vm706_vm7 = vcmp.ne.s32.totalorder %v705_v43, 0  ;;  %v715_v38 = vrot.slane %v714_v14, 2 }
 0x15f   :  { %v16454_v26 = vsel %vm8925_vm12, 4294967295, %v16453_v26  ;;  %v807_v47 = vsel %vm8925_vm12, 1, %v16344_v15  ;;  %vm699_vm14 = vmand %vm697_vm8, %vm698_vm4  ;;  %v8964_v57 = vshrl.u32 %v13_v39, 7  ;;  %16462 = vst [vmem:[#allocation41_spill] sm:$0xff] %v8990_v7 }
 0x160   :  { %16455 = vst [vmem:[#allocation54_spill] sm:$0xff] %v16454_v26  ;;  %vm703_vm15 = vmand %vm699_vm14, %vm702_vm10  ;;  %vm711_vm9 = vcmp.ne.s32.totalorder %v710_v60, 0  ;;  %vm716_vm4 = vcmp.ne.s32.totalorder %v715_v38, 0 }
 0x161   :  { %vm707_vm5 = vmand %vm703_vm15, %vm706_vm7  ;;  %16457 = vst [vmem:[#allocation64_spill] sm:$0xff] %v8964_v57  ;;  %v15357_v58 = vsub.s32 2, %v8964_v57  ;;  %v8976_v5 = vsub.s32 0, %v8964_v57  ;;  %v8998_v37 = vadd.s32 8, %v8964_v57  ;;  %v9011_v38 = vadd.s32 32, %v8964_v57 }
 0x162   :  { %854 = vperm.xlu1 %7660, %v807_v47   ;;  %vm712_vm8 = vmand %vm707_vm5, %vm711_vm9  ;;  %v721_v47 = vmul.u32 16, %v720_v4  ;;  %v9403_v16 = vadd.s32 112, %v8964_v57  ;;  %v9453_v34 = vadd.s32 104, %v8964_v57 }
 0x163   :  { %vm8970_vm1 = vmand %vm712_vm8, %vm716_vm4  ;;  %16461 = vst [vmem:[#allocation66_spill] sm:$0xff] %v8976_v5  ;;  %vm15352_vm8 = vcmp.lt.s32.totalorder %v8990_v7, %v8964_v57 }
 0x164   :  { %v16459_v21 = vsel %vm8970_vm1, 4294967295, %v16458_v21  ;;  %v723_v28 = vadd.s32 %v722_v52, %v721_v47  ;;  %v888_v36 = vsel %vm8970_vm1, 1, %v16344_v15  ;;  %16465 = vst [vmem:[#allocation24_spill] sm:$0xff] %v8998_v37  ;;  %16468 = vst [vmem:[#allocation80_spill] sm:$0xff] %v9011_v38 }
 0x165   :  { %16460 = vst [vmem:[#allocation19_spill] sm:$0xff] %v16459_v21  ;;  %v892_v59 = vrot.slane %v888_v36, %v8976_v5  ;;  %16522 = vst [vmem:[#allocation53_spill] sm:$0xff] %v9403_v16 }
 0x166   :  { %7662 = vset.pattern.permute.xlu1 %v16456_v27  ;;  %v8987_v50 = vrot.slane %v723_v28, %v15357_v58  ;;  %v9075_v58 = vadd.s32 24, %v8964_v57  ;;  %v9151_v27 = vadd.s32 40, %v8964_v57  ;;  %16529 = vst [vmem:[#allocation58_spill] sm:$0xff] %v9453_v34 }
 0x167   :  { %vm8993_vm14 = vcmp.eq.s32.totalorder %v892_v59, 1  ;;  %v9054_v59 = vadd.s32 16, %v8964_v57 }
 0x168   :  { %16479 = vst [vmem:[#allocation51_spill] sm:$0xff] %v9075_v58  ;;  %16491 = vst [vmem:[#allocation56_spill] sm:$0xff] %v9151_v27 }
 0x169   :  { %16475 = vst [vmem:[#allocation46_spill] sm:$0xff] %v9054_v59 }
 0x1a0   :  { %v729_v62 = vpop.permute.xlu1 %728  ;;  %v8936_v45 = vpop.permute.xlu0 %725 }
 0x1a1   :  { %vm777_vm3 = vcmp.eq.s32.totalorder %v729_v62, %v8987_v50  ;;  %vm776_vm5 = vcmp.eq.s32.totalorder %v8936_v45, %v8987_v50 }
 0x1a4   :  { %v8938_v11 = vpop.permute.xlu1 %731  ;;  %v8940_v46 = vpop.permute.xlu0 %734 }
 0x1a8   :  { %v8944_v2 = vpop.permute.xlu1 %737  ;;  %v8946_v25 = vpop.permute.xlu0 %740 }
 0x1ac   :  { %v8950_v17 = vpop.permute.xlu1 %743  ;;  %v8952_v12 = vpop.permute.xlu0 %746 }
 0x1b0   :  { %v8956_v18 = vpop.permute.xlu1 %749  ;;  %v8958_v23 = vpop.permute.xlu0 %752 }
 0x1b4   :  { %v8960_v22 = vpop.permute.xlu1 %755  ;;  %v8962_v9 = vpop.permute.xlu0 %758 }
 0x1b8   :  { %v8966_v41 = vpop.permute.xlu1 %761  ;;  %v8968_v51 = vpop.permute.xlu0 %764 }
 0x1bc   :  { %v8981_v29 = vpop.permute.xlu1 %767  ;;  %v8983_v1 = vpop.permute.xlu0 %770 }
 0x1c1   :  { %v813_v43 = vpop.permute.xlu0 %812  ;;  %v810_v56 = vpop.permute.xlu1 %809 }
 0x1c2   :  { %vm857_vm10 = vcmp.eq.s32.totalorder %v813_v43, 1  ;;  %vm856_vm7 = vcmp.eq.s32.totalorder %v810_v56, 1 }
 0x1c3   :  { %vm873_vm15 = vmand %vm777_vm3, %vm857_vm10 }
 0x1c4   :  { %vm9004_vm9 = vmand %vm873_vm15, %vm8993_vm14  ;;  %vm780_vm15 = vcmp.eq.s32.totalorder %v8944_v2, %v8987_v50 }
 0x1c5   :  { %v822_v62 = vpop.permute.xlu0 %821  ;;  %v816_v14 = vpop.permute.xlu1 %815  ;;  %vm872_vm4 = vmand %vm776_vm5, %vm856_vm7  ;;  %v9040_v2 = vsel %vm9004_vm9, %v8990_v7, 128 }
 0x1c6   :  { %vm860_vm3 = vcmp.eq.s32.totalorder %v822_v62, 1  ;;  %vm9015_vm10 = vmand %vm872_vm4, %vm8993_vm14  ;;  %vm858_vm4 = vcmp.eq.s32.totalorder %v816_v14, 1  ;;  %v941_v14 = vshra.s32 %v9040_v2, 16 }
 0x1c7   :  { %vm9028_vm7 = vmand %vm9015_vm10, %vm15352_vm8  ;;  %v9035_v4 = vsel %vm9015_vm10, %v8990_v7, 128  ;;  %vm778_vm8 = vcmp.eq.s32.totalorder %v8938_v11, %v8987_v50  ;;  %v1150_v11 = vsel %vm9015_vm10, %v8964_v57, 128 }
 0x1c8   :  { %vm876_vm5 = vmand %vm780_vm15, %vm860_vm3  ;;  %v927_v28 = vshra.s32 %v9035_v4, 16  ;;  %vm16476_vm3 = vcmp.lt.s32.totalorder %v8990_v7, %v8998_v37  ;;  %v9080_v61 = vsel %vm9028_vm7, 1, %v16344_v15  ;;  %vm16483_vm7 = vcmp.lt.s32.totalorder %v8990_v7, %v9011_v38 }
 0x1c9   :  { %v828_v47 = vpop.permute.xlu0 %827  ;;  %v819_v52 = vpop.permute.xlu1 %818  ;;  %vm9049_vm12 = vmand %vm876_vm5, %vm8993_vm14  ;;  %v1534_v3 = vshrl.u32 %v9080_v61, 16 }
 0x1ca   :  { %vm9061_vm15 = vmand %vm9004_vm9, %vm16476_vm3  ;;  %v1154_v56 = vsel %vm9049_vm12, %v9011_v38, 128  ;;  %v9071_v62 = vcvt.s32.f32 %v927_v28  ;;  %vm862_vm6 = vcmp.eq.s32.totalorder %v828_v47, 1  ;;  %v9089_v28 = vadd.s32 48, %v8964_v57 }
 0x1cb   :  { %vm1166_vm5 = vcmp.lt.s32.totalorder %v1150_v11, %v1154_v56  ;;  %vm874_vm13 = vmand %vm778_vm8, %vm858_vm4  ;;  %vm782_vm8 = vcmp.eq.s32.totalorder %v8950_v17, %v8987_v50  ;;  %v9127_v13 = vsel %vm9061_vm15, 1, %v16344_v15  ;;  %v9158_v38 = vsel %vm9049_vm12, %v8990_v7, 128 }
 0x1cc   :  { %vm9084_vm10 = vmand %vm874_vm13, %vm8993_vm14  ;;  %16482 = vst [vmem:[#allocation82_spill] sm:$0xff] %v9089_v28  ;;  %930 = vmin.xlane.f32.xlu0 %v9071_v62  ;;  %v9092_v47 = vsel %vm1166_vm5, %v1150_v11, %v1154_v56  ;;  %vm859_vm5 = vcmp.eq.s32.totalorder %v819_v52, 1  ;;  %v9112_v56 = vcvt.s32.f32 %v941_v14  ;;  %v1536_v63 = vcvt.s32.f32 %v1534_v3 }
 0x1cd   :  { %v825_v49 = vpop.permute.xlu1 %824  ;;  %vm9101_vm13 = vmand %vm9049_vm12, %vm16483_vm7  ;;  %v9110_v11 = vsel %vm9084_vm10, %v8990_v7, 128  ;;  %v834_v17 = vpop.permute.xlu0 %833  ;;  %v1152_v14 = vsel %vm9084_vm10, %v9054_v59, 128  ;;  %v1546_v55 = vshrl.u32 %v9127_v13, 16  ;;  %vm784_vm12 = vcmp.eq.s32.totalorder %v8956_v18, %v8987_v50 }
 0x1ce   :  { %vm878_vm3 = vmand %vm782_vm8, %vm862_vm6  ;;  %v955_v48 = vshra.s32 %v9110_v11, 16  ;;  %vm779_vm6 = vcmp.eq.s32.totalorder %v8940_v46, %v8987_v50  ;;  %vm16488_vm8 = vcmp.lt.s32.totalorder %v8990_v7, %v9054_v59  ;;  %vm864_vm2 = vcmp.eq.s32.totalorder %v834_v17, 1 }
 0x1cf   :  { %vm9118_vm7 = vmand %vm878_vm3, %vm8993_vm14  ;;  %v983_v31 = vshra.s32 %v9158_v38, 16  ;;  %v9210_v17 = vadd.s32 80, %v8964_v57  ;;  %v1548_v19 = vcvt.s32.f32 %v1546_v55  ;;  %v1151_v55 = vsel %vm9004_vm9, %v8998_v37, 128 }
 0x1d0   :  { %vm9139_vm3 = vmand %vm9084_vm10, %vm16488_vm8  ;;  %v1156_v43 = vsel %vm9118_vm7, %v9089_v28, 128  ;;  %944 = vmin.xlane.f32.xlu0 %v9112_v56  ;;  %v9147_v46 = vcvt.s32.f32 %v955_v48  ;;  %v9167_v48 = vadd.s32 64, %v8964_v57  ;;  %v9250_v36 = vsel %vm9101_vm13, 1, %v16344_v15 }
 0x1d1   :  { %vm1170_vm15 = vcmp.lt.s32.totalorder %v1152_v14, %v1156_v43  ;;  %vm875_vm4 = vmand %vm779_vm6, %vm859_vm5  ;;  %v9153_v45 = vpop.permute.xlu1 %830  ;;  %vm16495_vm5 = vcmp.lt.s32.totalorder %v8990_v7, %v9075_v58  ;;  %v9192_v3 = vsel %vm9139_vm3, 1, %v16344_v15  ;;  %v840_v18 = vpop.permute.xlu0 %839  ;;  %16500 = vst [vmem:[#allocation21_spill] sm:$0xff] %v9210_v17  ;;  %v9245_v26 = vcvt.s32.f32 %v983_v31 }
 0x1d2   :  { %vm9162_vm10 = vmand %vm875_vm4, %vm8993_vm14  ;;  %16494 = vst [vmem:[#allocation63_spill] sm:$0xff] %v9167_v48  ;;  %958 = vmin.xlane.f32.xlu1 %v9147_v46  ;;  %v9170_v52 = vsel %vm1170_vm15, %v1152_v14, %v1156_v43  ;;  %vm861_vm15 = vcmp.eq.s32.totalorder %v825_v49, 1  ;;  %v1558_v30 = vshrl.u32 %v9192_v3, 16  ;;  %vm866_vm3 = vcmp.eq.s32.totalorder %v840_v18, 1 }
 0x1d3   :  { %vm9180_vm4 = vmand %vm9162_vm10, %vm16495_vm5  ;;  %v9187_v14 = vsel %vm9162_vm10, %v8990_v7, 128  ;;  %vm781_vm5 = vcmp.eq.s32.totalorder %v8946_v25, %v8987_v50  ;;  %vm16504_vm9 = vcmp.lt.s32.totalorder %v8990_v7, %v9089_v28  ;;  %v1153_v42 = vsel %vm9162_vm10, %v9075_v58, 128 }
 0x1d4   :  { %vm880_vm8 = vmand %vm784_vm12, %vm864_vm2  ;;  %1539 = vadd.xlane.f32.xlu0 %v1536_v63  ;;  %v969_v43 = vshra.s32 %v9187_v14, 16  ;;  %v9213_v63 = vadd.s32 56, %v8964_v57  ;;  %vm786_vm2 = vcmp.eq.s32.totalorder %v8960_v22, %v8987_v50  ;;  %v9230_v32 = vsel %vm9180_vm4, 1, %v16344_v15 }
 0x1d5   :  { %vm9203_vm0 = vmand %vm880_vm8, %vm8993_vm14  ;;  %v9225_v20 = vpop.permute.xlu1 %836  ;;  %v1560_v39 = vcvt.s32.f32 %v1558_v30  ;;  %v1570_v6 = vshrl.u32 %v9230_v32, 16 }
 0x1d6   :  { %16501 = vst [vmem:[#allocation68_spill] sm:$0xff] %v9213_v63  ;;  %v1158_v8 = vsel %vm9203_vm0, %v9167_v48, 128  ;;  %v9218_v25 = vcvt.s32.f32 %v969_v43  ;;  %vm877_vm8 = vmand %vm781_vm5, %vm861_vm15  ;;  %vm863_vm15 = vcmp.eq.s32.totalorder %v9153_v45, 1  ;;  %v9385_v60 = vsel %vm9203_vm0, %v8990_v7, 128 }
 0x1d7   :  { %vm1174_vm12 = vcmp.lt.s32.totalorder %v9092_v47, %v1158_v8  ;;  %vm9237_vm6 = vmand %vm877_vm8, %vm8993_vm14  ;;  %v1572_v53 = vcvt.s32.f32 %v1570_v6  ;;  %v9349_v6 = vadd.s32 72, %v8964_v57 }
 0x1d8   :  { %972 = vmin.xlane.f32.xlu1 %v9218_v25  ;;  %v9243_v49 = vsel %vm1174_vm12, %v9092_v47, %v1158_v8  ;;  %1551 = vadd.xlane.f32.xlu0 %v1548_v19  ;;  %vm9257_vm4 = vmand %vm9118_vm7, %vm16504_vm9  ;;  %v1155_v19 = vsel %vm9237_vm6, %v9151_v27, 128  ;;  %v9268_v31 = vsel %vm9237_vm6, %v8990_v7, 128  ;;  %v9273_v8 = vsel %vm9118_vm7, %v8990_v7, 128  ;;  %v846_v47 = vpop.permute.xlu0 %845 }
 0x1d9   :  { %vm1168_vm13 = vcmp.lt.s32.totalorder %v1151_v55, %v1155_v19  ;;  %vm882_vm5 = vmand %vm786_vm2, %vm866_vm3  ;;  %v997_v28 = vshra.s32 %v9268_v31, 16  ;;  %vm783_vm7 = vcmp.eq.s32.totalorder %v8952_v12, %v8987_v50  ;;  %vm16509_vm3 = vcmp.lt.s32.totalorder %v8990_v7, %v9151_v27  ;;  %v843_v12 = vpop.permute.xlu1 %842  ;;  %16515 = vst [vmem:[#allocation79_spill] sm:$0xff] %v9349_v6 }
 0x1da   :  { %vm9285_vm8 = vmand %vm882_vm5, %vm8993_vm14  ;;  %v9289_v18 = vsel %vm1168_vm13, %v1151_v55, %v1155_v19  ;;  %vm15409_vm9 = vcmp.lt.s32.totalorder %v8990_v7, %v9213_v63  ;;  %v9308_v55 = vadd.s32 96, %v8964_v57  ;;  %vm868_vm5 = vcmp.eq.s32.totalorder %v846_v47, 1 }
 0x1db   :  { %vm9298_vm2 = vmand %vm9237_vm6, %vm16509_vm3  ;;  %v1160_v22 = vsel %vm9285_vm8, %v9210_v17, 128  ;;  %v1011_v43 = vshra.s32 %v9273_v8, 16  ;;  %v1582_v19 = vshrl.u32 %v9250_v36, 16  ;;  %vm788_vm3 = vcmp.eq.s32.totalorder %v8966_v41, %v8987_v50 }
 0x1dc   :  { %16512 = vst [vmem:[#allocation26_spill] sm:$0xff] %v9308_v55  ;;  %986 = vmin.xlane.f32.xlu1 %v9245_v26  ;;  %1563 = vadd.xlane.f32.xlu0 %v1560_v39  ;;  %vm1178_vm13 = vcmp.lt.s32.totalorder %v9170_v52, %v1160_v22  ;;  %vm879_vm6 = vmand %vm783_vm7, %vm863_vm15  ;;  %v9327_v45 = vcvt.s32.f32 %v997_v28  ;;  %vm785_vm15 = vcmp.eq.s32.totalorder %v8958_v23, %v8987_v50  ;;  %v852_v59 = vpop.permute.xlu0 %851  ;;  %v9366_v27 = vsel %vm9257_vm4, 1, %v16344_v15 }
 0x1dd   :  { %vm9320_vm12 = vmand %vm879_vm6, %vm8993_vm14  ;;  %v9325_v39 = vsel %vm1178_vm13, %v9170_v52, %v1160_v22  ;;  %v9343_v52 = vsel %vm9298_vm2, 1, %v16344_v15  ;;  %vm865_vm13 = vcmp.eq.s32.totalorder %v9225_v20, 1  ;;  %v9361_v22 = vcvt.s32.f32 %v1011_v43  ;;  %v849_v40 = vpop.permute.xlu1 %848 }
 0x1de   :  { %v1157_v41 = vsel %vm9320_vm12, %v9213_v63, 128  ;;  %v9338_v10 = vsel %vm9320_vm12, %v8990_v7, 128  ;;  %vm884_vm10 = vmand %vm788_vm3, %vm868_vm5  ;;  %v1584_v47 = vcvt.s32.f32 %v1582_v19  ;;  %v1594_v19 = vshrl.u32 %v9343_v52, 16 }
 0x1df   :  { %vm1172_vm7 = vcmp.lt.s32.totalorder %v1153_v42, %v1157_v41  ;;  %vm9355_vm6 = vmand %vm884_vm10, %vm8993_vm14  ;;  %v1025_v43 = vshra.s32 %v9338_v10, 16  ;;  %vm870_vm5 = vcmp.eq.s32.totalorder %v852_v59, 1  ;;  %v1606_v20 = vshrl.u32 %v9366_v27, 16 }
 0x1e0   :  { %1000 = vmin.xlane.f32.xlu1 %v9327_v45  ;;  %1575 = vadd.xlane.f32.xlu0 %v1572_v53  ;;  %v9359_v30 = vsel %vm1172_vm7, %v1153_v42, %v1157_v41  ;;  %vm9373_vm2 = vmand %vm9320_vm12, %vm15409_vm9  ;;  %v1162_v42 = vsel %vm9355_vm6, %v9308_v55, 128  ;;  %vm16523_vm7 = vcmp.lt.s32.totalorder %v8990_v7, %v9167_v48  ;;  %v1039_v59 = vshra.s32 %v9385_v60, 16 }
 0x1e1   :  { %vm1182_vm4 = vcmp.lt.s32.totalorder %v9243_v49, %v1162_v42  ;;  %vm881_vm12 = vmand %vm785_vm15, %vm865_vm13  ;;  %vm790_vm15 = vcmp.eq.s32.totalorder %v8981_v29, %v8987_v50  ;;  %vm15451_vm13 = vcmp.lt.s32.totalorder %v8990_v7, %v9349_v6  ;;  %vm867_vm9 = vcmp.eq.s32.totalorder %v843_v12, 1  ;;  %v855_v53 = vpop.permute.xlu1 %854 }
 0x1e2   :  { %v9394_v41 = vsel %vm1182_vm4, %v9243_v49, %v1162_v42  ;;  %vm9398_vm3 = vmand %vm881_vm12, %vm8993_vm14  ;;  %v9425_v29 = vcvt.s32.f32 %v1025_v43  ;;  %v1596_v54 = vcvt.s32.f32 %v1594_v19  ;;  %v9434_v42 = vadd.s32 88, %v8964_v57 }
 0x1e3   :  { %vm9414_vm10 = vmand %vm9203_vm0, %vm16523_vm7  ;;  %v1159_v49 = vsel %vm9398_vm3, %v9349_v6, 128  ;;  %v9440_v58 = vsel %vm9398_vm3, %v8990_v7, 128  ;;  %v9445_v43 = vsel %vm9373_vm2, 1, %v16344_v15  ;;  %vm869_vm2 = vcmp.eq.s32.totalorder %v849_v40, 1 }
 0x1e4   :  { %1014 = vmin.xlane.f32.xlu1 %v9361_v22  ;;  %1587 = vadd.xlane.f32.xlu0 %v1584_v47  ;;  %vm1176_vm4 = vcmp.lt.s32.totalorder %v9289_v18, %v1159_v49  ;;  %vm886_vm12 = vmand %vm790_vm15, %vm870_vm5  ;;  %16528 = vst [vmem:[#allocation84_spill] sm:$0xff] %v9434_v42  ;;  %vm787_vm5 = vcmp.eq.s32.totalorder %v8962_v9, %v8987_v50  ;;  %v9463_v9 = vsel %vm9414_vm10, 1, %v16344_v15  ;;  %v1053_v12 = vshra.s32 %v9440_v58, 16 }
 0x1e5   :  { %vm9429_vm0 = vmand %vm886_vm12, %vm8993_vm14  ;;  %v1177_v48 = vsel %vm1176_vm4, %v9289_v18, %v1159_v49  ;;  %v1608_v18 = vcvt.s32.f32 %v1606_v20  ;;  %v9458_v49 = vcvt.s32.f32 %v1039_v59  ;;  %v1618_v40 = vshrl.u32 %v9445_v43, 16 }
 0x1e6   :  { %v1164_v19 = vsel %vm9429_vm0, %v9403_v16, 128  ;;  %vm883_vm7 = vmand %vm787_vm5, %vm867_vm9  ;;  %v9477_v20 = vsel %vm9285_vm8, %v8990_v7, 128  ;;  %vm789_vm9 = vcmp.eq.s32.totalorder %v8968_v51, %v8987_v50  ;;  %v1630_v51 = vshrl.u32 %v9463_v9, 16 }
 0x1e7   :  { %vm1186_vm15 = vcmp.lt.s32.totalorder %v9325_v39, %v1164_v19  ;;  %vm9468_vm4 = vmand %vm883_vm7, %vm8993_vm14  ;;  %vm871_vm7 = vcmp.eq.s32.totalorder %v855_v53, 1  ;;  %v9505_v59 = vadd.s32 120, %v8964_v57  ;;  %v1067_v6 = vshra.s32 %v9477_v20, 16 }
 0x1e8   :  { %1028 = vmin.xlane.f32.xlu1 %v9425_v29  ;;  %1599 = vadd.xlane.f32.xlu0 %v1596_v54  ;;  %v1187_v37 = vsel %vm1186_vm15, %v9325_v39, %v1164_v19  ;;  %vm9488_vm12 = vmand %vm9398_vm3, %vm15451_vm13  ;;  %v1161_v23 = vsel %vm9468_vm4, %v9434_v42, 128  ;;  %vm791_vm3 = vcmp.eq.s32.totalorder %v8983_v1, %v8987_v50  ;;  %v9523_v57 = vcvt.s32.f32 %v1053_v12 }
 0x1e9   :  { %vm1180_vm5 = vcmp.lt.s32.totalorder %v9359_v30, %v1161_v23  ;;  %vm885_vm15 = vmand %vm789_vm9, %vm869_vm2  ;;  %16536 = vst [vmem:[#allocation65_spill] sm:$0xff] %v9505_v59  ;;  %vm16537_vm2 = vcmp.lt.s32.totalorder %v8990_v7, %v9210_v17  ;;  %v9528_v1 = vsel %vm9468_vm4, %v8990_v7, 128  ;;  %v9533_v50 = vsel %vm9488_vm12, 1, %v16344_v15 }
 0x1ea   :  { %vm9500_vm10 = vmand %vm885_vm15, %vm8993_vm14  ;;  %v1181_v19 = vsel %vm1180_vm5, %v9359_v30, %v1161_v23  ;;  %v1620_v30 = vcvt.s32.f32 %v1618_v40  ;;  %v1632_v40 = vcvt.s32.f32 %v1630_v51  ;;  %v9548_v23 = vcvt.s32.f32 %v1067_v6 }
 0x1eb   :  { %vm9516_vm9 = vmand %vm9285_vm8, %vm16537_vm2  ;;  %v1163_v53 = vsel %vm9500_vm10, %v9453_v34, 128  ;;  %vm15450_vm8 = vcmp.lt.s32.totalorder %v8990_v7, %v9434_v42  ;;  %v1642_v51 = vshrl.u32 %v9533_v50, 16  ;;  %v9561_v17 = vsel %vm9355_vm6, %v8990_v7, 128 }
 0x1ec   :  { %1042 = vmin.xlane.f32.xlu1 %v9458_v49  ;;  %1611 = vadd.xlane.f32.xlu0 %v1608_v18  ;;  %vm1184_vm5 = vcmp.lt.s32.totalorder %v1177_v48, %v1163_v53  ;;  %vm887_vm15 = vmand %vm791_vm3, %vm871_vm7  ;;  %v9553_v35 = vsel %vm9516_vm9, 1, %v16344_v15  ;;  %vm15449_vm9 = vcmp.lt.s32.totalorder %v8990_v7, %v9308_v55  ;;  %v9580_v54 = vsel %vm9500_vm10, %v8990_v7, 128 }
 0x1ed   :  { %v1185_v24 = vsel %vm1184_vm5, %v1177_v48, %v1163_v53  ;;  %vm9539_vm2 = vmand %vm887_vm15, %vm8993_vm14  ;;  %v1081_v53 = vshra.s32 %v9528_v1, 16  ;;  %v1644_v18 = vcvt.s32.f32 %v1642_v51  ;;  %vm15444_vm15 = vcmp.lt.s32.totalorder %v8990_v7, %v9453_v34 }
 0x1ee   :  { %vm1190_vm7 = vcmp.lt.s32.totalorder %v9394_v41, %v1185_v24  ;;  %v1165_v39 = vsel %vm9539_vm2, %v9505_v59, 128  ;;  %vm1512_vm12 = vmand %vm9468_vm4, %vm15450_vm8  ;;  %v9620_v55 = vsel %vm9539_vm2, %v8990_v7, 128  ;;  %v1533_v47 = vand.u32 65535, %v9080_v61 }
 0x1ef   :  { %v1191_v48 = vsel %vm1190_vm7, %v9394_v41, %v1185_v24  ;;  %vm1188_vm14 = vcmp.lt.s32.totalorder %v1181_v19, %v1165_v39  ;;  %v1654_v41 = vshrl.u32 %v9553_v35, 16  ;;  %v1095_v24 = vshra.s32 %v9561_v17, 16  ;;  %vm1513_vm4 = vmand %vm9355_vm6, %vm15449_vm9  ;;  %16543 = vst [vmem:[#allocation81_spill] sm:$0xff] %v9620_v55 }
 0x1f0   :  { %1056 = vmin.xlane.f32.xlu1 %v9523_v57  ;;  %1623 = vadd.xlane.f32.xlu0 %v1620_v30  ;;  %v1189_v30 = vsel %vm1188_vm14, %v1181_v19, %v1165_v39  ;;  %v9572_v19 = vcvt.s32.f32 %v1081_v53  ;;  %v1109_v53 = vshra.s32 %v9580_v54, 16  ;;  %v9603_v28 = vsel %vm1513_vm4, 1, %v16344_v15  ;;  %vm1514_vm6 = vmand %vm9500_vm10, %vm15444_vm15 }
 0x1f1   :  { %vm1192_vm3 = vcmp.lt.s32.totalorder %v1187_v37, %v1189_v30  ;;  %vm15443_vm7 = vcmp.lt.s32.totalorder %v8990_v7, %v9403_v16  ;;  %v1530_v63 = vsel %vm1514_vm6, 1, %v16344_v15  ;;  %v1581_v61 = vand.u32 65535, %v9250_v36 }
 0x1f2   :  { %v1193_v6 = vsel %vm1192_vm3, %v1187_v37, %v1189_v30  ;;  %v9593_v37 = vcvt.s32.f32 %v1095_v24  ;;  %v9600_v30 = vsel %vm9429_vm0, %v8990_v7, 128  ;;  %v1678_v24 = vshrl.u32 %v9603_v28, 16  ;;  %vm1515_vm10 = vmand %vm9429_vm0, %vm15443_vm7 }
 0x1f3   :  { %vm1194_vm5 = vcmp.lt.s32.totalorder %v1191_v48, %v1193_v6  ;;  %v1690_v34 = vshrl.u32 %v1530_v63, 16  ;;  %v1531_v42 = vsel %vm1515_vm10, 1, %v16344_v15  ;;  %v1641_v36 = vand.u32 65535, %v9533_v50 }
 0x1f4   :  { %1070 = vmin.xlane.f32.xlu1 %v9548_v23  ;;  %1635 = vadd.xlane.f32.xlu0 %v1632_v40  ;;  %v9575_v39 = vsel %vm1194_vm5, %v1191_v48, %v1193_v6  ;;  %v9583_v40 = vsel %vm1512_vm12, 1, %v16344_v15  ;;  %v1656_v48 = vcvt.s32.f32 %v1654_v41  ;;  %v9613_v6 = vcvt.s32.f32 %v1109_v53 }
 0x1f5   :  { %16542 = vst [vmem:[#allocation70_spill] sm:$0xff] %v9575_v39  ;;  %v1666_v51 = vshrl.u32 %v9583_v40, 16  ;;  %v1680_v53 = vcvt.s32.f32 %v1678_v24  ;;  %v1692_v16 = vcvt.s32.f32 %v1690_v34  ;;  %v1702_v21 = vshrl.u32 %v1531_v42, 16 }
 0x1f6   :  { %v1545_v24 = vand.u32 65535, %v9127_v13  ;;  %v1605_v13 = vand.u32 65535, %v9366_v27  ;;  %v1665_v27 = vand.u32 65535, %v9583_v40  ;;  %vm15442_vm0 = vcmp.lt.s32.totalorder %v8990_v7, %v9505_v59 }
 0x1f7   :  { %v1668_v41 = vcvt.s32.f32 %v1666_v51  ;;  %v1137_v51 = vshra.s32 %v9620_v55, 16  ;;  %v1557_v55 = vand.u32 65535, %v9192_v3  ;;  %v1617_v3 = vand.u32 65535, %v9445_v43  ;;  %vm1516_vm14 = vmand %vm9539_vm2, %vm15442_vm0 }
 0x1f8   :  { %1084 = vmin.xlane.f32.xlu1 %v9572_v19  ;;  %1647 = vadd.xlane.f32.xlu0 %v1644_v18  ;;  %v1123_v18 = vshra.s32 %v9600_v30, 16  ;;  %v1547_v39 = vcvt.s32.f32 %v1545_v24  ;;  %v1677_v43 = vand.u32 65535, %v9603_v28  ;;  %v1689_v24 = vand.u32 65535, %v1530_v63 }
 0x1f9   :  { %v9634_v5 = vcvt.s32.f32 %v1137_v51  ;;  %v1569_v51 = vand.u32 65535, %v9230_v32  ;;  %v1629_v32 = vand.u32 65535, %v9463_v9  ;;  %v9658_v40 = vsel %vm1516_vm14, 1, %v16344_v15 }
 0x1fa   :  { %v1679_v9 = vcvt.s32.f32 %v1677_v43  ;;  %v1691_v50 = vcvt.s32.f32 %v1689_v24  ;;  %v926_v63 = vand.u32 65535, %v9035_v4  ;;  %v940_v12 = vand.u32 65535, %v9040_v2 }
 0x1fb   :  { %16544 = vst [vmem:[#allocation55_spill] sm:$0xff] %v9634_v5  ;;  %v1571_v34 = vcvt.s32.f32 %v1569_v51  ;;  %v1038_v24 = vand.u32 65535, %v9385_v60 }
 0x1fc   :  { %1098 = vmin.xlane.f32.xlu1 %v9593_v37  ;;  %1659 = vadd.xlane.f32.xlu0 %v1656_v48  ;;  %v9629_v48 = vcvt.s32.f32 %v1123_v18  ;;  %v1704_v18 = vcvt.s32.f32 %v1702_v21 }
 0x200   :  { %1112 = vmin.xlane.f32.xlu1 %v9613_v6  ;;  %1671 = vadd.xlane.f32.xlu0 %v1668_v41  ;;  %v1535_v41 = vcvt.s32.f32 %v1533_v47  ;;  %v1607_v47 = vcvt.s32.f32 %v1605_v13  ;;  %v954_v13 = vand.u32 65535, %v9110_v11  ;;  %v982_v11 = vand.u32 65535, %v9158_v38 }
 0x201   :  { %v1010_v38 = vand.u32 65535, %v9273_v8 }
 0x202   :  { %v956_v2 = vcvt.s32.f32 %v954_v13 }
 0x204   :  { %1126 = vmin.xlane.f32.xlu1 %v9629_v48  ;;  %1683 = vadd.xlane.f32.xlu0 %v1680_v53  ;;  %v1559_v53 = vcvt.s32.f32 %v1557_v55  ;;  %v1619_v55 = vcvt.s32.f32 %v1617_v3 }
 0x208   :  { %1140 = vmin.xlane.f32.xlu1 %v9634_v5  ;;  %1695 = vadd.xlane.f32.xlu0 %v1692_v16  ;;  %v1583_v5 = vcvt.s32.f32 %v1581_v61  ;;  %v1593_v16 = vand.u32 65535, %v9343_v52  ;;  %v1653_v52 = vand.u32 65535, %v9553_v35  ;;  %v1701_v35 = vand.u32 65535, %v1531_v42 }
 0x209   :  { %v928_v61 = vcvt.s32.f32 %v926_v63  ;;  %v1080_v63 = vand.u32 65535, %v9528_v1 }
 0x20a   :  { %v1595_v21 = vcvt.s32.f32 %v1593_v16  ;;  %v1703_v28 = vcvt.s32.f32 %v1701_v35  ;;  %v1040_v35 = vcvt.s32.f32 %v1038_v24 }
 0x20c   :  { %1537 = vadd.xlane.f32.xlu1 %v1535_v41  ;;  %1707 = vadd.xlane.f32.xlu0 %v1704_v18  ;;  %v1643_v41 = vcvt.s32.f32 %v1641_v36  ;;  %v1667_v18 = vcvt.s32.f32 %v1665_v27  ;;  %v984_v36 = vcvt.s32.f32 %v982_v11  ;;  %v16552_v11 = vld [vmem:[#allocation6_spill] sm:$0xff] }
 0x210   :  { %1549 = vadd.xlane.f32.xlu1 %v1547_v39  ;;  %v1631_v39 = vcvt.s32.f32 %v1629_v32 }
 0x214   :  { %1561 = vadd.xlane.f32.xlu1 %v1559_v53  ;;  %v1713_v53 = vand.u32 65535, %v9658_v40 }
 0x216   :  { %v1715_v51 = vcvt.s32.f32 %v1713_v53 }
 0x218   :  { %1573 = vadd.xlane.f32.xlu1 %v1571_v34 }
 0x21c   :  { %1585 = vadd.xlane.f32.xlu1 %v1583_v5  ;;  %v1655_v5 = vcvt.s32.f32 %v1653_v52 }
 0x220   :  { %1597 = vadd.xlane.f32.xlu1 %v1595_v21  ;;  %v942_v21 = vcvt.s32.f32 %v940_v12  ;;  %v16548_v12 = vld [vmem:[#allocation3_spill] sm:$0xff] }
 0x224   :  { %1609 = vadd.xlane.f32.xlu1 %v1607_v47 }
 0x228   :  { %1621 = vadd.xlane.f32.xlu1 %v1619_v55 }
 0x22c   :  { %1633 = vadd.xlane.f32.xlu1 %v1631_v39 }
 0x230   :  { %1645 = vadd.xlane.f32.xlu1 %v1643_v41 }
 0x234   :  { %1657 = vadd.xlane.f32.xlu1 %v1655_v5  ;;  %v16545_v5 = vld [vmem:[#allocation27_spill] sm:$0xff] }
 0x238   :  { %1669 = vadd.xlane.f32.xlu1 %v1667_v18  ;;  %v1024_v18 = vand.u32 65535, %v9338_v10 }
 0x23c   :  { %1681 = vadd.xlane.f32.xlu1 %v1679_v9  ;;  %v1026_v9 = vcvt.s32.f32 %v1024_v18 }
 0x240   :  { %1693 = vadd.xlane.f32.xlu1 %v1691_v50 }
 0x244   :  { %1705 = vadd.xlane.f32.xlu1 %v1703_v28  ;;  %v1052_v28 = vand.u32 65535, %v9440_v58 }
 0x246   :  { %v1054_v53 = vcvt.s32.f32 %v1052_v28 }
 0x248   :  { %1717 = vadd.xlane.f32.xlu1 %v1715_v51  ;;  %v1066_v51 = vand.u32 65535, %v9477_v20 }
 0x259   :  { %v9662_v34 = vpop.xlane.xlu0 %930 }
 0x25a   :  { %vm932_vm2 = vcmp.eq.f32.partialorder %v9071_v62, %v9662_v34  ;;  %v968_v62 = vand.u32 65535, %v9187_v14 }
 0x25b   :  { %v933_v42 = vsel %vm932_vm2, %v928_v61, inf  ;;  %v1094_v61 = vand.u32 65535, %v9561_v17 }
 0x25c   :  { %934 = vmin.xlane.f32.xlu1 %v933_v42  ;;  %v970_v32 = vcvt.s32.f32 %v968_v62  ;;  %v1108_v42 = vand.u32 65535, %v9580_v54 }
 0x25d   :  { %v9667_v16 = vpop.xlane.xlu0 %944 }
 0x25e   :  { %vm946_vm12 = vcmp.eq.f32.partialorder %v9112_v56, %v9667_v16 }
 0x25f   :  { %v9672_v47 = vpop.xlane.xlu1 %958  ;;  %v947_v4 = vsel %vm946_vm12, %v942_v21, inf  ;;  %v16549_v21 = vld [vmem:[#allocation2_spill] sm:$0xff] }
 0x260   :  { %948 = vmin.xlane.f32.xlu0 %v947_v4  ;;  %vm960_vm3 = vcmp.eq.f32.partialorder %v9147_v46, %v9672_v47  ;;  %v996_v46 = vand.u32 65535, %v9268_v31  ;;  %v1012_v31 = vcvt.s32.f32 %v1010_v38  ;;  %v1110_v4 = vcvt.s32.f32 %v1108_v42 }
 0x261   :  { %v961_v3 = vsel %vm960_vm3, %v956_v2, inf  ;;  %v16550_v2 = vld [vmem:[#allocation4_spill] sm:$0xff] }
 0x262   :  { %v998_v52 = vcvt.s32.f32 %v996_v46  ;;  %v16553_v46 = vld [vmem:[#allocation55_spill] sm:$0xff] }
 0x264   :  { %962 = vmin.xlane.f32.xlu0 %v961_v3 }
 0x265   :  { %v9677_v55 = vpop.xlane.xlu1 %972 }
 0x266   :  { %vm974_vm5 = vcmp.eq.f32.partialorder %v9218_v25, %v9677_v55 }
 0x267   :  { %v975_v56 = vsel %vm974_vm5, %v970_v32, inf }
 0x268   :  { %976 = vmin.xlane.f32.xlu0 %v975_v56 }
 0x269   :  { %v9682_v39 = vpop.xlane.xlu1 %986 }
 0x26a   :  { %vm988_vm4 = vcmp.eq.f32.partialorder %v9245_v26, %v9682_v39  ;;  %v16546_v26 = vld [vmem:[#allocation30_spill] sm:$0xff] }
 0x26b   :  { %v989_v14 = vsel %vm988_vm4, %v984_v36, inf }
 0x26c   :  { %990 = vmin.xlane.f32.xlu0 %v989_v14  ;;  %v1714_v14 = vshrl.u32 %v9658_v40, 16  ;;  %v16558_v40 = vld [vmem:[#allocation14_spill] sm:$0xff] }
 0x26d   :  { %v9687_v41 = vpop.xlane.xlu1 %1000  ;;  %3135 = vperm.xlu1 %7662, %v16545_v5  }
 0x26e   :  { %vm1002_vm6 = vcmp.eq.f32.partialorder %v9327_v45, %v9687_v41  ;;  %v16547_v45 = vld [vmem:[#allocation32_spill] sm:$0xff] }
 0x26f   :  { %v1003_v25 = vsel %vm1002_vm6, %v998_v52, inf  ;;  %v16554_v52 = vld [vmem:[#allocation8_spill] sm:$0xff] }
 0x270   :  { %1004 = vmin.xlane.f32.xlu0 %v1003_v25  ;;  %v16555_v25 = vld [vmem:[#allocation10_spill] sm:$0xff] }
 0x271   :  { %v9693_v27 = vpop.xlane.xlu1 %1014  ;;  %3138 = vperm.xlu1 %7662, %v16546_v26   ;;  %v16556_v26 = vld [vmem:[#allocation12_spill] sm:$0xff] }
 0x272   :  { %vm1016_vm10 = vcmp.eq.f32.partialorder %v9361_v22, %v9693_v27 }
 0x273   :  { %v1017_v43 = vsel %vm1016_vm10, %v1012_v31, inf }
 0x274   :  { %1018 = vmin.xlane.f32.xlu0 %v1017_v43 }
 0x275   :  { %v9699_v8 = vpop.xlane.xlu1 %1028  ;;  %3144 = vperm.xlu1 %7662, %v16547_v45   ;;  %v16559_v45 = vld [vmem:[#allocation16_spill] sm:$0xff] }
 0x276   :  { %vm1030_vm14 = vcmp.eq.f32.partialorder %v9425_v29, %v9699_v8 }
 0x277   :  { %v1031_v50 = vsel %vm1030_vm14, %v1026_v9, inf }
 0x278   :  { %1032 = vmin.xlane.f32.xlu0 %v1031_v50 }
 0x279   :  { %v9705_v10 = vpop.xlane.xlu1 %1042  ;;  %3150 = vperm.xlu1 %7662, %v8168_v0   ;;  %v1068_v0 = vcvt.s32.f32 %v1066_v51 }
 0x27a   :  { %vm1044_vm2 = vcmp.eq.f32.partialorder %v9458_v49, %v9705_v10 }
 0x27b   :  { %v1045_v22 = vsel %vm1044_vm2, %v1040_v35, inf }
 0x27c   :  { %1046 = vmin.xlane.f32.xlu0 %v1045_v22 }
 0x27d   :  { %v9711_v60 = vpop.xlane.xlu1 %1056  ;;  %3156 = vperm.xlu1 %7662, %v8186_v44   ;;  %v1082_v44 = vcvt.s32.f32 %v1080_v63 }
 0x27e   :  { %vm1058_vm12 = vcmp.eq.f32.partialorder %v9523_v57, %v9711_v60  ;;  %v15438_v57 = vmov 1  }
 0x27f   :  { %v1059_v29 = vsel %vm1058_vm12, %v1054_v53, inf }
 0x280   :  { %1060 = vmin.xlane.f32.xlu0 %v1059_v29 }
 0x281   :  { %v9717_v58 = vpop.xlane.xlu1 %1070  ;;  %3162 = vperm.xlu1 %7662, %v8196_v33  }
 0x282   :  { %vm1072_vm3 = vcmp.eq.f32.partialorder %v9548_v23, %v9717_v58  ;;  %v1096_v23 = vcvt.s32.f32 %v1094_v61  ;;  %v16560_v61 = vld [vmem:[#allocation70_spill] sm:$0xff] }
 0x283   :  { %v1073_v49 = vsel %vm1072_vm3, %v1068_v0, inf }
 0x284   :  { %1074 = vmin.xlane.f32.xlu0 %v1073_v49 }
 0x285   :  { %v9723_v20 = vpop.xlane.xlu1 %1084  ;;  %7663 = vset.pattern.permute.xlu1 %v15438_v57  ;;  %v937_v57 = vcvt.f32.s32 %v9662_v34  ;;  %v965_v34 = vcvt.f32.s32 %v9672_v47 }
 0x286   :  { %vm1086_vm5 = vcmp.eq.f32.partialorder %v9572_v19, %v9723_v20  ;;  %3217 = vperm.xlu1 %7663, %v16548_v12   ;;  %v1122_v19 = vand.u32 65535, %v9600_v30  ;;  %v9748_v30 = vpop.xlane.xlu0 %1539  ;;  %v979_v12 = vcvt.f32.s32 %v9677_v55  ;;  %v993_v55 = vcvt.f32.s32 %v9682_v39 }
 0x287   :  { %v1087_v1 = vsel %vm1086_vm5, %v1082_v44, inf  ;;  %v1007_v39 = vcvt.f32.s32 %v9687_v41  ;;  %v1021_v41 = vcvt.f32.s32 %v9693_v27  ;;  %v1035_v27 = vcvt.f32.s32 %v9699_v8 }
 0x288   :  { %1088 = vmin.xlane.f32.xlu0 %v1087_v1  ;;  %v1124_v3 = vcvt.s32.f32 %v1122_v19  ;;  %v1196_v1 = vrot.slane %v16560_v61, 4  ;;  %v1049_v8 = vcvt.f32.s32 %v9705_v10  ;;  %v1063_v10 = vcvt.f32.s32 %v9711_v60 }
 0x289   :  { %v9730_v33 = vpop.xlane.xlu1 %1098  ;;  %v1077_v60 = vcvt.f32.s32 %v9717_v58  ;;  %v1091_v58 = vcvt.f32.s32 %v9723_v20 }
 0x28a   :  { %vm1100_vm4 = vcmp.eq.f32.partialorder %v9593_v37, %v9730_v33  ;;  %3223 = vperm.xlu1 %7663, %v16549_v21   ;;  %v16551_v37 = vld [vmem:[#allocation81_spill] sm:$0xff]  ;;  %v9759_v31 = vpop.xlane.xlu0 %1551  ;;  %vm1197_vm2 = vcmp.lt.s32.totalorder %v16560_v61, %v1196_v1  ;;  %v1105_v20 = vcvt.f32.s32 %v9730_v33 }
 0x28b   :  { %v1101_v17 = vsel %vm1100_vm4, %v1096_v23, inf  ;;  %v1136_v32 = vand.u32 65535, %v16551_v37 }
 0x28c   :  { %1102 = vmin.xlane.f32.xlu0 %v1101_v17  ;;  %v1198_v17 = vsel %vm1197_vm2, %v16560_v61, %v1196_v1 }
 0x28d   :  { %v9736_v13 = vpop.xlane.xlu1 %1112  ;;  %v1199_v19 = vrot.slane %v1198_v17, 2 }
 0x28e   :  { %vm1114_vm6 = vcmp.eq.f32.partialorder %v9613_v6, %v9736_v13  ;;  %3226 = vperm.xlu1 %7663, %v16550_v2   ;;  %v1138_v6 = vcvt.s32.f32 %v1136_v32  ;;  %v9764_v43 = vpop.xlane.xlu0 %1563  ;;  %v1119_v33 = vcvt.f32.s32 %v9736_v13 }
 0x28f   :  { %v1115_v62 = vsel %vm1114_vm6, %v1110_v4, inf  ;;  %vm1200_vm12 = vcmp.lt.s32.totalorder %v1198_v17, %v1199_v19 }
 0x290   :  { %1116 = vmin.xlane.f32.xlu0 %v1115_v62  ;;  %v1201_v37 = vsel %vm1200_vm12, %v1198_v17, %v1199_v19 }
 0x291   :  { %v9742_v54 = vpop.xlane.xlu1 %1126 }
 0x292   :  { %vm1128_vm10 = vcmp.eq.f32.partialorder %v9629_v48, %v9742_v54  ;;  %3232 = vperm.xlu1 %7663, %v16552_v11   ;;  %v1716_v48 = vcvt.s32.f32 %v1714_v14  ;;  %v9772_v50 = vpop.xlane.xlu0 %1575  ;;  %v1133_v13 = vcvt.f32.s32 %v9742_v54 }
 0x293   :  { %v1129_v56 = vsel %vm1128_vm10, %v1124_v3, inf }
 0x294   :  { %1130 = vmin.xlane.f32.xlu0 %v1129_v56  ;;  %v1202_v56 = vrot.slane %v1201_v37, 1 }
 0x295   :  { %v9750_v36 = vpop.xlane.xlu1 %1140 }
 0x296   :  { %vm1142_vm14 = vcmp.eq.f32.partialorder %v16553_v46, %v9750_v36  ;;  %3238 = vperm.xlu1 %7663, %v16554_v52   ;;  %v9777_v28 = vpop.xlane.xlu0 %1587  ;;  %vm1203_vm3 = vcmp.lt.s32.totalorder %v1201_v37, %v1202_v56  ;;  %v1147_v54 = vcvt.f32.s32 %v9750_v36 }
 0x297   :  { %v1143_v38 = vsel %vm1142_vm14, %v1138_v6, inf  ;;  %v1204_v14 = vsel %vm1203_vm3, %v1201_v37, %v1202_v56 }
 0x298   :  { %1144 = vmin.xlane.f32.xlu0 %v1143_v38  ;;  %vm1237_vm5 = vcmp.eq.s32.totalorder %v1204_v14, %v8990_v7  ;;  %v951_v14 = vcvt.f32.s32 %v9667_v16 }
 0x299   :  { %v9756_v5 = vpop.xlane.xlu1 %1537  ;;  %vm1238_vm4 = vmand %vm8970_vm1, %vm1237_vm5 }
 0x29a   :  { %3244 = vperm.xlu1 %7663, %v16555_v25   ;;  %v9783_v51 = vpop.xlane.xlu0 %1599  ;;  %v9826_v19 = vsel %vm1238_vm4, 1, %v16344_v15  ;;  %v952_v2 = vshll.u32 %v951_v14, 16 }
 0x29c   :  { %1719 = vadd.xlane.f32.xlu0 %v1716_v48 }
 0x29d   :  { %v9761_v18 = vpop.xlane.xlu1 %1549 }
 0x29e   :  { %3250 = vperm.xlu1 %7663, %v16556_v26   ;;  %v9787_v0 = vpop.xlane.xlu0 %1611  ;;  %v938_v26 = vshll.u32 %v937_v57, 16 }
 0x2a1   :  { %v9766_v9 = vpop.xlane.xlu1 %1561 }
 0x2a2   :  { %16557 = vst [vmem:[#allocation86_spill] sm:$0xff] %v9766_v9  ;;  %3256 = vperm.xlu1 %7663, %v16558_v40   ;;  %v9791_v49 = vpop.xlane.xlu0 %1623 }
 0x2a5   :  { %v9769_v24 = vpop.xlane.xlu1 %1573 }
 0x2a6   :  { %3262 = vperm.xlu1 %7663, %v16559_v45   ;;  %v9796_v23 = vpop.xlane.xlu0 %1635  ;;  %v16563_v45 = vld [vmem:[#allocation66_spill] sm:$0xff] }
 0x2a7   :  { %v1259_v37 = vrot.slane %v9826_v19, %v16563_v45 }
 0x2a9   :  { %v9774_v35 = vpop.xlane.xlu1 %1585  ;;  %vm9836_vm1 = vcmp.eq.s32.totalorder %v1259_v37, 1 }
 0x2aa   :  { %7664 = vset.pattern.permute.xlu1 %v16344_v15  ;;  %v9802_v4 = vpop.xlane.xlu0 %1647 }
 0x2ad   :  { %v9779_v22 = vpop.xlane.xlu1 %1597 }
 0x2ae   :  { %v9806_v3 = vpop.xlane.xlu0 %1659 }
 0x2b1   :  { %v9781_v53 = vpop.xlane.xlu1 %1609 }
 0x2b2   :  { %v9810_v6 = vpop.xlane.xlu0 %1671 }
 0x2b5   :  { %v9785_v29 = vpop.xlane.xlu1 %1621 }
 0x2b6   :  { %v9814_v38 = vpop.xlane.xlu0 %1683 }
 0x2b9   :  { %v9789_v63 = vpop.xlane.xlu1 %1633 }
 0x2ba   :  { %v9821_v1 = vpop.xlane.xlu0 %1695 }
 0x2bd   :  { %v9793_v44 = vpop.xlane.xlu1 %1645 }
 0x2be   :  { %v9831_v56 = vpop.xlane.xlu0 %1707 }
 0x2c1   :  { %v9799_v42 = vpop.xlane.xlu1 %1657 }
 0x2c5   :  { %v9804_v62 = vpop.xlane.xlu1 %1669 }
 0x2c9   :  { %v9808_v32 = vpop.xlane.xlu1 %1681 }
 0x2cd   :  { %v9812_v46 = vpop.xlane.xlu1 %1693 }
 0x2d1   :  { %v9816_v48 = vpop.xlane.xlu1 %1705 }
 0x2d5   :  { %v9823_v17 = vpop.xlane.xlu1 %1717 }
 0x2d6   :  { %16562 = vst [vmem:[#allocation60_spill] sm:$0xff] %v9823_v17  ;;  %v980_v17 = vshll.u32 %v979_v12, 16 }
 0x2e9   :  { %v935_v40 = vpop.xlane.xlu1 %934 }
 0x2ea   :  { %v936_v61 = vcvt.f32.s32 %v935_v40 }
 0x2ec   :  { %v9834_v25 = vadd.s32 %v938_v26, %v936_v61  ;;  %v966_v61 = vshll.u32 %v965_v34, 16 }
 0x2ed   :  { %v949_v11 = vpop.xlane.xlu0 %948 }
 0x2ee   :  { %vm1239_vm6 = vcmp.lt.s32.totalorder %v8990_v7, %v9834_v25  ;;  %v950_v45 = vcvt.f32.s32 %v949_v11 }
 0x2ef   :  { %vm1261_vm10 = vmand %vm9836_vm1, %vm1239_vm6 }
 0x2f0   :  { %v9845_v57 = vadd.s32 %v952_v2, %v950_v45  ;;  %v1277_v16 = vsel %vm1261_vm10, 1, %v16344_v15 }
 0x2f1   :  { %v963_v26 = vpop.xlane.xlu0 %962  ;;  %v1294_v40 = vshrl.u32 %v1277_v16, 16  ;;  %v1293_v37 = vand.u32 65535, %v1277_v16 }
 0x2f2   :  { %vm1240_vm14 = vcmp.lt.s32.totalorder %v8990_v7, %v9845_v57  ;;  %v964_v47 = vcvt.f32.s32 %v963_v26 }
 0x2f3   :  { %v1296_v14 = vcvt.s32.f32 %v1294_v40  ;;  %v1295_v9 = vcvt.s32.f32 %v1293_v37  ;;  %vm1262_vm2 = vmand %vm9836_vm1, %vm1240_vm14 }
 0x2f4   :  { %v9853_v11 = vadd.s32 %v966_v61, %v964_v47  ;;  %v1278_v2 = vsel %vm1262_vm2, 1, %v16344_v15 }
 0x2f5   :  { %v977_v45 = vpop.xlane.xlu0 %976  ;;  %1299 = vadd.xlane.f32.xlu0 %v1296_v14  ;;  %1297 = vadd.xlane.f32.xlu1 %v1295_v9  ;;  %v1306_v16 = vshrl.u32 %v1278_v2, 16  ;;  %v1305_v34 = vand.u32 65535, %v1278_v2  ;;  %v994_v2 = vshll.u32 %v993_v55, 16 }
 0x2f6   :  { %vm1241_vm12 = vcmp.lt.s32.totalorder %v8990_v7, %v9853_v11  ;;  %v978_v26 = vcvt.f32.s32 %v977_v45 }
 0x2f7   :  { %v1308_v40 = vcvt.s32.f32 %v1306_v16  ;;  %v1307_v37 = vcvt.s32.f32 %v1305_v34  ;;  %vm1263_vm3 = vmand %vm9836_vm1, %vm1241_vm12 }
 0x2f8   :  { %v9861_v61 = vadd.s32 %v980_v17, %v978_v26  ;;  %v1279_v47 = vsel %vm1263_vm3, 1, %v16344_v15 }
 0x2f9   :  { %v991_v14 = vpop.xlane.xlu0 %990  ;;  %1311 = vadd.xlane.f32.xlu0 %v1308_v40  ;;  %1309 = vadd.xlane.f32.xlu1 %v1307_v37  ;;  %v1318_v9 = vshrl.u32 %v1279_v47, 16  ;;  %v1317_v12 = vand.u32 65535, %v1279_v47  ;;  %v1008_v47 = vshll.u32 %v1007_v39, 16 }
 0x2fa   :  { %vm1242_vm5 = vcmp.lt.s32.totalorder %v8990_v7, %v9861_v61  ;;  %v992_v45 = vcvt.f32.s32 %v991_v14 }
 0x2fb   :  { %v1320_v16 = vcvt.s32.f32 %v1318_v9  ;;  %v1319_v34 = vcvt.s32.f32 %v1317_v12  ;;  %vm1264_vm4 = vmand %vm9836_vm1, %vm1242_vm5 }
 0x2fc   :  { %v9869_v17 = vadd.s32 %v994_v2, %v992_v45  ;;  %v1280_v26 = vsel %vm1264_vm4, 1, %v16344_v15 }
 0x2fd   :  { %v1005_v40 = vpop.xlane.xlu0 %1004  ;;  %1323 = vadd.xlane.f32.xlu0 %v1320_v16  ;;  %1321 = vadd.xlane.f32.xlu1 %v1319_v34  ;;  %v1330_v37 = vshrl.u32 %v1280_v26, 16  ;;  %v1329_v55 = vand.u32 65535, %v1280_v26  ;;  %v1022_v26 = vshll.u32 %v1021_v41, 16 }
 0x2fe   :  { %vm1243_vm6 = vcmp.lt.s32.totalorder %v8990_v7, %v9869_v17  ;;  %v1006_v14 = vcvt.f32.s32 %v1005_v40 }
 0x2ff   :  { %v1332_v9 = vcvt.s32.f32 %v1330_v37  ;;  %v1331_v12 = vcvt.s32.f32 %v1329_v55  ;;  %vm1265_vm10 = vmand %vm9836_vm1, %vm1243_vm6 }
 0x300   :  { %v9877_v2 = vadd.s32 %v1008_v47, %v1006_v14  ;;  %v1281_v45 = vsel %vm1265_vm10, 1, %v16344_v15 }
 0x301   :  { %v1019_v16 = vpop.xlane.xlu0 %1018  ;;  %1335 = vadd.xlane.f32.xlu0 %v1332_v9  ;;  %1333 = vadd.xlane.f32.xlu1 %v1331_v12  ;;  %v1342_v34 = vshrl.u32 %v1281_v45, 16  ;;  %v1341_v39 = vand.u32 65535, %v1281_v45  ;;  %v1036_v45 = vshll.u32 %v1035_v27, 16 }
 0x302   :  { %vm1244_vm14 = vcmp.lt.s32.totalorder %v8990_v7, %v9877_v2  ;;  %v1020_v40 = vcvt.f32.s32 %v1019_v16 }
 0x303   :  { %v1344_v37 = vcvt.s32.f32 %v1342_v34  ;;  %v1343_v55 = vcvt.s32.f32 %v1341_v39  ;;  %vm1266_vm2 = vmand %vm9836_vm1, %vm1244_vm14 }
 0x304   :  { %v9885_v47 = vadd.s32 %v1022_v26, %v1020_v40  ;;  %v1282_v14 = vsel %vm1266_vm2, 1, %v16344_v15 }
 0x305   :  { %v1033_v9 = vpop.xlane.xlu0 %1032  ;;  %1347 = vadd.xlane.f32.xlu0 %v1344_v37  ;;  %1345 = vadd.xlane.f32.xlu1 %v1343_v55  ;;  %v1354_v12 = vshrl.u32 %v1282_v14, 16  ;;  %v1353_v41 = vand.u32 65535, %v1282_v14  ;;  %v1050_v14 = vshll.u32 %v1049_v8, 16 }
 0x306   :  { %vm1245_vm12 = vcmp.lt.s32.totalorder %v8990_v7, %v9885_v47  ;;  %v1034_v16 = vcvt.f32.s32 %v1033_v9 }
 0x307   :  { %v1356_v34 = vcvt.s32.f32 %v1354_v12  ;;  %v1355_v39 = vcvt.s32.f32 %v1353_v41  ;;  %vm1267_vm3 = vmand %vm9836_vm1, %vm1245_vm12 }
 0x308   :  { %v9893_v26 = vadd.s32 %v1036_v45, %v1034_v16  ;;  %v1283_v40 = vsel %vm1267_vm3, 1, %v16344_v15 }
 0x309   :  { %v1047_v37 = vpop.xlane.xlu0 %1046  ;;  %1359 = vadd.xlane.f32.xlu0 %v1356_v34  ;;  %1357 = vadd.xlane.f32.xlu1 %v1355_v39  ;;  %v1366_v55 = vshrl.u32 %v1283_v40, 16  ;;  %v1365_v27 = vand.u32 65535, %v1283_v40  ;;  %v1064_v40 = vshll.u32 %v1063_v10, 16 }
 0x30a   :  { %vm1246_vm5 = vcmp.lt.s32.totalorder %v8990_v7, %v9893_v26  ;;  %v1048_v9 = vcvt.f32.s32 %v1047_v37 }
 0x30b   :  { %v1368_v12 = vcvt.s32.f32 %v1366_v55  ;;  %v1367_v41 = vcvt.s32.f32 %v1365_v27  ;;  %vm1268_vm4 = vmand %vm9836_vm1, %vm1246_vm5 }
 0x30c   :  { %v9901_v45 = vadd.s32 %v1050_v14, %v1048_v9  ;;  %v1284_v16 = vsel %vm1268_vm4, 1, %v16344_v15 }
 0x30d   :  { %v1061_v34 = vpop.xlane.xlu0 %1060  ;;  %1371 = vadd.xlane.f32.xlu0 %v1368_v12  ;;  %1369 = vadd.xlane.f32.xlu1 %v1367_v41  ;;  %v1378_v39 = vshrl.u32 %v1284_v16, 16  ;;  %v1377_v8 = vand.u32 65535, %v1284_v16  ;;  %v1078_v16 = vshll.u32 %v1077_v60, 16 }
 0x30e   :  { %vm1247_vm6 = vcmp.lt.s32.totalorder %v8990_v7, %v9901_v45  ;;  %v1062_v37 = vcvt.f32.s32 %v1061_v34 }
 0x30f   :  { %v1380_v55 = vcvt.s32.f32 %v1378_v39  ;;  %v1379_v27 = vcvt.s32.f32 %v1377_v8  ;;  %vm1269_vm10 = vmand %vm9836_vm1, %vm1247_vm6 }
 0x310   :  { %v9909_v14 = vadd.s32 %v1064_v40, %v1062_v37  ;;  %v1285_v9 = vsel %vm1269_vm10, 1, %v16344_v15 }
 0x311   :  { %v1075_v12 = vpop.xlane.xlu0 %1074  ;;  %1383 = vadd.xlane.f32.xlu0 %v1380_v55  ;;  %1381 = vadd.xlane.f32.xlu1 %v1379_v27  ;;  %v1390_v41 = vshrl.u32 %v1285_v9, 16  ;;  %v1389_v10 = vand.u32 65535, %v1285_v9  ;;  %v1092_v9 = vshll.u32 %v1091_v58, 16 }
 0x312   :  { %vm1248_vm14 = vcmp.lt.s32.totalorder %v8990_v7, %v9909_v14  ;;  %v1076_v34 = vcvt.f32.s32 %v1075_v12 }
 0x313   :  { %v1392_v39 = vcvt.s32.f32 %v1390_v41  ;;  %v1391_v8 = vcvt.s32.f32 %v1389_v10  ;;  %vm1270_vm2 = vmand %vm9836_vm1, %vm1248_vm14 }
 0x314   :  { %v9917_v40 = vadd.s32 %v1078_v16, %v1076_v34  ;;  %v1286_v37 = vsel %vm1270_vm2, 1, %v16344_v15 }
 0x315   :  { %v1089_v55 = vpop.xlane.xlu0 %1088  ;;  %1395 = vadd.xlane.f32.xlu0 %v1392_v39  ;;  %1393 = vadd.xlane.f32.xlu1 %v1391_v8  ;;  %v1402_v27 = vshrl.u32 %v1286_v37, 16  ;;  %v1401_v60 = vand.u32 65535, %v1286_v37  ;;  %v1106_v37 = vshll.u32 %v1105_v20, 16 }
 0x316   :  { %16566 = vst [vmem:[#allocation67_spill] sm:$0xff] %v9917_v40  ;;  %vm1249_vm12 = vcmp.lt.s32.totalorder %v8990_v7, %v9917_v40  ;;  %v1090_v12 = vcvt.f32.s32 %v1089_v55  ;;  %v1589_v40 = vcvt.f32.s32 %v9774_v35 }
 0x317   :  { %v1404_v41 = vcvt.s32.f32 %v1402_v27  ;;  %v1403_v10 = vcvt.s32.f32 %v1401_v60  ;;  %vm1271_vm3 = vmand %vm9836_vm1, %vm1249_vm12 }
 0x318   :  { %v9925_v16 = vadd.s32 %v1092_v9, %v1090_v12  ;;  %v1287_v34 = vsel %vm1271_vm3, 1, %v16344_v15 }
 0x319   :  { %v1103_v39 = vpop.xlane.xlu0 %1102  ;;  %1407 = vadd.xlane.f32.xlu0 %v1404_v41  ;;  %1405 = vadd.xlane.f32.xlu1 %v1403_v10  ;;  %v1414_v8 = vshrl.u32 %v1287_v34, 16  ;;  %v1413_v58 = vand.u32 65535, %v1287_v34  ;;  %v1120_v34 = vshll.u32 %v1119_v33, 16 }
 0x31a   :  { %vm1250_vm5 = vcmp.lt.s32.totalorder %v8990_v7, %v9925_v16  ;;  %v1104_v55 = vcvt.f32.s32 %v1103_v39 }
 0x31b   :  { %v1416_v27 = vcvt.s32.f32 %v1414_v8  ;;  %v1415_v60 = vcvt.s32.f32 %v1413_v58  ;;  %vm1272_vm4 = vmand %vm9836_vm1, %vm1250_vm5  ;;  %vm15441_vm5 = vcmask 1040384  }
 0x31c   :  { %v9933_v9 = vadd.s32 %v1106_v37, %v1104_v55  ;;  %v1288_v12 = vsel %vm1272_vm4, 1, %v16344_v15 }
 0x31d   :  { %v1117_v41 = vpop.xlane.xlu0 %1116  ;;  %1419 = vadd.xlane.f32.xlu0 %v1416_v27  ;;  %1417 = vadd.xlane.f32.xlu1 %v1415_v60  ;;  %v1426_v10 = vshrl.u32 %v1288_v12, 16  ;;  %v1425_v20 = vand.u32 65535, %v1288_v12  ;;  %v1134_v12 = vshll.u32 %v1133_v13, 16 }
 0x31e   :  { %16567 = vst [vmem:[#allocation72_spill] sm:$0xff] %v9933_v9  ;;  %vm1251_vm6 = vcmp.lt.s32.totalorder %v8990_v7, %v9933_v9  ;;  %v1118_v39 = vcvt.f32.s32 %v1117_v41 }
 0x31f   :  { %v1428_v8 = vcvt.s32.f32 %v1426_v10  ;;  %v1427_v58 = vcvt.s32.f32 %v1425_v20  ;;  %vm1273_vm10 = vmand %vm9836_vm1, %vm1251_vm6 }
 0x320   :  { %v9941_v37 = vadd.s32 %v1120_v34, %v1118_v39  ;;  %v1289_v55 = vsel %vm1273_vm10, 1, %v16344_v15 }
 0x321   :  { %v1131_v27 = vpop.xlane.xlu0 %1130  ;;  %1431 = vadd.xlane.f32.xlu0 %v1428_v8  ;;  %1429 = vadd.xlane.f32.xlu1 %v1427_v58  ;;  %v1438_v60 = vshrl.u32 %v1289_v55, 16  ;;  %v1437_v33 = vand.u32 65535, %v1289_v55  ;;  %v1148_v55 = vshll.u32 %v1147_v54, 16 }
 0x322   :  { %vm1252_vm14 = vcmp.lt.s32.totalorder %v8990_v7, %v9941_v37  ;;  %v1132_v41 = vcvt.f32.s32 %v1131_v27 }
 0x323   :  { %v1440_v10 = vcvt.s32.f32 %v1438_v60  ;;  %v1439_v20 = vcvt.s32.f32 %v1437_v33  ;;  %vm1274_vm2 = vmand %vm9836_vm1, %vm1252_vm14 }
 0x324   :  { %v9949_v34 = vadd.s32 %v1134_v12, %v1132_v41  ;;  %v1290_v39 = vsel %vm1274_vm2, 1, %v16344_v15 }
 0x325   :  { %v1145_v8 = vpop.xlane.xlu0 %1144  ;;  %1443 = vadd.xlane.f32.xlu0 %v1440_v10  ;;  %1441 = vadd.xlane.f32.xlu1 %v1439_v20  ;;  %v1450_v58 = vshrl.u32 %v1290_v39, 16  ;;  %v1449_v13 = vand.u32 65535, %v1290_v39  ;;  %v9959_v20 = vpop.permute.xlu1 %3135 }
 0x326   :  { %16568 = vst [vmem:[#allocation83_spill] sm:$0xff] %v9949_v34  ;;  %vm1253_vm12 = vcmp.lt.s32.totalorder %v8990_v7, %v9949_v34  ;;  %v1146_v36 = vcvt.f32.s32 %v1145_v8  ;;  %16569 = vst [vmem:[#allocation88_spill] sm:$0xff] %v9959_v20 }
 0x327   :  { %v1452_v27 = vcvt.s32.f32 %v1450_v58  ;;  %v1451_v60 = vcvt.s32.f32 %v1449_v13  ;;  %vm1275_vm3 = vmand %vm9836_vm1, %vm1253_vm12  ;;  %v3387_v58 = vsel %vm15441_vm5, %v9826_v19, 0  ;;  %v16573_v19 = vld [vmem:[#allocation24_spill] sm:$0xff] }
 0x328   :  { %v9956_v33 = vadd.s32 %v1148_v55, %v1146_v36  ;;  %v1291_v12 = vsel %vm1275_vm3, 1, %v16344_v15 }
 0x329   :  { %1455 = vadd.xlane.f32.xlu0 %v1452_v27  ;;  %1453 = vadd.xlane.f32.xlu1 %v1451_v60  ;;  %v1462_v41 = vshrl.u32 %v1291_v12, 16  ;;  %v1461_v10 = vand.u32 65535, %v1291_v12  ;;  %v3389_v60 = vshrl.u32 %v3387_v58, 16  ;;  %v3388_v12 = vand.u32 65535, %v3387_v58  ;;  %v9968_v20 = vpop.permute.xlu1 %3138 }
 0x32a   :  { %vm1254_vm4 = vcmp.lt.s32.totalorder %v8990_v7, %v9956_v33  ;;  %16570 = vst [vmem:[#allocation69_spill] sm:$0xff] %v9968_v20  ;;  %vm1220_vm15 = vcmp.eq.s32.totalorder %v9956_v33, %v9505_v59  ;;  %v16604_v33 = vld [vmem:[#allocation7_spill] sm:$0xff] }
 0x32b   :  { %v1464_v54 = vcvt.s32.f32 %v1462_v41  ;;  %v1463_v39 = vcvt.s32.f32 %v1461_v10  ;;  %vm1276_vm6 = vmand %vm9836_vm1, %vm1254_vm4  ;;  %v3391_v41 = vcvt.s32.f32 %v3389_v60  ;;  %v3390_v52 = vcvt.s32.f32 %v3388_v12  ;;  %v16584_v60 = vld [vmem:[#allocation68_spill] sm:$0xff] }
 0x32c   :  { %v1292_v8 = vsel %vm1276_vm6, 1, %v16344_v15  ;;  %vm1206_vm1 = vcmp.eq.s32.totalorder %v9845_v57, %v16573_v19  ;;  %vm1212_vm5 = vcmp.eq.s32.totalorder %v9893_v26, %v16584_v60  ;;  %v16607_v19 = vld [vmem:[#allocation11_spill] sm:$0xff]  ;;  %v16609_v60 = vld [vmem:[#allocation13_spill] sm:$0xff] }
 0x32d   :  { %1467 = vadd.xlane.f32.xlu0 %v1464_v54  ;;  %1465 = vadd.xlane.f32.xlu1 %v1463_v39  ;;  %v1474_v13 = vshrl.u32 %v1292_v8, 16  ;;  %v1473_v55 = vand.u32 65535, %v1292_v8  ;;  %v9970_v10 = vpop.permute.xlu1 %3144  ;;  %v16575_v39 = vld [vmem:[#allocation20_spill] sm:$0xff]  ;;  %v16577_v8 = vld [vmem:[#allocation51_spill] sm:$0xff] }
 0x32e   :  { %16571 = vst [vmem:[#allocation74_spill] sm:$0xff] %v9970_v10  ;;  %vm16576_vm10 = vnez %v16575_v39  ;;  %vm1208_vm2 = vcmp.eq.s32.totalorder %v9861_v61, %v16577_v8 }
 0x32f   :  { %v1476_v36 = vcvt.s32.f32 %v1474_v13  ;;  %v1475_v27 = vcvt.s32.f32 %v1473_v55  ;;  %vm1222_vm14 = vmand %vm16576_vm10, %vm1206_vm1  ;;  %v16578_v13 = vld [vmem:[#allocation50_spill] sm:$0xff]  ;;  %v16580_v55 = vld [vmem:[#allocation56_spill] sm:$0xff] }
 0x330   :  { %v2855_v58 = vsel %vm1222_vm14, 1, %v16344_v15  ;;  %vm16579_vm12 = vnez %v16578_v13  ;;  %vm1210_vm4 = vcmp.eq.s32.totalorder %v9877_v2, %v16580_v55  ;;  %vm1228_vm14 = vmand %vm8844_vm11, %vm1212_vm5  ;;  %v16587_v2 = vld [vmem:[#allocation79_spill] sm:$0xff]  ;;  %v16594_v55 = vld [vmem:[#allocation58_spill] sm:$0xff] }
 0x331   :  { %1479 = vadd.xlane.f32.xlu0 %v1476_v36  ;;  %1477 = vadd.xlane.f32.xlu1 %v1475_v27  ;;  %v9972_v34 = vpop.permute.xlu1 %3150  ;;  %vm1224_vm3 = vmand %vm16579_vm12, %vm1208_vm2  ;;  %v16582_v27 = vld [vmem:[#allocation61_spill] sm:$0xff]  ;;  %vm1214_vm2 = vcmp.eq.s32.totalorder %v9909_v14, %v16587_v2  ;;  %vm1218_vm7 = vcmp.eq.s32.totalorder %v9941_v37, %v16594_v55  ;;  %v16596_v2 = vld [vmem:[#allocation78_spill] sm:$0xff] }
 0x332   :  { %16572 = vst [vmem:[#allocation85_spill] sm:$0xff] %v9972_v34  ;;  %v2857_v57 = vsel %vm1224_vm3, 1, %v16344_v15  ;;  %vm16583_vm6 = vnez %v16582_v27 }
 0x333   :  { %vm1226_vm1 = vmand %vm16583_vm6, %vm1210_vm4 }
 0x334   :  { %v2859_v61 = vsel %vm1226_vm1, 1, %v16344_v15 }
 0x335   :  { %3394 = vadd.xlane.f32.xlu0 %v3391_v41  ;;  %3392 = vadd.xlane.f32.xlu1 %v3390_v52  ;;  %v9976_v54 = vpop.permute.xlu1 %3156  ;;  %v2861_v52 = vsel %vm1228_vm14, 1, %v16344_v15  ;;  %vm16597_vm14 = vnez %v16596_v2 }
 0x336   :  { %16574 = vst [vmem:[#allocation90_spill] sm:$0xff] %v9976_v54 }
 0x339   :  { %v9987_v36 = vpop.permute.xlu1 %3162 }
 0x33a   :  { %16581 = vst [vmem:[#allocation71_spill] sm:$0xff] %v9987_v36 }
 0x33d   :  { %v9995_v12 = vpop.permute.xlu1 %3217 }
 0x33e   :  { %16585 = vst [vmem:[#allocation76_spill] sm:$0xff] %v9995_v12 }
 0x341   :  { %v10006_v26 = vpop.permute.xlu1 %3223 }
 0x342   :  { %16591 = vst [vmem:[#allocation87_spill] sm:$0xff] %v10006_v26 }
 0x346   :  { %2874 = vperm.xlu1 %7664, %v2855_v58   ;;  %v16588_v58 = vld [vmem:[#allocation22_spill] sm:$0xff] }
 0x347   :  { %vm16589_vm3 = vnez %v16588_v58 }
 0x348   :  { %vm1230_vm4 = vmand %vm16589_vm3, %vm1214_vm2 }
 0x349   :  { %v2863_v12 = vsel %vm1230_vm4, 1, %v16344_v15  ;;  %vm1234_vm2 = vmand %vm16597_vm14, %vm1218_vm7 }
 0x34a   :  { %2880 = vperm.xlu1 %7664, %v2857_v57   ;;  %v16590_v57 = vld [vmem:[#allocation84_spill] sm:$0xff] }
 0x34b   :  { %vm1216_vm0 = vcmp.eq.s32.totalorder %v9925_v16, %v16590_v57  ;;  %v2867_v16 = vsel %vm1234_vm2, 1, %v16344_v15 }
 0x34e   :  { %2886 = vperm.xlu1 %7664, %v2859_v61   ;;  %v16592_v61 = vld [vmem:[#allocation77_spill] sm:$0xff] }
 0x34f   :  { %vm16593_vm1 = vnez %v16592_v61 }
 0x350   :  { %vm1232_vm5 = vmand %vm16593_vm1, %vm1216_vm0 }
 0x351   :  { %v2865_v14 = vsel %vm1232_vm5, 1, %v16344_v15 }
 0x352   :  { %2892 = vperm.xlu1 %7664, %v2861_v52   ;;  %v10014_v52 = vpop.permute.xlu1 %3226 }
 0x353   :  { %16595 = vst [vmem:[#allocation92_spill] sm:$0xff] %v10014_v52 }
 0x356   :  { %2898 = vperm.xlu1 %7664, %v2863_v12   ;;  %v16598_v12 = vld [vmem:[#allocation54_spill] sm:$0xff]  ;;  %v10023_v26 = vpop.permute.xlu1 %3232 }
 0x357   :  { %vm16599_vm4 = vnez %v16598_v12  ;;  %16600 = vst [vmem:[#allocation43_spill] sm:$0xff] %v10023_v26 }
 0x358   :  { %vm1236_vm0 = vmand %vm16599_vm4, %vm1220_vm15 }
 0x359   :  { %v2869_v37 = vsel %vm1236_vm0, 1, %v16344_v15 }
 0x35a   :  { %2904 = vperm.xlu1 %7664, %v2865_v14   ;;  %v10026_v55 = vpop.permute.xlu1 %3238  ;;  %v16602_v14 = vld [vmem:[#allocation5_spill] sm:$0xff] }
 0x35b   :  { %16601 = vst [vmem:[#allocation57_spill] sm:$0xff] %v10026_v55 }
 0x35e   :  { %2910 = vperm.xlu1 %7664, %v2867_v16   ;;  %v10030_v57 = vpop.permute.xlu1 %3244  ;;  %v16606_v16 = vld [vmem:[#allocation9_spill] sm:$0xff] }
 0x35f   :  { %16603 = vst [vmem:[#allocation73_spill] sm:$0xff] %v10030_v57  ;;  %v16612_v57 = vld [vmem:[#allocation17_spill] sm:$0xff] }
 0x362   :  { %2916 = vperm.xlu1 %7664, %v2869_v37   ;;  %v10033_v59 = vpop.permute.xlu1 %3250  ;;  %v10040_v37 = vpop.xlane.xlu0 %1719 }
 0x363   :  { %16605 = vst [vmem:[#allocation23_spill] sm:$0xff] %v10033_v59 }
 0x366   :  { %3305 = vperm.xlu1 %7664, %v16602_v14   ;;  %v10037_v26 = vpop.permute.xlu1 %3256  ;;  %v16611_v14 = vld [vmem:[#allocation15_spill] sm:$0xff] }
 0x367   :  { %16608 = vst [vmem:[#allocation89_spill] sm:$0xff] %v10037_v26 }
 0x36a   :  { %3308 = vperm.xlu1 %7664, %v16549_v21   ;;  %v10042_v8 = vpop.permute.xlu1 %3262 }
 0x36b   :  { %16610 = vst [vmem:[#allocation45_spill] sm:$0xff] %v10042_v8 }
 0x36e   :  { %3314 = vperm.xlu1 %7664, %v16604_v33  }
 0x372   :  { %3320 = vperm.xlu1 %7664, %v16606_v16   ;;  %v1554_v16 = vcvt.f32.s32 %v9759_v31 }
 0x376   :  { %3326 = vperm.xlu1 %7664, %v16607_v19   ;;  %v1553_v19 = vcvt.f32.s32 %v9761_v18  ;;  %v1577_v18 = vcvt.f32.s32 %v9769_v24 }
 0x37a   :  { %3332 = vperm.xlu1 %7664, %v16609_v60   ;;  %v1555_v60 = vshll.u32 %v1554_v16, 16 }
 0x37c   :  { %v1556_v34 = vadd.s32 %v1555_v60, %v1553_v19 }
 0x37e   :  { %3338 = vperm.xlu1 %7664, %v16611_v14   ;;  %vm1758_vm5 = vcmp.lt.s32.totalorder %v1556_v34, 8 }
 0x382   :  { %v10045_v21 = vpop.xlane.xlu0 %1299  ;;  %3344 = vperm.xlu1 %7664, %v16612_v57   ;;  %v10048_v33 = vpop.xlane.xlu1 %1297  ;;  %v1578_v57 = vcvt.f32.s32 %v9772_v50  ;;  %v1590_v50 = vcvt.f32.s32 %v9777_v28 }
 0x384   :  { %v1579_v19 = vshll.u32 %v1578_v57, 16  ;;  %v1602_v57 = vcvt.f32.s32 %v9783_v51 }
 0x386   :  { %v1312_v54 = vpop.xlane.xlu0 %1311  ;;  %v1310_v26 = vpop.xlane.xlu1 %1309  ;;  %v10068_v16 = vadd.s32 %v1579_v19, %v1577_v18  ;;  %v1603_v19 = vshll.u32 %v1602_v57, 16  ;;  %v16618_v57 = vmov 0 }
 0x387   :  { %v1314_v10 = vcvt.f32.s32 %v1312_v54  ;;  %v1313_v20 = vcvt.f32.s32 %v1310_v26 }
 0x389   :  { %v1315_v36 = vshll.u32 %v1314_v10, 16 }
 0x38a   :  { %v10052_v8 = vpop.xlane.xlu0 %1323  ;;  %v10054_v14 = vpop.xlane.xlu1 %1321 }
 0x38b   :  { %v10056_v59 = vadd.s32 %v1315_v36, %v1313_v20 }
 0x38d   :  { %vm15457_vm15 = vcmp.lt.s32.totalorder %v10056_v59, 32  ;;  %v1790_v31 = vmul.u32 8, %v10056_v59 }
 0x38e   :  { %v1336_v9 = vpop.xlane.xlu0 %1335  ;;  %v1334_v54 = vpop.xlane.xlu1 %1333  ;;  %vm1742_vm7 = vmand %vm16576_vm10, %vm15457_vm15 }
 0x38f   :  { %v1338_v10 = vcvt.f32.s32 %v1336_v9  ;;  %vm1774_vm2 = vmand %vm1742_vm7, %vm1758_vm5  ;;  %v1806_v20 = vadd.s32 %v1790_v31, %v1556_v34  ;;  %v1337_v26 = vcvt.f32.s32 %v1334_v54  ;;  %v1591_v34 = vshll.u32 %v1590_v50, 16 }
 0x390   :  { %v2999_v36 = vsel %vm1774_vm2, 1, %v16344_v15  ;;  %vm1760_vm7 = vcmp.lt.s32.totalorder %v10068_v16, 8 }
 0x391   :  { %v1339_v60 = vshll.u32 %v1338_v10, 16  ;;  %3018 = vperm.xlu1 %7664, %v2999_v36   ;;  %v1822_v24 = vsel %vm1774_vm2, %v1806_v20, 4294967295  ;;  %v1592_v54 = vadd.s32 %v1591_v34, %v1589_v40  ;;  %v1601_v10 = vcvt.f32.s32 %v9779_v22 }
 0x392   :  { %v1348_v55 = vpop.xlane.xlu0 %1347  ;;  %1841 = vperm.xlu0 %7661, %v1822_v24   ;;  %v1346_v39 = vpop.xlane.xlu1 %1345  ;;  %v1614_v40 = vcvt.f32.s32 %v9787_v0  ;;  %v16616_v0 = vld [vmem:[#allocation47_spill] sm:$0xff] }
 0x393   :  { %v10071_v52 = vadd.s32 %v1339_v60, %v1337_v26  ;;  %v1350_v9 = vcvt.f32.s32 %v1348_v55  ;;  %v1349_v31 = vcvt.f32.s32 %v1346_v39  ;;  %v10093_v60 = vadd.s32 %v1603_v19, %v1601_v10 }
 0x394   :  { %v1613_v26 = vcvt.f32.s32 %v9781_v53  ;;  %vm16617_vm2 = vnez %v16616_v0  ;;  %v1626_v10 = vcvt.f32.s32 %v9791_v49  ;;  %v1625_v19 = vcvt.f32.s32 %v9785_v29 }
 0x395   :  { %v1351_v28 = vshll.u32 %v1350_v9, 16  ;;  %vm15455_vm10 = vcmp.lt.s32.totalorder %v10071_v52, 32  ;;  %v1638_v29 = vcvt.f32.s32 %v9796_v23  ;;  %v16622_v23 = vld [vmem:[#allocation52_spill] sm:$0xff]  ;;  %v16685_v0 = vmov 0 }
 0x396   :  { %v1360_v18 = vpop.xlane.xlu0 %1359  ;;  %v1358_v20 = vpop.xlane.xlu1 %1357  ;;  %vm1744_vm0 = vmand %vm16579_vm12, %vm15455_vm10 }
 0x397   :  { %v10081_v35 = vadd.s32 %v1351_v28, %v1349_v31  ;;  %v1362_v55 = vcvt.f32.s32 %v1360_v18  ;;  %vm10083_vm5 = vmand %vm1744_vm0, %vm1760_vm7  ;;  %v1361_v36 = vcvt.f32.s32 %v1358_v20  ;;  %vm1761_vm7 = vcmp.lt.s32.totalorder %v1592_v54, 8 }
 0x398   :  { %v3001_v22 = vsel %vm10083_vm5, 1, %v16344_v15  ;;  %v1615_v31 = vshll.u32 %v1614_v40, 16  ;;  %v16620_v40 = vmov 0 }
 0x399   :  { %16613 = vst [vmem:[#allocation59_spill] sm:$0xff] %v10081_v35  ;;  %v1363_v50 = vshll.u32 %v1362_v55, 16  ;;  %3024 = vperm.xlu1 %7664, %v3001_v22   ;;  %vm15452_vm12 = vcmp.lt.s32.totalorder %v10081_v35, 32  ;;  %v1793_v13 = vmul.u32 8, %v10081_v35 }
 0x39a   :  { %v1372_v24 = vpop.xlane.xlu0 %1371  ;;  %v1370_v39 = vpop.xlane.xlu1 %1369  ;;  %vm1745_vm0 = vmand %vm16617_vm2, %vm15452_vm12  ;;  %v1616_v55 = vadd.s32 %v1615_v31, %v1613_v26 }
 0x39b   :  { %v10100_v9 = vadd.s32 %v1363_v50, %v1361_v36  ;;  %v1374_v34 = vcvt.f32.s32 %v1372_v24  ;;  %vm10102_vm9 = vmand %vm1745_vm0, %vm1761_vm7  ;;  %v1809_v28 = vadd.s32 %v1793_v13, %v1592_v54  ;;  %v1373_v18 = vcvt.f32.s32 %v1370_v39 }
 0x39c   :  { %v16619_v57 = vsel %vm10102_vm9, 4294967295, %v16618_v57  ;;  %vm1762_vm7 = vcmp.lt.s32.totalorder %v10093_v60, 8  ;;  %v1627_v36 = vshll.u32 %v1626_v10, 16  ;;  %vm1763_vm12 = vcmp.lt.s32.totalorder %v1616_v55, 8 }
 0x39d   :  { %v1375_v53 = vshll.u32 %v1374_v34, 16  ;;  %v1825_v20 = vsel %vm10102_vm9, %v1809_v28, 4294967295  ;;  %vm15453_vm8 = vcmp.lt.s32.totalorder %v10100_v9, 32  ;;  %v1637_v34 = vcvt.f32.s32 %v9789_v63 }
 0x39e   :  { %v1384_v22 = vpop.xlane.xlu0 %1383  ;;  %1850 = vperm.xlu0 %7661, %v1825_v20   ;;  %v1382_v50 = vpop.xlane.xlu1 %1381  ;;  %vm1746_vm0 = vmand %vm16583_vm6, %vm15453_vm8  ;;  %v10128_v39 = vadd.s32 %v1627_v36, %v1625_v19  ;;  %v15458_v19 = vmov 0.0   ;;  %v1639_v63 = vshll.u32 %v1638_v29, 16 }
 0x39f   :  { %v10116_v49 = vadd.s32 %v1375_v53, %v1373_v18  ;;  %v1386_v54 = vcvt.f32.s32 %v1384_v22  ;;  %vm10118_vm13 = vmand %vm1746_vm0, %vm1762_vm7  ;;  %v1385_v24 = vcvt.f32.s32 %v1382_v50  ;;  %vm16623_vm0 = vnez %v16622_v23  ;;  %2077 = vmatprep.mubr.f32.mxu0 %v15458_v19  ;;  %5451 = vmatprep.mubr.f32.mxu1 %v15458_v19 }
 0x3a0   :  { %v16621_v40 = vsel %vm10118_vm13, 4294967295, %v16620_v40  ;;  %v3003_v13 = vsel %vm10118_vm13, 1, %v16344_v15  ;;  %v16624_v18 = vmov 0  ;;  %v1650_v22 = vcvt.f32.s32 %v9802_v4 }
 0x3a1   :  { %v1387_v26 = vshll.u32 %v1386_v54, 16  ;;  %3030 = vperm.xlu1 %7664, %v3003_v13   ;;  %vm15454_vm6 = vcmp.lt.s32.totalorder %v10116_v49, 32  ;;  %v1795_v27 = vmul.u32 8, %v10116_v49  ;;  %v1640_v13 = vadd.s32 %v1639_v63, %v1637_v34 }
 0x3a2   :  { %v1396_v28 = vpop.xlane.xlu0 %1395  ;;  %v1394_v31 = vpop.xlane.xlu1 %1393  ;;  %vm1747_vm7 = vmand %vm16623_vm0, %vm15454_vm6  ;;  %v1651_v34 = vshll.u32 %v1650_v22, 16  ;;  %v1661_v63 = vcvt.f32.s32 %v9799_v42  ;;  %v1686_v42 = vcvt.f32.s32 %v9814_v38  ;;  %v16690_v23 = vmov 0 }
 0x3a3   :  { %v10135_v10 = vadd.s32 %v1387_v26, %v1385_v24  ;;  %v1398_v53 = vcvt.f32.s32 %v1396_v28  ;;  %vm10137_vm8 = vmand %vm1747_vm7, %vm1763_vm12  ;;  %v1811_v20 = vadd.s32 %v1795_v27, %v1616_v55  ;;  %v1397_v54 = vcvt.f32.s32 %v1394_v31 }
 0x3a4   :  { %v16625_v18 = vsel %vm10137_vm8, 4294967295, %v16624_v18  ;;  %v1649_v26 = vcvt.f32.s32 %v9793_v44  ;;  %vm1764_vm7 = vcmp.lt.s32.totalorder %v10128_v39, 8  ;;  %v16627_v27 = vmov 0 }
 0x3a5   :  { %v1399_v50 = vshll.u32 %v1398_v53, 16  ;;  %v1827_v36 = vsel %vm10137_vm8, %v1811_v20, 4294967295  ;;  %vm15456_vm6 = vcmp.lt.s32.totalorder %v10135_v10, 32  ;;  %v1662_v44 = vcvt.f32.s32 %v9806_v3  ;;  %v16629_v3 = vld [vmem:[#allocation18_spill] sm:$0xff] }
 0x3a6   :  { %v1408_v24 = vpop.xlane.xlu0 %1407  ;;  %1856 = vperm.xlu0 %7661, %v1827_v36   ;;  %v1406_v55 = vpop.xlane.xlu1 %1405  ;;  %vm1748_vm12 = vmand %vm8844_vm11, %vm15456_vm6  ;;  %v10165_v20 = vadd.s32 %v1651_v34, %v1649_v26  ;;  %vm1765_vm6 = vcmp.lt.s32.totalorder %v1640_v13, 8 }
 0x3a7   :  { %v10153_v4 = vadd.s32 %v1399_v50, %v1397_v54  ;;  %v1410_v29 = vcvt.f32.s32 %v1408_v24  ;;  %vm10155_vm10 = vmand %vm1748_vm12, %vm1764_vm7  ;;  %v1409_v53 = vcvt.f32.s32 %v1406_v55  ;;  %vm16630_vm12 = vnez %v16629_v3 }
 0x3a8   :  { %v16628_v27 = vsel %vm10155_vm10, 4294967295, %v16627_v27  ;;  %v3005_v28 = vsel %vm10155_vm10, 1, %v16344_v15  ;;  %v16631_v24 = vmov 0  ;;  %v1663_v26 = vshll.u32 %v1662_v44, 16 }
 0x3a9   :  { %16626 = vst [vmem:[#allocation75_spill] sm:$0xff] %v10153_v4  ;;  %v1411_v31 = vshll.u32 %v1410_v29, 16  ;;  %3036 = vperm.xlu1 %7664, %v3005_v28   ;;  %vm15460_vm11 = vcmp.lt.s32.totalorder %v10153_v4, 32  ;;  %v1797_v41 = vmul.u32 8, %v10153_v4  ;;  %v1674_v29 = vcvt.f32.s32 %v9810_v6 }
 0x3aa   :  { %v1420_v50 = vpop.xlane.xlu0 %1419  ;;  %v1418_v54 = vpop.xlane.xlu1 %1417  ;;  %vm1749_vm7 = vmand %vm16630_vm12, %vm15460_vm11 }
 0x3ab   :  { %v10172_v22 = vadd.s32 %v1411_v31, %v1409_v53  ;;  %v1422_v36 = vcvt.f32.s32 %v1420_v50  ;;  %vm10174_vm15 = vmand %vm1749_vm7, %vm1765_vm6  ;;  %v1813_v55 = vadd.s32 %v1797_v41, %v1640_v13  ;;  %v1421_v28 = vcvt.f32.s32 %v1418_v54 }
 0x3ac   :  { %v16632_v24 = vsel %vm10174_vm15, 4294967295, %v16631_v24  ;;  %v1664_v31 = vadd.s32 %v1663_v26, %v1661_v63  ;;  %v1673_v53 = vcvt.f32.s32 %v9804_v62  ;;  %vm1766_vm7 = vcmp.lt.s32.totalorder %v10165_v20, 8 }
 0x3ad   :  { %v1423_v34 = vshll.u32 %v1422_v36, 16  ;;  %v1829_v19 = vsel %vm10174_vm15, %v1813_v55, 4294967295  ;;  %vm15464_vm11 = vcmp.lt.s32.totalorder %v10172_v22, 32  ;;  %v16633_v13 = vmov 0 }
 0x3ae   :  { %v1432_v50 = vpop.xlane.xlu0 %1431  ;;  %1862 = vperm.xlu0 %7661, %v1829_v19   ;;  %v1430_v4 = vpop.xlane.xlu1 %1429  ;;  %vm1750_vm6 = vmand %vm16589_vm3, %vm15464_vm11  ;;  %v1675_v44 = vshll.u32 %v1674_v29, 16  ;;  %v1687_v41 = vshll.u32 %v1686_v42, 16  ;;  %v1685_v62 = vcvt.f32.s32 %v9808_v32  ;;  %v1698_v36 = vcvt.f32.s32 %v9821_v1  ;;  %v16635_v32 = vld [vmem:[#allocation40_spill] sm:$0xff] }
 0x3af   :  { %v10189_v6 = vadd.s32 %v1423_v34, %v1421_v28  ;;  %v1434_v38 = vcvt.f32.s32 %v1432_v50  ;;  %vm10191_vm8 = vmand %vm1750_vm6, %vm1766_vm7  ;;  %v1433_v58 = vcvt.f32.s32 %v1430_v4  ;;  %v1302_v26 = vcvt.f32.s32 %v10045_v21 }
 0x3b0   :  { %v16634_v13 = vsel %vm10191_vm8, 4294967295, %v16633_v13  ;;  %v3007_v19 = vsel %vm10191_vm8, 1, %v16344_v15  ;;  %v10202_v55 = vadd.s32 %v1675_v44, %v1673_v53  ;;  %vm16636_vm6 = vnez %v16635_v32 }
 0x3b1   :  { %v1435_v63 = vshll.u32 %v1434_v38, 16  ;;  %3042 = vperm.xlu1 %7664, %v3007_v19   ;;  %vm15466_vm3 = vcmp.lt.s32.totalorder %v10189_v6, 32  ;;  %v1799_v54 = vmul.u32 8, %v10189_v6  ;;  %vm1767_vm11 = vcmp.lt.s32.totalorder %v1664_v31, 8 }
 0x3b2   :  { %v1444_v29 = vpop.xlane.xlu0 %1443  ;;  %v1442_v42 = vpop.xlane.xlu1 %1441  ;;  %vm1751_vm7 = vmand %vm16636_vm6, %vm15466_vm3  ;;  %v1542_v4 = vcvt.f32.s32 %v9748_v30  ;;  %v16637_v50 = vmov 0  ;;  %v1688_v53 = vadd.s32 %v1687_v41, %v1685_v62  ;;  %v1697_v21 = vcvt.f32.s32 %v9812_v46 }
 0x3b3   :  { %v10210_v34 = vadd.s32 %v1435_v63, %v1433_v58  ;;  %v1446_v28 = vcvt.f32.s32 %v1444_v29  ;;  %vm10212_vm15 = vmand %vm1751_vm7, %vm1767_vm11  ;;  %v1815_v1 = vadd.s32 %v1799_v54, %v1664_v31  ;;  %v1445_v44 = vcvt.f32.s32 %v1442_v42 }
 0x3b4   :  { %v16638_v50 = vsel %vm10212_vm15, 4294967295, %v16637_v50  ;;  %v1699_v35 = vshll.u32 %v1698_v36, 16  ;;  %v1303_v30 = vshll.u32 %v1302_v26, 16  ;;  %v1326_v63 = vcvt.f32.s32 %v10052_v8 }
 0x3b5   :  { %v1447_v38 = vshll.u32 %v1446_v28, 16  ;;  %v1831_v19 = vsel %vm10212_vm15, %v1815_v1, 4294967295  ;;  %vm15470_vm3 = vcmp.lt.s32.totalorder %v10210_v34, 32  ;;  %vm1768_vm7 = vcmp.lt.s32.totalorder %v10202_v55, 8 }
 0x3b6   :  { %v1456_v58 = vpop.xlane.xlu0 %1455  ;;  %1868 = vperm.xlu0 %7661, %v1831_v19   ;;  %v1454_v29 = vpop.xlane.xlu1 %1453  ;;  %vm1752_vm11 = vmand %vm16593_vm1, %vm15470_vm3  ;;  %v1543_v46 = vshll.u32 %v1542_v4, 16  ;;  %v1710_v31 = vcvt.f32.s32 %v9831_v56  ;;  %v16640_v54 = vmov 0  ;;  %v10233_v8 = vadd.s32 %v1699_v35, %v1697_v21 }
 0x3b7   :  { %v10227_v41 = vadd.s32 %v1447_v38, %v1445_v44  ;;  %v1458_v62 = vcvt.f32.s32 %v1456_v58  ;;  %vm10229_vm15 = vmand %vm1752_vm11, %vm1768_vm7  ;;  %v1301_v36 = vcvt.f32.s32 %v10048_v33  ;;  %vm1769_vm1 = vcmp.lt.s32.totalorder %v1688_v53, 8  ;;  %v16643_v38 = vld [vmem:[#allocation44_spill] sm:$0xff] }
 0x3b8   :  { %v16641_v54 = vsel %vm10229_vm15, 4294967295, %v16640_v54  ;;  %v3009_v61 = vsel %vm10229_vm15, 1, %v16344_v15  ;;  %v1457_v42 = vcvt.f32.s32 %v1454_v29  ;;  %v1709_v4 = vcvt.f32.s32 %v9816_v48  ;;  %v16647_v29 = vld [vmem:[#allocation64_spill] sm:$0xff] }
 0x3b9   :  { %16639 = vst [vmem:[#allocation25_spill] sm:$0xff] %v10227_v41  ;;  %v1459_v26 = vshll.u32 %v1458_v62, 16  ;;  %3048 = vperm.xlu1 %7664, %v3009_v61   ;;  %vm15474_vm3 = vcmp.lt.s32.totalorder %v10227_v41, 32  ;;  %v1801_v56 = vmul.u32 8, %v10227_v41  ;;  %v1722_v28 = vcvt.f32.s32 %v10040_v37 }
 0x3ba   :  { %v10243_v35 = vadd.s32 %v1303_v30, %v1301_v36  ;;  %v1327_v1 = vshll.u32 %v1326_v63, 16  ;;  %v1468_v33 = vpop.xlane.xlu0 %1467  ;;  %v1466_v21 = vpop.xlane.xlu1 %1465  ;;  %vm16644_vm11 = vnez %v16643_v38  ;;  %v1541_v44 = vcvt.f32.s32 %v9756_v5 }
 0x3bb   :  { %vm1753_vm7 = vmand %vm16644_vm11, %vm15474_vm3  ;;  %v10250_v19 = vadd.s32 %v1459_v26, %v1457_v42  ;;  %v1470_v58 = vcvt.f32.s32 %v1468_v33  ;;  %v16645_v48 = vmov 0  ;;  %v1817_v37 = vadd.s32 %v1801_v56, %v1688_v53 }
 0x3bc   :  { %16642 = vst [vmem:[#allocation91_spill] sm:$0xff] %v10243_v35  ;;  %vm10253_vm9 = vmand %vm1753_vm7, %vm1769_vm1  ;;  %v1711_v30 = vshll.u32 %v1710_v31, 16  ;;  %v1325_v63 = vcvt.f32.s32 %v10054_v14  ;;  %vm1770_vm15 = vcmp.lt.s32.totalorder %v10233_v8, 8  ;;  %v1469_v36 = vcvt.f32.s32 %v1466_v21 }
 0x3bd   :  { %v16646_v48 = vsel %vm10253_vm9, 4294967295, %v16645_v48  ;;  %v1471_v62 = vshll.u32 %v1470_v58, 16  ;;  %v1833_v5 = vsel %vm10253_vm9, %v1817_v37, 4294967295  ;;  %vm15475_vm3 = vcmp.lt.s32.totalorder %v10250_v19, 32 }
 0x3be   :  { %v1712_v61 = vadd.s32 %v1711_v30, %v1709_v4  ;;  %v1723_v26 = vshll.u32 %v1722_v28, 16  ;;  %v10264_v42 = vadd.s32 %v1327_v1, %v1325_v63  ;;  %v1480_v53 = vpop.xlane.xlu0 %1479  ;;  %1874 = vperm.xlu0 %7661, %v1833_v5   ;;  %v1478_v31 = vpop.xlane.xlu1 %1477  ;;  %vm1754_vm1 = vmand %vm16597_vm14, %vm15475_vm3  ;;  %v1544_v14 = vadd.s32 %v1543_v46, %v1541_v44  ;;  %v16650_v1 = vld [vmem:[#allocation60_spill] sm:$0xff]  ;;  %v16652_v46 = vld [vmem:[#allocation42_spill] sm:$0xff] }
 0x3bf   :  { %v10271_v56 = vadd.s32 %v1471_v62, %v1469_v36  ;;  %v1482_v33 = vcvt.f32.s32 %v1480_v53  ;;  %vm10275_vm8 = vmand %vm1754_vm1, %vm1770_vm15  ;;  %v16648_v4 = vmov 0  ;;  %v1566_v28 = vcvt.f32.s32 %v9764_v43  ;;  %v16657_v30 = vld [vmem:[#allocation86_spill] sm:$0xff]  ;;  %v16659_v36 = vld [vmem:[#allocation49_spill] sm:$0xff] }
 0x3c0   :  { %v16649_v4 = vsel %vm10275_vm8, 4294967295, %v16648_v4  ;;  %v1721_v21 = vcvt.f32.s32 %v16650_v1  ;;  %v3011_v2 = vsel %vm10275_vm8, 1, %v16344_v15  ;;  %vm16651_vm14 = vcmp.eq.s32.totalorder %v9834_v25, %v16647_v29 }
 0x3c1   :  { %vm16653_vm3 = vnez %v16652_v46  ;;  %v1483_v58 = vshll.u32 %v1482_v33, 16  ;;  %v1481_v37 = vcvt.f32.s32 %v1478_v31  ;;  %3054 = vperm.xlu1 %7664, %v3011_v2   ;;  %vm15479_vm15 = vcmp.lt.s32.totalorder %v10271_v56, 32  ;;  %v16665_v2 = vld [vmem:[#allocation48_spill] sm:$0xff] }
 0x3c2   :  { %vm10289_vm7 = vmand %vm16653_vm3, %vm16651_vm14  ;;  %v1803_v43 = vmul.u32 8, %v10271_v56  ;;  %vm16656_vm1 = vcmp.lt.s32.totalorder %v10243_v35, 32  ;;  %v1565_v25 = vcvt.f32.s32 %v16657_v30  ;;  %v10300_v63 = vadd.s32 %v1723_v26, %v1721_v21  ;;  %v10302_v62 = vpop.xlane.xlu1 %3392  ;;  %v10551_v33 = vld [vmem:[%s15238_s0 + $0xb0] sm:$0xff] }
 0x3c3   :  { %vm1741_vm9 = vmand %vm16653_vm3, %vm16656_vm1  ;;  %16658 = vst [vmem:[#allocation27_spill] sm:$0xff] %v10302_v62  ;;  %vm16660_vm14 = vnez %v16659_v36  ;;  %vm1771_vm11 = vcmp.lt.s32.totalorder %v1712_v61, 8  ;;  %vm15482_vm10 = vcmp.lt.s32.totalorder %v10264_v42, 32  ;;  %v10309_v5 = vadd.s32 %v1483_v58, %v1481_v37  ;;  %v16671_v37 = vld [vmem:[#allocation46_spill] sm:$0xff] }
 0x3c4   :  { %vm1755_vm8 = vmand %vm16660_vm14, %vm15479_vm15  ;;  %v16661_v53 = vmov 0  ;;  %v1819_v31 = vadd.s32 %v1803_v43, %v1712_v61  ;;  %vm1757_vm3 = vcmp.lt.s32.totalorder %v1544_v14, 8  ;;  %v1567_v26 = vshll.u32 %v1566_v28, 16 }
 0x3c5   :  { %vm10311_vm6 = vmand %vm1755_vm8, %vm1771_vm11  ;;  %v1789_v1 = vmul.u32 8, %v10243_v35  ;;  %vm15484_vm15 = vcmp.lt.s32.totalorder %v10309_v5, 32  ;;  %vm16666_vm8 = vnez %v16665_v2  ;;  %v1791_v30 = vmul.u32 8, %v10264_v42 }
 0x3c6   :  { %v16662_v53 = vsel %vm10311_vm6, 4294967295, %v16661_v53  ;;  %vm10315_vm1 = vmand %vm1741_vm9, %vm1757_vm3  ;;  %v1835_v21 = vsel %vm10311_vm6, %v1819_v31, 4294967295  ;;  %v1568_v61 = vadd.s32 %v1567_v26, %v1565_v25  ;;  %v2875_v28 = vpop.permute.xlu1 %2874  ;;  %vm1772_vm3 = vcmp.lt.s32.totalorder %v10300_v63, 8  ;;  %v16678_v26 = vld [vmem:[#allocation80_spill] sm:$0xff] }
 0x3c7   :  { %vm10327_vm11 = vmand %vm16666_vm8, %vm15482_vm10  ;;  %1880 = vperm.xlu0 %7661, %v1835_v21   ;;  %vm15483_vm6 = vcmp.eq.s32.totalorder %v10056_v59, %v8990_v7  ;;  %vm2919_vm14 = vcmp.eq.s32.totalorder %v2875_v28, 1  ;;  %vm1207_vm10 = vcmp.eq.s32.totalorder %v9853_v11, %v16671_v37  ;;  %v1805_v43 = vadd.s32 %v1789_v1, %v1544_v14 }
 0x3c8   :  { %vm1756_vm9 = vmand %vm16599_vm4, %vm15484_vm15  ;;  %vm16672_vm4 = vcmp.lt.s32.totalorder %v10056_v59, 32  ;;  %v16673_v25 = vmov 0  ;;  %v2854_v11 = vsel %vm10289_vm7, 1, %v16344_v15  ;;  %v1807_v1 = vadd.s32 %v1791_v30, %v1568_v61 }
 0x3c9   :  { %vm10338_vm13 = vmand %vm1756_vm9, %vm1772_vm3  ;;  %vm1759_vm3 = vcmp.lt.s32.totalorder %v1568_v61, 8  ;;  %v1821_v44 = vsel %vm10315_vm1, %v1805_v43, 4294967295  ;;  %v1792_v21 = vmul.u32 8, %v10071_v52  ;;  %v16680_v2 = vmov 0  ;;  %v16683_v61 = vld [vmem:[#allocation82_spill] sm:$0xff] }
 0x3ca   :  { %vm2935_vm12 = vmand %vm2919_vm14, %vm15483_vm6  ;;  %v3013_v12 = vsel %vm10338_vm13, 1, %v16344_v15  ;;  %v2881_v31 = vpop.permute.xlu1 %2880  ;;  %vm15485_vm6 = vcmp.eq.s32.totalorder %v10071_v52, %v8990_v7  ;;  %v1794_v43 = vmul.u32 8, %v10100_v9 }
 0x3cb   :  { %vm10353_vm9 = vmand %vm2935_vm12, %vm16672_vm4  ;;  %3060 = vperm.xlu1 %7664, %v3013_v12   ;;  %2871 = vperm.xlu0 %7661, %v2854_v11   ;;  %vm2921_vm15 = vcmp.eq.s32.totalorder %v2881_v31, 1  ;;  %vm1209_vm4 = vcmp.eq.s32.totalorder %v9869_v17, %v16678_v26  ;;  %v1808_v12 = vadd.s32 %v1792_v21, %v10068_v16  ;;  %v16688_v16 = vld [vmem:[#allocation63_spill] sm:$0xff] }
 0x3cc   :  { %v16674_v25 = vsel %vm10353_vm9, 4294967295, %v16673_v25  ;;  %vm1223_vm14 = vmand %vm16666_vm8, %vm1207_vm10  ;;  %vm16679_vm10 = vcmp.lt.s32.totalorder %v10071_v52, 32  ;;  %v1810_v31 = vadd.s32 %v1794_v43, %v10093_v60  ;;  %v10690_v26 = vld [vmem:[%s15238_s0 + $0xc8] sm:$0xff] }
 0x3cd   :  { %16675 = vst [vmem:[#allocation30_spill] sm:$0xff] %v16674_v25  ;;  %vm10366_vm12 = vmand %vm10327_vm11, %vm1759_vm3  ;;  %v2856_v46 = vsel %vm1223_vm14, 1, %v16344_v15  ;;  %vm15486_vm11 = vcmp.eq.s32.totalorder %v10100_v9, %v8990_v7  ;;  %v1824_v11 = vsel %vm10083_vm5, %v1808_v12, 4294967295  ;;  %vm16695_vm5 = vnez %v16629_v3  ;;  %v16697_v12 = vld [vmem:[#allocation67_spill] sm:$0xff] }
 0x3ce   :  { %vm2937_vm7 = vmand %vm2921_vm15, %vm15485_vm6  ;;  %v2887_v17 = vpop.permute.xlu1 %2886  ;;  %vm1211_vm6 = vcmp.eq.s32.totalorder %v9885_v47, %v16683_v61  ;;  %v1823_v28 = vsel %vm10366_vm12, %v1807_v1, 4294967295  ;;  %v16693_v1 = vld [vmem:[#allocation92_spill] sm:$0xff]  ;;  %v1798_v3 = vmul.u32 8, %v10172_v22 }
 0x3cf   :  { %vm10380_vm8 = vmand %vm2937_vm7, %vm16679_vm10  ;;  %1838 = vperm.xlu1 %7664, %v1821_v44   ;;  %2877 = vperm.xlu0 %7661, %v2856_v46   ;;  %vm2923_vm3 = vcmp.eq.s32.totalorder %v2887_v17, 1  ;;  %vm15488_vm10 = vcmp.eq.s32.totalorder %v10135_v10, %v8990_v7  ;;  %v1796_v44 = vmul.u32 8, %v10135_v10  ;;  %v16694_v46 = vld [vmem:[#allocation57_spill] sm:$0xff] }
 0x3d0   :  { %v16681_v2 = vsel %vm10380_vm8, 4294967295, %v16680_v2  ;;  %vm1225_vm15 = vmand %vm16617_vm2, %vm1209_vm4  ;;  %vm16684_vm2 = vcmp.lt.s32.totalorder %v10100_v9, 32  ;;  %v3267_v21 = vsel %vm10380_vm8, %v16693_v1, 0  ;;  %v1800_v1 = vmul.u32 8, %v10210_v34 }
 0x3d1   :  { %16682 = vst [vmem:[#allocation32_spill] sm:$0xff] %v16681_v2  ;;  %vm2939_vm7 = vmand %vm2923_vm3, %vm15486_vm11  ;;  %v2858_v47 = vsel %vm1225_vm15, 1, %v16344_v15  ;;  %vm1213_vm11 = vcmp.eq.s32.totalorder %v9901_v45, %v16688_v16  ;;  %v16756_v2 = vld [vmem:[#allocation8_spill] sm:$0xff] }
 0x3d2   :  { %vm10400_vm14 = vmand %vm2939_vm7, %vm16684_vm2  ;;  %v2893_v30 = vpop.permute.xlu1 %2892  ;;  %vm15487_vm2 = vcmp.eq.s32.totalorder %v10172_v22, %v8990_v7 }
 0x3d3   :  { %v16686_v0 = vsel %vm10400_vm14, 4294967295, %v16685_v0  ;;  %1844 = vperm.xlu1 %7664, %v1823_v28   ;;  %2883 = vperm.xlu0 %7661, %v2858_v47   ;;  %vm1227_vm4 = vmand %vm16623_vm0, %vm1211_vm6  ;;  %vm2925_vm3 = vcmp.eq.s32.totalorder %v2893_v30, 1  ;;  %vm16689_vm0 = vcmp.lt.s32.totalorder %v10135_v10, 32  ;;  %v16696_v28 = vld [vmem:[#allocation21_spill] sm:$0xff]  ;;  %v1812_v47 = vadd.s32 %v1796_v44, %v10128_v39  ;;  %v16705_v39 = vld [vmem:[#allocation72_spill] sm:$0xff] }
 0x3d4   :  { %16687 = vst [vmem:[#allocation2_spill] sm:$0xff] %v16686_v0  ;;  %vm2941_vm7 = vmand %vm2925_vm3, %vm15488_vm10  ;;  %v2860_v45 = vsel %vm1227_vm4, 1, %v16344_v15  ;;  %vm1215_vm4 = vcmp.eq.s32.totalorder %v16697_v12, %v16696_v28  ;;  %v16700_v30 = vmov 0  ;;  %v1814_v44 = vadd.s32 %v1798_v3, %v10165_v20  ;;  %v16714_v12 = vld [vmem:[#allocation83_spill] sm:$0xff]  ;;  %v10674_v28 = vld [vmem:[%s15238_s0 + $0xb8] sm:$0xff] }
 0x3d5   :  { %vm10420_vm6 = vmand %vm2941_vm7, %vm16689_vm0  ;;  %vm16698_vm0 = vnez %v16621_v40  ;;  %v16704_v40 = vld [vmem:[#allocation26_spill] sm:$0xff]  ;;  %v3447_v16 = vmul.f32 2.0, %v10674_v28 }
 0x3d6   :  { %v16691_v23 = vsel %vm10420_vm6, 4294967295, %v16690_v23  ;;  %v3271_v51 = vsel %vm10420_vm6, %v16694_v46, 0  ;;  %v2899_v60 = vpop.permute.xlu1 %2898  ;;  %vm1229_vm15 = vmand %vm16695_vm5, %vm1213_vm11  ;;  %v1826_v43 = vsel %vm16698_vm0, %v1810_v31, 4294967295  ;;  %vm16699_vm11 = vcmp.lt.s32.totalorder %v10172_v22, 32  ;;  %v16711_v46 = vld [vmem:[#allocation23_spill] sm:$0xff] }
 0x3d7   :  { %16692 = vst [vmem:[#allocation81_spill] sm:$0xff] %v16691_v23  ;;  %1847 = vperm.xlu1 %7664, %v1824_v11   ;;  %2889 = vperm.xlu0 %7661, %v2860_v45   ;;  %v3283_v17 = vadd.s32 %v3271_v51, %v3267_v21  ;;  %vm2927_vm3 = vcmp.eq.s32.totalorder %v2899_v60, 1  ;;  %v2862_v11 = vsel %vm1229_vm15, 1, %v16344_v15  ;;  %vm15491_vm0 = vcmp.eq.s32.totalorder %v10210_v34, %v8990_v7  ;;  %v16713_v60 = vld [vmem:[#allocation53_spill] sm:$0xff] }
 0x3d8   :  { %vm2943_vm7 = vmand %vm2927_vm3, %vm15487_vm2  ;;  %vm16703_vm3 = vnez %v16635_v32  ;;  %vm1217_vm6 = vcmp.eq.s32.totalorder %v16705_v39, %v16704_v40  ;;  %vm16707_vm15 = vcmp.lt.s32.totalorder %v10210_v34, 32  ;;  %v16708_v32 = vmov 0 }
 0x3d9   :  { %vm10446_vm5 = vmand %vm2943_vm7, %vm16699_vm11  ;;  %vm16706_vm11 = vnez %v16628_v27  ;;  %v1804_v39 = vmul.u32 8, %v10309_v5 }
 0x3da   :  { %v16701_v30 = vsel %vm10446_vm5, 4294967295, %v16700_v30  ;;  %v2905_v45 = vpop.permute.xlu1 %2904  ;;  %vm1231_vm2 = vmand %vm16703_vm3, %vm1215_vm4  ;;  %v1828_v31 = vsel %vm16706_vm11, %v1812_v47, 4294967295  ;;  %vm15492_vm11 = vcmp.eq.s32.totalorder %v10250_v19, %v8990_v7  ;;  %v1816_v47 = vadd.s32 %v1800_v1, %v10202_v55  ;;  %v16726_v1 = vld [vmem:[#allocation45_spill] sm:$0xff] }
 0x3db   :  { %16702 = vst [vmem:[#allocation55_spill] sm:$0xff] %v16701_v30  ;;  %1853 = vperm.xlu1 %7664, %v1826_v43   ;;  %2895 = vperm.xlu0 %7661, %v2862_v11   ;;  %vm2929_vm10 = vcmp.eq.s32.totalorder %v2905_v45, 1  ;;  %v2864_v21 = vsel %vm1231_vm2, 1, %v16344_v15  ;;  %v10497_v11 = vld [vmem:[%s15238_s0 + $0x88] sm:$0xff]  ;;  %v10716_v30 = vadd.s32 128, %v8990_v7 }
 0x3dc   :  { %vm2945_vm7 = vmand %vm2929_vm10, %vm15491_vm0  ;;  %vm16712_vm10 = vnez %v16643_v38  ;;  %vm16715_vm0 = vnez %v16634_v13  ;;  %v1802_v38 = vmul.u32 8, %v10250_v19 }
 0x3dd   :  { %vm10466_vm4 = vmand %vm2945_vm7, %vm16707_vm15  ;;  %vm1219_vm15 = vcmp.eq.s32.totalorder %v16714_v12, %v16713_v60  ;;  %v1830_v43 = vsel %vm16715_vm0, %v1814_v44, 4294967295  ;;  %vm16720_vm0 = vnez %v16659_v36  ;;  %v16723_v36 = vmov 0  ;;  %16755 = vst [vmem:[#allocation49_spill] sm:$0xff] %v10716_v30 }
 0x3de   :  { %v16709_v32 = vsel %vm10466_vm4, 4294967295, %v16708_v32  ;;  %v3275_v51 = vsel %vm10466_vm4, %v16711_v46, 0  ;;  %v2911_v27 = vpop.permute.xlu1 %2910  ;;  %vm1233_vm3 = vmand %vm16712_vm10, %vm1217_vm6  ;;  %vm16716_vm6 = vcmp.lt.s32.totalorder %v10250_v19, 32  ;;  %v1818_v45 = vadd.s32 %v1802_v38, %v10233_v8 }
 0x3df   :  { %16710 = vst [vmem:[#allocation70_spill] sm:$0xff] %v16709_v32  ;;  %1859 = vperm.xlu1 %7664, %v1828_v31   ;;  %2901 = vperm.xlu0 %7661, %v2864_v21   ;;  %v3287_v20 = vadd.s32 %v3283_v17, %v3275_v51  ;;  %vm2931_vm7 = vcmp.eq.s32.totalorder %v2911_v27, 1  ;;  %v16717_v17 = vmov 0  ;;  %v2866_v3 = vsel %vm1233_vm3, 1, %v16344_v15 }
 0x3e0   :  { %vm2947_vm2 = vmand %vm2931_vm7, %vm15492_vm11  ;;  %vm15584_vm11 = vcmp.eq.s32.totalorder %v10309_v5, %v8990_v7  ;;  %vm16721_vm3 = vnez %v16641_v54  ;;  %v3441_v31 = vmul.f32 2.0, %v10497_v11  ;;  %v10521_v54 = vld [vmem:[%s15238_s0 + $0x90] sm:$0xff]  ;;  %v1820_v51 = vadd.s32 %v1804_v39, %v10300_v63 }
 0x3e1   :  { %vm10489_vm10 = vmand %vm2947_vm2, %vm16716_vm6  ;;  %v1832_v55 = vsel %vm16721_vm3, %v1816_v47, 4294967295  ;;  %v3442_v12 = vmul.f32 2.0, %v10521_v54  ;;  %v2998_v47 = vsel %vm10315_vm1, 1, %v16344_v15 }
 0x3e2   :  { %v16718_v17 = vsel %vm10489_vm10, 4294967295, %v16717_v17  ;;  %v2917_v13 = vpop.permute.xlu1 %2916  ;;  %vm1235_vm7 = vmand %vm16720_vm0, %vm1219_vm15  ;;  %vm16722_vm10 = vcmp.lt.s32.totalorder %v10309_v5, 32  ;;  %v3457_v27 = vfloor.f32 %v3441_v31  ;;  %v1836_v63 = vsel %vm10338_vm13, %v1820_v51, 4294967295 }
 0x3e3   :  { %16719 = vst [vmem:[#allocation19_spill] sm:$0xff] %v16718_v17  ;;  %1865 = vperm.xlu1 %7664, %v1830_v43   ;;  %2907 = vperm.xlu0 %7661, %v2866_v3   ;;  %vm2933_vm2 = vcmp.eq.s32.totalorder %v2917_v13, 1  ;;  %v2868_v44 = vsel %vm1235_vm7, 1, %v16344_v15  ;;  %v10535_v43 = vld [vmem:[%s15238_s0 + $0xa0] sm:$0xff]  ;;  %v3458_v3 = vfloor.f32 %v3442_v12  ;;  %v3000_v13 = vsel %vm10366_vm12, 1, %v16344_v15 }
 0x3e4   :  { %vm2949_vm6 = vmand %vm2933_vm2, %vm15584_vm11  ;;  %v7583_v38 = vtrunc.f32 %v3457_v27  ;;  %v3446_v31 = vmul.f32 2.0, %v10551_v33  ;;  %vm16732_vm13 = vnez %v16619_v57  ;;  %vm16735_vm12 = vnez %v16625_v18 }
 0x3e5   :  { %vm10513_vm15 = vmand %vm2949_vm6, %vm16722_vm10  ;;  %vm16728_vm10 = vnez %v16649_v4  ;;  %v3444_v4 = vmul.f32 2.0, %v10535_v43  ;;  %v7585_v58 = vtrunc.f32 %v3458_v3  ;;  %v3002_v14 = vsel %vm16732_vm13, 1, %v16344_v15 }
 0x3e6   :  { %v16724_v36 = vsel %vm10513_vm15, 4294967295, %v16723_v36  ;;  %v3279_v8 = vsel %vm10513_vm15, %v16726_v1, 0  ;;  %v1834_v46 = vsel %vm16728_vm10, %v1818_v45, 4294967295  ;;  %v10555_v39 = vcvt.f32.s32 %v7583_v38  ;;  %v10565_v1 = vld [vmem:[%s15238_s0 + $0xc0] sm:$0xff] }
 0x3e7   :  { %16725 = vst [vmem:[#allocation20_spill] sm:$0xff] %v16724_v36  ;;  %1871 = vperm.xlu1 %7664, %v1832_v55   ;;  %2913 = vperm.xlu0 %7661, %v2868_v44   ;;  %v10526_v21 = vadd.s32 %v3287_v20, %v3279_v8  ;;  %v10540_v20 = vpop.permute.xlu1 %3305  ;;  %v3460_v55 = vfloor.f32 %v3444_v4  ;;  %v16731_v44 = vmov 2   ;;  %v16733_v8 = vld [vmem:[#allocation37_spill] sm:$0xff]  ;;  %v10569_v51 = vcvt.f32.s32 %v7585_v58 }
 0x3e8   :  { %16729 = vst [vmem:[#allocation61_spill] sm:$0xff] %v10540_v20  ;;  %16730 = vst [vmem:[#allocation62_spill] sm:$0xff] %v10555_v39  ;;  %vm15519_vm1 = vcmp.ge.s32.totalorder %v10555_v39, 0  ;;  %v3462_v27 = vfloor.f32 %v3446_v31  ;;  %v3448_v12 = vmul.f32 2.0, %v10565_v1  ;;  %v3004_v57 = vsel %vm16735_vm12, 1, %v16344_v15  ;;  %v10596_v31 = vld [vmem:[%s15238_s0 + $0xe0] sm:$0xff] }
 0x3e9   :  { %16727 = vst [vmem:[#allocation50_spill] sm:$0xff] %v10526_v21  ;;  %16734 = vst [vmem:[#allocation22_spill] sm:$0xff] %v10569_v51  ;;  %v3601_v38 = vsel %vm15519_vm1, 1, %v16344_v15  ;;  %vm15539_vm0 = vcmp.ge.s32.totalorder %v10569_v51, 0  ;;  %vm16739_vm7 = vnez %v16632_v24  ;;  %vm16741_vm6 = vnez %v16638_v50  ;;  %v6944_v50 = vld [vmem:[%s15238_s0 + $0x80] sm:$0xff] }
 0x3ea   :  { %v7593_v18 = vtrunc.f32 %v3462_v27  ;;  %v3006_v58 = vsel %vm16739_vm7, 1, %v16344_v15  ;;  %vm16743_vm10 = vnez %v16646_v48  ;;  %vm16746_vm12 = vnez %v16662_v53  ;;  %v10654_v53 = vld [vmem:[%s15238_s0 + $0x98] sm:$0xff] }
 0x3eb   :  { %1877 = vperm.xlu1 %7664, %v1834_v46   ;;  %3015 = vperm.xlu0 %7661, %v2998_v47   ;;  %v10553_v45 = vpop.permute.xlu1 %3308  ;;  %v7589_v46 = vtrunc.f32 %v3460_v55  ;;  %v10578_v47 = vld [vmem:[%s15238_s0 + $0xd0] sm:$0xff]  ;;  %v3012_v48 = vsel %vm16746_vm12, 1, %v16344_v15  ;;  %vm15540_vm12 = vcmp.lt.s32.totalorder %v10569_v51, 16  ;;  %v3463_v17 = vfloor.f32 %v3447_v16 }
 0x3ec   :  { %v3450_v55 = vmul.f32 2.0, %v10578_v47  ;;  %v6961_v32 = vadd.f32 4.0, %v6944_v50  ;;  %v3682_v23 = vsel %vm15540_vm12, 1, %v16344_v15  ;;  %v6963_v16 = vadd.f32 4.0, %v10521_v54 }
 0x3ed   :  { %v10586_v3 = vcvt.f32.s32 %v7589_v46  ;;  %v10610_v46 = vcvt.f32.s32 %v7593_v18  ;;  %v7595_v20 = vtrunc.f32 %v3463_v17  ;;  %v6967_v17 = vadd.f32 4.0, %v10551_v33 }
 0x3ee   :  { %vm15620_vm11 = vcmp.eq.s32.totalorder %v10264_v42, %v8990_v7 }
 0x3ef   :  { %1883 = vperm.xlu1 %7664, %v1836_v63   ;;  %3021 = vperm.xlu0 %7661, %v3000_v13   ;;  %v10580_v4 = vpop.permute.xlu1 %3314  ;;  %v16737_v63 = vld [vmem:[#allocation39_spill] sm:$0xff]  ;;  %16738 = vst [vmem:[#allocation78_spill] sm:$0xff] %v10586_v3  ;;  %v3464_v13 = vfloor.f32 %v3448_v12  ;;  %vm15510_vm2 = vcmp.ge.s32.totalorder %v10586_v3, 0  ;;  %16740 = vst [vmem:[#allocation54_spill] sm:$0xff] %v10610_v46  ;;  %v3466_v12 = vfloor.f32 %v3450_v55  ;;  %vm15522_vm3 = vcmp.ge.s32.totalorder %v10610_v46, 0 }
 0x3f0   :  { %16736 = vst [vmem:[#allocation77_spill] sm:$0xff] %v10580_v4  ;;  %v3504_v4 = vmul.f32 0.125, %v6961_v32  ;;  %v3506_v32 = vmul.f32 0.125, %v6963_v16 }
 0x3f1   :  { %v7597_v27 = vtrunc.f32 %v3464_v13  ;;  %v7601_v13 = vtrunc.f32 %v3466_v12  ;;  %v3440_v12 = vmul.f32 2.0, %v6944_v50 }
 0x3f3   :  { %7665 = vset.pattern.permute.xlu1 %v16731_v44  ;;  %3027 = vperm.xlu0 %7661, %v3002_v14   ;;  %v3602_v14 = vsel %vm15539_vm0, 1, %v16344_v15  ;;  %v10608_v24 = vpop.permute.xlu1 %3320  ;;  %v10622_v18 = vcvt.f32.s32 %v7597_v27  ;;  %v3606_v27 = vsel %vm15522_vm3, 1, %v16344_v15  ;;  %v3449_v44 = vmul.f32 2.0, %v10690_v26 }
 0x3f4   :  { %3168 = vperm.xlu1 %7665, %v16733_v8   ;;  %v10606_v8 = vld [vmem:[%s15238_s0 + $0xf0] sm:$0xff]  ;;  %vm15576_vm0 = vcmp.lt.s32.totalorder %v10555_v39, 16 }
 0x3f5   :  { %16742 = vst [vmem:[#allocation47_spill] sm:$0xff] %v10622_v18  ;;  %vm15495_vm13 = vcmp.ge.s32.totalorder %v10622_v18, 0  ;;  %v3465_v0 = vfloor.f32 %v3449_v44 }
 0x3f7   :  { %3033 = vperm.xlu0 %7661, %v3004_v57   ;;  %v3452_v57 = vmul.f32 2.0, %v10596_v31  ;;  %v7599_v44 = vtrunc.f32 %v3465_v0 }
 0x3f8   :  { %3174 = vperm.xlu1 %7665, %v16737_v63   ;;  %v3008_v63 = vsel %vm16741_vm6, 1, %v16344_v15 }
 0x3f9   :  { %v3468_v55 = vfloor.f32 %v3452_v57  ;;  %v10637_v57 = vcvt.f32.s32 %v7601_v13 }
 0x3fb   :  { %3039 = vperm.xlu0 %7661, %v3006_v58   ;;  %v3604_v58 = vsel %vm15510_vm2, 1, %v16344_v15  ;;  %16745 = vst [vmem:[#allocation18_spill] sm:$0xff] %v10637_v57  ;;  %v7605_v21 = vtrunc.f32 %v3468_v55  ;;  %vm15518_vm7 = vcmp.ge.s32.totalorder %v10637_v57, 0  ;;  %v16748_v55 = vld [vmem:[#allocation3_spill] sm:$0xff]  ;;  %vm15538_vm2 = vcmp.lt.s32.totalorder %v10610_v46, 16 }
 0x3fc   :  { %3618 = vrot.lane.b32.xlu1 %v3601_v38, %s7694_s9  ;;  %v3454_v38 = vmul.f32 2.0, %v10606_v8  ;;  %v3686_v54 = vsel %vm15538_vm2, 1, %v16344_v15 }
 0x3fd   :  { %v10649_v13 = vcvt.f32.s32 %v7605_v21  ;;  %v3610_v21 = vsel %vm15518_vm7, 1, %v16344_v15  ;;  %vm15530_vm7 = vcmp.lt.s32.totalorder %v10637_v57, 16  ;;  %v6971_v57 = vadd.f32 4.0, %v10578_v47 }
 0x3fe   :  { %v3470_v62 = vfloor.f32 %v3454_v38  ;;  %v3608_v38 = vsel %vm15495_vm13, 1, %v16344_v15 }
 0x3ff   :  { %3045 = vperm.xlu0 %7661, %v3008_v63   ;;  %v10630_v63 = vpop.permute.xlu1 %3326  ;;  %16747 = vst [vmem:[#allocation40_spill] sm:$0xff] %v10649_v13  ;;  %vm15494_vm6 = vcmp.ge.s32.totalorder %v10649_v13, 0 }
 0x400   :  { %3620 = vrot.lane.b32.xlu1 %v3602_v14, %s7694_s9  ;;  %v3010_v14 = vsel %vm16743_vm10, 1, %v16344_v15  ;;  %16744 = vst [vmem:[#allocation52_spill] sm:$0xff] %v10630_v63 }
 0x403   :  { %3051 = vperm.xlu0 %7661, %v3010_v14   ;;  %v7609_v14 = vtrunc.f32 %v3470_v62  ;;  %v10646_v60 = vpop.permute.xlu1 %3332  ;;  %v10659_v62 = vld [vmem:[%s15238_s0 + $0xa8] sm:$0xff] }
 0x404   :  { %3624 = vrot.lane.b32.xlu1 %v3604_v58, %s7694_s9  ;;  %v3456_v58 = vfloor.f32 %v3440_v12  ;;  %v3445_v40 = vmul.f32 2.0, %v10659_v62 }
 0x406   :  { %v7581_v12 = vtrunc.f32 %v3456_v58  ;;  %v3461_v37 = vfloor.f32 %v3445_v40 }
 0x407   :  { %3057 = vperm.xlu0 %7661, %v3012_v48   ;;  %v3443_v48 = vmul.f32 2.0, %v10654_v53 }
 0x408   :  { %3628 = vrot.lane.b32.xlu1 %v3606_v27, %s7694_s9  ;;  %v10663_v27 = vcvt.f32.s32 %v7609_v14  ;;  %v16751_v14 = vld [vmem:[#allocation4_spill] sm:$0xff]  ;;  %v10684_v58 = vcvt.f32.s32 %v7581_v12  ;;  %v16753_v12 = vld [vmem:[#allocation6_spill] sm:$0xff]  ;;  %v7591_v29 = vtrunc.f32 %v3461_v37 }
 0x409   :  { %v3459_v61 = vfloor.f32 %v3443_v48 }
 0x40a   :  { %16749 = vst [vmem:[#allocation44_spill] sm:$0xff] %v10663_v27  ;;  %vm15509_vm10 = vcmp.ge.s32.totalorder %v10663_v27, 0  ;;  %16752 = vst [vmem:[#allocation42_spill] sm:$0xff] %v10684_v58  ;;  %vm15521_vm13 = vcmp.lt.s32.totalorder %v10684_v58, 16 }
 0x40b   :  { %3302 = vperm.xlu0 %7661, %v16748_v55   ;;  %v10676_v55 = vpop.permute.xlu1 %3338  ;;  %v3614_v40 = vsel %vm15509_vm10, 1, %v16344_v15  ;;  %v7587_v48 = vtrunc.f32 %v3459_v61  ;;  %vm15520_vm10 = vcmp.ge.s32.totalorder %v10684_v58, 0  ;;  %v10731_v61 = vld [vmem:[%s15238_s0 + $0xf8] sm:$0xff] }
 0x40c   :  { %3632 = vrot.lane.b32.xlu1 %v3608_v38, %s7694_s9  ;;  %16750 = vst [vmem:[#allocation60_spill] sm:$0xff] %v10676_v55  ;;  %v3612_v38 = vsel %vm15494_vm6, 1, %v16344_v15  ;;  %vm15517_vm6 = vcmp.lt.s32.totalorder %v10586_v3, 16  ;;  %v10744_v41 = vsel %vm15520_vm10, 1, %v16344_v15  ;;  %v16761_v3 = vld [vmem:[#allocation12_spill] sm:$0xff] }
 0x40d   :  { %v3684_v37 = vsel %vm15517_vm6, 1, %v16344_v15  ;;  %v10737_v50 = vcvt.f32.s32 %v7587_v48  ;;  %v3455_v48 = vmul.f32 2.0, %v10731_v61  ;;  %vm15527_vm6 = vcmp.lt.s32.totalorder %v10622_v18, 16 }
 0x40e   :  { %v10764_v16 = vsel %vm15527_vm6, 1, %v16344_v15  ;;  %vm16763_vm6 = vcmp.eq.s32.totalorder %v10056_v59, %v8990_v7  ;;  %v16769_v59 = vld [vmem:[#allocation14_spill] sm:$0xff] }
 0x40f   :  { %3311 = vperm.xlu0 %7661, %v16751_v14   ;;  %v10700_v14 = vld [vmem:[%s15238_s0 + $0xe8] sm:$0xff]  ;;  %v10711_v36 = vpop.permute.xlu1 %3344  ;;  %16757 = vst [vmem:[#allocation48_spill] sm:$0xff] %v10737_v50  ;;  %vm15528_vm1 = vcmp.ge.s32.totalorder %v10737_v50, 0  ;;  %v3471_v33 = vfloor.f32 %v3455_v48 }
 0x410   :  { %3636 = vrot.lane.b32.xlu1 %v3610_v21, %s7694_s9  ;;  %v10695_v21 = vld [vmem:[%s15238_s0 + $0xd8] sm:$0xff]  ;;  %16754 = vst [vmem:[#allocation86_spill] sm:$0xff] %v10711_v36  ;;  %v16759_v36 = vld [vmem:[#allocation10_spill] sm:$0xff]  ;;  %v10771_v0 = vsel %vm15528_vm1, 1, %v16344_v15 }
 0x413   :  { %3317 = vperm.xlu0 %7661, %v16753_v12   ;;  %v3451_v12 = vmul.f32 2.0, %v10695_v21  ;;  %v3019_v25 = vpop.permute.xlu1 %3018 }
 0x414   :  { %3640 = vrot.lane.b32.xlu1 %v3612_v38, %s7694_s9  ;;  %v3453_v38 = vmul.f32 2.0, %v10700_v14  ;;  %vm3063_vm3 = vcmp.eq.s32.totalorder %v3019_v25, 1  ;;  %v6969_v25 = vadd.f32 4.0, %v10565_v1 }
 0x415   :  { %v3467_v55 = vfloor.f32 %v3451_v12  ;;  %vm10794_vm1 = vmand %vm3063_vm3, %vm16763_vm6  ;;  %vm15541_vm6 = vcmp.lt.s32.totalorder %v10663_v27, 16 }
 0x416   :  { %v3469_v63 = vfloor.f32 %v3453_v38 }
 0x417   :  { %3323 = vperm.xlu0 %7661, %v16756_v2   ;;  %v3680_v2 = vsel %vm15521_vm13, 1, %v16344_v15  ;;  %vm15535_vm13 = vcmp.lt.s32.totalorder %v10649_v13, 16 }
 0x418   :  { %3644 = vrot.lane.b32.xlu1 %v3614_v40, %s7694_s9  ;;  %v10739_v40 = vcvt.f32.s32 %v7591_v29  ;;  %v6965_v29 = vadd.f32 4.0, %v10535_v43  ;;  %v3025_v12 = vpop.permute.xlu1 %3024  ;;  %v10759_v43 = vcvt.f32.s32 %v7595_v20  ;;  %v7607_v38 = vtrunc.f32 %v3469_v63 }
 0x419   :  { %v3522_v20 = vfloor.f32 %v3506_v32  ;;  %v3510_v63 = vmul.f32 0.125, %v6967_v17  ;;  %vm3065_vm12 = vcmp.eq.s32.totalorder %v3025_v12, 1 }
 0x41a   :  { %16758 = vst [vmem:[#allocation92_spill] sm:$0xff] %v10739_v40  ;;  %vm15529_vm10 = vcmp.ge.s32.totalorder %v10739_v40, 0  ;;  %16760 = vst [vmem:[#allocation57_spill] sm:$0xff] %v10759_v43  ;;  %v3508_v46 = vmul.f32 0.125, %v6965_v29  ;;  %v10801_v32 = vcvt.f32.s32 %v7607_v38  ;;  %v3512_v38 = vmul.f32 0.125, %v6969_v25 }
 0x41b   :  { %3329 = vperm.xlu0 %7661, %v16759_v36   ;;  %v7603_v36 = vtrunc.f32 %v3467_v55  ;;  %v10789_v55 = vsel %vm15535_vm13, 1, %v16344_v15  ;;  %vm16768_vm13 = vcmp.eq.s32.totalorder %v10100_v9, %v8990_v7  ;;  %v3526_v18 = vfloor.f32 %v3510_v63  ;;  %v16772_v63 = vld [vmem:[#allocation16_spill] sm:$0xff] }
 0x41c   :  { %3696 = vrot.lane.b32.xlu1 %v3680_v2, %s7694_s9  ;;  %v3520_v2 = vfloor.f32 %v3504_v4  ;;  %v10777_v4 = vsel %vm15529_vm10, 1, %v16344_v15  ;;  %vm15545_vm10 = vcmp.ge.s32.totalorder %v10759_v43, 0  ;;  %16767 = vst [vmem:[#allocation23_spill] sm:$0xff] %v10801_v32  ;;  %v3524_v13 = vfloor.f32 %v3508_v46 }
 0x41d   :  { %v10799_v29 = vcvt.f32.s32 %v7603_v36  ;;  %v7617_v36 = vtrunc.f32 %v3522_v20  ;;  %v3514_v20 = vmul.f32 0.125, %v6971_v57  ;;  %v10829_v25 = vsel %vm15545_vm10, 1, %v16344_v15 }
 0x41e   :  { %v7613_v17 = vtrunc.f32 %v3520_v2  ;;  %v3095_v2 = vsel %vm10794_vm1, 1, %v16344_v15  ;;  %v10841_v57 = vsel %vm15541_vm6, 1, %v16344_v15  ;;  %vm16774_vm1 = vcmp.eq.s32.totalorder %v10071_v52, %v8990_v7 }
 0x41f   :  { %3335 = vperm.xlu0 %7661, %v16761_v3   ;;  %v10782_v3 = vsel %vm15530_vm7, 1, %v16344_v15  ;;  %16766 = vst [vmem:[#allocation72_spill] sm:$0xff] %v10799_v29  ;;  %v10831_v1 = vcvt.f32.s32 %v7617_v36  ;;  %vm15575_vm10 = vcmp.lt.s32.totalorder %v10737_v50, 16  ;;  %v6968_v50 = vadd.f32 4.0, %v10674_v28 }
 0x420   :  { %3700 = vrot.lane.b32.xlu1 %v3682_v23, %s7694_s9  ;;  %v10784_v23 = vcvt.f32.s32 %v7599_v44  ;;  %v3031_v48 = vpop.permute.xlu1 %3030  ;;  %v7611_v44 = vtrunc.f32 %v3471_v33  ;;  %v10820_v47 = vcvt.f32.s32 %v7613_v17  ;;  %v7621_v33 = vtrunc.f32 %v3524_v13 }
 0x421   :  { %vm3067_vm7 = vcmp.eq.s32.totalorder %v3031_v48, 1  ;;  %16773 = vst [vmem:[#allocation37_spill] sm:$0xff] %v10831_v1  ;;  %v7625_v48 = vtrunc.f32 %v3526_v18  ;;  %v10846_v13 = vsel %vm15576_vm0, 1, %v16344_v15 }
 0x422   :  { %16762 = vst [vmem:[#allocation67_spill] sm:$0xff] %v10784_v23  ;;  %vm3083_vm3 = vmand %vm3067_vm7, %vm16768_vm13  ;;  %vm15542_vm2 = vcmp.ge.s32.totalorder %v10784_v23, 0  ;;  %vm15543_vm13 = vcmp.ge.s32.totalorder %v10799_v29, 0  ;;  %vm15544_vm7 = vcmp.ge.s32.totalorder %v10801_v32, 0  ;;  %vm3760_vm6 = vcmp.ge.s32.totalorder %v10820_v47, 0 }
 0x423   :  { %3341 = vperm.xlu0 %7661, %v16769_v59   ;;  %v3099_v46 = vsel %vm3083_vm3, 1, %v16344_v15  ;;  %16770 = vst [vmem:[#allocation83_spill] sm:$0xff] %v10820_v47  ;;  %v3528_v59 = vfloor.f32 %v3512_v38  ;;  %v10836_v12 = vsel %vm15542_vm2, 1, %v16344_v15  ;;  %vm10852_vm3 = vmand %vm3065_vm12, %vm16774_vm1  ;;  %v10864_v36 = vsel %vm15544_vm7, 1, %v16344_v15 }
 0x424   :  { %3704 = vrot.lane.b32.xlu1 %v3684_v37, %s7694_s9  ;;  %v10816_v9 = vadd.s32 %v3099_v46, %v3095_v2  ;;  %v10822_v37 = vcvt.f32.s32 %v7611_v44  ;;  %v10859_v44 = vsel %vm15543_vm13, 1, %v16344_v15  ;;  %v10870_v52 = vcvt.f32.s32 %v7621_v33 }
 0x425   :  { %v3530_v38 = vfloor.f32 %v3514_v20  ;;  %vm16779_vm1 = vcmp.eq.s32.totalorder %v10135_v10, %v8990_v7  ;;  %vm3762_vm7 = vcmp.ge.s32.totalorder %v10831_v1, 0  ;;  %v10881_v2 = vcvt.f32.s32 %v7625_v48 }
 0x426   :  { %16771 = vst [vmem:[#allocation45_spill] sm:$0xff] %v10822_v37  ;;  %vm15550_vm12 = vcmp.ge.s32.totalorder %v10822_v37, 0  ;;  %16778 = vst [vmem:[#allocation3_spill] sm:$0xff] %v10870_v52  ;;  %v7629_v46 = vtrunc.f32 %v3528_v59  ;;  %v3097_v33 = vsel %vm10852_vm3, 1, %v16344_v15  ;;  %v6962_v59 = vadd.f32 4.0, %v10497_v11 }
 0x427   :  { %3347 = vperm.xlu0 %7661, %v16772_v63   ;;  %16780 = vst [vmem:[#allocation4_spill] sm:$0xff] %v10881_v2  ;;  %v6975_v63 = vadd.f32 4.0, %v10606_v8  ;;  %v10898_v48 = vsel %vm15550_vm12, 1, %v16344_v15  ;;  %vm15568_vm3 = vcmp.lt.s32.totalorder %v10759_v43, 16  ;;  %v7633_v8 = vtrunc.f32 %v3530_v38 }
 0x428   :  { %3708 = vrot.lane.b32.xlu1 %v3686_v54, %s7694_s9  ;;  %v6973_v54 = vadd.f32 4.0, %v10596_v31  ;;  %v3037_v17 = vpop.permute.xlu1 %3036  ;;  %v10867_v31 = vpop.xlane.xlu0 %3394  ;;  %v10918_v11 = vsel %vm15575_vm10, 1, %v16344_v15  ;;  %v10922_v38 = vcvt.f32.s32 %v7629_v46  ;;  %v10936_v27 = vsel %vm15568_vm3, 1, %v16344_v15 }
 0x429   :  { %16777 = vst [vmem:[#allocation39_spill] sm:$0xff] %v10867_v31  ;;  %vm3069_vm2 = vcmp.eq.s32.totalorder %v3037_v17, 1  ;;  %v6964_v17 = vadd.f32 4.0, %v10654_v53  ;;  %v3505_v53 = vmul.f32 0.125, %v6962_v59  ;;  %vm3858_vm3 = vcmp.lt.s32.totalorder %v10831_v1, 1 }
 0x42a   :  { %vm3085_vm13 = vmand %vm3069_vm2, %vm16779_vm1  ;;  %v3516_v20 = vmul.f32 0.125, %v6973_v54  ;;  %vm3764_vm2 = vcmp.ge.s32.totalorder %v10870_v52, 0  ;;  %v10913_v54 = vsel %vm3762_vm7, 1, %v16344_v15  ;;  %16781 = vst [vmem:[#allocation6_spill] sm:$0xff] %v10922_v38  ;;  %vm15561_vm1 = vcmp.lt.s32.totalorder %v10784_v23, 16  ;;  %v7691_v23 = vld [vmem:[%s15239_s1] sm:$0xff] }
 0x42b   :  { %3616 = vrot.lane.b32.xlu0 %v10744_v41, %s7694_s9  ;;  %v3101_v10 = vsel %vm3085_vm13, 1, %v16344_v15  ;;  %vm15574_vm13 = vcmp.lt.s32.totalorder %v10739_v40, 16  ;;  %v3507_v28 = vmul.f32 0.125, %v6964_v17  ;;  %v3521_v43 = vfloor.f32 %v3505_v53 }
 0x42c   :  { %3712 = vrot.lane.b32.xlu1 %v10764_v16, %s7694_s9  ;;  %v10888_v41 = vadd.s32 %v3101_v10, %v3097_v33  ;;  %v10893_v16 = vsel %vm3760_vm6, 1, %v16344_v15  ;;  %v10901_v18 = vpop.permute.xlu0 %1841  ;;  %vm3766_vm6 = vcmp.ge.s32.totalorder %v10881_v2, 0  ;;  %v10926_v10 = vsel %vm3764_vm2, 1, %v16344_v15 }
 0x42d   :  { %v10931_v31 = vsel %vm15574_vm13, 1, %v16344_v15  ;;  %vm16783_vm2 = vcmp.eq.s32.totalorder %v10172_v22, %v8990_v7  ;;  %v10954_v59 = vsel %vm3766_vm6, 1, %v16344_v15  ;;  %v6970_v22 = vadd.f32 4.0, %v10690_v26 }
 0x42e   :  { %vm15562_vm6 = vcmp.lt.s32.totalorder %v10799_v29, 16  ;;  %v10971_v40 = vand.u32 4294901760, %v7691_v23  ;;  %v6972_v53 = vadd.f32 4.0, %v10695_v21  ;;  %v7615_v21 = vtrunc.f32 %v3521_v43 }
 0x42f   :  { %3622 = vrot.lane.b32.xlu0 %v10771_v0, %s7694_s9  ;;  %v3532_v0 = vfloor.f32 %v3516_v20  ;;  %v10940_v20 = vcvt.f32.s32 %v7633_v8  ;;  %vm16794_vm13 = vcmp.eq.s32.totalorder %v10250_v19, %v8990_v7 }
 0x430   :  { %3716 = vrot.lane.b32.xlu1 %v10782_v3, %s7694_s9  ;;  %v3518_v3 = vmul.f32 0.125, %v6975_v63  ;;  %v3043_v33 = vpop.permute.xlu1 %3042  ;;  %v10938_v46 = vpop.permute.xlu0 %1850  ;;  %v6966_v63 = vadd.f32 4.0, %v10659_v62  ;;  %v10959_v62 = vsel %vm15561_vm1, 1, %v16344_v15  ;;  %16784 = vst [vmem:[#allocation10_spill] sm:$0xff] %v10971_v40  ;;  %vm3856_vm1 = vcmp.lt.s32.totalorder %v10820_v47, 1 }
 0x431   :  { %vm3071_vm7 = vcmp.eq.s32.totalorder %v3043_v33, 1  ;;  %16782 = vst [vmem:[#allocation8_spill] sm:$0xff] %v10940_v20 }
 0x432   :  { %vm3087_vm12 = vmand %vm3071_vm7, %vm16783_vm2  ;;  %vm3768_vm7 = vcmp.ge.s32.totalorder %v10922_v38, 0  ;;  %v3534_v33 = vfloor.f32 %v3518_v3  ;;  %vm15567_vm2 = vcmp.lt.s32.totalorder %v10801_v32, 16  ;;  %v3509_v26 = vmul.f32 0.125, %v6966_v63 }
 0x433   :  { %3626 = vrot.lane.b32.xlu0 %v10777_v4, %s7694_s9  ;;  %v3103_v8 = vsel %vm3087_vm12, 1, %v16344_v15  ;;  %v7637_v4 = vtrunc.f32 %v3532_v0  ;;  %vm3770_vm12 = vcmp.ge.s32.totalorder %v10940_v20, 0  ;;  %v3511_v0 = vmul.f32 0.125, %v6968_v50 }
 0x434   :  { %3720 = vrot.lane.b32.xlu1 %v10789_v55, %s7694_s9  ;;  %v10965_v55 = vadd.s32 %v10816_v9, %v3103_v8  ;;  %v10973_v17 = vpop.permute.xlu0 %1856  ;;  %v3523_v9 = vfloor.f32 %v3507_v28  ;;  %v3513_v3 = vmul.f32 0.125, %v6970_v22  ;;  %v6974_v8 = vadd.f32 4.0, %v10700_v14 }
 0x435   :  { %v10986_v20 = vsel %vm3768_vm7, 1, %v16344_v15  ;;  %v10988_v35 = vcvt.f32.s32 %v7637_v4  ;;  %v10993_v50 = vsel %vm15562_vm6, 1, %v16344_v15  ;;  %v10996_v63 = vsel %vm3770_vm12, 1, %v16344_v15 }
 0x436   :  { %v11000_v14 = vsub.f32 %v7691_v23, %v10971_v40  ;;  %v11007_v22 = vsel %vm15567_vm2, 1, %v16344_v15  ;;  %v3525_v4 = vfloor.f32 %v3509_v26  ;;  %vm16787_vm12 = vcmp.eq.s32.totalorder %v10210_v34, %v8990_v7 }
 0x437   :  { %3630 = vrot.lane.b32.xlu0 %v10829_v25, %s7694_s9  ;;  %16785 = vst [vmem:[#allocation12_spill] sm:$0xff] %v10988_v35  ;;  %v7641_v25 = vtrunc.f32 %v3534_v33  ;;  %v3527_v33 = vfloor.f32 %v3511_v0  ;;  %v7619_v43 = vtrunc.f32 %v3523_v9  ;;  %v3529_v23 = vfloor.f32 %v3513_v3 }
 0x438   :  { %3724 = vrot.lane.b32.xlu1 %v10841_v57, %s7694_s9  ;;  %v3049_v57 = vpop.permute.xlu1 %3048  ;;  %16786 = vst [vmem:[#allocation14_spill] sm:$0xff] %v11000_v14  ;;  %v11002_v28 = vpop.permute.xlu0 %1862  ;;  %v3517_v29 = vmul.f32 0.125, %v6974_v8  ;;  %vm3772_vm2 = vcmp.ge.s32.totalorder %v10988_v35, 0  ;;  %v11023_v34 = vsel %vm3856_vm1, 1, %v16344_v15  ;;  %v15577_v0 = vand.u32 4294901760, %v11000_v14 }
 0x439   :  { %vm3073_vm7 = vcmp.eq.s32.totalorder %v3049_v57, 1  ;;  %v3515_v57 = vmul.f32 0.125, %v6972_v53  ;;  %v11018_v26 = vcvt.f32.s32 %v7641_v25  ;;  %v7623_v3 = vtrunc.f32 %v3525_v4 }
 0x43a   :  { %vm3089_vm6 = vmand %vm3073_vm7, %vm16787_vm12  ;;  %vm15569_vm7 = vcmp.lt.s32.totalorder %v10822_v37, 16  ;;  %vm15580_vm12 = vcmp.eq.s32.totalorder %v8990_v7, %v10901_v18  ;;  %v7627_v53 = vtrunc.f32 %v3527_v33  ;;  %v3533_v25 = vfloor.f32 %v3517_v29 }
 0x43b   :  { %3634 = vrot.lane.b32.xlu0 %v10836_v12, %s7694_s9  ;;  %v3105_v32 = vsel %vm3089_vm6, 1, %v16344_v15  ;;  %16788 = vst [vmem:[#allocation16_spill] sm:$0xff] %v11018_v26  ;;  %vm15581_vm6 = vcmp.eq.s32.totalorder %v10716_v30, %v10901_v18  ;;  %v3531_v8 = vfloor.f32 %v3515_v57  ;;  %vm3774_vm1 = vcmp.ge.s32.totalorder %v11018_v26, 0 }
 0x43c   :  { %3792 = vrot.lane.b32.xlu1 %v10893_v16, %s7695_s18  ;;  %v11026_v12 = vadd.s32 %v10888_v41, %v3105_v32  ;;  %v11029_v16 = vcvt.f32.s32 %v7615_v21  ;;  %v11032_v9 = vpop.permute.xlu0 %1868  ;;  %v11042_v32 = vcvt.f32.s32 %v7619_v43  ;;  %v7631_v41 = vtrunc.f32 %v3529_v23 }
 0x43d   :  { %v11047_v21 = vsel %vm3772_vm2, 1, %v16344_v15  ;;  %v11053_v4 = vsel %vm15569_vm7, 1, %v16344_v15  ;;  %v11067_v43 = vsub.f32 %v11000_v14, %v15577_v0  ;;  %v6976_v23 = vadd.f32 4.0, %v10731_v61 }
 0x43e   :  { %16789 = vst [vmem:[#allocation93_spill] sm:$0xff] %v11029_v16  ;;  %16790 = vst [vmem:[#allocation94_spill] sm:$0xff] %v11042_v32  ;;  %vm3761_vm7 = vcmp.ge.s32.totalorder %v11029_v16, 0  ;;  %v11073_v47 = vcvt.f32.s32 %v7623_v3  ;;  %v11075_v37 = vcvt.f32.s32 %v7627_v53  ;;  %vm3763_vm0 = vcmp.ge.s32.totalorder %v11042_v32, 0 }
 0x43f   :  { %3638 = vrot.lane.b32.xlu0 %v10859_v44, %s7694_s9  ;;  %v11085_v61 = vcvt.f32.s32 %v7631_v41  ;;  %v7639_v0 = vtrunc.f32 %v3533_v25  ;;  %v11095_v19 = vsel %vm3774_vm1, 1, %v16344_v15  ;;  %v11104_v41 = vsel %vm3858_vm3, 1, %v16344_v15 }
 0x440   :  { %3796 = vrot.lane.b32.xlu1 %v10913_v54, %s7695_s18  ;;  %v3055_v44 = vpop.permute.xlu1 %3054  ;;  %v16791_v54 = vmov 0.0   ;;  %v11070_v57 = vpop.permute.xlu0 %1874  ;;  %16792 = vst [vmem:[#allocation95_spill] sm:$0xff] %v11073_v47  ;;  %16793 = vst [vmem:[#allocation96_spill] sm:$0xff] %v11075_v37  ;;  %vm15607_vm1 = vcmp.eq.s32.totalorder %v10716_v30, %v10938_v46 }
 0x441   :  { %v6819_v29 = vsel %vm15581_vm6, 1.0, %v16791_v54  ;;  %v6818_v33 = vsel %vm15580_vm12, 1.0, %v16791_v54  ;;  %vm3075_vm2 = vcmp.eq.s32.totalorder %v3055_v44, 1  ;;  %16795 = vst [vmem:[#allocation97_spill] sm:$0xff] %v11085_v61  ;;  %v7635_v44 = vtrunc.f32 %v3531_v8 }
 0x442   :  { %vm3091_vm10 = vmand %vm3075_vm2, %vm16794_vm13  ;;  %v11088_v53 = vsub.f32 %v6819_v29, %v6819_v29  ;;  %v11090_v14 = vsub.f32 %v6818_v33, %v6818_v33  ;;  %v3519_v8 = vmul.f32 0.125, %v6976_v23  ;;  %v11111_v29 = vsel %vm3761_vm7, 1, %v16344_v15 }
 0x443   :  { %3642 = vrot.lane.b32.xlu0 %v10864_v36, %s7694_s9  ;;  %v3107_v3 = vsel %vm3091_vm10, 1, %v16344_v15  ;;  %v11114_v33 = vsel %vm3763_vm0, 1, %v16344_v15  ;;  %vm3765_vm10 = vcmp.ge.s32.totalorder %v11073_v47, 0  ;;  %vm3767_vm13 = vcmp.ge.s32.totalorder %v11075_v37, 0 }
 0x444   :  { %3800 = vrot.lane.b32.xlu1 %v10926_v10, %s7695_s18  ;;  %16796 = vst [vmem:[#allocation98_spill] sm:$0xff] %v11088_v53  ;;  %16797 = vst [vmem:[#allocation99_spill] sm:$0xff] %v11090_v14  ;;  %v11098_v36 = vadd.s32 %v10965_v55, %v3107_v3  ;;  %vm3769_vm3 = vcmp.ge.s32.totalorder %v11085_v61, 0  ;;  %v11123_v55 = vcvt.f32.s32 %v7635_v44  ;;  %vm3860_vm7 = vcmp.lt.s32.totalorder %v10870_v52, 1 }
 0x445   :  { %v11126_v23 = vcvt.f32.s32 %v7639_v0  ;;  %vm15608_vm0 = vcmp.eq.s32.totalorder %v8990_v7, %v10938_v46  ;;  %vm15606_vm2 = vcmp.eq.s32.totalorder %v10716_v30, %v10973_v17  ;;  %v11137_v44 = vsel %vm3765_vm10, 1, %v16344_v15 }
 0x446   :  { %16798 = vst [vmem:[#allocation100_spill] sm:$0xff] %v11098_v36  ;;  %v11106_v25 = vpop.permute.xlu0 %1880  ;;  %16799 = vst [vmem:[#allocation101_spill] sm:$0xff] %v11123_v55  ;;  %v11140_v0 = vsel %vm3767_vm13, 1, %v16344_v15  ;;  %v3535_v10 = vfloor.f32 %v3519_v8  ;;  %vm15603_vm12 = vcmp.eq.s32.totalorder %v8990_v7, %v10973_v17  ;;  %v11156_v3 = vsel %vm3860_vm7, 1, %v16344_v15 }
 0x447   :  { %3646 = vrot.lane.b32.xlu0 %v10898_v48, %s7694_s9  ;;  %16800 = vst [vmem:[#allocation102_spill] sm:$0xff] %v11126_v23  ;;  %v11151_v48 = vsel %vm3769_vm3, 1, %v16344_v15  ;;  %v6824_v8 = vsel %vm15608_vm0, 1.0, %v16791_v54  ;;  %vm16801_vm10 = vcmp.eq.s32.totalorder %v10309_v5, %v8990_v7  ;;  %vm3771_vm3 = vcmp.ge.s32.totalorder %v11123_v55, 0 }
 0x448   :  { %3804 = vrot.lane.b32.xlu1 %v10954_v59, %s7695_s18  ;;  %vm3773_vm7 = vcmp.ge.s32.totalorder %v11126_v23, 0  ;;  %v6829_v52 = vsel %vm15606_vm2, 1.0, %v16791_v54  ;;  %v16802_v5 = vand.u32 4294901760, %v11090_v14  ;;  %v6828_v37 = vsel %vm15603_vm12, 1.0, %v16791_v54 }
 0x449   :  { %v7643_v40 = vtrunc.f32 %v3535_v10  ;;  %v11201_v32 = vsub.f32 %v6824_v8, %v6824_v8  ;;  %vm15622_vm12 = vcmp.eq.s32.totalorder %v8990_v7, %v11002_v28  ;;  %vm16808_vm2 = vcmp.eq.s32.totalorder %v10716_v30, %v10901_v18 }
 0x44a   :  { %v3061_v59 = vpop.permute.xlu1 %3060  ;;  %v11144_v1 = vpop.permute.xlu0 %2871  ;;  %v11183_v26 = vsub.f32 %v11090_v14, %v16802_v5  ;;  %v15609_v8 = vmov 1.0|1.0   ;;  %v16831_v36 = vmov 0 }
 0x44b   :  { %vm3077_vm6 = vcmp.eq.s32.totalorder %v3061_v59, 1  ;;  %v6825_v59 = vsel %vm15607_vm1, 1.0, %v16791_v54  ;;  %3698 = vrot.lane.b32.xlu0 %v10846_v13, %s7694_s9  ;;  %v16803_v13 = vand.u32 4294901760, %v11088_v53  ;;  %16806 = vst [vmem:[#allocation105_spill] sm:$0xff] %v11201_v32 }
 0x44c   :  { %vm3093_vm13 = vmand %vm3077_vm6, %vm16801_vm10  ;;  %3808 = vrot.lane.b32.xlu1 %v10986_v20, %s7695_s18  ;;  %vm15611_vm6 = vcmp.eq.s32.totalorder %v10716_v30, %v11002_v28  ;;  %v11199_v5 = vsub.f32 %v6825_v59, %v6825_v59 }
 0x44d   :  { %v3109_v61 = vsel %vm3093_vm13, 1, %v16344_v15  ;;  %v11188_v20 = vsub.f32 %v11088_v53, %v16803_v13  ;;  %v11205_v13 = vsub.f32 %v6829_v52, %v6829_v52  ;;  %v11226_v52 = vsub.f32 %v6828_v37, %v6828_v37 }
 0x44e   :  { %v11197_v35 = vadd.s32 %v11026_v12, %v3109_v61  ;;  %v1839_v47 = vpop.permute.xlu1 %1838  ;;  %16805 = vst [vmem:[#allocation104_spill] sm:$0xff] %v11199_v5  ;;  %v2878_v38 = vpop.permute.xlu0 %2877  ;;  %v16809_v12 = vmov 0  ;;  %v6833_v10 = vsel %vm15611_vm6, 1.0, %v16791_v54  ;;  %v11244_v37 = vsel %vm3771_vm3, 1, %v16344_v15 }
 0x44f   :  { %vm1886_vm10 = vcmp.eq.s32.totalorder %v10716_v30, %v1839_v47  ;;  %vm1885_vm13 = vcmp.eq.s32.totalorder %v8990_v7, %v1839_v47  ;;  %16807 = vst [vmem:[#allocation106_spill] sm:$0xff] %v11205_v13  ;;  %3702 = vrot.lane.b32.xlu0 %v10918_v11, %s7694_s9  ;;  %16812 = vst [vmem:[#allocation108_spill] sm:$0xff] %v11226_v52  ;;  %vm15621_vm6 = vcmp.eq.s32.totalorder %v10716_v30, %v11032_v9  ;;  %v16823_v47 = vmov 1.0|1.0  }
 0x450   :  { %16804 = vst [vmem:[#allocation103_spill] sm:$0xff] %v11197_v35  ;;  %v6817_v16 = vsel %vm1886_vm10, 1.0, %v16791_v54  ;;  %vm11213_vm1 = vmpackc.low %vm16808_vm2, %vm1886_vm10  ;;  %v6816_v61 = vsel %vm1885_vm13, 1.0, %v16791_v54  ;;  %3812 = vrot.lane.b32.xlu1 %v10996_v63, %s7695_s18  ;;  %vm2920_vm2 = vcmp.eq.s32.totalorder %v2878_v38, 1  ;;  %v11249_v63 = vsel %vm3773_vm7, 1, %v16344_v15 }
 0x451   :  { %v16810_v12 = vsel %vm11213_vm1, 4294967295, %v16809_v12  ;;  %7110 = vmatprep.subr.msk.bf16.mxu0 %vm11213_vm1, %v15609_v8  ;;  %v11235_v11 = vsub.f32 %v6817_v16, %v6817_v16  ;;  %v11237_v59 = vsub.f32 %v6816_v61, %v6816_v61  ;;  %16815 = vst [vmem:[#allocation111_spill] sm:$0xff] %v11249_v63  ;;  %vm3862_vm10 = vcmp.lt.s32.totalorder %v10881_v2, 1  ;;  %vm11277_vm7 = vmand %vm2920_vm2, %vm15620_vm11 }
 0x452   :  { %16811 = vst [vmem:[#allocation107_spill] sm:$0xff] %v16810_v12  ;;  %v11239_v35 = vpop.permute.xlu1 %1844  ;;  %v6832_v16 = vsel %vm15622_vm12, 1.0, %v16791_v54  ;;  %vm16816_vm3 = vcmp.eq.s32.totalorder %v8990_v7, %v10901_v18  ;;  %v16817_v61 = vmov 0  ;;  %v11269_v8 = vpop.permute.xlu0 %2883  ;;  %v11271_v55 = vsub.f32 %v6833_v10, %v6833_v10 }
 0x453   :  { %16813 = vst [vmem:[#allocation109_spill] sm:$0xff] %v11235_v11  ;;  %16814 = vst [vmem:[#allocation110_spill] sm:$0xff] %v11237_v59  ;;  %3706 = vrot.lane.b32.xlu0 %v10931_v31, %s7694_s9  ;;  %v15623_v18 = vand.u32 4294901760, %v11235_v11  ;;  %v11293_v63 = vcvt.f32.s32 %v7643_v40  ;;  %v11300_v31 = vsub.f32 %v6832_v16, %v6832_v16  ;;  %v6837_v10 = vsel %vm15621_vm6, 1.0, %v16791_v54 }
 0x454   :  { %vm11264_vm0 = vmpackc.low %vm16816_vm3, %vm1885_vm13  ;;  %16820 = vst [vmem:[#allocation113_spill] sm:$0xff] %v11271_v55  ;;  %3816 = vrot.lane.b32.xlu1 %v11047_v21, %s7695_s18  ;;  %v16827_v40 = vand.u32 4294901760, %v11088_v53  ;;  %v16829_v38 = vand.u32 4294901760, %v11201_v32  ;;  %vm15639_vm13 = vcmp.eq.s32.totalorder %v8990_v7, %v11032_v9  ;;  %vm16830_vm2 = vcmp.lt.s32.totalorder %v10264_v42, 32 }
 0x455   :  { %v16818_v61 = vsel %vm11264_vm0, 4294967295, %v16817_v61  ;;  %7112 = vmatpush1.bf16.msk.msra.mxu0 %vm11264_vm0, %v16823_v47  ;;  %16824 = vst [vmem:[#allocation114_spill] sm:$0xff] %v11293_v63  ;;  %16826 = vst [vmem:[#allocation116_spill] sm:$0xff] %v11300_v31  ;;  %vm15628_vm3 = vcmp.eq.s32.totalorder %v10716_v30, %v11239_v35  ;;  %v16834_v12 = vmov 0  ;;  %v16838_v2 = vand.u32 4294901760, %v11226_v52 }
 0x456   :  { %16819 = vst [vmem:[#allocation112_spill] sm:$0xff] %v16818_v61  ;;  %v11298_v61 = vsel %vm3862_vm10, 1, %v16344_v15  ;;  %v11307_v23 = vpop.permute.xlu1 %1847  ;;  %v11313_v21 = vpack.c.bf16 %v16827_v40, %v15623_v18  ;;  %v11318_v16 = vsub.f32 %v11201_v32, %v16829_v38  ;;  %vm11326_vm10 = vmand %vm11277_vm7, %vm16830_vm2  ;;  %v2890_v40 = vpop.permute.xlu0 %2889  ;;  %v16837_v38 = vand.u32 4294901760, %v11199_v5 }
 0x457   :  { %16825 = vst [vmem:[#allocation115_spill] sm:$0xff] %v11298_v61  ;;  %v16832_v36 = vsel %vm11326_vm10, 4294967295, %v16831_v36  ;;  %vm15629_vm11 = vcmp.eq.s32.totalorder %v10716_v30, %v11307_v23  ;;  %vm2924_vm12 = vcmp.eq.s32.totalorder %v2890_v40, 1  ;;  %3710 = vrot.lane.b32.xlu0 %v10936_v27, %s7694_s9  ;;  %v11361_v32 = vsub.f32 %v6837_v10, %v6837_v10 }
 0x458   :  { %16828 = vst [vmem:[#allocation117_spill] sm:$0xff] %v11313_v21  ;;  %16833 = vst [vmem:[#allocation118_spill] sm:$0xff] %v16832_v36  ;;  %v11353_v40 = vsub.f32 %v11199_v5, %v16837_v38  ;;  %v11359_v21 = vsub.f32 %v11226_v52, %v16838_v2  ;;  %3820 = vrot.lane.b32.xlu1 %v11095_v19, %s7695_s18  ;;  %v16841_v27 = vand.u32 4294901760, %v11205_v13  ;;  %v6836_v10 = vsel %vm15639_vm13, 1.0, %v16791_v54 }
 0x459   :  { %vm11342_vm7 = vmpackc.low %vm15629_vm11, %vm15628_vm3  ;;  %16839 = vst [vmem:[#allocation120_spill] sm:$0xff] %v11361_v32  ;;  %vm16840_vm3 = vcmp.eq.s32.totalorder %v10116_v49, %v8990_v7  ;;  %v16843_v19 = vmov 0  ;;  %v16846_v18 = vand.u32 4294901760, %v11237_v59  ;;  %v16847_v2 = vand.u32 4294901760, %v11090_v14 }
 0x45a   :  { %v16835_v12 = vsel %vm11342_vm7, 4294967295, %v16834_v12  ;;  %vm2940_vm11 = vmand %vm2924_vm12, %vm16840_vm3  ;;  %7114 = vmatprep.subr.msk.bf16.mxu0 %vm11342_vm7, %v16823_v47  ;;  %v11374_v38 = vsub.f32 %v11205_v13, %v16841_v27  ;;  %vm15641_vm12 = vcmp.eq.s32.totalorder %v8990_v7, %v11239_v35  ;;  %vm16842_vm3 = vcmp.lt.s32.totalorder %v10116_v49, 32  ;;  %v11390_v27 = vpop.permute.xlu1 %1853  ;;  %v16849_v13 = vld [vmem:[#allocation85_spill] sm:$0xff] }
 0x45b   :  { %16836 = vst [vmem:[#allocation119_spill] sm:$0xff] %v16835_v12  ;;  %vm11386_vm6 = vmand %vm2940_vm11, %vm16842_vm3  ;;  %v11396_v12 = vpack.c.bf16 %v16847_v2, %v16846_v18  ;;  %v3351_v52 = vsel %vm11326_vm10, %v10553_v45, 0  ;;  %vm16850_vm11 = vcmp.eq.s32.totalorder %v8990_v7, %v11307_v23  ;;  %v16851_v18 = vmov 0  ;;  %v11419_v45 = vpop.permute.xlu0 %2895  ;;  %3714 = vrot.lane.b32.xlu0 %v10959_v62, %s7694_s9 }
 0x45c   :  { %v16844_v19 = vsel %vm11386_vm6, 4294967295, %v16843_v19  ;;  %v3185_v5 = vsel %vm11386_vm6, %v16849_v13, 0  ;;  %v3355_v53 = vsel %vm11386_vm6, %v10608_v24, 0  ;;  %vm11413_vm3 = vmpackc.low %vm16850_vm11, %vm15641_vm12  ;;  %vm15649_vm13 = vcmp.eq.s32.totalorder %v8990_v7, %v11390_v27  ;;  %16854 = vst [vmem:[#allocation123_spill] sm:$0xff] %v11419_v45  ;;  %3888 = vrot.lane.b32.xlu1 %v11023_v34, %s7695_s18 }
 0x45d   :  { %16845 = vst [vmem:[#allocation121_spill] sm:$0xff] %v16844_v19  ;;  %16848 = vst [vmem:[#allocation122_spill] sm:$0xff] %v11396_v12  ;;  %v16852_v18 = vsel %vm11413_vm3, 4294967295, %v16851_v18  ;;  %v3367_v13 = vadd.s32 %v3355_v53, %v3351_v52  ;;  %7116 = vmatpush1.bf16.msk.msra.mxu0 %vm11413_vm3, %v16823_v47  ;;  %v16855_v24 = vand.u32 4294901760, %v11271_v55  ;;  %vm16856_vm11 = vcmp.ge.s32.totalorder %v11293_v63, 0  ;;  %v16859_v52 = vld [vmem:[#allocation69_spill] sm:$0xff] }
 0x45e   :  { %16853 = vst [vmem:[#allocation85_spill] sm:$0xff] %v16852_v18  ;;  %v11436_v19 = vsel %vm16856_vm11, 1, %v16344_v15  ;;  %v11438_v53 = vsub.f32 %v6836_v10, %v6836_v10  ;;  %v3181_v12 = vsel %vm11326_vm10, %v16859_v52, 0  ;;  %vm16860_vm12 = vcmp.eq.s32.totalorder %v8990_v7, %v10938_v46  ;;  %v11469_v36 = vpop.permute.xlu1 %1859 }
 0x45f   :  { %v11431_v2 = vsub.f32 %v11271_v55, %v16855_v24  ;;  %16857 = vst [vmem:[#allocation124_spill] sm:$0xff] %v11436_v19  ;;  %vm11449_vm2 = vmpackc.low %vm15649_vm13, %vm16860_vm12  ;;  %v16861_v62 = vmov 0  ;;  %vm16864_vm6 = vcmp.eq.s32.totalorder %v10716_v30, %v10938_v46  ;;  %vm16865_vm10 = vcmp.eq.s32.totalorder %v10716_v30, %v11390_v27  ;;  %v2902_v46 = vpop.permute.xlu0 %2901  ;;  %3718 = vrot.lane.b32.xlu0 %v10993_v50, %s7694_s9  ;;  %v16899_v55 = vld [vmem:[#allocation71_spill] sm:$0xff] }
 0x460   :  { %16858 = vst [vmem:[#allocation125_spill] sm:$0xff] %v11438_v53  ;;  %v16862_v62 = vsel %vm11449_vm2, 4294967295, %v16861_v62  ;;  %vm11465_vm12 = vmpackc.low %vm16865_vm10, %vm16864_vm6  ;;  %v16866_v52 = vmov 0  ;;  %v3197_v34 = vadd.s32 %v3185_v5, %v3181_v12  ;;  %v16869_v63 = vand.u32 4294901760, %v11300_v31  ;;  %3970 = vrot.lane.b32.xlu1 %v10555_v39, %s7696_s19 }
 0x461   :  { %16863 = vst [vmem:[#allocation69_spill] sm:$0xff] %v16862_v62  ;;  %v16867_v52 = vsel %vm11465_vm12, 4294967295, %v16866_v52  ;;  %7118 = vmatprep.subr.msk.bf16.mxu0 %vm11465_vm12, %v16823_v47  ;;  %vm15654_vm6 = vcmp.eq.s32.totalorder %v10716_v30, %v11469_v36  ;;  %vm16871_vm10 = vcmp.eq.s32.totalorder %v10716_v30, %v11307_v23  ;;  %vm2928_vm11 = vcmp.eq.s32.totalorder %v2902_v46, 1 }
 0x462   :  { %16868 = vst [vmem:[#allocation126_spill] sm:$0xff] %v16867_v52  ;;  %v11476_v18 = vsub.f32 %v11300_v31, %v16869_v63  ;;  %v6823_v12 = vsel %vm16871_vm10, 1.0, %v16791_v54  ;;  %7120 = vmatpush1.bf16.msk.msra.mxu0 %vm11449_vm2, %v16823_v47  ;;  %vm16872_vm12 = vcmp.eq.s32.totalorder %v10716_v30, %v10973_v17  ;;  %v16873_v63 = vmov 0  ;;  %v11550_v62 = vpop.permute.xlu1 %1865 }
 0x463   :  { %vm11501_vm3 = vmpackc.low %vm15654_vm6, %vm16872_vm12  ;;  %vm16876_vm10 = vcmp.eq.s32.totalorder %v8990_v7, %v11070_v57  ;;  %vm16877_vm13 = vcmp.eq.s32.totalorder %v8990_v7, %v11307_v23  ;;  %vm16878_vm12 = vcmp.eq.s32.totalorder %v10189_v6, %v8990_v7  ;;  %v16879_v50 = vand.u32 4294901760, %v11361_v32  ;;  %v11571_v31 = vpop.permute.xlu0 %2907  ;;  %3722 = vrot.lane.b32.xlu0 %v11007_v22, %s7694_s9 }
 0x464   :  { %16870 = vst [vmem:[#allocation127_spill] sm:$0xff] %v11476_v18  ;;  %v16874_v63 = vsel %vm11501_vm3, 4294967295, %v16873_v63  ;;  %v6840_v46 = vsel %vm16876_vm10, 1.0, %v16791_v54  ;;  %v6822_v10 = vsel %vm16877_vm13, 1.0, %v16791_v54  ;;  %vm2944_vm6 = vmand %vm2928_vm11, %vm16878_vm12  ;;  %7122 = vmatprep.subr.msk.bf16.mxu0 %vm11501_vm3, %v16823_v47  ;;  %vm16881_vm13 = vcmp.eq.s32.totalorder %v10716_v30, %v11070_v57  ;;  %3972 = vrot.lane.b32.xlu1 %v10569_v51, %s7696_s19 }
 0x465   :  { %16875 = vst [vmem:[#allocation128_spill] sm:$0xff] %v16874_v63  ;;  %v11528_v24 = vsub.f32 %v11361_v32, %v16879_v50  ;;  %v6841_v23 = vsel %vm16881_vm13, 1.0, %v16791_v54  ;;  %vm16882_vm10 = vcmp.eq.s32.totalorder %v8990_v7, %v11239_v35  ;;  %vm16883_vm12 = vcmp.eq.s32.totalorder %v10716_v30, %v11239_v35  ;;  %16893 = vst [vmem:[#allocation132_spill] sm:$0xff] %v11571_v31 }
 0x466   :  { %v6820_v5 = vsel %vm16882_vm10, 1.0, %v16791_v54  ;;  %v6821_v63 = vsel %vm16883_vm12, 1.0, %v16791_v54  ;;  %vm16884_vm3 = vcmp.lt.s32.totalorder %v10189_v6, 32  ;;  %v16885_v50 = vmov 0 }
 0x467   :  { %16880 = vst [vmem:[#allocation129_spill] sm:$0xff] %v11528_v24  ;;  %vm11546_vm2 = vmand %vm2944_vm6, %vm16884_vm3  ;;  %v11554_v52 = vsub.f32 %v6823_v12, %v6823_v12  ;;  %vm16888_vm10 = vcmp.eq.s32.totalorder %v8990_v7, %v10973_v17  ;;  %vm16889_vm3 = vcmp.eq.s32.totalorder %v8990_v7, %v11469_v36  ;;  %v16890_v35 = vmov 0  ;;  %3726 = vrot.lane.b32.xlu0 %v11053_v4, %s7694_s9 }
 0x468   :  { %v16886_v50 = vsel %vm11546_vm2, 4294967295, %v16885_v50  ;;  %v3359_v32 = vsel %vm11546_vm2, %v10646_v60, 0  ;;  %vm11565_vm6 = vmpackc.low %vm16889_vm3, %vm16888_vm10  ;;  %vm15676_vm12 = vcmp.eq.s32.totalorder %v10716_v30, %v11550_v62  ;;  %v11573_v12 = vsub.f32 %v6822_v10, %v6822_v10  ;;  %4032 = vrot.lane.b32.xlu1 %v10684_v58, %s7698_s20 }
 0x469   :  { %16887 = vst [vmem:[#allocation130_spill] sm:$0xff] %v16886_v50  ;;  %v16891_v35 = vsel %vm11565_vm6, 4294967295, %v16890_v35  ;;  %vm16894_vm13 = vcmp.eq.s32.totalorder %v10716_v30, %v11390_v27  ;;  %v11579_v17 = vadd.s32 %v3367_v13, %v3359_v32  ;;  %7124 = vmatpush1.bf16.msk.msra.mxu0 %vm11565_vm6, %v16823_v47  ;;  %vm15681_vm10 = vcmp.eq.s32.totalorder %v8990_v7, %v11550_v62 }
 0x46a   :  { %16892 = vst [vmem:[#allocation131_spill] sm:$0xff] %v16891_v35  ;;  %v6827_v60 = vsel %vm16894_vm13, 1.0, %v16791_v54  ;;  %vm16895_vm3 = vcmp.eq.s32.totalorder %v10716_v30, %v11002_v28  ;;  %v16896_v10 = vmov 0  ;;  %v11598_v32 = vsub.f32 %v6841_v23, %v6841_v23 }
 0x46b   :  { %vm11592_vm11 = vmpackc.low %vm15676_vm12, %vm16895_vm3  ;;  %v11600_v13 = vsub.f32 %v6821_v63, %v6821_v63  ;;  %v11602_v35 = vsub.f32 %v6820_v5, %v6820_v5  ;;  %v3189_v39 = vsel %vm11546_vm2, %v16899_v55, 0  ;;  %v11612_v14 = vsub.f32 %v6840_v46, %v6840_v46  ;;  %v11622_v63 = vpop.permute.xlu1 %1871  ;;  %3794 = vrot.lane.b32.xlu0 %v11111_v29, %s7695_s18 }
 0x46c   :  { %v16897_v10 = vsel %vm11592_vm11, 4294967295, %v16896_v10  ;;  %7126 = vmatprep.subr.msk.bf16.mxu0 %vm11592_vm11, %v16823_v47  ;;  %vm16901_vm13 = vcmp.eq.s32.totalorder %v8990_v7, %v11106_v25  ;;  %vm16902_vm3 = vcmp.eq.s32.totalorder %v8990_v7, %v11390_v27  ;;  %v11624_v23 = vadd.s32 %v3197_v34, %v3189_v39  ;;  %v2914_v27 = vpop.permute.xlu0 %2913  ;;  %3892 = vrot.lane.b32.xlu1 %v11104_v41, %s7695_s18 }
 0x46d   :  { %16898 = vst [vmem:[#allocation133_spill] sm:$0xff] %v16897_v10  ;;  %16900 = vst [vmem:[#allocation71_spill] sm:$0xff] %v11612_v14  ;;  %v6844_v22 = vsel %vm16901_vm13, 1.0, %v16791_v54  ;;  %v6826_v5 = vsel %vm16902_vm3, 1.0, %v16791_v54  ;;  %vm16903_vm12 = vcmp.eq.s32.totalorder %v10716_v30, %v11106_v25  ;;  %v16904_v46 = vand.u32 4294901760, %v11237_v59 }
 0x46e   :  { %v6845_v55 = vsel %vm16903_vm12, 1.0, %v16791_v54  ;;  %v11635_v10 = vsub.f32 %v6827_v60, %v6827_v60  ;;  %vm16906_vm13 = vcmp.eq.s32.totalorder %v8990_v7, %v11002_v28  ;;  %v16907_v39 = vmov 0 }
 0x46f   :  { %v11633_v50 = vsub.f32 %v11237_v59, %v16904_v46  ;;  %vm11643_vm3 = vmpackc.low %vm15681_vm10, %vm16906_vm13  ;;  %vm16910_vm2 = vcmp.eq.s32.totalorder %v8990_v7, %v11469_v36  ;;  %vm15696_vm13 = vcmp.eq.s32.totalorder %v8990_v7, %v11622_v63  ;;  %vm16911_vm12 = vcmp.eq.s32.totalorder %v10716_v30, %v11032_v9  ;;  %3798 = vrot.lane.b32.xlu0 %v11114_v33, %s7695_s18 }
 0x470   :  { %16905 = vst [vmem:[#allocation134_spill] sm:$0xff] %v11635_v10  ;;  %v16908_v39 = vsel %vm11643_vm3, 4294967295, %v16907_v39  ;;  %v6830_v60 = vsel %vm16910_vm2, 1.0, %v16791_v54  ;;  %7128 = vmatpush1.bf16.msk.msra.mxu0 %vm11643_vm3, %v16823_v47  ;;  %vm16912_vm11 = vcmp.eq.s32.totalorder %v10716_v30, %v11622_v63  ;;  %v16913_v28 = vmov 0 }
 0x471   :  { %16909 = vst [vmem:[#allocation135_spill] sm:$0xff] %v16908_v39  ;;  %vm11667_vm6 = vmpackc.low %vm16912_vm11, %vm16911_vm12  ;;  %v11675_v39 = vsub.f32 %v6826_v5, %v6826_v5  ;;  %v16917_v59 = vand.u32 4294901760, %v11235_v11  ;;  %v11687_v46 = vsub.f32 %v6845_v55, %v6845_v55  ;;  %v16918_v5 = vld [vmem:[#allocation91_spill] sm:$0xff]  ;;  %vm16919_vm11 = vcmp.eq.s32.totalorder %v10716_v30, %v11469_v36  ;;  %v3016_v36 = vpop.permute.xlu0 %3015 }
 0x472   :  { %v16914_v28 = vsel %vm11667_vm6, 4294967295, %v16913_v28  ;;  %7130 = vmatprep.subr.msk.bf16.mxu0 %vm11667_vm6, %v16823_v47  ;;  %v6831_v34 = vsel %vm16919_vm11, 1.0, %v16791_v54  ;;  %vm16920_vm12 = vcmp.eq.s32.totalorder %v8990_v7, %v11032_v9  ;;  %v16921_v55 = vmov 0 }
 0x473   :  { %16915 = vst [vmem:[#allocation136_spill] sm:$0xff] %v16914_v28  ;;  %16916 = vst [vmem:[#allocation137_spill] sm:$0xff] %v11675_v39  ;;  %v2092_v19 = vsub.f32 %v11235_v11, %v16917_v59  ;;  %v11695_v28 = vpop.permute.xlu1 %1877  ;;  %v11698_v11 = vsub.f32 %v6830_v60, %v6830_v60  ;;  %v11715_v4 = vsub.f32 %v6844_v22, %v6844_v22  ;;  %v2099_v9 = vand.u32 4294901760, %v11633_v50  ;;  %v16925_v59 = vld [vmem:[#allocation59_spill] sm:$0xff] }
 0x474   :  { %vm11706_vm10 = vmpackc.low %vm15696_vm13, %vm16920_vm12  ;;  %vm15701_vm11 = vcmp.eq.s32.totalorder %v10716_v30, %v11695_v28  ;;  %v16926_v61 = vand.u32 4294901760, %v11573_v12  ;;  %vm16927_vm12 = vcmp.eq.s32.totalorder %v10716_v30, %v11070_v57  ;;  %v16928_v22 = vmov 0  ;;  %3802 = vrot.lane.b32.xlu0 %v11137_v44, %s7695_s18 }
 0x475   :  { %v16922_v55 = vsel %vm11706_vm10, 4294967295, %v16921_v55  ;;  %16924 = vst [vmem:[#allocation138_spill] sm:$0xff] %v11715_v4  ;;  %7132 = vmatpush1.bf16.msk.msra.mxu0 %vm11706_vm10, %v16823_v47  ;;  %vm11732_vm13 = vmpackc.low %vm15701_vm11, %vm16927_vm12  ;;  %v16931_v50 = vand.u32 4294901760, %v11554_v52  ;;  %v16932_v60 = vand.u32 4294901760, %v11602_v35  ;;  %v2093_v31 = vand.u32 4294901760, %v2092_v19 }
 0x476   :  { %16923 = vst [vmem:[#allocation91_spill] sm:$0xff] %v16922_v55  ;;  %v2134_v58 = vsub.f32 %v11573_v12, %v16926_v61  ;;  %v16929_v22 = vsel %vm11732_vm13, 4294967295, %v16928_v22  ;;  %7134 = vmatprep.subr.msk.bf16.mxu0 %vm11732_vm13, %v16823_v47  ;;  %v16933_v45 = vand.u32 4294901760, %v11600_v13  ;;  %v11753_v29 = vsub.f32 %v6831_v34, %v6831_v34 }
 0x477   :  { %16930 = vst [vmem:[#allocation59_spill] sm:$0xff] %v16929_v22  ;;  %v2128_v61 = vsub.f32 %v11554_v52, %v16931_v50  ;;  %v2122_v55 = vsub.f32 %v11602_v35, %v16932_v60  ;;  %vm16934_vm12 = vcmp.eq.s32.totalorder %v8990_v7, %v11550_v62  ;;  %vm16935_vm11 = vcmp.eq.s32.totalorder %v10716_v30, %v11550_v62  ;;  %v11773_v19 = vpop.permute.xlu1 %1883  ;;  %v3022_v62 = vpop.permute.xlu0 %3021 }
 0x478   :  { %v2116_v18 = vsub.f32 %v11600_v13, %v16933_v45  ;;  %v6834_v60 = vsel %vm16934_vm12, 1.0, %v16791_v54  ;;  %v6835_v50 = vsel %vm16935_vm11, 1.0, %v16791_v54  ;;  %vm2932_vm6 = vcmp.eq.s32.totalorder %v2914_v27, 1  ;;  %3806 = vrot.lane.b32.xlu0 %v11140_v0, %s7695_s18 }
 0x479   :  { %vm16936_vm2 = vcmp.eq.s32.totalorder %v8990_v7, %v11070_v57  ;;  %vm16937_vm13 = vcmp.eq.s32.totalorder %v8990_v7, %v11695_v28  ;;  %v16938_v41 = vmov 0  ;;  %vm15716_vm11 = vcmp.eq.s32.totalorder %v10716_v30, %v11773_v19 }
 0x47a   :  { %vm11769_vm10 = vmpackc.low %vm16937_vm13, %vm16936_vm2  ;;  %v16941_v57 = vand.u32 4294901760, %v11635_v10  ;;  %vm16942_vm2 = vcmp.eq.s32.totalorder %v10716_v30, %v11106_v25  ;;  %v16943_v45 = vmov 0  ;;  %v2135_v24 = vand.u32 4294901760, %v2134_v58 }
 0x47b   :  { %v16939_v41 = vsel %vm11769_vm10, 4294967295, %v16938_v41  ;;  %7136 = vmatpush1.bf16.msk.msra.mxu0 %vm11769_vm10, %v16823_v47  ;;  %vm11793_vm12 = vmpackc.low %vm15716_vm11, %vm16942_vm2  ;;  %v11799_v22 = vsub.f32 %v6835_v50, %v6835_v50  ;;  %vm16946_vm13 = vcmp.eq.s32.totalorder %v10271_v56, %v8990_v7  ;;  %v16949_v33 = vand.u32 4294901760, %v11188_v20  ;;  %v16950_v50 = vld [vmem:[#allocation78_spill] sm:$0xff] }
 0x47c   :  { %16940 = vst [vmem:[#allocation139_spill] sm:$0xff] %v16939_v41  ;;  %v2152_v34 = vsub.f32 %v11635_v10, %v16941_v57  ;;  %v16944_v45 = vsel %vm11793_vm12, 4294967295, %v16943_v45  ;;  %v2129_v57 = vand.u32 4294901760, %v2128_v61  ;;  %v11801_v10 = vsub.f32 %v6834_v60, %v6834_v60  ;;  %vm11807_vm10 = vmand %vm2932_vm6, %vm16946_vm13  ;;  %7138 = vmatprep.subr.msk.bf16.mxu0 %vm11793_vm12, %v16823_v47  ;;  %3976 = vrot.lane.b32.xlu1 %v16950_v50, %s7696_s19 }
 0x47d   :  { %16945 = vst [vmem:[#allocation140_spill] sm:$0xff] %v16944_v45  ;;  %v7141_v61 = vpack.c.bf16 %v16949_v33, %v2093_v31  ;;  %v2123_v58 = vand.u32 4294901760, %v2122_v55  ;;  %v16951_v60 = vand.u32 4294901760, %v11675_v39  ;;  %vm16952_vm6 = vcmp.eq.s32.totalorder %v8990_v7, %v11622_v63  ;;  %v11854_v45 = vpop.permute.xlu1 %3168  ;;  %3810 = vrot.lane.b32.xlu0 %v11151_v48, %s7695_s18 }
 0x47e   :  { %v6838_v27 = vsel %vm16952_vm6, 1.0, %v16791_v54  ;;  %vm16953_vm13 = vcmp.eq.s32.totalorder %v10716_v30, %v11622_v63  ;;  %vm16954_vm2 = vcmp.eq.s32.totalorder %v8990_v7, %v11106_v25  ;;  %vm16955_vm11 = vcmp.eq.s32.totalorder %v8990_v7, %v11773_v19  ;;  %v3028_v25 = vpop.permute.xlu0 %3027  ;;  %16963 = vst [vmem:[#allocation141_spill] sm:$0xff] %v11854_v45  ;;  %v16978_v45 = vld [vmem:[#allocation86_spill] sm:$0xff] }
 0x47f   :  { %v11821_v4 = vsub.f32 %v11675_v39, %v16951_v60  ;;  %v6839_v20 = vsel %vm16953_vm13, 1.0, %v16791_v54  ;;  %vm11837_vm12 = vmpackc.low %vm16955_vm11, %vm16954_vm2  ;;  %v16956_v31 = vmov 0  ;;  %v2117_v55 = vand.u32 4294901760, %v2116_v18 }
 0x480   :  { %v16957_v31 = vsel %vm11837_vm12, 4294967295, %v16956_v31  ;;  %v16958_v33 = vand.u32 4294901760, %v11698_v11  ;;  %vm16959_vm6 = vcmp.eq.s32.totalorder %v16918_v5, %v8990_v7  ;;  %vm16960_vm13 = vcmp.eq.s32.totalorder %v3016_v36, 1  ;;  %7140 = vmatpush1.bf16.msk.msra.mxu0 %vm11837_vm12, %v16823_v47  ;;  %4036 = vrot.lane.b32.xlu1 %v10569_v51, %s7698_s20 }
 0x481   :  { %vm11850_vm3 = vmand %vm16960_vm13, %vm16959_vm6  ;;  %v16964_v39 = vand.u32 4294901760, %v11183_v26  ;;  %v2153_v18 = vand.u32 4294901760, %v2152_v34  ;;  %v15733_v14 = vand.u32 4294901760, %v11753_v29  ;;  %vm16966_vm2 = vcmp.lt.s32.totalorder %v10271_v56, 32  ;;  %7142 = vmatprep.subr.bf16.mxu0 %v7141_v61  ;;  %3814 = vrot.lane.b32.xlu0 %v11244_v37, %s7695_s18 }
 0x482   :  { %v11844_v60 = vsub.f32 %v11698_v11, %v16958_v33  ;;  %v16965_v33 = vld [vmem:[#allocation75_spill] sm:$0xff]  ;;  %vm11865_vm6 = vmand %vm11807_vm10, %vm16966_vm2  ;;  %v16967_v36 = vmov 0  ;;  %vm3064_vm13 = vcmp.eq.s32.totalorder %v3022_v62, 1  ;;  %vm3066_vm7 = vcmp.eq.s32.totalorder %v3028_v25, 1  ;;  %v3034_v63 = vpop.permute.xlu0 %3033 }
 0x483   :  { %v7143_v53 = vpack.c.bf16 %v16964_v39, %v2099_v9  ;;  %v16968_v36 = vsel %vm11865_vm6, 4294967295, %v16967_v36  ;;  %v7145_v26 = vpack.c.bf16 %v2129_v57, %v2117_v55  ;;  %v7147_v39 = vpack.c.bf16 %v2135_v24, %v2123_v58  ;;  %v3175_v9 = vpop.permute.xlu1 %3174 }
 0x484   :  { %16969 = vst [vmem:[#allocation75_spill] sm:$0xff] %v16968_v36  ;;  %v11875_v34 = vsub.f32 %v6839_v20, %v6839_v20  ;;  %v11877_v41 = vsub.f32 %v6838_v27, %v6838_v27  ;;  %vm16970_vm10 = vcmp.eq.s32.totalorder %v16925_v59, %v8990_v7  ;;  %vm16971_vm11 = vcmp.eq.s32.totalorder %v10716_v30, %v11695_v28 }
 0x485   :  { %vm3082_vm2 = vmand %vm3066_vm7, %vm16970_vm10  ;;  %v6843_v44 = vsel %vm16971_vm11, 1.0, %v16791_v54  ;;  %v3094_v24 = vsel %vm11850_vm3, 1, %v16344_v15  ;;  %v2159_v58 = vand.u32 4294901760, %v11821_v4  ;;  %vm16972_vm7 = vcmp.eq.s32.totalorder %v8990_v7, %v11695_v28  ;;  %3896 = vrot.lane.b32.xlu1 %v11156_v3, %s7695_s18 }
 0x486   :  { %v3098_v57 = vsel %vm3082_vm2, 1, %v16344_v15  ;;  %v6842_v61 = vsel %vm16972_vm7, 1.0, %v16791_v54  ;;  %vm16973_vm10 = vcmp.eq.s32.totalorder %v10264_v42, %v8990_v7  ;;  %v16976_v55 = vand.u32 4294901760, %v11067_v43 }
 0x487   :  { %vm11902_vm12 = vmand %vm3064_vm13, %vm16973_vm10  ;;  %v3110_v20 = vadd.s32 %v3098_v57, %v3094_v24  ;;  %v16977_v4 = vand.u32 4294901760, %v11353_v40  ;;  %v2176_v28 = vsub.f32 %v11753_v29, %v15733_v14  ;;  %v3363_v42 = vsel %vm11865_vm6, %v16978_v45, 0  ;;  %v3040_v24 = vpop.permute.xlu0 %3039  ;;  %v11951_v57 = vpop.permute.xlu1 %3618 }
 0x488   :  { %2083 = vmatmul.mubr.f32.vlgmr.msra.gmra.mrb[0].mxu0 %v16976_v55  ;;  %vm16979_vm3 = vcmp.eq.s32.totalorder %v10716_v30, %v11773_v19  ;;  %vm3068_vm11 = vcmp.eq.s32.totalorder %v3034_v63, 1  ;;  %v3193_v43 = vsel %vm11865_vm6, %v3175_v9, 0  ;;  %v11924_v40 = vsub.f32 %v6843_v44, %v6843_v44  ;;  %16984 = vst [vmem:[#allocation142_spill] sm:$0xff] %v11951_v57  ;;  %v16986_v63 = vld [vmem:[#allocation25_spill] sm:$0xff] }
 0x489   :  { %v7149_v25 = vpack.c.bf16 %v2153_v18, %v16977_v4  ;;  %v6847_v62 = vsel %vm16979_vm3, 1.0, %v16791_v54  ;;  %7144 = vmatpush1.bf16.msra.mxu0 %v7143_v53  ;;  %vm16980_vm13 = vcmp.eq.s32.totalorder %v8990_v7, %v11773_v19  ;;  %vm16981_vm2 = vcmp.eq.s32.totalorder %v10116_v49, %v8990_v7  ;;  %2313 = vmatprep.mubr.f32.mxu0 %v16791_v54 }
 0x48a   :  { %v6846_v45 = vsel %vm16980_vm13, 1.0, %v16791_v54  ;;  %vm3084_vm7 = vmand %vm3068_vm11, %vm16981_vm2  ;;  %7146 = vmatprep.subr.bf16.mxu0 %v7145_v26  ;;  %v11934_v53 = vadd.s32 %v11624_v23, %v3193_v43  ;;  %v16983_v18 = vand.u32 4294901760, %v11799_v22  ;;  %v11941_v0 = vsub.f32 %v6842_v61, %v6842_v61 }
 0x48b   :  { %v3096_v19 = vsel %vm11902_vm12, 1, %v16344_v15  ;;  %v3100_v49 = vsel %vm3084_vm7, 1, %v16344_v15  ;;  %v15734_v26 = vand.u32 4294901760, %v11875_v34  ;;  %v11949_v23 = vsub.f32 %v6847_v62, %v6847_v62 }
 0x48c   :  { %16982 = vst [vmem:[#allocation86_spill] sm:$0xff] %v11934_v53  ;;  %v2200_v9 = vsub.f32 %v11799_v22, %v16983_v18  ;;  %v3112_v44 = vadd.s32 %v3100_v49, %v3096_v19  ;;  %v2177_v55 = vand.u32 4294901760, %v2176_v28  ;;  %v11954_v3 = vadd.s32 %v11579_v17, %v3363_v42  ;;  %v17018_v53 = vld [vmem:[#allocation123_spill] sm:$0xff] }
 0x48d   :  { %v16985_v61 = vand.u32 4294901760, %v11801_v10  ;;  %vm15740_vm12 = vcmp.eq.s32.totalorder %v16986_v63, %v8990_v7  ;;  %v11963_v4 = vsub.f32 %v6846_v45, %v6846_v45  ;;  %7148 = vmatpush1.bf16.msra.mxu0 %v7147_v39  ;;  %vm3070_vm10 = vcmp.eq.s32.totalorder %v3040_v24, 1  ;;  %v16989_v45 = vld [vmem:[#allocation54_spill] sm:$0xff] }
 0x48e   :  { %v2183_v28 = vand.u32 4294901760, %v11844_v60  ;;  %vm16987_vm3 = vcmp.eq.s32.totalorder %v16965_v33, %v8990_v7  ;;  %7150 = vmatprep.subr.bf16.mxu0 %v7149_v25  ;;  %v16988_v42 = vand.u32 4294901760, %v11318_v16  ;;  %v2201_v43 = vand.u32 4294901760, %v2200_v9  ;;  %3980 = vrot.lane.b32.xlu1 %v16989_v45, %s7696_s19 }
 0x48f   :  { %v11959_v27 = vsub.f32 %v11801_v10, %v16985_v61  ;;  %vm3086_vm11 = vmand %vm3070_vm10, %vm16987_vm3  ;;  %v2247_v39 = vand.u32 4294901760, %v11924_v40  ;;  %v2224_v60 = vsub.f32 %v11875_v34, %v15734_v26  ;;  %v16990_v18 = vand.u32 4294901760, %v11600_v13  ;;  %v3046_v61 = vpop.permute.xlu0 %3045  ;;  %v11996_v26 = vpop.permute.xlu1 %3620 }
 0x490   :  { %v7151_v62 = vpack.c.bf16 %v2159_v58, %v16988_v42  ;;  %v3102_v48 = vsel %vm3086_vm11, 1, %v16344_v15  ;;  %v16991_v19 = vand.u32 4294901760, %v11554_v52  ;;  %v16992_v16 = vand.u32 4294901760, %v11602_v35 }
 0x491   :  { %v16993_v58 = vand.u32 4294901760, %v11573_v12  ;;  %v2253_v49 = vand.u32 4294901760, %v11941_v0  ;;  %v3114_v24 = vadd.s32 %v3110_v20, %v3102_v48  ;;  %v16994_v42 = vand.u32 4294901760, %v11374_v38 }
 0x492   :  { %v11985_v25 = vpack.c.bf16 %v16991_v19, %v16990_v18  ;;  %v2271_v17 = vand.u32 4294901760, %v11949_v23  ;;  %vm2918_vm13 = vcmp.eq.s32.totalorder %v11144_v1, 1  ;;  %7152 = vmatpush1.bf16.msra.mxu0 %v7151_v62  ;;  %vm3072_vm2 = vcmp.eq.s32.totalorder %v3046_v61, 1  ;;  %4040 = vrot.lane.b32.xlu1 %v16950_v50, %s7698_s20 }
 0x493   :  { %v11991_v9 = vpack.c.bf16 %v16993_v58, %v16992_v16  ;;  %v7153_v14 = vpack.c.bf16 %v2177_v55, %v16994_v42  ;;  %v2259_v19 = vand.u32 4294901760, %v11687_v46  ;;  %vm2922_vm7 = vcmp.eq.s32.totalorder %v11269_v8, 1  ;;  %v17019_v8 = vld [vmem:[#allocation132_spill] sm:$0xff] }
 0x494   :  { %v16995_v38 = vand.u32 4294901760, %v11877_v41  ;;  %vm16996_vm10 = vcmp.eq.s32.totalorder %v10189_v6, %v8990_v7  ;;  %v16997_v55 = vand.u32 4294901760, %v11359_v21  ;;  %v2207_v48 = vand.u32 4294901760, %v11959_v27  ;;  %v3052_v21 = vpop.permute.xlu0 %3051  ;;  %v12029_v27 = vpop.permute.xlu1 %3624 }
 0x495   :  { %vm3088_vm3 = vmand %vm3072_vm2, %vm16996_vm10  ;;  %7154 = vmatprep.subr.bf16.mxu0 %v7153_v14  ;;  %v16998_v16 = vand.u32 4294901760, %v11431_v2  ;;  %v2225_v61 = vand.u32 4294901760, %v2224_v60  ;;  %v2248_v42 = vsub.f32 %v11924_v40, %v2247_v39  ;;  %vm16999_vm11 = vcmp.eq.s32.totalorder %v16918_v5, %v8990_v7  ;;  %17002 = vst [vmem:[#allocation25_spill] sm:$0xff] %v12029_v27  ;;  %v17022_v27 = vld [vmem:[#allocation115_spill] sm:$0xff] }
 0x496   :  { %v2230_v20 = vsub.f32 %v11877_v41, %v16995_v38  ;;  %v7155_v62 = vpack.c.bf16 %v2183_v28, %v16997_v55  ;;  %v3104_v37 = vsel %vm3088_vm3, 1, %v16344_v15  ;;  %vm12025_vm2 = vmand %vm2918_vm13, %vm16999_vm11  ;;  %v17003_v28 = vand.u32 4294901760, %v11598_v32  ;;  %3900 = vrot.lane.b32.xlu1 %v17022_v27, %s7695_s18 }
 0x497   :  { %v7157_v58 = vpack.c.bf16 %v2201_v43, %v16998_v16  ;;  %v3116_v14 = vadd.s32 %v3112_v44, %v3104_v37  ;;  %v17004_v43 = vld [vmem:[#allocation71_spill] sm:$0xff]  ;;  %v12039_v55 = vpack.c.bf16 %v2271_v17, %v2259_v19  ;;  %v17007_v16 = vld [vmem:[#allocation125_spill] sm:$0xff]  ;;  %vm17009_vm13 = vcmp.eq.s32.totalorder %v16925_v59, %v8990_v7 }
 0x498   :  { %v12033_v2 = vpack.c.bf16 %v2247_v39, %v17003_v28  ;;  %v17005_v60 = vand.u32 4294901760, %v17004_v43  ;;  %v17008_v1 = vand.u32 4294901760, %v17007_v16  ;;  %vm12049_vm10 = vmand %vm2922_vm7, %vm17009_vm13  ;;  %7156 = vmatpush1.bf16.msra.mxu0 %v7155_v62  ;;  %vm3074_vm3 = vcmp.eq.s32.totalorder %v3052_v21, 1  ;;  %v17012_v39 = vld [vmem:[#allocation127_spill] sm:$0xff]  ;;  %v17020_v62 = vld [vmem:[#allocation129_spill] sm:$0xff]  ;;  %v3058_v6 = vpop.permute.xlu0 %3057  ;;  %v12091_v57 = vpop.permute.xlu1 %3628 }
 0x499   :  { %17006 = vst [vmem:[#allocation71_spill] sm:$0xff] %v12039_v55  ;;  %v2195_v37 = vand.u32 4294901760, %v17012_v39  ;;  %v17013_v28 = vld [vmem:[#allocation111_spill] sm:$0xff]  ;;  %vm3090_vm13 = vmand %vm3074_vm3, %vm15740_vm12  ;;  %7158 = vmatprep.subr.bf16.mxu0 %v7157_v58  ;;  %v2213_v21 = vand.u32 4294901760, %v17020_v62  ;;  %v17021_v39 = vand.u32 4294901760, %v11598_v32  ;;  %vm17023_vm6 = vcmp.lt.s32.totalorder %v16918_v5, 32 }
 0x49a   :  { %v12037_v38 = vpack.c.bf16 %v2253_v49, %v17005_v60  ;;  %v2218_v18 = vsub.f32 %v17007_v16, %v17008_v1  ;;  %3818 = vrot.lane.b32.xlu0 %v17013_v28, %s7695_s18  ;;  %v17014_v60 = vld [vmem:[#allocation138_spill] sm:$0xff]  ;;  %v17016_v1 = vand.u32 4294901760, %v11963_v4  ;;  %vm12077_vm11 = vmand %vm12025_vm2, %vm17023_vm6  ;;  %v3106_v58 = vsel %vm3090_vm13, 1, %v16344_v15  ;;  %v17040_v44 = vld [vmem:[#allocation47_spill] sm:$0xff] }
 0x49b   :  { %v17015_v36 = vand.u32 4294901760, %v17014_v60  ;;  %v2236_v28 = vsub.f32 %v11598_v32, %v17021_v39  ;;  %v7159_v62 = vpack.c.bf16 %v2207_v48, %v2195_v37  ;;  %v2231_v50 = vand.u32 4294901760, %v2230_v20  ;;  %v17036_v48 = vld [vmem:[#allocation124_spill] sm:$0xff]  ;;  %3984 = vrot.lane.b32.xlu1 %v17040_v44, %s7696_s19 }
 0x49c   :  { %vm17027_vm3 = vcmp.lt.s32.totalorder %v16925_v59, 32  ;;  %v17028_v27 = vmov 0  ;;  %v3118_v5 = vadd.s32 %v3114_v24, %v3106_v58  ;;  %v7161_v39 = vpack.c.bf16 %v2225_v61, %v2213_v21 }
 0x49d   :  { %v12060_v30 = vpack.c.bf16 %v17016_v1, %v17015_v36  ;;  %v17024_v36 = vmov 0  ;;  %v2254_v1 = vsub.f32 %v11941_v0, %v2253_v49  ;;  %vm12087_vm7 = vmand %vm12049_vm10, %vm17027_vm3  ;;  %v2272_v49 = vsub.f32 %v11949_v23, %v2271_v17  ;;  %7160 = vmatpush1.bf16.msra.mxu0 %v7159_v62  ;;  %v17037_v17 = vld [vmem:[#allocation100_spill] sm:$0xff]  ;;  %v3303_v62 = vpop.permute.xlu0 %3302 }
 0x49e   :  { %v17025_v36 = vsel %vm12077_vm11, 4294967295, %v17024_v36  ;;  %v17029_v27 = vsel %vm12087_vm7, 4294967295, %v17028_v27  ;;  %v17031_v55 = vand.u32 4294901760, %v17004_v43  ;;  %vm17032_vm6 = vcmp.eq.s32.totalorder %v16965_v33, %v8990_v7  ;;  %3822 = vrot.lane.b32.xlu0 %v17036_v48, %s7695_s18  ;;  %7162 = vmatprep.subr.bf16.mxu0 %v7161_v39  ;;  %v17047_v48 = vld [vmem:[#allocation6_spill] sm:$0xff] }
 0x49f   :  { %17017 = vst [vmem:[#allocation125_spill] sm:$0xff] %v12060_v30  ;;  %17026 = vst [vmem:[#allocation127_spill] sm:$0xff] %v17025_v36  ;;  %v2249_v30 = vand.u32 4294901760, %v2248_v42  ;;  %vm17033_vm2 = vcmp.eq.s32.totalorder %v17018_v53, 1  ;;  %vm3076_vm13 = vcmp.eq.s32.totalorder %v3058_v6, 1  ;;  %v2219_v24 = vand.u32 4294901760, %v2218_v18  ;;  %v12129_v6 = vpop.permute.xlu1 %3632  ;;  %4044 = vrot.lane.b32.xlu1 %v16989_v45, %s7698_s20 }
 0x4a0   :  { %17030 = vst [vmem:[#allocation111_spill] sm:$0xff] %v17029_v27  ;;  %v2242_v20 = vsub.f32 %v17004_v43, %v17031_v55  ;;  %vm12102_vm10 = vmand %vm17033_vm2, %vm17032_vm6  ;;  %v3122_v61 = vadd.s32 %v17037_v17, %v3118_v5  ;;  %vm17038_vm3 = vcmp.eq.s32.totalorder %v10271_v56, %v8990_v7  ;;  %v2237_v42 = vand.u32 4294901760, %v2236_v28  ;;  %v17039_v55 = vld [vmem:[#allocation93_spill] sm:$0xff] }
 0x4a1   :  { %vm3092_vm12 = vmand %vm3076_vm13, %vm17038_vm3  ;;  %v2260_v53 = vsub.f32 %v11687_v46, %v2259_v19  ;;  %vm3857_vm6 = vcmp.lt.s32.totalorder %v17039_v55, 1  ;;  %vm17041_vm2 = vcmp.eq.s32.totalorder %v16986_v63, %v8990_v7  ;;  %vm17042_vm0 = vcmp.eq.s32.totalorder %v17019_v8, 1  ;;  %17046 = vst [vmem:[#allocation138_spill] sm:$0xff] %v12129_v6 }
 0x4a2   :  { %vm12121_vm1 = vmand %vm17042_vm0, %vm17041_vm2  ;;  %v17045_v56 = vand.u32 4294901760, %v11963_v4  ;;  %v3108_v19 = vsel %vm3092_vm12, 1, %v16344_v15  ;;  %v7163_v21 = vpack.c.bf16 %v2231_v50, %v2219_v24  ;;  %v2255_v28 = vand.u32 4294901760, %v2254_v1  ;;  %v17059_v24 = vld [vmem:[#allocation103_spill] sm:$0xff] }
 0x4a3   :  { %v3120_v58 = vadd.s32 %v3116_v14, %v3108_v19  ;;  %v7165_v5 = vpack.c.bf16 %v2249_v30, %v2237_v42  ;;  %v2273_v39 = vand.u32 4294901760, %v2272_v49  ;;  %vm3864_vm13 = vcmp.lt.s32.totalorder %v17047_v48, 1  ;;  %v17053_v14 = vld [vmem:[#allocation77_spill] sm:$0xff] }
 0x4a4   :  { %v2278_v37 = vsub.f32 %v11963_v4, %v17045_v56  ;;  %vm17048_vm0 = vcmp.lt.s32.totalorder %v16965_v33, 32  ;;  %v17049_v8 = vmov 0  ;;  %v17052_v17 = vand.u32 4294901760, %v17014_v60  ;;  %7164 = vmatpush1.bf16.msra.mxu0 %v7163_v21  ;;  %v17054_v33 = vld [vmem:[#allocation42_spill] sm:$0xff] }
 0x4a5   :  { %vm12136_vm3 = vmand %vm12102_vm10, %vm17048_vm0  ;;  %v3349_v30 = vsel %vm12077_vm11, %v3303_v62, 0  ;;  %v3353_v1 = vsel %vm12087_vm7, %v17053_v14, 0  ;;  %v2243_v49 = vand.u32 4294901760, %v2242_v20  ;;  %3968 = vrot.lane.b32.xlu0 %v17054_v33, %s7696_s19  ;;  %vm17055_vm12 = vcmp.lt.s32.totalorder %v16986_v63, 32  ;;  %7166 = vmatprep.subr.bf16.mxu0 %v7165_v5  ;;  %v17060_v62 = vld [vmem:[#allocation52_spill] sm:$0xff] }
 0x4a6   :  { %v17050_v8 = vsel %vm12136_vm3, 4294967295, %v17049_v8  ;;  %v2266_v50 = vsub.f32 %v17014_v60, %v17052_v17  ;;  %vm12154_vm10 = vmand %vm12121_vm1, %vm17055_vm12  ;;  %v17056_v59 = vmov 0  ;;  %v3123_v42 = vadd.s32 %v17059_v24, %v3120_v58 }
 0x4a7   :  { %17051 = vst [vmem:[#allocation123_spill] sm:$0xff] %v17050_v8  ;;  %v17057_v59 = vsel %vm12154_vm10, 4294967295, %v17056_v59  ;;  %v3365_v56 = vadd.s32 %v3353_v1, %v3349_v30  ;;  %v2261_v19 = vand.u32 4294901760, %v2260_v53  ;;  %v3873_v20 = vsel %vm3857_vm6, 1, %v16344_v15  ;;  %v3312_v53 = vpop.permute.xlu0 %3311  ;;  %v12172_v30 = vpop.permute.xlu1 %3636  ;;  %v17063_v1 = vld [vmem:[#allocation60_spill] sm:$0xff]  ;;  %v17087_v8 = vld [vmem:[#allocation106_spill] sm:$0xff] }
 0x4a8   :  { %17058 = vst [vmem:[#allocation132_spill] sm:$0xff] %v17057_v59  ;;  %v7167_v21 = vpack.c.bf16 %v2255_v28, %v2243_v49  ;;  %v2279_v63 = vand.u32 4294901760, %v2278_v37  ;;  %v3880_v18 = vsel %vm3864_vm13, 1, %v16344_v15  ;;  %v3357_v58 = vsel %vm12136_vm3, %v17060_v62, 0  ;;  %17062 = vst [vmem:[#allocation115_spill] sm:$0xff] %v12172_v30 }
 0x4a9   :  { %v12170_v17 = vadd.s32 %v3123_v42, %v3122_v61  ;;  %v7169_v5 = vpack.c.bf16 %v2273_v39, %v2261_v19  ;;  %v3369_v14 = vadd.s32 %v3365_v56, %v3357_v58  ;;  %v3361_v28 = vsel %vm12154_vm10, %v17063_v1, 0  ;;  %3890 = vrot.lane.b32.xlu0 %v3873_v20, %s7695_s18  ;;  %3904 = vrot.lane.b32.xlu1 %v3880_v18, %s7695_s18  ;;  %v17064_v42 = vld [vmem:[#allocation109_spill] sm:$0xff]  ;;  %v17065_v39 = vld [vmem:[#allocation98_spill] sm:$0xff] }
 0x4aa   :  { %7168 = vmatpush1.bf16.msra.mxu0 %v7167_v21  ;;  %v2267_v37 = vand.u32 4294901760, %v2266_v50  ;;  %v7173_v19 = vpack.c.bf16 %v17065_v39, %v17064_v42  ;;  %v17067_v56 = vld [vmem:[#allocation61_spill] sm:$0xff]  ;;  %v17070_v21 = vld [vmem:[#allocation48_spill] sm:$0xff]  ;;  %v17075_v42 = vld [vmem:[#allocation10_spill] sm:$0xff]  ;;  %v7185_v36 = vpack.c.bf16 %v11753_v29, %v17087_v8  ;;  %v7195_v48 = vpack.c.bf16 %v11877_v41, %v17007_v16 }
 0x4ab   :  { %17061 = vst [vmem:[#allocation129_spill] sm:$0xff] %v12170_v17  ;;  %7170 = vmatprep.subr.bf16.mxu0 %v7169_v5  ;;  %v12179_v49 = vadd.s32 %v3369_v14, %v3361_v28  ;;  %v3318_v24 = vpop.permute.xlu0 %3317  ;;  %v12183_v62 = vpop.permute.xlu1 %3640  ;;  %v3350_v1 = vsel %vm10353_vm9, %v17067_v56, 0  ;;  %v17072_v5 = vld [vmem:[#allocation110_spill] sm:$0xff]  ;;  %v17073_v14 = vld [vmem:[#allocation99_spill] sm:$0xff]  ;;  %v17077_v56 = vld [vmem:[#allocation8_spill] sm:$0xff] }
 0x4ac   :  { %v7171_v61 = vpack.c.bf16 %v2279_v63, %v2267_v37  ;;  %17066 = vst [vmem:[#allocation124_spill] sm:$0xff] %v12183_v62  ;;  %v3354_v20 = vsel %vm10400_vm14, %v3318_v24, 0  ;;  %v17071_v63 = vld [vmem:[#allocation18_spill] sm:$0xff]  ;;  %v7175_v28 = vpack.c.bf16 %v17073_v14, %v17072_v5  ;;  %vm3866_vm6 = vcmp.lt.s32.totalorder %v17077_v56, 1  ;;  %v17098_v56 = vld [vmem:[#allocation116_spill] sm:$0xff] }
 0x4ad   :  { %3974 = vrot.lane.b32.xlu0 %v17070_v21, %s7696_s19  ;;  %v3366_v18 = vadd.s32 %v3354_v20, %v3350_v1  ;;  %3988 = vrot.lane.b32.xlu1 %v17071_v63, %s7696_s19  ;;  %v17074_v37 = vld [vmem:[#allocation94_spill] sm:$0xff]  ;;  %v17079_v20 = vld [vmem:[#allocation81_spill] sm:$0xff]  ;;  %v7191_v6 = vpack.c.bf16 %v11801_v10, %v17098_v56 }
 0x4ae   :  { %7172 = vmatpush1.bf16.msra.mxu0 %v7171_v61  ;;  %vm3859_vm1 = vcmp.lt.s32.totalorder %v17074_v37, 1  ;;  %v7177_v61 = vpack.c.bf16 %v11554_v52, %v11600_v13  ;;  %vm17080_vm2 = vnez %v17079_v20  ;;  %v17081_v5 = vld [vmem:[#allocation62_spill] sm:$0xff]  ;;  %v7179_v52 = vpack.c.bf16 %v11573_v12, %v11602_v35  ;;  %v17085_v35 = vld [vmem:[#allocation105_spill] sm:$0xff] }
 0x4af   :  { %7174 = vmatprep.subr.bf16.mxu0 %v7173_v19  ;;  %v3324_v39 = vpop.permute.xlu0 %3323  ;;  %v12200_v24 = vpop.permute.xlu1 %3644  ;;  %v3352_v19 = vsel %vm10380_vm8, %v3312_v53, 0  ;;  %v3875_v50 = vsel %vm3859_vm1, 1, %v16344_v15  ;;  %v3882_v13 = vsel %vm3866_vm6, 1, %v16344_v15  ;;  %v17086_v12 = vld [vmem:[#allocation137_spill] sm:$0xff] }
 0x4b0   :  { %17076 = vst [vmem:[#allocation100_spill] sm:$0xff] %v12200_v24  ;;  %v3356_v17 = vsel %vm17080_vm2, %v3324_v39, 0  ;;  %v17083_v39 = vld [vmem:[#allocation134_spill] sm:$0xff]  ;;  %v7183_v58 = vpack.c.bf16 %v17086_v12, %v17085_v35  ;;  %v17093_v24 = vld [vmem:[#allocation113_spill] sm:$0xff] }
 0x4b1   :  { %2315 = vmatmul.mubr.f32.vlgmr.msra.gmra.mrb[0].mxu0 %v17075_v42  ;;  %4034 = vrot.lane.b32.xlu0 %v17081_v5, %s7698_s20  ;;  %v3368_v14 = vadd.s32 %v3356_v17, %v3352_v19 }
 0x4b2   :  { %7176 = vmatpush1.bf16.msra.mxu0 %v7175_v28  ;;  %4048 = vrot.lane.b32.xlu1 %v17040_v44, %s7698_s20  ;;  %v17082_v28 = vld [vmem:[#allocation104_spill] sm:$0xff] }
 0x4b3   :  { %7178 = vmatprep.subr.bf16.mxu0 %v7177_v61  ;;  %2449 = vmatprep.mubr.f32.mxu0 %v16791_v54  ;;  %v3330_v53 = vpop.permute.xlu0 %3329  ;;  %v7181_v20 = vpack.c.bf16 %v17083_v39, %v17082_v28  ;;  %v12218_v1 = vpop.permute.xlu1 %3696 }
 0x4b4   :  { %v3358_v61 = vsel %vm10446_vm5, %v3330_v53, 0  ;;  %v17089_v53 = vld [vmem:[#allocation92_spill] sm:$0xff] }
 0x4b5   :  { %3894 = vrot.lane.b32.xlu0 %v3875_v50, %s7695_s18  ;;  %v3370_v19 = vadd.s32 %v3366_v18, %v3358_v61  ;;  %v17090_v18 = vld [vmem:[#allocation40_spill] sm:$0xff]  ;;  %v17092_v61 = vld [vmem:[#allocation95_spill] sm:$0xff] }
 0x4b6   :  { %7180 = vmatpush1.bf16.msra.mxu0 %v7179_v52  ;;  %3908 = vrot.lane.b32.xlu1 %v3882_v13, %s7695_s18  ;;  %vm3861_vm13 = vcmp.lt.s32.totalorder %v17092_v61, 1  ;;  %v17096_v52 = vld [vmem:[#allocation19_spill] sm:$0xff] }
 0x4b7   :  { %7182 = vmatprep.subr.bf16.mxu0 %v7181_v20  ;;  %v3336_v59 = vpop.permute.xlu0 %3335  ;;  %v12228_v27 = vpop.permute.xlu1 %3700  ;;  %v17091_v20 = vld [vmem:[#allocation108_spill] sm:$0xff]  ;;  %vm17097_vm12 = vnez %v17096_v52 }
 0x4b8   :  { %v3360_v17 = vsel %vm10466_vm4, %v3336_v59, 0  ;;  %v7187_v13 = vpack.c.bf16 %v11698_v11, %v17091_v20  ;;  %v17095_v59 = vld [vmem:[#allocation12_spill] sm:$0xff] }
 0x4b9   :  { %3978 = vrot.lane.b32.xlu0 %v17089_v53, %s7696_s19  ;;  %v3372_v50 = vadd.s32 %v3368_v14, %v3360_v17  ;;  %vm3868_vm0 = vcmp.lt.s32.totalorder %v17095_v59, 1  ;;  %v3877_v17 = vsel %vm3861_vm13, 1, %v16344_v15 }
 0x4ba   :  { %7184 = vmatpush1.bf16.msra.mxu0 %v7183_v58  ;;  %3992 = vrot.lane.b32.xlu1 %v17090_v18, %s7696_s19  ;;  %v7189_v58 = vpack.c.bf16 %v11799_v22, %v17093_v24  ;;  %v3884_v44 = vsel %vm3868_vm0, 1, %v16344_v15 }
 0x4bb   :  { %7186 = vmatprep.subr.bf16.mxu0 %v7185_v36  ;;  %v3342_v7 = vpop.permute.xlu0 %3341  ;;  %v12241_v62 = vpop.permute.xlu1 %3704 }
 0x4bc   :  { %17094 = vst [vmem:[#allocation77_spill] sm:$0xff] %v12241_v62  ;;  %v3362_v36 = vsel %vm17097_vm12, %v3342_v7, 0 }
 0x4bd   :  { %4038 = vrot.lane.b32.xlu0 %v17070_v21, %s7698_s20  ;;  %v3374_v14 = vadd.s32 %v3370_v19, %v3362_v36  ;;  %v17155_v21 = vld [vmem:[#allocation140_spill] sm:$0xff] }
 0x4be   :  { %7188 = vmatpush1.bf16.msra.mxu0 %v7187_v13  ;;  %4052 = vrot.lane.b32.xlu1 %v17071_v63, %s7698_s20  ;;  %v17099_v13 = vld [vmem:[#allocation120_spill] sm:$0xff]  ;;  %vm17156_vm11 = vnez %v17155_v21 }
 0x4bf   :  { %7190 = vmatprep.subr.bf16.mxu0 %v7189_v58  ;;  %v3348_v59 = vpop.permute.xlu0 %3347  ;;  %v7193_v52 = vpack.c.bf16 %v11875_v34, %v17099_v13  ;;  %v12256_v7 = vpop.permute.xlu1 %3708  ;;  %v3377_v61 = vadd.s32 %v3374_v14, %v12179_v49  ;;  %v7197_v49 = vpack.c.bf16 %v11924_v40, %v11598_v32  ;;  %v7201_v32 = vpack.c.bf16 %v11949_v23, %v11687_v46 }
 0x4c0   :  { %v3364_v58 = vsel %vm10513_vm15, %v3348_v59, 0  ;;  %v17102_v59 = vld [vmem:[#allocation57_spill] sm:$0xff] }
 0x4c1   :  { %3898 = vrot.lane.b32.xlu0 %v3877_v17, %s7695_s18  ;;  %v3376_v36 = vadd.s32 %v3372_v50, %v3364_v58  ;;  %v17105_v50 = vld [vmem:[#allocation96_spill] sm:$0xff]  ;;  %v17113_v17 = vld [vmem:[#allocation14_spill] sm:$0xff] }
 0x4c2   :  { %7192 = vmatpush1.bf16.msra.mxu0 %v7191_v6  ;;  %3912 = vrot.lane.b32.xlu1 %v3884_v44, %s7695_s18  ;;  %vm3863_vm1 = vcmp.lt.s32.totalorder %v17105_v50, 1  ;;  %v17162_v30 = vand.u32 4294901760, %v17113_v17 }
 0x4c3   :  { %7194 = vmatprep.subr.bf16.mxu0 %v7193_v52  ;;  %v3378_v55 = vadd.s32 %v3376_v36, %v11954_v3  ;;  %v12266_v62 = vpop.permute.xlu0 %3616  ;;  %v12270_v6 = vpop.permute.xlu1 %3712  ;;  %v17103_v52 = vld [vmem:[#allocation44_spill] sm:$0xff]  ;;  %v7199_v3 = vpack.c.bf16 %v11941_v0, %v17004_v43  ;;  %v7203_v0 = vpack.c.bf16 %v11963_v4, %v17014_v60  ;;  %v17118_v36 = vld [vmem:[#allocation67_spill] sm:$0xff] }
 0x4c4   :  { %17101 = vst [vmem:[#allocation103_spill] sm:$0xff] %v12270_v6  ;;  %v17116_v60 = vld [vmem:[#allocation112_spill] sm:$0xff] }
 0x4c5   :  { %3982 = vrot.lane.b32.xlu0 %v17102_v59, %s7696_s19  ;;  %v12276_v44 = vadd.s32 %v3378_v55, %v3377_v61  ;;  %v3879_v55 = vsel %vm3863_vm1, 1, %v16344_v15  ;;  %v17111_v61 = vld [vmem:[#allocation107_spill] sm:$0xff]  ;;  %vm17117_vm0 = vnez %v17116_v60 }
 0x4c6   :  { %7196 = vmatpush1.bf16.msra.mxu0 %v7195_v48  ;;  %3996 = vrot.lane.b32.xlu1 %v17103_v52, %s7696_s19  ;;  %v17108_v48 = vld [vmem:[#allocation16_spill] sm:$0xff]  ;;  %vm17112_vm13 = vnez %v17111_v61 }
 0x4c7   :  { %7198 = vmatprep.subr.bf16.mxu0 %v7197_v49  ;;  %17104 = vst [vmem:[#allocation52_spill] sm:$0xff] %v12276_v44  ;;  %v12281_v14 = vpop.permute.xlu0 %3622  ;;  %v12285_v40 = vpop.permute.xlu1 %3716  ;;  %vm3870_vm6 = vcmp.lt.s32.totalorder %v17108_v48, 1  ;;  %v17119_v49 = vld [vmem:[#allocation119_spill] sm:$0xff] }
 0x4c8   :  { %17106 = vst [vmem:[#allocation60_spill] sm:$0xff] %v12281_v14  ;;  %17107 = vst [vmem:[#allocation109_spill] sm:$0xff] %v12285_v40  ;;  %v3886_v43 = vsel %vm3870_vm6, 1, %v16344_v15  ;;  %vm17120_vm1 = vnez %v17119_v49  ;;  %v17152_v14 = vld [vmem:[#allocation139_spill] sm:$0xff] }
 0x4c9   :  { %4042 = vrot.lane.b32.xlu0 %v17089_v53, %s7698_s20 }
 0x4ca   :  { %7200 = vmatpush1.bf16.msra.mxu0 %v7199_v3  ;;  %4056 = vrot.lane.b32.xlu1 %v17090_v18, %s7698_s20  ;;  %v17121_v3 = vld [vmem:[#allocation97_spill] sm:$0xff] }
 0x4cb   :  { %7202 = vmatprep.subr.bf16.mxu0 %v7201_v32  ;;  %v12296_v46 = vpop.permute.xlu0 %3626  ;;  %v12298_v23 = vpop.permute.xlu1 %3720  ;;  %vm3865_vm6 = vcmp.lt.s32.totalorder %v17121_v3, 1  ;;  %v17134_v3 = vld [vmem:[#allocation131_spill] sm:$0xff] }
 0x4cc   :  { %17109 = vst [vmem:[#allocation98_spill] sm:$0xff] %v12296_v46  ;;  %17110 = vst [vmem:[#allocation61_spill] sm:$0xff] %v12298_v23  ;;  %v3881_v44 = vsel %vm3865_vm6, 1, %v16344_v15  ;;  %v17128_v23 = vld [vmem:[#allocation69_spill] sm:$0xff]  ;;  %vm17135_vm6 = vnez %v17134_v3  ;;  %v17148_v46 = vld [vmem:[#allocation59_spill] sm:$0xff] }
 0x4cd   :  { %3902 = vrot.lane.b32.xlu0 %v3879_v55, %s7695_s18  ;;  %vm17129_vm4 = vnez %v17128_v23  ;;  %vm17149_vm3 = vnez %v17148_v46 }
 0x4ce   :  { %7204 = vmatpush1.bf16.msra.mxu0 %v7203_v0  ;;  %3916 = vrot.lane.b32.xlu1 %v3886_v43, %s7695_s18  ;;  %v17123_v0 = vld [vmem:[#allocation85_spill] sm:$0xff]  ;;  %v17125_v43 = vld [vmem:[#allocation126_spill] sm:$0xff] }
 0x4cf   :  { %7206 = vmatprep.subr.msk.bf16.mxu0 %vm17112_vm13, %v16823_v47  ;;  %v12306_v58 = vpop.permute.xlu0 %3630  ;;  %v12308_v4 = vpop.permute.xlu1 %3724  ;;  %vm17124_vm15 = vnez %v17123_v0  ;;  %vm17126_vm12 = vnez %v17125_v43 }
 0x4d0   :  { %17114 = vst [vmem:[#allocation110_spill] sm:$0xff] %v12306_v58  ;;  %17115 = vst [vmem:[#allocation99_spill] sm:$0xff] %v12308_v4 }
 0x4d1   :  { %2452 = vmatmul.mubr.f32.vlgmr.msra.gmra.mrb[0].mxu0 %v17113_v17  ;;  %3986 = vrot.lane.b32.xlu0 %v17118_v36, %s7696_s19 }
 0x4d2   :  { %7208 = vmatpush1.bf16.msk.msra.mxu0 %vm17117_vm0, %v16823_v47  ;;  %2554 = vmatprep.mubr.f32.mxu0 %v16791_v54 }
 0x4d3   :  { %7210 = vmatprep.subr.msk.bf16.mxu0 %vm17120_vm1, %v16823_v47  ;;  %4060 = vrot.lane.b32.xlu1 %v17103_v52, %s7698_s20  ;;  %v12322_v32 = vpop.permute.xlu0 %3634  ;;  %v12324_v55 = vpop.permute.xlu1 %3792  ;;  %v17130_v52 = vld [vmem:[#allocation128_spill] sm:$0xff] }
 0x4d4   :  { %17122 = vst [vmem:[#allocation10_spill] sm:$0xff] %v12322_v32  ;;  %vm17131_vm5 = vnez %v17130_v52  ;;  %v17137_v32 = vld [vmem:[#allocation133_spill] sm:$0xff] }
 0x4d5   :  { %4046 = vrot.lane.b32.xlu0 %v17102_v59, %s7698_s20  ;;  %vm17138_vm2 = vnez %v17137_v32  ;;  %v17143_v59 = vld [vmem:[#allocation136_spill] sm:$0xff] }
 0x4d6   :  { %7212 = vmatpush1.bf16.msk.msra.mxu0 %vm17124_vm15, %v16823_v47  ;;  %vm17144_vm9 = vnez %v17143_v59 }
 0x4d7   :  { %7214 = vmatprep.subr.msk.bf16.mxu0 %vm17126_vm12, %v16823_v47  ;;  %v12335_v19 = vpop.permute.xlu0 %3638  ;;  %v12337_v4 = vpop.permute.xlu1 %3796 }
 0x4d8   :  { %17127 = vst [vmem:[#allocation104_spill] sm:$0xff] %v12335_v19  ;;  %v17136_v19 = vld [vmem:[#allocation72_spill] sm:$0xff] }
 0x4d9   :  { %3906 = vrot.lane.b32.xlu0 %v3881_v44, %s7695_s18  ;;  %v17139_v44 = vld [vmem:[#allocation101_spill] sm:$0xff] }
 0x4da   :  { %7216 = vmatpush1.bf16.msk.msra.mxu0 %vm17129_vm4, %v16823_v47  ;;  %vm3867_vm8 = vcmp.lt.s32.totalorder %v17139_v44, 1 }
 0x4db   :  { %7218 = vmatprep.subr.msk.bf16.mxu0 %vm17131_vm5, %v16823_v47  ;;  %v12346_v18 = vpop.permute.xlu0 %3642  ;;  %v12348_v48 = vpop.permute.xlu1 %3800  ;;  %v3883_v50 = vsel %vm3867_vm8, 1, %v16344_v15  ;;  %vm17153_vm8 = vnez %v17152_v14 }
 0x4dc   :  { %17132 = vst [vmem:[#allocation134_spill] sm:$0xff] %v12346_v18  ;;  %17133 = vst [vmem:[#allocation105_spill] sm:$0xff] %v12348_v48  ;;  %v17141_v18 = vld [vmem:[#allocation135_spill] sm:$0xff] }
 0x4dd   :  { %3990 = vrot.lane.b32.xlu0 %v17136_v19, %s7696_s19  ;;  %vm17142_vm14 = vnez %v17141_v18 }
 0x4de   :  { %7220 = vmatpush1.bf16.msk.msra.mxu0 %vm17135_vm6, %v16823_v47 }
 0x4df   :  { %7222 = vmatprep.subr.msk.bf16.mxu0 %vm17138_vm2, %v16823_v47  ;;  %v12359_v6 = vpop.permute.xlu0 %3646  ;;  %v12361_v58 = vpop.permute.xlu1 %3804 }
 0x4e0   :  { %17140 = vst [vmem:[#allocation137_spill] sm:$0xff] %v12359_v6  ;;  %v17146_v6 = vld [vmem:[#allocation91_spill] sm:$0xff] }
 0x4e1   :  { %4050 = vrot.lane.b32.xlu0 %v17118_v36, %s7698_s20  ;;  %vm17147_vm10 = vnez %v17146_v6 }
 0x4e2   :  { %7224 = vmatpush1.bf16.msk.msra.mxu0 %vm17142_vm14, %v16823_v47 }
 0x4e3   :  { %7226 = vmatprep.subr.msk.bf16.mxu0 %vm17144_vm9, %v16823_v47  ;;  %v12372_v48 = vpop.permute.xlu0 %3698  ;;  %v12374_v44 = vpop.permute.xlu1 %3808  ;;  %vm3826_vm9 = vcmp.ne.s32.totalorder %v12337_v4, 0  ;;  %v17190_v4 = vld [vmem:[#allocation71_spill] sm:$0xff] }
 0x4e4   :  { %17145 = vst [vmem:[#allocation106_spill] sm:$0xff] %v12374_v44  ;;  %v17154_v44 = vld [vmem:[#allocation23_spill] sm:$0xff] }
 0x4e5   :  { %3910 = vrot.lane.b32.xlu0 %v3883_v50, %s7695_s18  ;;  %v17157_v50 = vld [vmem:[#allocation102_spill] sm:$0xff] }
 0x4e6   :  { %7228 = vmatpush1.bf16.msk.msra.mxu0 %vm17147_vm10, %v16823_v47  ;;  %vm3869_vm7 = vcmp.lt.s32.totalorder %v17157_v50, 1  ;;  %vm3730_vm10 = vcmp.ne.s32.totalorder %v12228_v27, 0 }
 0x4e7   :  { %7230 = vmatprep.subr.msk.bf16.mxu0 %vm17149_vm3, %v16823_v47  ;;  %v12383_v36 = vpop.permute.xlu0 %3702  ;;  %v12385_v53 = vpop.permute.xlu1 %3812  ;;  %vm17160_vm3 = vnez %v16957_v31 }
 0x4e8   :  { %17150 = vst [vmem:[#allocation108_spill] sm:$0xff] %v12383_v36  ;;  %17151 = vst [vmem:[#allocation113_spill] sm:$0xff] %v12385_v53  ;;  %v17161_v36 = vld [vmem:[#allocation117_spill] sm:$0xff]  ;;  %v3885_v53 = vsel %vm3869_vm7, 1, %v16344_v15 }
 0x4e9   :  { %3994 = vrot.lane.b32.xlu0 %v17154_v44, %s7696_s19 }
 0x4ea   :  { %7232 = vmatpush1.bf16.msk.msra.mxu0 %vm17153_vm8, %v16823_v47  ;;  %vm3650_vm8 = vcmp.ne.s32.totalorder %v11996_v26, 0  ;;  %v17187_v26 = vmov 0 }
 0x4eb   :  { %7234 = vmatprep.subr.msk.bf16.mxu0 %vm17156_vm11, %v16823_v47  ;;  %v12396_v40 = vpop.permute.xlu0 %3706  ;;  %v12398_v37 = vpop.permute.xlu1 %3816 }
 0x4ec   :  { %17158 = vst [vmem:[#allocation116_spill] sm:$0xff] %v12396_v40  ;;  %17159 = vst [vmem:[#allocation120_spill] sm:$0xff] %v12398_v37  ;;  %v17165_v40 = vld [vmem:[#allocation122_spill] sm:$0xff] }
 0x4ed   :  { %4054 = vrot.lane.b32.xlu0 %v17136_v19, %s7698_s20  ;;  %v17168_v19 = vand.u32 4294901760, %v17083_v39  ;;  %v17174_v39 = vand.u32 4294901760, %v11753_v29  ;;  %v17178_v29 = vand.u32 4294901760, %v11799_v22 }
 0x4ee   :  { %7236 = vmatpush1.bf16.msk.msra.mxu0 %vm17160_vm3, %v16823_v47  ;;  %vm17184_vm3 = vcmp.ge.s32.totalorder %v10569_v51, 0 }
 0x4ef   :  { %7238 = vmatprep.subr.bf16.mxu0 %v17161_v36  ;;  %v12409_v63 = vpop.permute.xlu0 %3710  ;;  %v12411_v50 = vpop.permute.xlu1 %3820  ;;  %v17167_v36 = vand.u32 4294901760, %v17082_v28  ;;  %v17173_v28 = vand.u32 4294901760, %v17087_v8  ;;  %v17177_v8 = vand.u32 4294901760, %v17093_v24  ;;  %v17182_v24 = vand.u32 4294901760, %v11875_v34 }
 0x4f0   :  { %17163 = vst [vmem:[#allocation107_spill] sm:$0xff] %v12409_v63  ;;  %17164 = vst [vmem:[#allocation14_spill] sm:$0xff] %v12411_v50  ;;  %v17169_v50 = vld [vmem:[#allocation45_spill] sm:$0xff]  ;;  %v17172_v63 = vld [vmem:[#allocation114_spill] sm:$0xff]  ;;  %v17186_v34 = vand.u32 4294901760, %v11877_v41 }
 0x4f1   :  { %2558 = vmatmul.mubr.f32.vlgmr.msra.gmra.mrb[0].mxu0 %v17162_v30  ;;  %3914 = vrot.lane.b32.xlu0 %v3885_v53, %s7695_s18  ;;  %v7245_v17 = vpack.c.bf16 %v17168_v19, %v17167_v36  ;;  %v17170_v53 = vand.u32 4294901760, %v17085_v35  ;;  %vm3871_vm7 = vcmp.lt.s32.totalorder %v17172_v63, 1  ;;  %v7249_v19 = vpack.c.bf16 %v17174_v39, %v17173_v28 }
 0x4f2   :  { %7240 = vmatpush1.bf16.msra.mxu0 %v17165_v40  ;;  %2724 = vmatprep.mubr.f32.mxu0 %v16791_v54  ;;  %v17175_v35 = vand.u32 4294901760, %v17091_v20  ;;  %v17180_v20 = vand.u32 4294901760, %v11801_v10  ;;  %v17185_v10 = vand.u32 4294901760, %v17007_v16 }
 0x4f3   :  { %7242 = vmatprep.subr.bf16.mxu0 %v11985_v25  ;;  %v12417_v37 = vpop.permute.xlu0 %3714  ;;  %v12423_v30 = vpop.permute.xlu1 %3888  ;;  %v17171_v25 = vand.u32 4294901760, %v17086_v12  ;;  %v17176_v12 = vand.u32 4294901760, %v11698_v11 }
 0x4f4   :  { %17166 = vst [vmem:[#allocation112_spill] sm:$0xff] %v12417_v37 }
 0x4f5   :  { %3998 = vrot.lane.b32.xlu0 %v17169_v50, %s7696_s19  ;;  %v7247_v40 = vpack.c.bf16 %v17171_v25, %v17170_v53  ;;  %v7253_v25 = vpack.c.bf16 %v17178_v29, %v17177_v8 }
 0x4f6   :  { %7244 = vmatpush1.bf16.msra.mxu0 %v11991_v9  ;;  %v3887_v9 = vsel %vm3871_vm7, 1, %v16344_v15  ;;  %vm17183_vm7 = vcmp.lt.s32.totalorder %v10569_v51, 16  ;;  %v17288_v51 = vld [vmem:[#allocation106_spill] sm:$0xff] }
 0x4f7   :  { %7246 = vmatprep.subr.bf16.mxu0 %v7245_v17  ;;  %v12433_v37 = vpop.permute.xlu0 %3718  ;;  %v12439_v36 = vpop.permute.xlu1 %3970  ;;  %v7251_v17 = vpack.c.bf16 %v17176_v12, %v17175_v35  ;;  %vm3586_vm11 = vmand %vm17184_vm3, %vm17183_vm7 }
 0x4f8   :  { %vm3666_vm14 = vmand %vm3586_vm11, %vm3650_vm8 }
 0x4f9   :  { %4058 = vrot.lane.b32.xlu0 %v17154_v44, %s7698_s20  ;;  %vm3746_vm3 = vmand %vm3666_vm14, %vm3730_vm10  ;;  %vm17193_vm14 = vcmp.ge.s32.totalorder %v16989_v45, 0  ;;  %vm3654_vm10 = vcmp.ne.s32.totalorder %v12091_v57, 0  ;;  %v17196_v57 = vmov 0 }
 0x4fa   :  { %7248 = vmatpush1.bf16.msra.mxu0 %v7247_v40  ;;  %v17179_v40 = vand.u32 4294901760, %v17098_v56  ;;  %v7259_v56 = vpack.c.bf16 %v17186_v34, %v17185_v10  ;;  %vm3842_vm2 = vmand %vm3746_vm3, %vm3826_vm9  ;;  %vm17192_vm9 = vcmp.lt.s32.totalorder %v16989_v45, 16  ;;  %v17226_v10 = vld [vmem:[#allocation113_spill] sm:$0xff]  ;;  %v17282_v45 = vld [vmem:[#allocation103_spill] sm:$0xff] }
 0x4fb   :  { %7250 = vmatprep.subr.bf16.mxu0 %v7249_v19  ;;  %v12448_v53 = vpop.permute.xlu0 %3722  ;;  %v12454_v28 = vpop.permute.xlu1 %3972  ;;  %v17181_v19 = vand.u32 4294901760, %v17099_v13  ;;  %vm3590_vm11 = vmand %vm17193_vm14, %vm17192_vm9  ;;  %vm17202_vm9 = vcmp.lt.s32.totalorder %v17054_v33, 16  ;;  %vm17203_vm14 = vcmp.ge.s32.totalorder %v17054_v33, 0 }
 0x4fc   :  { %v7255_v39 = vpack.c.bf16 %v17180_v20, %v17179_v40 }
 0x4fd   :  { %3918 = vrot.lane.b32.xlu0 %v3887_v9, %s7695_s18  ;;  %v7257_v35 = vpack.c.bf16 %v17182_v24, %v17181_v19  ;;  %v17223_v19 = vld [vmem:[#allocation115_spill] sm:$0xff]  ;;  %v17224_v24 = vld [vmem:[#allocation94_spill] sm:$0xff] }
 0x4fe   :  { %7252 = vmatpush1.bf16.msra.mxu0 %v7251_v17  ;;  %v17191_v17 = vld [vmem:[#allocation125_spill] sm:$0xff] }
 0x4ff   :  { %7254 = vmatprep.subr.bf16.mxu0 %v7253_v25  ;;  %v12461_v11 = vpop.permute.xlu0 %3726  ;;  %v12467_v22 = vpop.permute.xlu1 %4032 }
 0x501   :  { %4062 = vrot.lane.b32.xlu0 %v17169_v50, %s7698_s20 }
 0x502   :  { %7256 = vmatpush1.bf16.msra.mxu0 %v7255_v39 }
 0x503   :  { %7258 = vmatprep.subr.bf16.mxu0 %v7257_v35  ;;  %v12482_v13 = vpop.permute.xlu0 %3794  ;;  %v3893_v9 = vpop.permute.xlu1 %3892  ;;  %v3955_v35 = vmul.u32 16, %v17224_v24 }
 0x504   :  { %vm3922_vm7 = vcmp.ne.s32.totalorder %v3893_v9, 0  ;;  %v17227_v9 = vmov 0 }
 0x505   :  { %vm12485_vm6 = vmand %vm3842_vm2, %vm3922_vm7  ;;  %vm3830_vm2 = vcmp.ne.s32.totalorder %v12361_v58, 0  ;;  %v17200_v58 = vld [vmem:[#allocation83_spill] sm:$0xff]  ;;  %vm17201_vm7 = vnez %v17143_v59 }
 0x506   :  { %7260 = vmatpush1.bf16.msra.mxu0 %v7259_v56  ;;  %v17188_v26 = vsel %vm12485_vm6, 4294967295, %v17187_v26  ;;  %v4184_v41 = vsel %vm12485_vm6, 1, %v16344_v15 }
 0x507   :  { %7262 = vmatprep.subr.bf16.mxu0 %v12033_v2  ;;  %17189 = vst [vmem:[#allocation119_spill] sm:$0xff] %v17188_v26  ;;  %v12489_v27 = vpop.permute.xlu0 %3798  ;;  %v12494_v16 = vpop.permute.xlu1 %3976  ;;  %4205 = vperm.xlu0 %7661, %v4184_v41   ;;  %v17230_v41 = vld [vmem:[#allocation48_spill] sm:$0xff] }
 0x50a   :  { %7264 = vmatpush1.bf16.msra.mxu0 %v12037_v38 }
 0x50b   :  { %7266 = vmatprep.subr.bf16.mxu0 %v17190_v4  ;;  %v12498_v12 = vpop.permute.xlu0 %3802  ;;  %v12500_v2 = vpop.permute.xlu1 %4036  ;;  %v17233_v4 = vld [vmem:[#allocation60_spill] sm:$0xff] }
 0x50e   :  { %7268 = vmatpush1.bf16.msra.mxu0 %v17191_v17 }
 0x50f   :  { %7270 = vmatprep.subr.msk.bf16.mxu0 %vm17112_vm13, %v16823_v47  ;;  %v12507_v8 = vpop.permute.xlu0 %3806  ;;  %v12509_v29 = vpop.permute.xlu1 %3896 }
 0x511   :  { %2726 = vmatmul.mubr.f32.vlgmr.msra.gmra.mrb[0].mxu0 %v17075_v42 }
 0x512   :  { %7272 = vmatpush1.bf16.msk.msra.mxu0 %vm17117_vm0, %v16823_v47  ;;  %2828 = vmatprep.mubr.f32.mxu0 %v16791_v54  ;;  %vm17194_vm0 = vnez %v17134_v3  ;;  %v3952_v3 = vmul.u32 16, %v17200_v58  ;;  %v17390_v58 = vld [vmem:[#allocation20_spill] sm:$0xff] }
 0x513   :  { %7274 = vmatprep.subr.msk.bf16.mxu0 %vm17120_vm1, %v16823_v47  ;;  %v12518_v38 = vpop.permute.xlu0 %3810  ;;  %v12520_v61 = vpop.permute.xlu1 %3980 }
 0x516   :  { %7276 = vmatpush1.bf16.msk.msra.mxu0 %vm17124_vm15, %v16823_v47  ;;  %vm3734_vm15 = vcmp.ne.s32.totalorder %v12256_v7, 0 }
 0x517   :  { %7278 = vmatprep.subr.msk.bf16.mxu0 %vm17126_vm12, %v16823_v47  ;;  %v12528_v60 = vpop.permute.xlu0 %3814  ;;  %v12530_v25 = vpop.permute.xlu1 %4040  ;;  %vm3670_vm12 = vmand %vm3590_vm11, %vm3654_vm10  ;;  %vm3648_vm10 = vcmp.ne.s32.totalorder %v12266_v62, 0 }
 0x518   :  { %vm3750_vm13 = vmand %vm3670_vm12, %vm3734_vm15  ;;  %vm17204_vm15 = vnez %v17146_v6 }
 0x519   :  { %vm3846_vm8 = vmand %vm3750_vm13, %vm3830_vm2  ;;  %vm17205_vm2 = vnez %v17148_v46  ;;  %vm3824_vm13 = vcmp.ne.s32.totalorder %v12324_v55, 0  ;;  %v17211_v46 = vld [vmem:[#allocation142_spill] sm:$0xff] }
 0x51a   :  { %7280 = vmatpush1.bf16.msk.msra.mxu0 %vm17129_vm4, %v16823_v47  ;;  %vm17195_vm4 = vnez %v17137_v32  ;;  %vm3584_vm11 = vmand %vm17203_vm14, %vm17202_vm9  ;;  %vm3649_vm9 = vcmp.ne.s32.totalorder %v17211_v46, 0  ;;  %v17238_v46 = vmov 0 }
 0x51b   :  { %7282 = vmatprep.subr.msk.bf16.mxu0 %vm17131_vm5, %v16823_v47  ;;  %v12545_v49 = vpop.permute.xlu0 %3818  ;;  %v3901_v0 = vpop.permute.xlu1 %3900  ;;  %vm17199_vm5 = vnez %v17141_v18  ;;  %vm3664_vm12 = vmand %vm3584_vm11, %vm3648_vm10  ;;  %vm17212_vm11 = vnez %v17155_v21 }
 0x51c   :  { %vm3926_vm1 = vcmp.ne.s32.totalorder %v3901_v0, 0 }
 0x51d   :  { %vm12553_vm3 = vmand %vm3846_vm8, %vm3926_vm1  ;;  %vm17207_vm1 = vcmp.ge.s32.totalorder %v17081_v5, 0 }
 0x51e   :  { %7284 = vmatpush1.bf16.msk.msra.mxu0 %vm17194_vm0, %v16823_v47  ;;  %v17197_v57 = vsel %vm12553_vm3, 4294967295, %v17196_v57  ;;  %v4188_v52 = vsel %vm12553_vm3, 1, %v16344_v15  ;;  %vm17206_vm0 = vcmp.lt.s32.totalorder %v17081_v5, 16  ;;  %vm3651_vm3 = vcmp.ne.s32.totalorder %v17233_v4, 0  ;;  %v17252_v4 = vld [vmem:[#allocation31_spill] sm:$0xff] }
 0x51f   :  { %7286 = vmatprep.subr.msk.bf16.mxu0 %vm17195_vm4, %v16823_v47  ;;  %17198 = vst [vmem:[#allocation85_spill] sm:$0xff] %v17197_v57  ;;  %v12557_v7 = vpop.permute.xlu0 %3822  ;;  %v12562_v23 = vpop.permute.xlu1 %3984  ;;  %4217 = vperm.xlu0 %7661, %v4188_v52   ;;  %vm12591_vm8 = vmand %vm17207_vm1, %vm17206_vm0  ;;  %vm3728_vm4 = vcmp.ne.s32.totalorder %v12218_v1, 0  ;;  %v17213_v1 = vmov 0  ;;  %vm3825_vm0 = vcmp.ne.s32.totalorder %v12482_v13, 0  ;;  %v17234_v52 = vmov 2  }
 0x520   :  { %vm3744_vm14 = vmand %vm3664_vm12, %vm3728_vm4  ;;  %vm17216_vm4 = vnez %v16957_v31  ;;  %v17220_v31 = vld [vmem:[#allocation18_spill] sm:$0xff] }
 0x521   :  { %vm3840_vm10 = vmand %vm3744_vm14, %vm3824_vm13 }
 0x522   :  { %7288 = vmatpush1.bf16.msk.msra.mxu0 %vm17199_vm5, %v16823_v47  ;;  %vm3920_vm5 = vcmp.ne.s32.totalorder %v12423_v30, 0  ;;  %vm3665_vm12 = vmand %vm12591_vm8, %vm3649_vm9  ;;  %vm17221_vm8 = vcmp.lt.s32.totalorder %v17220_v31, 16  ;;  %vm17222_vm9 = vcmp.ge.s32.totalorder %v17220_v31, 0  ;;  %v17272_v31 = vld [vmem:[#allocation36_spill] sm:$0xff] }
 0x523   :  { %7290 = vmatprep.subr.msk.bf16.mxu0 %vm17201_vm7, %v16823_v47  ;;  %v3969_v32 = vpop.permute.xlu0 %3968  ;;  %v12576_v43 = vpop.permute.xlu1 %4044  ;;  %vm17210_vm7 = vnez %v17152_v14  ;;  %vm3594_vm14 = vmand %vm17222_vm9, %vm17221_vm8  ;;  %vm17232_vm8 = vcmp.ge.s32.totalorder %v17230_v41, 0 }
 0x524   :  { %v4000_v18 = vadd.s32 %v3969_v32, %v3952_v3  ;;  %v17235_v32 = vld [vmem:[#allocation108_spill] sm:$0xff] }
 0x526   :  { %7292 = vmatpush1.bf16.msk.msra.mxu0 %vm17204_vm15, %v16823_v47  ;;  %v4016_v59 = vmul.u32 16, %v4000_v18  ;;  %vm3729_vm15 = vcmp.ne.s32.totalorder %v12372_v48, 0  ;;  %v17217_v48 = vmov 0 }
 0x527   :  { %7294 = vmatprep.subr.msk.bf16.mxu0 %vm17205_vm2, %v16823_v47  ;;  %v3891_v40 = vpop.permute.xlu0 %3890  ;;  %v12585_v20 = vpop.permute.xlu1 %3904  ;;  %vm12606_vm2 = vmand %vm3840_vm10, %vm3920_vm5 }
 0x528   :  { %v4064_v6 = vadd.s32 %v12467_v22, %v4016_v59  ;;  %v17214_v1 = vsel %vm12606_vm2, 4294967295, %v17213_v1  ;;  %vm3921_vm1 = vcmp.ne.s32.totalorder %v3891_v40, 0  ;;  %vm3745_vm13 = vmand %vm3665_vm12, %vm3729_vm15  ;;  %v4182_v21 = vsel %vm12606_vm2, 1, %v16344_v15  ;;  %v17225_v22 = vld [vmem:[#allocation109_spill] sm:$0xff]  ;;  %v17236_v59 = vld [vmem:[#allocation3_spill] sm:$0xff] }
 0x529   :  { %17215 = vst [vmem:[#allocation126_spill] sm:$0xff] %v17214_v1  ;;  %vm3738_vm10 = vcmp.ne.s32.totalorder %v17225_v22, 0  ;;  %vm3834_vm15 = vcmp.ne.s32.totalorder %v17226_v10, 0  ;;  %v3956_v40 = vmul.u32 16, %v17236_v59  ;;  %v17246_v10 = vld [vmem:[#allocation77_spill] sm:$0xff] }
 0x52a   :  { %7296 = vmatpush1.bf16.msk.msra.mxu0 %vm17210_vm7, %v16823_v47  ;;  %4115 = vperm.xlu1 %7665, %v4064_v6   ;;  %vm3841_vm7 = vmand %vm3745_vm13, %vm3825_vm0  ;;  %v17237_v6 = vld [vmem:[#allocation28_spill] sm:$0xff] }
 0x52b   :  { %7298 = vmatprep.subr.msk.bf16.mxu0 %vm17212_vm11, %v16823_v47  ;;  %v3975_v55 = vpop.permute.xlu0 %3974  ;;  %v12611_v14 = vpop.permute.xlu1 %3988  ;;  %vm12622_vm5 = vmand %vm3841_vm7, %vm3921_vm1  ;;  %vm3658_vm11 = vcmp.ne.s32.totalorder %v17223_v19, 0  ;;  %vm17231_vm7 = vcmp.lt.s32.totalorder %v17230_v41, 16  ;;  %v17242_v19 = vld [vmem:[#allocation78_spill] sm:$0xff] }
 0x52c   :  { %v17218_v48 = vsel %vm12622_vm5, 4294967295, %v17217_v48  ;;  %v4183_v34 = vsel %vm12622_vm5, 1, %v16344_v15  ;;  %vm3674_vm0 = vmand %vm3594_vm14, %vm3658_vm11  ;;  %v4003_v13 = vadd.s32 %v3975_v55, %v3955_v35  ;;  %vm3731_vm11 = vcmp.ne.s32.totalorder %v17235_v32, 0  ;;  %v17245_v35 = vld [vmem:[#allocation25_spill] sm:$0xff]  ;;  %v17253_v32 = vld [vmem:[#allocation116_spill] sm:$0xff] }
 0x52d   :  { %17219 = vst [vmem:[#allocation69_spill] sm:$0xff] %v17218_v48  ;;  %vm3754_vm12 = vmand %vm3674_vm0, %vm3738_vm10  ;;  %vm3827_vm10 = vcmp.ne.s32.totalorder %v12489_v27, 0  ;;  %v17241_v27 = vld [vmem:[#allocation29_spill] sm:$0xff] }
 0x52e   :  { %7300 = vmatpush1.bf16.msk.msra.mxu0 %vm17216_vm4, %v16823_v47  ;;  %7666 = vset.pattern.permute.xlu1 %v16344_v15  ;;  %vm3850_vm4 = vmand %vm3754_vm12, %vm3834_vm15  ;;  %v4019_v3 = vmul.u32 16, %v4003_v13  ;;  %v17251_v13 = vld [vmem:[#allocation105_spill] sm:$0xff] }
 0x52f   :  { %v12626_v30 = vpop.permute.xlu0 %4034  ;;  %4199 = vperm.xlu1 %7666, %v4182_v21   ;;  %v12628_v39 = vpop.permute.xlu1 %4048  ;;  %vm3587_vm9 = vmand %vm17232_vm8, %vm17231_vm7  ;;  %v4004_v21 = vadd.s32 %v12494_v16, %v3956_v40  ;;  %vm3652_vm8 = vcmp.ne.s32.totalorder %v17245_v35, 0  ;;  %v17247_v16 = vld [vmem:[#allocation92_spill] sm:$0xff]  ;;  %v17263_v35 = vld [vmem:[#allocation57_spill] sm:$0xff] }
 0x530   :  { %vm3667_vm14 = vmand %vm3587_vm9, %vm3651_vm3  ;;  %vm17243_vm3 = vcmp.lt.s32.totalorder %v17242_v19, 16  ;;  %vm3732_vm9 = vcmp.ne.s32.totalorder %v17246_v10, 0 }
 0x531   :  { %2830 = vmatmul.mubr.f32.vlgmr.msra.gmra.mrb[0].mxu0 %v17075_v42  ;;  %vm3747_vm0 = vmand %vm3667_vm14, %vm3731_vm11  ;;  %vm17248_vm14 = vcmp.lt.s32.totalorder %v17247_v16, 16  ;;  %vm17249_vm11 = vcmp.ge.s32.totalorder %v17247_v16, 0 }
 0x532   :  { %vm3843_vm12 = vmand %vm3747_vm0, %vm3827_vm10 }
 0x533   :  { %v3895_v56 = vpop.permute.xlu0 %3894  ;;  %4202 = vperm.xlu1 %7666, %v4183_v34   ;;  %v3909_v42 = vpop.permute.xlu1 %3908  ;;  %vm3589_vm10 = vmand %vm17249_vm11, %vm17248_vm14  ;;  %vm3733_vm14 = vcmp.ne.s32.totalorder %v17253_v32, 0  ;;  %v17270_v32 = vld [vmem:[#allocation6_spill] sm:$0xff] }
 0x534   :  { %vm3930_vm1 = vcmp.ne.s32.totalorder %v3909_v42, 0  ;;  %vm3923_vm15 = vcmp.ne.s32.totalorder %v3895_v56, 0  ;;  %v17250_v56 = vld [vmem:[#allocation98_spill] sm:$0xff]  ;;  %v4020_v42 = vmul.u32 16, %v4004_v21 }
 0x535   :  { %vm12642_vm13 = vmand %vm3850_vm4, %vm3930_vm1  ;;  %vm17244_vm4 = vcmp.ge.s32.totalorder %v17242_v19, 0 }
 0x536   :  { %v17228_v9 = vsel %vm12642_vm13, 4294967295, %v17227_v9  ;;  %v4192_v0 = vsel %vm12642_vm13, 1, %v16344_v15  ;;  %vm12662_vm1 = vmand %vm3843_vm12, %vm3923_vm15  ;;  %vm3653_vm15 = vcmp.ne.s32.totalorder %v17250_v56, 0  ;;  %vm3828_vm12 = vcmp.ne.s32.totalorder %v17251_v13, 0  ;;  %v17267_v56 = vld [vmem:[#allocation93_spill] sm:$0xff]  ;;  %v17268_v13 = vld [vmem:[#allocation35_spill] sm:$0xff] }
 0x537   :  { %17229 = vst [vmem:[#allocation128_spill] sm:$0xff] %v17228_v9  ;;  %v12651_v17 = vpop.permute.xlu0 %3978  ;;  %7667 = vset.pattern.permute.xlu1 %v17234_v52  ;;  %4229 = vperm.xlu0 %7661, %v4192_v0   ;;  %v17239_v46 = vsel %vm12662_vm1, 4294967295, %v17238_v46  ;;  %vm3588_vm7 = vmand %vm17244_vm4, %vm17243_vm3  ;;  %v4185_v22 = vsel %vm12662_vm1, 1, %v16344_v15  ;;  %vm3924_vm4 = vcmp.ne.s32.totalorder %v12509_v29, 0  ;;  %v4068_v0 = vadd.s32 %v12530_v25, %v4020_v42  ;;  %v17258_v29 = vld [vmem:[#allocation33_spill] sm:$0xff]  ;;  %v17418_v9 = vld [vmem:[#allocation79_spill] sm:$0xff] }
 0x538   :  { %17240 = vst [vmem:[#allocation131_spill] sm:$0xff] %v17239_v46  ;;  %vm3668_vm0 = vmand %vm3588_vm7, %vm3652_vm8  ;;  %vm3829_vm7 = vcmp.ne.s32.totalorder %v12498_v12, 0  ;;  %v17262_v12 = vld [vmem:[#allocation34_spill] sm:$0xff]  ;;  %v3953_v42 = vmul.u32 16, %v17267_v56 }
 0x539   :  { %vm3748_vm3 = vmand %vm3668_vm0, %vm3732_vm9 }
 0x53a   :  { %vm3669_vm13 = vmand %vm3589_vm10, %vm3653_vm15 }
 0x53b   :  { %v4039_v18 = vpop.permute.xlu0 %4038  ;;  %7676 = vset.pattern.permute.xlu0 %v17234_v52  ;;  %vm3844_vm1 = vmand %vm3748_vm3, %vm3828_vm12 }
 0x53c   :  { %v4067_v62 = vadd.s32 %v4039_v18, %v4019_v3  ;;  %3132 = vperm.xlu0 %7676, %v17237_v6   ;;  %v17254_v18 = vld [vmem:[#allocation96_spill] sm:$0xff]  ;;  %vm12693_vm8 = vmand %vm3844_vm1, %vm3924_vm4  ;;  %vm17264_vm1 = vcmp.lt.s32.totalorder %v17263_v35, 16 }
 0x53d   :  { %v3959_v40 = vmul.u32 16, %v17254_v18  ;;  %vm3749_vm11 = vmand %vm3669_vm13, %vm3733_vm14  ;;  %v4186_v21 = vsel %vm12693_vm8, 1, %v16344_v15  ;;  %vm17265_vm13 = vcmp.ge.s32.totalorder %v17263_v35, 0  ;;  %vm3831_vm14 = vcmp.ne.s32.totalorder %v12507_v8, 0 }
 0x53e   :  { %4124 = vperm.xlu1 %7667, %v4067_v62   ;;  %v17255_v62 = vmov 0  ;;  %vm3845_vm10 = vmand %vm3749_vm11, %vm3829_vm7 }
 0x53f   :  { %v3899_v55 = vpop.permute.xlu0 %3898  ;;  %v17256_v62 = vsel %vm12693_vm8, 4294967295, %v17255_v62  ;;  %vm3591_vm0 = vmand %vm17265_vm13, %vm17264_vm1 }
 0x540   :  { %3141 = vperm.xlu0 %7676, %v17241_v27   ;;  %17257 = vst [vmem:[#allocation133_spill] sm:$0xff] %v17256_v62  ;;  %vm3925_vm9 = vcmp.ne.s32.totalorder %v3899_v55, 0  ;;  %v17259_v27 = vmov 0  ;;  %v17266_v55 = vld [vmem:[#allocation110_spill] sm:$0xff] }
 0x541   :  { %vm12702_vm15 = vmand %vm3845_vm10, %vm3925_vm9  ;;  %vm3655_vm12 = vcmp.ne.s32.totalorder %v17266_v55, 0  ;;  %v12724_v55 = vpop.permute.xlu1 %3992 }
 0x542   :  { %7668 = vset.pattern.permute.xlu1 %v16344_v15  ;;  %v17260_v27 = vsel %vm12702_vm15, 4294967295, %v17259_v27  ;;  %vm3671_vm3 = vmand %vm3591_vm0, %vm3655_vm12 }
 0x543   :  { %v3983_v34 = vpop.permute.xlu0 %3982  ;;  %4208 = vperm.xlu1 %7668, %v4185_v22   ;;  %17261 = vst [vmem:[#allocation135_spill] sm:$0xff] %v17260_v27 }
 0x544   :  { %3147 = vperm.xlu0 %7676, %v17252_v4   ;;  %v4007_v6 = vadd.s32 %v3983_v34, %v3959_v40  ;;  %v4187_v34 = vsel %vm12702_vm15, 1, %v16344_v15  ;;  %v17269_v4 = vld [vmem:[#allocation107_spill] sm:$0xff]  ;;  %v3960_v40 = vmul.u32 16, %v17270_v32 }
 0x545   :  { %vm3735_vm4 = vcmp.ne.s32.totalorder %v17269_v4, 0  ;;  %v17277_v4 = vld [vmem:[#allocation38_spill] sm:$0xff]  ;;  %v17410_v32 = vld [vmem:[#allocation63_spill] sm:$0xff] }
 0x546   :  { %v4023_v10 = vmul.u32 16, %v4007_v6  ;;  %vm3751_vm9 = vmand %vm3671_vm3, %vm3735_vm4  ;;  %v4001_v6 = vadd.s32 %v12439_v36, %v3953_v42  ;;  %vm3736_vm3 = vcmp.ne.s32.totalorder %v17282_v45, 0 }
 0x547   :  { %v12687_v3 = vpop.permute.xlu0 %4042  ;;  %7669 = vset.pattern.permute.xlu1 %v17234_v52  ;;  %vm3847_vm11 = vmand %vm3751_vm9, %vm3831_vm14 }
 0x548   :  { %4127 = vperm.xlu1 %7669, %v4068_v0   ;;  %3153 = vperm.xlu0 %7676, %v17258_v29   ;;  %v4017_v36 = vmul.u32 16, %v4001_v6 }
 0x54b   :  { %v3903_v25 = vpop.permute.xlu0 %3902 }
 0x54c   :  { %7670 = vset.pattern.permute.xlu1 %v16344_v15  ;;  %3159 = vperm.xlu0 %7676, %v17262_v12   ;;  %vm3927_vm7 = vcmp.ne.s32.totalorder %v3903_v25, 0 }
 0x54d   :  { %4211 = vperm.xlu1 %7670, %v4186_v21   ;;  %v17271_v21 = vld [vmem:[#allocation37_spill] sm:$0xff]  ;;  %vm12729_vm10 = vmand %vm3847_vm11, %vm3927_vm7 }
 0x54e   :  { %v3954_v12 = vmul.u32 16, %v17271_v21 }
 0x54f   :  { %v12712_v22 = vpop.permute.xlu0 %3986 }
 0x550   :  { %3165 = vperm.xlu0 %7676, %v17268_v13   ;;  %v17274_v13 = vmov 0  ;;  %v4002_v42 = vadd.s32 %v12454_v28, %v3954_v12  ;;  %v17283_v12 = vld [vmem:[#allocation67_spill] sm:$0xff] }
 0x551   :  { %4214 = vperm.xlu1 %7670, %v4187_v34   ;;  %v17273_v34 = vld [vmem:[#allocation95_spill] sm:$0xff]  ;;  %v17275_v13 = vsel %vm12729_vm10, 4294967295, %v17274_v13  ;;  %vm17284_vm4 = vcmp.lt.s32.totalorder %v17283_v12, 16  ;;  %vm17285_vm14 = vcmp.ge.s32.totalorder %v17283_v12, 0  ;;  %v17368_v12 = vld [vmem:[#allocation132_spill] sm:$0xff] }
 0x552   :  { %v3957_v8 = vmul.u32 16, %v17273_v34  ;;  %17276 = vst [vmem:[#allocation136_spill] sm:$0xff] %v17275_v13  ;;  %vm3593_vm7 = vmand %vm17285_vm14, %vm17284_vm4 }
 0x553   :  { %v4047_v0 = vpop.permute.xlu0 %4046 }
 0x554   :  { %v4071_v29 = vadd.s32 %v4047_v0, %v4023_v10  ;;  %3171 = vperm.xlu0 %7676, %v17272_v31   ;;  %v4008_v10 = vadd.s32 %v12562_v23, %v3960_v40  ;;  %v17278_v0 = vld [vmem:[#allocation47_spill] sm:$0xff]  ;;  %v17281_v31 = vld [vmem:[#allocation138_spill] sm:$0xff]  ;;  %v4065_v23 = vadd.s32 %v12626_v30, %v4017_v36  ;;  %v4005_v28 = vadd.s32 %v12651_v17, %v3957_v8  ;;  %v12748_v40 = vpop.permute.xlu1 %4052  ;;  %v17289_v36 = vld [vmem:[#allocation97_spill] sm:$0xff] }
 0x555   :  { %7671 = vset.pattern.permute.xlu1 %v17234_v52  ;;  %vm17279_vm1 = vcmp.lt.s32.totalorder %v17278_v0, 16  ;;  %vm17280_vm13 = vcmp.ge.s32.totalorder %v17278_v0, 0  ;;  %vm3656_vm12 = vcmp.ne.s32.totalorder %v17281_v31, 0  ;;  %v17287_v31 = vld [vmem:[#allocation4_spill] sm:$0xff]  ;;  %v4018_v30 = vmul.u32 16, %v4002_v42  ;;  %v17293_v42 = vld [vmem:[#allocation101_spill] sm:$0xff] }
 0x556   :  { %4136 = vperm.xlu1 %7671, %v4071_v29   ;;  %vm3592_vm0 = vmand %vm17280_vm13, %vm17279_vm1  ;;  %v4189_v29 = vsel %vm12729_vm10, 1, %v16344_v15  ;;  %v3958_v0 = vmul.u32 16, %v17287_v31  ;;  %v4024_v19 = vmul.u32 16, %v4008_v10  ;;  %vm3832_vm1 = vcmp.ne.s32.totalorder %v17288_v51, 0  ;;  %v17292_v51 = vld [vmem:[#allocation112_spill] sm:$0xff] }
 0x557   :  { %v3907_v25 = vpop.permute.xlu0 %3906  ;;  %vm3672_vm11 = vmand %vm3592_vm0, %vm3656_vm12  ;;  %v3961_v17 = vmul.u32 16, %v17289_v36  ;;  %vm3928_vm10 = vcmp.ne.s32.totalorder %v12585_v20, 0  ;;  %v4066_v10 = vadd.s32 %v12500_v2, %v4018_v30  ;;  %vm3737_vm12 = vcmp.ne.s32.totalorder %v17292_v51, 0  ;;  %v17367_v36 = vld [vmem:[#allocation141_spill] sm:$0xff] }
 0x558   :  { %3177 = vperm.xlu0 %7676, %v17277_v4   ;;  %v17286_v4 = vld [vmem:[#allocation10_spill] sm:$0xff]  ;;  %vm3752_vm13 = vmand %vm3672_vm11, %vm3736_vm3  ;;  %v4072_v8 = vadd.s32 %v12628_v39, %v4024_v19  ;;  %v3963_v45 = vmul.u32 16, %v17293_v42  ;;  %vm3833_vm3 = vcmp.ne.s32.totalorder %v12518_v38, 0  ;;  %v4006_v20 = vadd.s32 %v12520_v61, %v3958_v0  ;;  %v12776_v19 = vpop.permute.xlu1 %3912  ;;  %v17297_v38 = vld [vmem:[#allocation8_spill] sm:$0xff] }
 0x559   :  { %vm3657_vm9 = vcmp.ne.s32.totalorder %v17286_v4, 0  ;;  %v4021_v4 = vmul.u32 16, %v4005_v28  ;;  %vm3848_vm0 = vmand %vm3752_vm13, %vm3832_vm1  ;;  %v17294_v39 = vmov 0  ;;  %v4009_v2 = vadd.s32 %v12712_v22, %v3961_v17 }
 0x55a   :  { %7672 = vset.pattern.permute.xlu1 %v16344_v15  ;;  %vm12762_vm4 = vmand %vm3593_vm7, %vm3657_vm9  ;;  %vm3929_vm7 = vcmp.ne.s32.totalorder %v3907_v25, 0  ;;  %v3962_v30 = vmul.u32 16, %v17297_v38  ;;  %v17298_v25 = vmov 0 }
 0x55b   :  { %v3991_v6 = vpop.permute.xlu0 %3990  ;;  %4220 = vperm.xlu1 %7672, %v4189_v29   ;;  %vm12772_vm14 = vmand %vm3848_vm0, %vm3928_vm10  ;;  %v4025_v22 = vmul.u32 16, %v4009_v2 }
 0x55c   :  { %4118 = vperm.xlu0 %7676, %v4065_v23   ;;  %v17295_v39 = vsel %vm12772_vm14, 4294967295, %v17294_v39  ;;  %vm3753_vm9 = vmand %vm12762_vm4, %vm3737_vm12  ;;  %v4069_v23 = vadd.s32 %v12687_v3, %v4021_v4  ;;  %v4011_v61 = vadd.s32 %v3991_v6, %v3963_v45  ;;  %v4190_v0 = vsel %vm12772_vm14, 1, %v16344_v15  ;;  %v17301_v3 = vld [vmem:[#allocation72_spill] sm:$0xff]  ;;  %v3997_v29 = vpop.permute.xlu1 %3996 }
 0x55d   :  { %17296 = vst [vmem:[#allocation91_spill] sm:$0xff] %v17295_v39  ;;  %vm3849_vm11 = vmand %vm3753_vm9, %vm3833_vm3  ;;  %vm17302_vm1 = vcmp.lt.s32.totalorder %v17301_v3, 16  ;;  %vm17303_vm13 = vcmp.ge.s32.totalorder %v17301_v3, 0  ;;  %v17304_v6 = vld [vmem:[#allocation104_spill] sm:$0xff]  ;;  %v4010_v2 = vadd.s32 %v12611_v14, %v3962_v30  ;;  %vm3739_vm3 = vcmp.ne.s32.totalorder %v12433_v37, 0  ;;  %v17422_v39 = vld [vmem:[#allocation21_spill] sm:$0xff] }
 0x55e   :  { %vm12787_vm10 = vmand %vm3849_vm11, %vm3929_vm7  ;;  %vm3659_vm0 = vcmp.ne.s32.totalorder %v17304_v6, 0  ;;  %v17305_v4 = vld [vmem:[#allocation12_spill] sm:$0xff]  ;;  %v4027_v45 = vmul.u32 16, %v4011_v61  ;;  %vm3835_vm7 = vcmp.ne.s32.totalorder %v12528_v60, 0  ;;  %v17308_v60 = vmov 0 }
 0x55f   :  { %v4051_v5 = vpop.permute.xlu0 %4050  ;;  %7673 = vset.pattern.permute.xlu1 %v17234_v52  ;;  %v17299_v25 = vsel %vm12787_vm10, 4294967295, %v17298_v25  ;;  %vm3595_vm4 = vmand %vm17303_vm13, %vm17302_vm1  ;;  %v3964_v51 = vmul.u32 16, %v17305_v4  ;;  %v4026_v42 = vmul.u32 16, %v4010_v2 }
 0x560   :  { %4139 = vperm.xlu1 %7673, %v4072_v8   ;;  %4121 = vperm.xlu0 %7676, %v4066_v10   ;;  %v4022_v8 = vmul.u32 16, %v4006_v20  ;;  %17300 = vst [vmem:[#allocation59_spill] sm:$0xff] %v17299_v25  ;;  %v4191_v20 = vsel %vm12787_vm10, 1, %v16344_v15  ;;  %vm3675_vm12 = vmand %vm3595_vm4, %vm3659_vm0  ;;  %v4057_v3 = vpop.permute.xlu1 %4056 }
 0x561   :  { %vm3755_vm11 = vmand %vm3675_vm12, %vm3739_vm3  ;;  %v4074_v37 = vadd.s32 %v12748_v40, %v4026_v42  ;;  %v17318_v40 = vld [vmem:[#allocation100_spill] sm:$0xff] }
 0x562   :  { %v4070_v17 = vadd.s32 %v12576_v43, %v4022_v8  ;;  %v17306_v8 = vld [vmem:[#allocation102_spill] sm:$0xff]  ;;  %vm3851_vm1 = vmand %vm3755_vm11, %vm3835_vm7 }
 0x563   :  { %v3911_v28 = vpop.permute.xlu0 %3910  ;;  %v3965_v61 = vmul.u32 16, %v17306_v8 }
 0x564   :  { %7674 = vset.pattern.permute.xlu1 %v16344_v15  ;;  %4130 = vperm.xlu0 %7676, %v4069_v23   ;;  %v4073_v23 = vadd.s32 %v4051_v5, %v4025_v22  ;;  %vm3931_vm9 = vcmp.ne.s32.totalorder %v3911_v28, 0  ;;  %v17307_v5 = vld [vmem:[#allocation16_spill] sm:$0xff]  ;;  %v3917_v2 = vpop.permute.xlu1 %3916 }
 0x565   :  { %4223 = vperm.xlu1 %7674, %v4190_v0   ;;  %v4012_v0 = vadd.s32 %v12724_v55, %v3964_v51  ;;  %v3966_v14 = vmul.u32 16, %v17307_v5  ;;  %vm12809_vm13 = vmand %vm3851_vm1, %vm3931_vm9  ;;  %v17311_v22 = vld [vmem:[#allocation40_spill] sm:$0xff]  ;;  %vm3662_vm9 = vcmp.ne.s32.totalorder %v17318_v40, 0  ;;  %vm3934_vm5 = vcmp.ne.s32.totalorder %v3917_v2, 0 }
 0x566   :  { %v17309_v60 = vsel %vm12809_vm13, 4294967295, %v17308_v60  ;;  %vm17312_vm4 = vcmp.lt.s32.totalorder %v17311_v22, 16  ;;  %vm17313_vm0 = vcmp.ge.s32.totalorder %v17311_v22, 0  ;;  %v17315_v51 = vld [vmem:[#allocation44_spill] sm:$0xff]  ;;  %v17364_v22 = vld [vmem:[#allocation90_spill] sm:$0xff] }
 0x567   :  { %v3995_v10 = vpop.permute.xlu0 %3994  ;;  %17310 = vst [vmem:[#allocation139_spill] sm:$0xff] %v17309_v60  ;;  %v4028_v28 = vmul.u32 16, %v4012_v0  ;;  %vm3596_vm12 = vmand %vm17313_vm0, %vm17312_vm4  ;;  %vm17316_vm7 = vcmp.lt.s32.totalorder %v17315_v51, 16  ;;  %vm17317_vm11 = vcmp.ge.s32.totalorder %v17315_v51, 0  ;;  %v4014_v42 = vadd.s32 %v3997_v29, %v3966_v14  ;;  %v17324_v29 = vld [vmem:[#allocation134_spill] sm:$0xff] }
 0x568   :  { %4133 = vperm.xlu0 %7676, %v4070_v17   ;;  %v4013_v30 = vadd.s32 %v3995_v10, %v3965_v61  ;;  %v17314_v17 = vld [vmem:[#allocation124_spill] sm:$0xff]  ;;  %vm3598_vm10 = vmand %vm17317_vm11, %vm17316_vm7  ;;  %v4193_v10 = vsel %vm12809_vm13, 1, %v16344_v15  ;;  %vm17320_vm4 = vcmp.lt.s32.totalorder %v17154_v44, 16  ;;  %vm17321_vm0 = vcmp.ge.s32.totalorder %v17154_v44, 0 }
 0x569   :  { %4226 = vperm.xlu1 %7674, %v4191_v20   ;;  %vm3660_vm3 = vcmp.ne.s32.totalorder %v17314_v17, 0  ;;  %vm12832_vm14 = vmand %vm17321_vm0, %vm17320_vm4  ;;  %vm3661_vm11 = vcmp.ne.s32.totalorder %v17324_v29, 0  ;;  %vm3932_vm4 = vcmp.ne.s32.totalorder %v12776_v19, 0  ;;  %v4030_v14 = vmul.u32 16, %v4014_v42  ;;  %v17328_v17 = vld [vmem:[#allocation99_spill] sm:$0xff]  ;;  %v17338_v20 = vld [vmem:[#allocation14_spill] sm:$0xff] }
 0x56a   :  { %vm3676_vm7 = vmand %vm3596_vm12, %vm3660_vm3  ;;  %v4029_v0 = vmul.u32 16, %v4013_v30  ;;  %vm3742_vm0 = vcmp.ne.s32.totalorder %v17328_v17, 0  ;;  %vm17332_vm3 = vcmp.ge.s32.totalorder %v17169_v50, 0  ;;  %v17335_v42 = vmov 0 }
 0x56b   :  { %v4055_v43 = vpop.permute.xlu0 %4054  ;;  %vm12837_vm15 = vmand %vm3598_vm10, %vm3662_vm9  ;;  %vm17331_vm10 = vcmp.lt.s32.totalorder %v17169_v50, 16  ;;  %vm3838_vm6 = vcmp.ne.s32.totalorder %v17338_v20, 0  ;;  %v17339_v29 = vmov 0 }
 0x56c   :  { %v4075_v6 = vadd.s32 %v4055_v43, %v4027_v45  ;;  %4142 = vperm.xlu0 %7676, %v4073_v23   ;;  %v17319_v45 = vld [vmem:[#allocation61_spill] sm:$0xff]  ;;  %v4076_v43 = vadd.s32 %v4057_v3, %v4028_v28  ;;  %vm12847_vm12 = vmand %vm12832_vm14, %vm3661_vm11  ;;  %v4061_v28 = vpop.permute.xlu1 %4060  ;;  %vm3837_vm14 = vcmp.ne.s32.totalorder %v12545_v49, 0 }
 0x56d   :  { %7675 = vset.pattern.permute.xlu1 %v17234_v52  ;;  %vm3740_vm1 = vcmp.ne.s32.totalorder %v17319_v45, 0  ;;  %vm12855_vm9 = vmand %vm17332_vm3, %vm17331_vm10  ;;  %v4078_v45 = vadd.s32 %v4061_v28, %v4030_v14 }
 0x56e   :  { %4148 = vperm.xlu1 %7675, %v4075_v6   ;;  %v17327_v6 = vld [vmem:[#allocation120_spill] sm:$0xff]  ;;  %vm3756_vm8 = vmand %vm3676_vm7, %vm3740_vm1  ;;  %vm3741_vm7 = vcmp.ne.s32.totalorder %v12448_v53, 0 }
 0x56f   :  { %v3915_v55 = vpop.permute.xlu0 %3914  ;;  %vm3836_vm13 = vcmp.ne.s32.totalorder %v17327_v6, 0  ;;  %vm3758_vm10 = vmand %vm12837_vm15, %vm3742_vm0 }
 0x570   :  { %4145 = vperm.xlu0 %7676, %v4074_v37   ;;  %v3967_v37 = vmul.u32 16, %v17172_v63  ;;  %vm3852_vm1 = vmand %vm3756_vm8, %vm3836_vm13  ;;  %vm3933_vm3 = vcmp.ne.s32.totalorder %v3915_v55, 0  ;;  %v17365_v63 = vld [vmem:[#allocation123_spill] sm:$0xff] }
 0x571   :  { %vm12862_vm11 = vmand %vm3852_vm1, %vm3932_vm4  ;;  %vm3743_vm1 = vcmp.ne.s32.totalorder %v12461_v11, 0  ;;  %v17346_v11 = vmov 0 }
 0x572   :  { %7677 = vset.pattern.permute.xlu1 %v16344_v15  ;;  %v17336_v42 = vsel %vm12862_vm11, 4294967295, %v17335_v42  ;;  %vm3757_vm8 = vmand %vm12847_vm12, %vm3741_vm7  ;;  %v4194_v49 = vsel %vm12862_vm11, 1, %v16344_v15 }
 0x573   :  { %v3999_v23 = vpop.permute.xlu0 %3998  ;;  %4232 = vperm.xlu1 %7677, %v4193_v10   ;;  %17337 = vst [vmem:[#allocation140_spill] sm:$0xff] %v17336_v42  ;;  %vm3853_vm13 = vmand %vm3757_vm8, %vm3837_vm14 }
 0x574   :  { %v4015_v10 = vadd.s32 %v3999_v23, %v3967_v37  ;;  %vm12875_vm4 = vmand %vm3853_vm13, %vm3933_vm3  ;;  %v17342_v23 = vld [vmem:[#allocation137_spill] sm:$0xff] }
 0x575   :  { %v17340_v29 = vsel %vm12875_vm4, 4294967295, %v17339_v29  ;;  %vm3854_vm15 = vmand %vm3758_vm10, %vm3838_vm6  ;;  %vm3663_vm0 = vcmp.ne.s32.totalorder %v17342_v23, 0  ;;  %v4195_v61 = vsel %vm12875_vm4, 1, %v16344_v15 }
 0x576   :  { %17341 = vst [vmem:[#allocation117_spill] sm:$0xff] %v17340_v29  ;;  %v4031_v55 = vmul.u32 16, %v4015_v10  ;;  %vm12880_vm12 = vmand %vm3854_vm15, %vm3934_vm5  ;;  %vm3839_vm5 = vcmp.ne.s32.totalorder %v12557_v7, 0  ;;  %v17415_v29 = vmov 0 }
 0x577   :  { %v4059_v19 = vpop.permute.xlu0 %4058  ;;  %7678 = vset.pattern.permute.xlu1 %v17234_v52  ;;  %vm3679_vm6 = vmand %vm12855_vm9, %vm3663_vm0  ;;  %v4196_v37 = vsel %vm12880_vm12, 1, %v16344_v15 }
 0x578   :  { %v4077_v30 = vadd.s32 %v4059_v19, %v4029_v0  ;;  %4151 = vperm.xlu1 %7678, %v4076_v43   ;;  %v17343_v43 = vmov 0  ;;  %v6960_v0 = vld [vmem:[%s15239_s1 + $0x8] sm:$0xff]  ;;  %vm3759_vm14 = vmand %vm3679_vm6, %vm3743_vm1 }
 0x579   :  { %v17344_v43 = vsel %vm12880_vm12, 4294967295, %v17343_v43  ;;  %v4080_v6 = vmul.f32 2.0, %v6960_v0  ;;  %v6977_v17 = vadd.f32 4.0, %v6960_v0  ;;  %vm3855_vm10 = vmand %vm3759_vm14, %vm3839_vm5 }
 0x57a   :  { %4154 = vperm.xlu0 %7676, %v4077_v30   ;;  %17345 = vst [vmem:[#allocation122_spill] sm:$0xff] %v17344_v43 }
 0x57b   :  { %v3919_v53 = vpop.permute.xlu0 %3918  ;;  %v4081_v40 = vfloor.f32 %v4080_v6  ;;  %v4084_v3 = vmul.f32 0.125, %v6977_v17 }
 0x57c   :  { %7679 = vset.pattern.permute.xlu1 %v16344_v15  ;;  %vm3935_vm7 = vcmp.ne.s32.totalorder %v3919_v53, 0 }
 0x57d   :  { %4235 = vperm.xlu1 %7679, %v4194_v49   ;;  %vm12899_vm9 = vmand %vm3855_vm10, %vm3935_vm7  ;;  %v7645_v19 = vtrunc.f32 %v4081_v40  ;;  %v4085_v28 = vfloor.f32 %v4084_v3 }
 0x57e   :  { %4157 = vperm.xlu0 %7676, %v4078_v45   ;;  %v17347_v11 = vsel %vm12899_vm9, 4294967295, %v17346_v11  ;;  %v4197_v7 = vsel %vm12899_vm9, 1, %v16344_v15 }
 0x57f   :  { %v4063_v2 = vpop.permute.xlu0 %4062  ;;  %17348 = vst [vmem:[#allocation71_spill] sm:$0xff] %v17347_v11  ;;  %v7646_v30 = vcvt.f32.s32 %v7645_v19  ;;  %v7647_v10 = vtrunc.f32 %v4085_v28  ;;  %v17414_v11 = vld [vmem:[#allocation82_spill] sm:$0xff] }
 0x580   :  { %v4079_v14 = vadd.s32 %v4063_v2, %v4031_v55 }
 0x581   :  { %4238 = vperm.xlu1 %7679, %v4195_v61   ;;  %vm4087_vm3 = vcmp.ge.s32.totalorder %v7646_v30, 0  ;;  %vm4088_vm8 = vcmp.lt.s32.totalorder %v7646_v30, 16  ;;  %v7648_v20 = vcvt.f32.s32 %v7647_v10  ;;  %v4109_v6 = vrot.slane %v7646_v30, 7  ;;  %v17351_v10 = vld [vmem:[#allocation66_spill] sm:$0xff] }
 0x582   :  { %7681 = vset.pattern.permute.xlu0 %v16344_v15  ;;  %v4090_v45 = vsel %vm4087_vm3, 1, %v16344_v15  ;;  %v4094_v49 = vsel %vm4088_vm8, 1, %v16344_v15  ;;  %vm4089_vm0 = vmand %vm4087_vm3, %vm4088_vm8  ;;  %v4112_v40 = vrot.slane %v7646_v30, 6 }
 0x583   :  { %4241 = vperm.xlu0 %7681, %v4196_v37   ;;  %v4091_v53 = vrot.slane %v4090_v45, 1  ;;  %vm4098_vm13 = vcmp.ge.s32.totalorder %v7648_v20, 0  ;;  %v4095_v55 = vrot.slane %v4094_v49, 1  ;;  %vm4103_vm15 = vcmp.lt.s32.totalorder %v7648_v20, 1 }
 0x584   :  { %v4099_v23 = vsel %vm4098_vm13, 1, %v16344_v15  ;;  %v4104_v0 = vsel %vm4103_vm15, 1, %v16344_v15  ;;  %v4108_v61 = vmul.u32 16, %v7648_v20  ;;  %v17352_v20 = vld [vmem:[#allocation64_spill] sm:$0xff] }
 0x585   :  { %7680 = vset.pattern.permute.xlu1 %v17234_v52  ;;  %vm4092_vm6 = vcmp.ne.s32.totalorder %v4091_v53, 0  ;;  %v4100_v2 = vrot.slane %v4099_v23, 2  ;;  %vm4096_vm5 = vcmp.ne.s32.totalorder %v4095_v55, 0  ;;  %v17353_v53 = vsub.s32 2, %v17352_v20 }
 0x586   :  { %4160 = vperm.xlu1 %7680, %v4079_v14   ;;  %vm4093_vm1 = vmand %vm4089_vm0, %vm4092_vm6  ;;  %v4105_v14 = vrot.slane %v4104_v0, 2  ;;  %v4110_v37 = vadd.s32 %v4109_v6, %v4108_v61  ;;  %v12927_v23 = vpop.permute.xlu0 %4205  ;;  %v17358_v0 = vld [vmem:[#allocation41_spill] sm:$0xff] }
 0x587   :  { %vm4097_vm7 = vmand %vm4093_vm1, %vm4096_vm5  ;;  %vm4101_vm14 = vcmp.ne.s32.totalorder %v4100_v2, 0  ;;  %vm17366_vm1 = vnez %v17365_v63  ;;  %vm17369_vm5 = vnez %v17368_v12  ;;  %v17377_v12 = vld [vmem:[#allocation32_spill] sm:$0xff] }
 0x588   :  { %vm4102_vm10 = vmand %vm4097_vm7, %vm4101_vm14  ;;  %vm4106_vm9 = vcmp.ne.s32.totalorder %v4105_v14, 0  ;;  %v4111_v17 = vmul.u32 16, %v4110_v37  ;;  %v3191_v18 = vsel %vm17369_vm5, %v17367_v36, 0 }
 0x589   :  { %vm12911_vm12 = vmand %vm4102_vm10, %vm4106_vm9 }
 0x58a   :  { %7682 = vset.pattern.permute.xlu1 %v16344_v15  ;;  %v4113_v19 = vadd.s32 %v4112_v40, %v4111_v17 }
 0x58b   :  { %4244 = vperm.xlu1 %7682, %v4197_v7   ;;  %v4278_v7 = vsel %vm12911_vm12, 1, %v16344_v15 }
 0x58c   :  { %v4282_v45 = vrot.slane %v4278_v7, %v17351_v10  ;;  %v12921_v49 = vrot.slane %v4113_v19, %v17353_v53  ;;  %v17359_v7 = vld [vmem:[#allocation74_spill] sm:$0xff]  ;;  %v17362_v53 = vld [vmem:[#allocation127_spill] sm:$0xff] }
 0x58d   :  { %vm17363_vm6 = vnez %v17362_v53  ;;  %v17379_v53 = vld [vmem:[#allocation81_spill] sm:$0xff] }
 0x58e   :  { %vm12923_vm3 = vcmp.eq.s32.totalorder %v4282_v45, 1 }
 0x59e   :  { %v12941_v6 = vpop.permute.xlu0 %4217 }
 0x59f   :  { %vm4252_vm2 = vcmp.eq.s32.totalorder %v12941_v6, 1 }
 0x5a9   :  { %v4116_v28 = vpop.permute.xlu1 %4115 }
 0x5aa   :  { %vm4166_vm9 = vcmp.eq.s32.totalorder %v4116_v28, %v12921_v49  ;;  %v17360_v28 = vld [vmem:[#allocation111_spill] sm:$0xff] }
 0x5ab   :  { %vm17361_vm0 = vnez %v17360_v28 }
 0x5ac   :  { %v3183_v45 = vsel %vm17361_vm0, %v17359_v7, 0 }
 0x5ae   :  { %v4200_v30 = vpop.permute.xlu1 %4199 }
 0x5af   :  { %vm4246_vm8 = vcmp.eq.s32.totalorder %v4200_v30, 1 }
 0x5b0   :  { %vm4262_vm13 = vmand %vm4166_vm9, %vm4246_vm8 }
 0x5b1   :  { %vm12932_vm15 = vmand %vm4262_vm13, %vm12923_vm3 }
 0x5b2   :  { %v12939_v61 = vsel %vm12932_vm15, %v17358_v0, 128  ;;  %v12949_v40 = vpop.permute.xlu1 %4202 }
 0x5b3   :  { %v4317_v14 = vshra.s32 %v12939_v61, 16 }
 0x5b5   :  { %v12944_v37 = vcvt.s32.f32 %v4317_v14  ;;  %v3187_v14 = vsel %vm17366_vm1, %v17364_v22, 0  ;;  %v17372_v22 = vld [vmem:[#allocation88_spill] sm:$0xff] }
 0x5b6   :  { %v12946_v17 = vpop.permute.xlu0 %4229 }
 0x5b7   :  { %4320 = vmin.xlane.f32.xlu1 %v12944_v37 }
 0x5bb   :  { %v3133_v19 = vpop.permute.xlu0 %3132 }
 0x5bc   :  { %v3179_v30 = vsel %vm17363_vm6, %v3133_v19, 0 }
 0x5bd   :  { %v4125_v50 = vpop.permute.xlu1 %4124  ;;  %v3195_v44 = vadd.s32 %v3183_v45, %v3179_v30  ;;  %v17373_v45 = vld [vmem:[#allocation30_spill] sm:$0xff] }
 0x5be   :  { %vm4169_vm7 = vcmp.eq.s32.totalorder %v4125_v50, %v12921_v49  ;;  %vm17374_vm8 = vnez %v17373_v45  ;;  %v17375_v30 = vld [vmem:[#allocation2_spill] sm:$0xff] }
 0x5bf   :  { %v3142_v8 = vpop.permute.xlu0 %3141  ;;  %v3199_v51 = vadd.s32 %v3195_v44, %v3187_v14  ;;  %v3180_v44 = vsel %vm17374_vm8, %v17372_v22, 0  ;;  %vm17376_vm13 = vnez %v17375_v30  ;;  %vm4247_vm8 = vcmp.eq.s32.totalorder %v12949_v40, 1 }
 0x5c1   :  { %v3203_v28 = vadd.s32 %v3199_v51, %v3191_v18 }
 0x5c2   :  { %v4209_v35 = vpop.permute.xlu1 %4208 }
 0x5c3   :  { %vm4249_vm14 = vcmp.eq.s32.totalorder %v4209_v35, 1  ;;  %v3148_v7 = vpop.permute.xlu0 %3147 }
 0x5c4   :  { %vm4265_vm10 = vmand %vm4169_vm7, %vm4249_vm14  ;;  %v3184_v36 = vsel %vm17376_vm13, %v3148_v7, 0  ;;  %vm17378_vm7 = vnez %v17377_v12  ;;  %vm17380_vm14 = vnez %v17379_v53 }
 0x5c5   :  { %vm12965_vm9 = vmand %vm4265_vm10, %vm12923_vm3  ;;  %v3196_v14 = vadd.s32 %v3184_v36, %v3180_v44  ;;  %v3182_v63 = vsel %vm17378_vm7, %v3142_v8, 0  ;;  %v17381_v36 = vld [vmem:[#allocation55_spill] sm:$0xff]  ;;  %v17385_v8 = vld [vmem:[#allocation80_spill] sm:$0xff] }
 0x5c6   :  { %v12977_v50 = vsel %vm12965_vm9, %v17358_v0, 128  ;;  %vm17382_vm5 = vnez %v17381_v36 }
 0x5c7   :  { %v4128_v18 = vpop.permute.xlu1 %4127  ;;  %v4359_v35 = vshra.s32 %v12977_v50, 16  ;;  %v3154_v51 = vpop.permute.xlu0 %3153 }
 0x5c8   :  { %v3186_v45 = vsel %vm17380_vm14, %v3154_v51, 0  ;;  %vm4170_vm10 = vcmp.eq.s32.totalorder %v4128_v18, %v12921_v49  ;;  %v17386_v18 = vld [vmem:[#allocation70_spill] sm:$0xff] }
 0x5c9   :  { %v12984_v22 = vcvt.s32.f32 %v4359_v35  ;;  %v3198_v30 = vadd.s32 %v3186_v45, %v3182_v63  ;;  %v4540_v63 = vsel %vm12932_vm15, %v17352_v20, 128  ;;  %vm17387_vm6 = vnez %v17386_v18 }
 0x5cb   :  { %4362 = vmin.xlane.f32.xlu1 %v12984_v22  ;;  %v3160_v7 = vpop.permute.xlu0 %3159 }
 0x5cc   :  { %v4212_v44 = vpop.permute.xlu1 %4211  ;;  %v3188_v34 = vsel %vm17382_vm5, %v3160_v7, 0 }
 0x5cd   :  { %vm4250_vm1 = vcmp.eq.s32.totalorder %v4212_v44, 1  ;;  %v3200_v16 = vadd.s32 %v3196_v14, %v3188_v34  ;;  %v17388_v44 = vld [vmem:[#allocation19_spill] sm:$0xff] }
 0x5ce   :  { %vm4266_vm0 = vmand %vm4170_vm10, %vm4250_vm1  ;;  %vm17391_vm10 = vnez %v17390_v58 }
 0x5cf   :  { %vm12992_vm7 = vmand %vm4266_vm0, %vm12923_vm3  ;;  %v3166_v45 = vpop.permute.xlu0 %3165  ;;  %vm17389_vm0 = vnez %v17388_v44 }
 0x5d0   :  { %v4544_v53 = vsel %vm12992_vm7, %v17385_v8, 128  ;;  %v3190_v34 = vsel %vm17387_vm6, %v3166_v45, 0  ;;  %v4215_v14 = vpop.permute.xlu1 %4214  ;;  %v17392_v45 = vld [vmem:[#allocation86_spill] sm:$0xff] }
 0x5d1   :  { %vm4556_vm14 = vcmp.lt.s32.totalorder %v4540_v63, %v4544_v53  ;;  %v3202_v35 = vadd.s32 %v3198_v30, %v3190_v34 }
 0x5d2   :  { %v13004_v51 = vsel %vm4556_vm14, %v4540_v63, %v4544_v53  ;;  %v17393_v53 = vmov 0 }
 0x5d3   :  { %v3172_v7 = vpop.permute.xlu0 %3171 }
 0x5d4   :  { %v3192_v36 = vsel %vm17389_vm0, %v3172_v7, 0 }
 0x5d5   :  { %v4137_v24 = vpop.permute.xlu1 %4136  ;;  %v3204_v41 = vadd.s32 %v3200_v16, %v3192_v36 }
 0x5d6   :  { %vm4173_vm1 = vcmp.eq.s32.totalorder %v4137_v24, %v12921_v49  ;;  %v17396_v24 = vld [vmem:[#allocation51_spill] sm:$0xff] }
 0x5d7   :  { %v3178_v21 = vpop.permute.xlu0 %3177  ;;  %v3207_v33 = vadd.s32 %v3204_v41, %v3203_v28  ;;  %v4543_v58 = vsel %vm12965_vm9, %v17396_v24, 128  ;;  %v17397_v41 = vld [vmem:[#allocation68_spill] sm:$0xff] }
 0x5d8   :  { %v3194_v5 = vsel %vm17391_vm10, %v3178_v21, 0 }
 0x5d9   :  { %v3206_v4 = vadd.s32 %v3202_v35, %v3194_v5 }
 0x5da   :  { %v4221_v18 = vpop.permute.xlu1 %4220 }
 0x5db   :  { %vm4253_vm6 = vcmp.eq.s32.totalorder %v4221_v18, 1  ;;  %v3208_v30 = vadd.s32 %v3206_v4, %v17392_v45  ;;  %v4119_v63 = vpop.permute.xlu0 %4118  ;;  %v13060_v45 = vsel %vm12992_vm7, %v17358_v0, 128 }
 0x5dc   :  { %vm4269_vm14 = vmand %vm4173_vm1, %vm4253_vm6  ;;  %vm4167_vm0 = vcmp.eq.s32.totalorder %v4119_v63, %v12921_v49 }
 0x5dd   :  { %vm13014_vm5 = vmand %vm4269_vm14, %vm12923_vm3  ;;  %v13026_v21 = vadd.s32 %v3208_v30, %v3207_v33  ;;  %vm4248_vm14 = vcmp.eq.s32.totalorder %v12927_v23, 1 }
 0x5de   :  { %v17394_v53 = vsel %vm13014_vm5, 4294967295, %v17393_v53  ;;  %v4547_v16 = vsel %vm13014_vm5, %v17397_v41, 128  ;;  %vm4263_vm10 = vmand %vm4167_vm0, %vm4247_vm8 }
 0x5df   :  { %17395 = vst [vmem:[#allocation125_spill] sm:$0xff] %v17394_v53  ;;  %17398 = vst [vmem:[#allocation142_spill] sm:$0xff] %v13026_v21  ;;  %vm4562_vm1 = vcmp.lt.s32.totalorder %v4543_v58, %v4547_v16  ;;  %v4140_v4 = vpop.permute.xlu1 %4139  ;;  %v4122_v40 = vpop.permute.xlu0 %4121 }
 0x5e0   :  { %vm13030_vm6 = vmand %vm4263_vm10, %vm12923_vm3  ;;  %v13034_v28 = vsel %vm4562_vm1, %v4543_v58, %v4547_v16  ;;  %vm4168_vm13 = vcmp.eq.s32.totalorder %v4122_v40, %v12921_v49  ;;  %v4373_v16 = vshra.s32 %v13060_v45, 16  ;;  %v17405_v40 = vld [vmem:[#allocation24_spill] sm:$0xff] }
 0x5e1   :  { %v13041_v33 = vsel %vm13030_vm6, %v17358_v0, 128  ;;  %vm4264_vm8 = vmand %vm4168_vm13, %vm4248_vm14  ;;  %vm4251_vm13 = vcmp.eq.s32.totalorder %v4215_v14, 1  ;;  %v13077_v14 = vsel %vm13014_vm5, %v17358_v0, 128 }
 0x5e2   :  { %v4331_v36 = vshra.s32 %v13041_v33, 16  ;;  %vm13046_vm0 = vmand %vm4264_vm8, %vm12923_vm3  ;;  %v13108_v56 = vcvt.s32.f32 %v4373_v16  ;;  %v17413_v16 = vld [vmem:[#allocation46_spill] sm:$0xff] }
 0x5e3   :  { %v4131_v35 = vpop.permute.xlu0 %4130  ;;  %v13055_v18 = vsel %vm13046_vm0, %v17358_v0, 128  ;;  %v4542_v52 = vsel %vm13046_vm0, %v17413_v16, 128 }
 0x5e4   :  { %v13050_v7 = vcvt.s32.f32 %v4331_v36  ;;  %v4224_v23 = vpop.permute.xlu1 %4223  ;;  %vm4171_vm1 = vcmp.eq.s32.totalorder %v4131_v35, %v12921_v49  ;;  %v4345_v30 = vshra.s32 %v13055_v18, 16  ;;  %v4541_v36 = vsel %vm13030_vm6, %v17405_v40, 128  ;;  %v17406_v35 = vld [vmem:[#allocation56_spill] sm:$0xff] }
 0x5e5   :  { %vm4267_vm10 = vmand %vm4171_vm1, %vm4251_vm13  ;;  %vm4254_vm14 = vcmp.eq.s32.totalorder %v4224_v23, 1  ;;  %vm4174_vm13 = vcmp.eq.s32.totalorder %v4140_v4, %v12921_v49  ;;  %v17407_v4 = vmov 0 }
 0x5e6   :  { %4334 = vmin.xlane.f32.xlu0 %v13050_v7  ;;  %vm13067_vm8 = vmand %vm4267_vm10, %vm12923_vm3  ;;  %v13071_v58 = vcvt.s32.f32 %v4345_v30 }
 0x5e7   :  { %v4545_v23 = vsel %vm13067_vm8, %v17406_v35, 128  ;;  %v4134_v21 = vpop.permute.xlu0 %4133  ;;  %v13089_v30 = vsel %vm13067_vm8, %v17358_v0, 128  ;;  %vm4270_vm10 = vmand %vm4174_vm13, %vm4254_vm14 }
 0x5e8   :  { %vm4558_vm1 = vcmp.lt.s32.totalorder %v4541_v36, %v4545_v23  ;;  %vm4172_vm4 = vcmp.eq.s32.totalorder %v4134_v21, %v12921_v49  ;;  %v4227_v44 = vpop.permute.xlu1 %4226  ;;  %v4387_v47 = vshra.s32 %v13089_v30, 16  ;;  %vm13095_vm11 = vmand %vm4270_vm10, %vm12923_vm3  ;;  %v4415_v21 = vshra.s32 %v13077_v14, 16 }
 0x5e9   :  { %v17408_v4 = vsel %vm13095_vm11, 4294967295, %v17407_v4  ;;  %v4559_v38 = vsel %vm4558_vm1, %v4541_v36, %v4545_v23  ;;  %v4548_v54 = vsel %vm13095_vm11, %v17410_v32, 128  ;;  %vm4268_vm13 = vmand %vm4172_vm4, %vm4252_vm2  ;;  %v17411_v36 = vmov 0 }
 0x5ea   :  { %17409 = vst [vmem:[#allocation115_spill] sm:$0xff] %v17408_v4  ;;  %4348 = vmin.xlane.f32.xlu0 %v13071_v58  ;;  %v13104_v31 = vcvt.s32.f32 %v4387_v47  ;;  %vm4564_vm14 = vcmp.lt.s32.totalorder %v13004_v51, %v4548_v54  ;;  %vm13112_vm10 = vmand %vm4268_vm13, %vm12923_vm3  ;;  %v13121_v6 = vsel %vm13095_vm11, %v17358_v0, 128  ;;  %vm4255_vm2 = vcmp.eq.s32.totalorder %v4227_v44, 1 }
 0x5eb   :  { %v4143_v59 = vpop.permute.xlu0 %4142  ;;  %v17412_v36 = vsel %vm13112_vm10, 4294967295, %v17411_v36  ;;  %v13124_v23 = vsel %vm4564_vm14, %v13004_v51, %v4548_v54  ;;  %v4546_v43 = vsel %vm13112_vm10, %v17414_v11, 128  ;;  %v13139_v51 = vcvt.s32.f32 %v4415_v21 }
 0x5ec   :  { %vm4175_vm1 = vcmp.eq.s32.totalorder %v4143_v59, %v12921_v49  ;;  %4390 = vmin.xlane.f32.xlu1 %v13104_v31  ;;  %v13136_v59 = vsel %vm13112_vm10, %v17358_v0, 128  ;;  %vm4560_vm4 = vcmp.lt.s32.totalorder %v4542_v52, %v4546_v43  ;;  %vm4256_vm14 = vcmp.eq.s32.totalorder %v12946_v17, 1 }
 0x5ed   :  { %v4149_v47 = vpop.permute.xlu1 %4148  ;;  %vm4271_vm13 = vmand %vm4175_vm1, %vm4255_vm2  ;;  %v4401_v54 = vshra.s32 %v13136_v59, 16  ;;  %v4561_v44 = vsel %vm4560_vm4, %v4542_v52, %v4546_v43  ;;  %v4429_v60 = vshra.s32 %v13121_v6, 16 }
 0x5ee   :  { %4376 = vmin.xlane.f32.xlu0 %v13108_v56  ;;  %vm13144_vm11 = vmand %vm4271_vm13, %vm12923_vm3  ;;  %vm4177_vm4 = vcmp.eq.s32.totalorder %v4149_v47, %v12921_v49 }
 0x5ef   :  { %v17416_v29 = vsel %vm13144_vm11, 4294967295, %v17415_v29  ;;  %v4146_v42 = vpop.permute.xlu0 %4145  ;;  %v4549_v25 = vsel %vm13144_vm11, %v17418_v9, 128  ;;  %v13153_v21 = vcvt.s32.f32 %v4401_v54  ;;  %v13159_v17 = vsel %vm13144_vm11, %v17358_v0, 128 }
 0x5f0   :  { %17417 = vst [vmem:[#allocation109_spill] sm:$0xff] %v17416_v29  ;;  %vm4176_vm1 = vcmp.eq.s32.totalorder %v4146_v42, %v12921_v49  ;;  %4418 = vmin.xlane.f32.xlu1 %v13139_v51  ;;  %vm4566_vm2 = vcmp.lt.s32.totalorder %v4559_v38, %v4549_v25  ;;  %v4443_v43 = vshra.s32 %v13159_v17, 16  ;;  %v17419_v42 = vmov 0 }
 0x5f1   :  { %vm4272_vm13 = vmand %vm4176_vm1, %vm4256_vm14  ;;  %v4567_v54 = vsel %vm4566_vm2, %v4559_v38, %v4549_v25  ;;  %v13180_v27 = vcvt.s32.f32 %v4429_v60  ;;  %v17423_v38 = vmov 0 }
 0x5f2   :  { %v4233_v52 = vpop.permute.xlu1 %4232  ;;  %vm13165_vm5 = vmand %vm4272_vm13, %vm12923_vm3  ;;  %4404 = vmin.xlane.f32.xlu0 %v13153_v21  ;;  %v13173_v57 = vcvt.s32.f32 %v4443_v43 }
 0x5f3   :  { %v17420_v42 = vsel %vm13165_vm5, 4294967295, %v17419_v42  ;;  %vm4257_vm10 = vcmp.eq.s32.totalorder %v4233_v52, 1  ;;  %v4550_v13 = vsel %vm13165_vm5, %v17422_v39, 128  ;;  %v13178_v47 = vsel %vm13165_vm5, %v17358_v0, 128  ;;  %v17426_v52 = vld [vmem:[#allocation84_spill] sm:$0xff] }
 0x5f4   :  { %17421 = vst [vmem:[#allocation113_spill] sm:$0xff] %v17420_v42  ;;  %vm4568_vm14 = vcmp.lt.s32.totalorder %v4561_v44, %v4550_v13  ;;  %vm4273_vm1 = vmand %vm4177_vm4, %vm4257_vm10  ;;  %v4457_v62 = vshra.s32 %v13178_v47, 16  ;;  %4446 = vmin.xlane.f32.xlu1 %v13173_v57  ;;  %v17430_v42 = vld [vmem:[#allocation26_spill] sm:$0xff] }
 0x5f5   :  { %vm13185_vm2 = vmand %vm4273_vm1, %vm12923_vm3  ;;  %v4569_v25 = vsel %vm4568_vm14, %v4561_v44, %v4550_v13 }
 0x5f6   :  { %v17424_v38 = vsel %vm13185_vm2, 4294967295, %v17423_v38  ;;  %v4551_v43 = vsel %vm13185_vm2, %v17426_v52, 128  ;;  %4432 = vmin.xlane.f32.xlu0 %v13180_v27  ;;  %v13194_v46 = vcvt.s32.f32 %v4457_v62  ;;  %v13199_v26 = vsel %vm13185_vm2, %v17358_v0, 128 }
 0x5f7   :  { %17425 = vst [vmem:[#allocation60_spill] sm:$0xff] %v17424_v38  ;;  %v4152_v60 = vpop.permute.xlu1 %4151  ;;  %vm4570_vm10 = vcmp.lt.s32.totalorder %v13034_v28, %v4551_v43  ;;  %v4471_v48 = vshra.s32 %v13199_v26, 16  ;;  %v17427_v52 = vmov 0 }
 0x5f8   :  { %v4571_v13 = vsel %vm4570_vm10, %v13034_v28, %v4551_v43  ;;  %vm4178_vm4 = vcmp.eq.s32.totalorder %v4152_v60, %v12921_v49 }
 0x5f9   :  { %v4155_v1 = vpop.permute.xlu0 %4154  ;;  %v13204_v44 = vcvt.s32.f32 %v4471_v48 }
 0x5fa   :  { %4460 = vmin.xlane.f32.xlu0 %v13194_v46  ;;  %vm4179_vm10 = vcmp.eq.s32.totalorder %v4155_v1, %v12921_v49  ;;  %v17434_v1 = vld [vmem:[#allocation58_spill] sm:$0xff] }
 0x5fb   :  { %4474 = vmin.xlane.f32.xlu1 %v13204_v44 }
 0x5fc   :  { %v4236_v62 = vpop.permute.xlu1 %4235 }
 0x5fd   :  { %vm4258_vm13 = vcmp.eq.s32.totalorder %v4236_v62, 1  ;;  %v4158_v38 = vpop.permute.xlu0 %4157 }
 0x5fe   :  { %vm4274_vm14 = vmand %vm4178_vm4, %vm4258_vm13 }
 0x5ff   :  { %vm13211_vm1 = vmand %vm4274_vm14, %vm12923_vm3 }
 0x600   :  { %v17428_v52 = vsel %vm13211_vm1, 4294967295, %v17427_v52  ;;  %v4552_v48 = vsel %vm13211_vm1, %v17430_v42, 128  ;;  %v4239_v28 = vpop.permute.xlu1 %4238  ;;  %v13221_v43 = vsel %vm13211_vm1, %v17358_v0, 128  ;;  %v17431_v42 = vmov 0 }
 0x601   :  { %17429 = vst [vmem:[#allocation108_spill] sm:$0xff] %v17428_v52  ;;  %vm4572_vm4 = vcmp.lt.s32.totalorder %v13124_v23, %v4552_v48  ;;  %vm4259_vm13 = vcmp.eq.s32.totalorder %v4239_v28, 1  ;;  %v4485_v60 = vshra.s32 %v13221_v43, 16  ;;  %vm4180_vm1 = vcmp.eq.s32.totalorder %v4158_v38, %v12921_v49 }
 0x602   :  { %v4573_v62 = vsel %vm4572_vm4, %v13124_v23, %v4552_v48  ;;  %vm4275_vm14 = vmand %vm4179_vm10, %vm4259_vm13  ;;  %v4242_v39 = vpop.permute.xlu0 %4241  ;;  %v17435_v38 = vmov 0 }
 0x603   :  { %vm13229_vm2 = vmand %vm4275_vm14, %vm12923_vm3  ;;  %vm4260_vm5 = vcmp.eq.s32.totalorder %v4242_v39, 1  ;;  %v13233_v52 = vcvt.s32.f32 %v4485_v60 }
 0x604   :  { %v17432_v42 = vsel %vm13229_vm2, 4294967295, %v17431_v42  ;;  %v4553_v28 = vsel %vm13229_vm2, %v17434_v1, 128  ;;  %v13242_v23 = vsel %vm13229_vm2, %v17358_v0, 128  ;;  %vm4276_vm4 = vmand %vm4180_vm1, %vm4260_vm5  ;;  %v17438_v1 = vld [vmem:[#allocation53_spill] sm:$0xff] }
 0x605   :  { %17433 = vst [vmem:[#allocation28_spill] sm:$0xff] %v17432_v42  ;;  %vm4574_vm10 = vcmp.lt.s32.totalorder %v4567_v54, %v4553_v28  ;;  %4488 = vmin.xlane.f32.xlu0 %v13233_v52  ;;  %v4161_v48 = vpop.permute.xlu1 %4160  ;;  %v4499_v39 = vshra.s32 %v13242_v23, 16  ;;  %vm13248_vm13 = vmand %vm4276_vm4, %vm12923_vm3 }
 0x606   :  { %v4575_v60 = vsel %vm4574_vm10, %v4567_v54, %v4553_v28  ;;  %v17436_v38 = vsel %vm13248_vm13, 4294967295, %v17435_v38  ;;  %v4554_v42 = vsel %vm13248_vm13, %v17438_v1, 128  ;;  %v13260_v9 = vsel %vm13248_vm13, %v17358_v0, 128 }
 0x607   :  { %17437 = vst [vmem:[#allocation29_spill] sm:$0xff] %v17436_v38  ;;  %vm4580_vm14 = vcmp.lt.s32.totalorder %v4573_v62, %v4575_v60  ;;  %v13255_v29 = vcvt.s32.f32 %v4499_v39  ;;  %vm4576_vm5 = vcmp.lt.s32.totalorder %v4569_v25, %v4554_v42  ;;  %v4513_v54 = vshra.s32 %v13260_v9, 16 }
 0x608   :  { %v4581_v4 = vsel %vm4580_vm14, %v4573_v62, %v4575_v60  ;;  %v4577_v28 = vsel %vm4576_vm5, %v4569_v25, %v4554_v42  ;;  %vm4181_vm1 = vcmp.eq.s32.totalorder %v4161_v48, %v12921_v49  ;;  %v17439_v39 = vmov 0  ;;  %v17442_v62 = vld [vmem:[#allocation65_spill] sm:$0xff] }
 0x609   :  { %4502 = vmin.xlane.f32.xlu1 %v13255_v29  ;;  %v13265_v53 = vcvt.s32.f32 %v4513_v54  ;;  %v4316_v54 = vand.u32 65535, %v12939_v61 }
 0x60a   :  { %v4245_v32 = vpop.permute.xlu1 %4244 }
 0x60b   :  { %vm4261_vm10 = vcmp.eq.s32.totalorder %v4245_v32, 1  ;;  %4516 = vmin.xlane.f32.xlu0 %v13265_v53 }
 0x60c   :  { %vm4277_vm4 = vmand %vm4181_vm1, %vm4261_vm10 }
 0x60d   :  { %vm13270_vm13 = vmand %vm4277_vm4, %vm12923_vm3 }
 0x60e   :  { %v17440_v39 = vsel %vm13270_vm13, 4294967295, %v17439_v39  ;;  %v4555_v42 = vsel %vm13270_vm13, %v17442_v62, 128  ;;  %v13280_v49 = vsel %vm13270_vm13, %v17358_v0, 128 }
 0x60f   :  { %17441 = vst [vmem:[#allocation25_spill] sm:$0xff] %v17440_v39  ;;  %vm4578_vm14 = vcmp.lt.s32.totalorder %v4571_v13, %v4555_v42  ;;  %v4527_v32 = vshra.s32 %v13280_v49, 16  ;;  %v4318_v39 = vcvt.s32.f32 %v4316_v54 }
 0x610   :  { %v4579_v25 = vsel %vm4578_vm14, %v4571_v13, %v4555_v42  ;;  %v4330_v13 = vand.u32 65535, %v13041_v33 }
 0x611   :  { %vm4582_vm5 = vcmp.lt.s32.totalorder %v4577_v28, %v4579_v25  ;;  %v13283_v48 = vcvt.s32.f32 %v4527_v32 }
 0x612   :  { %v4583_v55 = vsel %vm4582_vm5, %v4577_v28, %v4579_v25  ;;  %v4332_v32 = vcvt.s32.f32 %v4330_v13  ;;  %v4358_v25 = vand.u32 65535, %v12977_v50 }
 0x613   :  { %vm4584_vm3 = vcmp.lt.s32.totalorder %v4581_v4, %v4583_v55  ;;  %4530 = vmin.xlane.f32.xlu1 %v13283_v48 }
 0x614   :  { %v13286_v60 = vsel %vm4584_vm3, %v4581_v4, %v4583_v55  ;;  %v4344_v4 = vand.u32 65535, %v13055_v18  ;;  %v4372_v55 = vand.u32 65535, %v13060_v45 }
 0x644   :  { %v13289_v62 = vpop.xlane.xlu1 %4320 }
 0x645   :  { %vm4322_vm1 = vcmp.eq.f32.partialorder %v12944_v37, %v13289_v62  ;;  %v4386_v37 = vand.u32 65535, %v13089_v30  ;;  %v4374_v30 = vcvt.s32.f32 %v4372_v55 }
 0x646   :  { %v4323_v38 = vsel %vm4322_vm1, %v4318_v39, inf  ;;  %v4360_v39 = vcvt.s32.f32 %v4358_v25 }
 0x647   :  { %4324 = vmin.xlane.f32.xlu0 %v4323_v38  ;;  %v4346_v38 = vcvt.s32.f32 %v4344_v4  ;;  %v4388_v54 = vcvt.s32.f32 %v4386_v37 }
 0x658   :  { %v13294_v42 = vpop.xlane.xlu1 %4362 }
 0x659   :  { %vm4364_vm4 = vcmp.eq.f32.partialorder %v12984_v22, %v13294_v42  ;;  %v4414_v22 = vand.u32 65535, %v13077_v14  ;;  %v4442_v14 = vand.u32 65535, %v13159_v17  ;;  %v4456_v17 = vand.u32 65535, %v13178_v47 }
 0x65a   :  { %v4365_v18 = vsel %vm4364_vm4, %v4360_v39, inf }
 0x65b   :  { %v4416_v25 = vcvt.s32.f32 %v4414_v22  ;;  %v4444_v39 = vcvt.s32.f32 %v4442_v14 }
 0x673   :  { %v13296_v28 = vpop.xlane.xlu0 %4334 }
 0x674   :  { %vm4336_vm10 = vcmp.eq.f32.partialorder %v13050_v7, %v13296_v28 }
 0x675   :  { %v4337_v61 = vsel %vm4336_vm10, %v4332_v32, inf }
 0x676   :  { %4338 = vmin.xlane.f32.xlu1 %v4337_v61 }
 0x677   :  { %v13305_v33 = vpop.xlane.xlu0 %4348 }
 0x678   :  { %vm4350_vm14 = vcmp.eq.f32.partialorder %v13071_v58, %v13305_v33  ;;  %v4400_v58 = vand.u32 65535, %v13136_v59  ;;  %v4355_v2 = vcvt.f32.s32 %v13305_v33 }
 0x679   :  { %v4351_v50 = vsel %vm4350_vm14, %v4346_v38, inf  ;;  %v13310_v7 = vpop.xlane.xlu1 %4390 }
 0x67a   :  { %4352 = vmin.xlane.f32.xlu0 %v4351_v50  ;;  %4366 = vmin.xlane.f32.xlu1 %v4365_v18  ;;  %vm4392_vm5 = vcmp.eq.f32.partialorder %v13104_v31, %v13310_v7  ;;  %v4402_v31 = vcvt.s32.f32 %v4400_v58  ;;  %v4498_v58 = vand.u32 65535, %v13242_v23 }
 0x67b   :  { %v13313_v13 = vpop.xlane.xlu0 %4376  ;;  %v4393_v45 = vsel %vm4392_vm5, %v4388_v54, inf  ;;  %v4458_v54 = vcvt.s32.f32 %v4456_v17 }
 0x67c   :  { %vm4378_vm3 = vcmp.eq.f32.partialorder %v13108_v56, %v13313_v13  ;;  %v4428_v56 = vand.u32 65535, %v13121_v6 }
 0x67d   :  { %v4379_v32 = vsel %vm4378_vm3, %v4374_v30, inf  ;;  %v13320_v4 = vpop.xlane.xlu1 %4418 }
 0x67e   :  { %4380 = vmin.xlane.f32.xlu0 %v4379_v32  ;;  %4394 = vmin.xlane.f32.xlu1 %v4393_v45  ;;  %vm4420_vm1 = vcmp.eq.f32.partialorder %v13139_v51, %v13320_v4  ;;  %v4430_v51 = vcvt.s32.f32 %v4428_v56  ;;  %v4512_v32 = vand.u32 65535, %v13260_v9 }
 0x67f   :  { %v13325_v61 = vpop.xlane.xlu0 %4404  ;;  %v4421_v37 = vsel %vm4420_vm1, %v4416_v25, inf }
 0x680   :  { %vm4406_vm10 = vcmp.eq.f32.partialorder %v13153_v21, %v13325_v61  ;;  %v4470_v21 = vand.u32 65535, %v13199_v26  ;;  %v4484_v26 = vand.u32 65535, %v13221_v43 }
 0x681   :  { %v4407_v59 = vsel %vm4406_vm10, %v4402_v31, inf  ;;  %v13330_v38 = vpop.xlane.xlu1 %4446  ;;  %v4514_v31 = vcvt.s32.f32 %v4512_v32  ;;  %v4341_v32 = vcvt.f32.s32 %v13296_v28 }
 0x682   :  { %4422 = vmin.xlane.f32.xlu1 %v4421_v37  ;;  %4408 = vmin.xlane.f32.xlu0 %v4407_v59  ;;  %vm4448_vm4 = vcmp.eq.f32.partialorder %v13173_v57, %v13330_v38  ;;  %v4472_v57 = vcvt.s32.f32 %v4470_v21  ;;  %v4486_v45 = vcvt.s32.f32 %v4484_v26 }
 0x683   :  { %v13332_v55 = vpop.xlane.xlu0 %4432  ;;  %v4449_v6 = vsel %vm4448_vm4, %v4444_v39, inf }
 0x684   :  { %vm4434_vm14 = vcmp.eq.f32.partialorder %v13180_v27, %v13332_v55 }
 0x685   :  { %v4435_v50 = vsel %vm4434_vm14, %v4430_v51, inf }
 0x686   :  { %4450 = vmin.xlane.f32.xlu1 %v4449_v6  ;;  %4436 = vmin.xlane.f32.xlu0 %v4435_v50 }
 0x687   :  { %v13340_v18 = vpop.xlane.xlu0 %4460 }
 0x688   :  { %vm4462_vm5 = vcmp.eq.f32.partialorder %v13194_v46, %v13340_v18  ;;  %v13344_v22 = vpop.xlane.xlu1 %4474 }
 0x689   :  { %v4463_v30 = vsel %vm4462_vm5, %v4458_v54, inf  ;;  %vm4476_vm3 = vcmp.eq.f32.partialorder %v13204_v44, %v13344_v22  ;;  %v4500_v44 = vcvt.s32.f32 %v4498_v58 }
 0x68a   :  { %4464 = vmin.xlane.f32.xlu0 %v4463_v30  ;;  %v4477_v27 = vsel %vm4476_vm3, %v4472_v57, inf }
 0x68b   :  { %4478 = vmin.xlane.f32.xlu1 %v4477_v27 }
 0x692   :  { %v13349_v47 = vpop.xlane.xlu0 %4488 }
 0x693   :  { %vm4490_vm1 = vcmp.eq.f32.partialorder %v13233_v52, %v13349_v47  ;;  %v4526_v52 = vand.u32 65535, %v13280_v49 }
 0x694   :  { %v4491_v46 = vsel %vm4490_vm1, %v4486_v45, inf }
 0x695   :  { %4492 = vmin.xlane.f32.xlu0 %v4491_v46  ;;  %v4528_v9 = vcvt.s32.f32 %v4526_v52 }
 0x696   :  { %v13355_v25 = vpop.xlane.xlu1 %4502 }
 0x697   :  { %vm4504_vm10 = vcmp.eq.f32.partialorder %v13255_v29, %v13355_v25  ;;  %v4586_v29 = vrot.slane %v13286_v60, 4 }
 0x698   :  { %v4505_v14 = vsel %vm4504_vm10, %v4500_v44, inf  ;;  %v13359_v43 = vpop.xlane.xlu0 %4516  ;;  %v4369_v44 = vcvt.f32.s32 %v13294_v42  ;;  %v4383_v42 = vcvt.f32.s32 %v13313_v13 }
 0x699   :  { %4506 = vmin.xlane.f32.xlu1 %v4505_v14  ;;  %vm4518_vm4 = vcmp.eq.f32.partialorder %v13265_v53, %v13359_v43  ;;  %vm4587_vm5 = vcmp.lt.s32.totalorder %v13286_v60, %v4586_v29 }
 0x69a   :  { %v4519_v23 = vsel %vm4518_vm4, %v4514_v31, inf  ;;  %v4588_v59 = vsel %vm4587_vm5, %v13286_v60, %v4586_v29  ;;  %v4342_v31 = vshll.u32 %v4341_v32, 16  ;;  %v4397_v32 = vcvt.f32.s32 %v13310_v7 }
 0x69b   :  { %4520 = vmin.xlane.f32.xlu0 %v4519_v23  ;;  %v4589_v39 = vrot.slane %v4588_v59, 2 }
 0x69d   :  { %vm4590_vm3 = vcmp.lt.s32.totalorder %v4588_v59, %v4589_v39 }
 0x69e   :  { %v4591_v53 = vsel %vm4590_vm3, %v4588_v59, %v4589_v39  ;;  %vm17446_vm3 = vcmp.lt.s32.totalorder %v17358_v0, %v17352_v20  ;;  %v4356_v59 = vshll.u32 %v4355_v2, 16 }
 0x69f   :  { %v4592_v51 = vrot.slane %v4591_v53, 1 }
 0x6a0   :  { %v13364_v37 = vpop.xlane.xlu1 %4530 }
 0x6a1   :  { %vm4532_vm14 = vcmp.eq.f32.partialorder %v13283_v48, %v13364_v37  ;;  %vm4593_vm1 = vcmp.lt.s32.totalorder %v4591_v53, %v4592_v51  ;;  %v4327_v48 = vcvt.f32.s32 %v13289_v62 }
 0x6a2   :  { %v4533_v56 = vsel %vm4532_vm14, %v4528_v9, inf  ;;  %v4594_v49 = vsel %vm4593_vm1, %v4591_v53, %v4592_v51  ;;  %vm4875_vm1 = vmand %vm12932_vm15, %vm17446_vm3  ;;  %v4370_v9 = vshll.u32 %v4369_v44, 16 }
 0x6a3   :  { %4534 = vmin.xlane.f32.xlu1 %v4533_v56  ;;  %vm4627_vm10 = vcmp.eq.s32.totalorder %v4594_v49, %v17358_v0  ;;  %v4328_v21 = vshll.u32 %v4327_v48, 16  ;;  %v4891_v26 = vsel %vm4875_vm1, 1, %v16344_v15 }
 0x6a4   :  { %vm4628_vm4 = vmand %vm12911_vm12, %vm4627_vm10  ;;  %v4908_v58 = vshrl.u32 %v4891_v26, 16 }
 0x6a5   :  { %v13376_v17 = vsel %vm4628_vm4, 1, %v16344_v15  ;;  %vm17447_vm4 = vcmp.lt.s32.totalorder %v17358_v0, %v17405_v40 }
 0x6a6   :  { %17443 = vst [vmem:[#allocation77_spill] sm:$0xff] %v13376_v17  ;;  %v4649_v60 = vrot.slane %v13376_v17, %v17351_v10  ;;  %v4910_v46 = vcvt.s32.f32 %v4908_v58  ;;  %v4907_v58 = vand.u32 65535, %v4891_v26  ;;  %v17512_v17 = vld [vmem:[#allocation133_spill] sm:$0xff] }
 0x6a8   :  { %vm13382_vm14 = vcmp.eq.s32.totalorder %v4649_v60, 1 }
 0x6d4   :  { %v4325_v6 = vpop.xlane.xlu0 %4324 }
 0x6d5   :  { %v4326_v50 = vcvt.f32.s32 %v4325_v6 }
 0x6d7   :  { %v13380_v54 = vadd.s32 %v4328_v21, %v4326_v50  ;;  %v4384_v21 = vshll.u32 %v4383_v42, 16  ;;  %v4411_v42 = vcvt.f32.s32 %v13325_v61 }
 0x6d9   :  { %vm4629_vm12 = vcmp.lt.s32.totalorder %v17358_v0, %v13380_v54 }
 0x6da   :  { %vm4651_vm5 = vmand %vm13382_vm14, %vm4629_vm12 }
 0x6db   :  { %v4667_v3 = vsel %vm4651_vm5, 1, %v16344_v15  ;;  %vm4876_vm12 = vmand %vm13030_vm6, %vm17447_vm4 }
 0x6dc   :  { %v4684_v62 = vshrl.u32 %v4667_v3, 16  ;;  %v4683_v27 = vand.u32 65535, %v4667_v3  ;;  %v4892_v5 = vsel %vm4876_vm12, 1, %v16344_v15 }
 0x6de   :  { %v4686_v30 = vcvt.s32.f32 %v4684_v62  ;;  %v4685_v45 = vcvt.s32.f32 %v4683_v27 }
 0x6e0   :  { %4689 = vadd.xlane.f32.xlu0 %v4686_v30 }
 0x6e4   :  { %4687 = vadd.xlane.f32.xlu0 %v4685_v45 }
 0x6e8   :  { %4913 = vadd.xlane.f32.xlu0 %v4910_v46  ;;  %v4920_v46 = vshrl.u32 %v4892_v5, 16 }
 0x6ea   :  { %v4922_v2 = vcvt.s32.f32 %v4920_v46 }
 0x703   :  { %v4339_v14 = vpop.xlane.xlu1 %4338 }
 0x704   :  { %v4340_v23 = vcvt.f32.s32 %v4339_v14 }
 0x706   :  { %v13400_v52 = vadd.s32 %v4342_v31, %v4340_v23  ;;  %v4909_v31 = vcvt.s32.f32 %v4907_v58 }
 0x707   :  { %v4353_v56 = vpop.xlane.xlu0 %4352  ;;  %v4367_v29 = vpop.xlane.xlu1 %4366 }
 0x708   :  { %vm4630_vm15 = vcmp.lt.s32.totalorder %v17358_v0, %v13400_v52  ;;  %v4354_v39 = vcvt.f32.s32 %v4353_v56  ;;  %v4368_v53 = vcvt.f32.s32 %v4367_v29 }
 0x709   :  { %vm4652_vm10 = vmand %vm13382_vm14, %vm4630_vm15  ;;  %vm17448_vm15 = vcmp.lt.s32.totalorder %v17358_v0, %v17413_v16 }
 0x70a   :  { %v13407_v28 = vadd.s32 %v4356_v59, %v4354_v39  ;;  %v13409_v33 = vadd.s32 %v4370_v9, %v4368_v53  ;;  %v4668_v51 = vsel %vm4652_vm10, 1, %v16344_v15  ;;  %vm4877_vm10 = vmand %vm13046_vm0, %vm17448_vm15  ;;  %v4398_v9 = vshll.u32 %v4397_v32, 16 }
 0x70b   :  { %v4381_v49 = vpop.xlane.xlu0 %4380  ;;  %v4696_v48 = vshrl.u32 %v4668_v51, 16  ;;  %v4695_v60 = vand.u32 65535, %v4668_v51  ;;  %v4395_v30 = vpop.xlane.xlu1 %4394  ;;  %v4893_v7 = vsel %vm4877_vm10, 1, %v16344_v15  ;;  %v4919_v53 = vand.u32 65535, %v4892_v5 }
 0x70c   :  { %vm4631_vm5 = vcmp.lt.s32.totalorder %v17358_v0, %v13407_v28  ;;  %vm4632_vm3 = vcmp.lt.s32.totalorder %v17358_v0, %v13409_v33  ;;  %v4382_v13 = vcvt.f32.s32 %v4381_v49  ;;  %v4396_v14 = vcvt.f32.s32 %v4395_v30 }
 0x70d   :  { %v4698_v6 = vcvt.s32.f32 %v4696_v48  ;;  %vm4653_vm1 = vmand %vm13382_vm14, %vm4631_vm5  ;;  %v4697_v45 = vcvt.s32.f32 %v4695_v60  ;;  %v4932_v39 = vshrl.u32 %v4893_v7, 16  ;;  %vm17449_vm0 = vcmp.lt.s32.totalorder %v17358_v0, %v17396_v24 }
 0x70e   :  { %v4669_v50 = vsel %vm4653_vm1, 1, %v16344_v15  ;;  %vm4654_vm6 = vmand %vm13382_vm14, %vm4632_vm3  ;;  %v13427_v62 = vadd.s32 %v4384_v21, %v4382_v13  ;;  %v13441_v34 = vadd.s32 %v4398_v9, %v4396_v14  ;;  %v4921_v13 = vcvt.s32.f32 %v4919_v53 }
 0x70f   :  { %4701 = vadd.xlane.f32.xlu1 %v4698_v6  ;;  %v4708_v3 = vshrl.u32 %v4669_v50, 16  ;;  %v4670_v44 = vsel %vm4654_vm6, 1, %v16344_v15  ;;  %v4707_v26 = vand.u32 65535, %v4669_v50  ;;  %v4409_v56 = vpop.xlane.xlu0 %4408  ;;  %vm4878_vm5 = vmand %vm12965_vm9, %vm17449_vm0  ;;  %v4934_v48 = vcvt.s32.f32 %v4932_v39  ;;  %v4423_v50 = vpop.xlane.xlu1 %4422 }
 0x710   :  { %vm4633_vm4 = vcmp.lt.s32.totalorder %v17358_v0, %v13427_v62  ;;  %v4720_v23 = vshrl.u32 %v4670_v44, 16  ;;  %vm4634_vm3 = vcmp.lt.s32.totalorder %v17358_v0, %v13441_v34  ;;  %v4410_v49 = vcvt.f32.s32 %v4409_v56 }
 0x711   :  { %v4710_v27 = vcvt.s32.f32 %v4708_v3  ;;  %vm4655_vm12 = vmand %vm13382_vm14, %vm4633_vm4  ;;  %v4709_v29 = vcvt.s32.f32 %v4707_v26  ;;  %v4719_v60 = vand.u32 65535, %v4670_v44  ;;  %v4412_v21 = vshll.u32 %v4411_v42, 16 }
 0x712   :  { %v4722_v59 = vcvt.s32.f32 %v4720_v23  ;;  %v4671_v51 = vsel %vm4655_vm12, 1, %v16344_v15  ;;  %v4894_v61 = vsel %vm4878_vm5, 1, %v16344_v15  ;;  %vm4656_vm1 = vmand %vm13382_vm14, %vm4634_vm3  ;;  %v4931_v30 = vand.u32 65535, %v4893_v7 }
 0x713   :  { %4713 = vadd.xlane.f32.xlu0 %v4710_v27  ;;  %4699 = vadd.xlane.f32.xlu1 %v4697_v45  ;;  %v4732_v6 = vshrl.u32 %v4671_v51, 16  ;;  %v13455_v19 = vadd.s32 %v4412_v21, %v4410_v49  ;;  %v4721_v3 = vcvt.s32.f32 %v4719_v60  ;;  %v4944_v27 = vshrl.u32 %v4894_v61, 16  ;;  %v4437_v26 = vpop.xlane.xlu0 %4436 }
 0x714   :  { %v4425_v45 = vcvt.f32.s32 %v13320_v4  ;;  %v4672_v58 = vsel %vm4656_vm1, 1, %v16344_v15  ;;  %vm17450_vm9 = vcmp.lt.s32.totalorder %v17358_v0, %v17385_v8  ;;  %v4424_v46 = vcvt.f32.s32 %v4423_v50 }
 0x715   :  { %v4734_v5 = vcvt.s32.f32 %v4732_v6  ;;  %vm4879_vm6 = vmand %vm12992_vm7, %vm17450_vm9  ;;  %vm4635_vm15 = vcmp.lt.s32.totalorder %v17358_v0, %v13455_v19  ;;  %v4933_v32 = vcvt.s32.f32 %v4931_v30  ;;  %v4946_v44 = vcvt.s32.f32 %v4944_v27 }
 0x716   :  { %v4731_v14 = vand.u32 65535, %v4671_v51  ;;  %v4895_v4 = vsel %vm4879_vm6, 1, %v16344_v15  ;;  %vm4657_vm10 = vmand %vm13382_vm14, %vm4635_vm15  ;;  %v4943_v56 = vand.u32 65535, %v4894_v61  ;;  %vm17451_vm7 = vcmp.lt.s32.totalorder %v17358_v0, %v17406_v35 }
 0x717   :  { %4911 = vadd.xlane.f32.xlu0 %v4909_v31  ;;  %4925 = vadd.xlane.f32.xlu1 %v4922_v2  ;;  %v4744_v31 = vshrl.u32 %v4672_v58, 16  ;;  %v4426_v2 = vshll.u32 %v4425_v45, 16  ;;  %v4956_v7 = vshrl.u32 %v4895_v4, 16  ;;  %vm4880_vm4 = vmand %vm13067_vm8, %vm17451_vm7  ;;  %v4438_v39 = vcvt.f32.s32 %v4437_v26 }
 0x718   :  { %v4733_v23 = vcvt.s32.f32 %v4731_v14  ;;  %v4945_v42 = vcvt.s32.f32 %v4943_v56  ;;  %v4743_v49 = vand.u32 65535, %v4672_v58  ;;  %v4955_v21 = vand.u32 65535, %v4895_v4 }
 0x719   :  { %v13469_v12 = vadd.s32 %v4426_v2, %v4424_v46  ;;  %v4746_v9 = vcvt.s32.f32 %v4744_v31  ;;  %v4958_v53 = vcvt.s32.f32 %v4956_v7  ;;  %v4453_v50 = vcvt.f32.s32 %v13330_v38 }
 0x71a   :  { %v4745_v60 = vcvt.s32.f32 %v4743_v49  ;;  %vm17452_vm8 = vcmp.lt.s32.totalorder %v17358_v0, %v17414_v11  ;;  %vm17453_vm5 = vnez %v17412_v36  ;;  %v4957_v30 = vcvt.s32.f32 %v4955_v21  ;;  %v17460_v21 = vld [vmem:[#allocation115_spill] sm:$0xff] }
 0x71b   :  { %4711 = vadd.xlane.f32.xlu0 %v4709_v29  ;;  %4725 = vadd.xlane.f32.xlu1 %v4722_v59  ;;  %v4439_v29 = vcvt.f32.s32 %v13332_v55  ;;  %v4673_v59 = vsel %vm4657_vm10, 1, %v16344_v15  ;;  %vm4636_vm12 = vcmp.lt.s32.totalorder %v17358_v0, %v13469_v12  ;;  %v4896_v55 = vsel %vm4880_vm4, 1, %v16344_v15  ;;  %vm4881_vm3 = vmand %vm17453_vm5, %vm17452_vm8 }
 0x71c   :  { %v4756_v51 = vshrl.u32 %v4673_v59, 16  ;;  %vm4658_vm0 = vmand %vm13382_vm14, %vm4636_vm12  ;;  %v4968_v61 = vshrl.u32 %v4896_v55, 16  ;;  %v4755_v45 = vand.u32 65535, %v4673_v59  ;;  %v4454_v46 = vshll.u32 %v4453_v50, 16 }
 0x71d   :  { %v4897_v38 = vsel %vm4881_vm3, 1, %v16344_v15  ;;  %v4967_v2 = vand.u32 65535, %v4896_v55  ;;  %v4467_v4 = vcvt.f32.s32 %v13340_v18  ;;  %vm17455_vm6 = vcmp.lt.s32.totalorder %v17358_v0, %v17397_v41 }
 0x71e   :  { %v4758_v6 = vcvt.s32.f32 %v4756_v51  ;;  %v4970_v27 = vcvt.s32.f32 %v4968_v61  ;;  %v4980_v31 = vshrl.u32 %v4897_v38, 16 }
 0x71f   :  { %4937 = vadd.xlane.f32.xlu0 %v4934_v48  ;;  %4923 = vadd.xlane.f32.xlu1 %v4921_v13  ;;  %v4440_v48 = vshll.u32 %v4439_v29, 16  ;;  %v4451_v13 = vpop.xlane.xlu1 %4450  ;;  %v4969_v56 = vcvt.s32.f32 %v4967_v2  ;;  %v17463_v2 = vld [vmem:[#allocation79_spill] sm:$0xff] }
 0x720   :  { %v4982_v7 = vcvt.s32.f32 %v4980_v31 }
 0x721   :  { %v13483_v63 = vadd.s32 %v4440_v48, %v4438_v39  ;;  %v4468_v39 = vshll.u32 %v4467_v4, 16  ;;  %v4979_v48 = vand.u32 65535, %v4897_v38  ;;  %v17473_v4 = vld [vmem:[#allocation60_spill] sm:$0xff] }
 0x723   :  { %4737 = vadd.xlane.f32.xlu0 %v4734_v5  ;;  %4723 = vadd.xlane.f32.xlu1 %v4721_v3  ;;  %v4674_v5 = vsel %vm4658_vm0, 1, %v16344_v15  ;;  %vm4637_vm1 = vcmp.lt.s32.totalorder %v17358_v0, %v13483_v63  ;;  %v4452_v3 = vcvt.f32.s32 %v4451_v13  ;;  %v4481_v13 = vcvt.f32.s32 %v13344_v22 }
 0x724   :  { %v4768_v58 = vshrl.u32 %v4674_v5, 16  ;;  %vm4659_vm9 = vmand %vm13382_vm14, %vm4637_vm1  ;;  %v4767_v59 = vand.u32 65535, %v4674_v5  ;;  %vm17461_vm0 = vnez %v17460_v21  ;;  %v4981_v50 = vcvt.s32.f32 %v4979_v48 }
 0x725   :  { %v13497_v36 = vadd.s32 %v4454_v46, %v4452_v3  ;;  %v4675_v26 = vsel %vm4659_vm9, 1, %v16344_v15  ;;  %vm17464_vm1 = vcmp.lt.s32.totalorder %v17358_v0, %v17463_v2  ;;  %v4509_v48 = vcvt.f32.s32 %v13355_v25 }
 0x726   :  { %v4770_v14 = vcvt.s32.f32 %v4768_v58  ;;  %v4780_v29 = vshrl.u32 %v4675_v26, 16  ;;  %v4769_v49 = vcvt.s32.f32 %v4767_v59  ;;  %v4779_v3 = vand.u32 65535, %v4675_v26  ;;  %vm4884_vm9 = vmand %vm13144_vm11, %vm17464_vm1 }
 0x727   :  { %4935 = vadd.xlane.f32.xlu0 %v4933_v32  ;;  %4949 = vadd.xlane.f32.xlu1 %v4946_v44  ;;  %17454 = vst [vmem:[#allocation98_spill] sm:$0xff] %v13497_v36  ;;  %v4465_v32 = vpop.xlane.xlu0 %4464  ;;  %v4757_v44 = vcvt.s32.f32 %v4755_v45  ;;  %vm4638_vm7 = vcmp.lt.s32.totalorder %v17358_v0, %v13497_v36 }
 0x728   :  { %vm4660_vm4 = vmand %vm13382_vm14, %vm4638_vm7  ;;  %v4782_v51 = vcvt.s32.f32 %v4780_v29  ;;  %v4781_v46 = vcvt.s32.f32 %v4779_v3 }
 0x72b   :  { %4735 = vadd.xlane.f32.xlu0 %v4733_v23  ;;  %4749 = vadd.xlane.f32.xlu1 %v4746_v9  ;;  %v17456_v23 = vld [vmem:[#allocation125_spill] sm:$0xff]  ;;  %v4466_v9 = vcvt.f32.s32 %v4465_v32  ;;  %v4493_v58 = vpop.xlane.xlu0 %4492 }
 0x72c   :  { %vm17457_vm15 = vnez %v17456_v23  ;;  %v4494_v26 = vcvt.f32.s32 %v4493_v58 }
 0x72d   :  { %vm4882_vm10 = vmand %vm17457_vm15, %vm17455_vm6 }
 0x72e   :  { %v4898_v18 = vsel %vm4882_vm10, 1, %v16344_v15 }
 0x72f   :  { %4961 = vadd.xlane.f32.xlu0 %v4958_v53  ;;  %4947 = vadd.xlane.f32.xlu1 %v4945_v42  ;;  %v13511_v53 = vadd.s32 %v4468_v39, %v4466_v9  ;;  %v4479_v42 = vpop.xlane.xlu1 %4478  ;;  %v4992_v55 = vshrl.u32 %v4898_v18, 16 }
 0x730   :  { %v4480_v61 = vcvt.f32.s32 %v4479_v42 }
 0x731   :  { %vm4639_vm5 = vcmp.lt.s32.totalorder %v17358_v0, %v13511_v53  ;;  %v4994_v5 = vcvt.s32.f32 %v4992_v55 }
 0x732   :  { %vm4661_vm3 = vmand %vm13382_vm14, %vm4639_vm5 }
 0x733   :  { %4761 = vadd.xlane.f32.xlu0 %v4758_v6  ;;  %4747 = vadd.xlane.f32.xlu1 %v4745_v60  ;;  %v4676_v6 = vsel %vm4660_vm4, 1, %v16344_v15  ;;  %v17458_v60 = vld [vmem:[#allocation63_spill] sm:$0xff]  ;;  %v4677_v31 = vsel %vm4661_vm3, 1, %v16344_v15  ;;  %v4507_v39 = vpop.xlane.xlu1 %4506 }
 0x734   :  { %vm17459_vm12 = vcmp.lt.s32.totalorder %v17358_v0, %v17458_v60  ;;  %v4508_v21 = vcvt.f32.s32 %v4507_v39 }
 0x735   :  { %vm4883_vm8 = vmand %vm17461_vm0, %vm17459_vm12 }
 0x736   :  { %v4899_v22 = vsel %vm4883_vm8, 1, %v16344_v15  ;;  %vm17474_vm8 = vnez %v17473_v4  ;;  %v17480_v4 = vld [vmem:[#allocation58_spill] sm:$0xff] }
 0x737   :  { %4959 = vadd.xlane.f32.xlu0 %v4957_v30  ;;  %4973 = vadd.xlane.f32.xlu1 %v4970_v27  ;;  %v4792_v30 = vshrl.u32 %v4676_v6, 16  ;;  %v4482_v27 = vshll.u32 %v4481_v13, 16  ;;  %v5004_v32 = vshrl.u32 %v4899_v22, 16  ;;  %v17466_v13 = vld [vmem:[#allocation21_spill] sm:$0xff]  ;;  %v4535_v39 = vpop.xlane.xlu1 %4534 }
 0x738   :  { %vm17467_vm11 = vcmp.lt.s32.totalorder %v17358_v0, %v17466_v13 }
 0x739   :  { %v13525_v45 = vadd.s32 %v4482_v27, %v4480_v61  ;;  %v4794_v38 = vcvt.s32.f32 %v4792_v30  ;;  %v5006_v23 = vcvt.s32.f32 %v5004_v32  ;;  %v4510_v30 = vshll.u32 %v4509_v48, 16 }
 0x73a   :  { %v4537_v48 = vcvt.f32.s32 %v13364_v37 }
 0x73b   :  { %4759 = vadd.xlane.f32.xlu0 %v4757_v44  ;;  %4773 = vadd.xlane.f32.xlu1 %v4770_v14  ;;  %17462 = vst [vmem:[#allocation105_spill] sm:$0xff] %v13525_v45  ;;  %v4991_v44 = vand.u32 65535, %v4898_v18  ;;  %v4495_v14 = vcvt.f32.s32 %v13349_v47  ;;  %vm4640_vm6 = vcmp.lt.s32.totalorder %v17358_v0, %v13525_v45  ;;  %v4900_v47 = vsel %vm4884_vm9, 1, %v16344_v15 }
 0x73c   :  { %vm4662_vm15 = vmand %vm13382_vm14, %vm4640_vm6  ;;  %v13553_v27 = vadd.s32 %v4510_v30, %v4508_v21  ;;  %v5015_v32 = vand.u32 65535, %v4900_v47  ;;  %v17477_v21 = vld [vmem:[#allocation108_spill] sm:$0xff] }
 0x73d   :  { %v4993_v9 = vcvt.s32.f32 %v4991_v44  ;;  %v4496_v29 = vshll.u32 %v4495_v14, 16  ;;  %v4678_v55 = vsel %vm4662_vm15, 1, %v16344_v15  ;;  %v4523_v44 = vcvt.f32.s32 %v13359_v43 }
 0x73e   :  { %v4816_v3 = vshrl.u32 %v4678_v55, 16  ;;  %17470 = vst [vmem:[#allocation31_spill] sm:$0xff] %v13553_v27  ;;  %vm4642_vm3 = vcmp.lt.s32.totalorder %v17358_v0, %v13553_v27  ;;  %vm17478_vm6 = vnez %v17477_v21 }
 0x73f   :  { %4985 = vadd.xlane.f32.xlu0 %v4982_v7  ;;  %4971 = vadd.xlane.f32.xlu1 %v4969_v56  ;;  %v4804_v7 = vshrl.u32 %v4677_v31, 16  ;;  %v4791_v56 = vand.u32 65535, %v4676_v6  ;;  %v13539_v59 = vadd.s32 %v4496_v29, %v4494_v26  ;;  %v17468_v6 = vld [vmem:[#allocation113_spill] sm:$0xff]  ;;  %v4524_v29 = vshll.u32 %v4523_v44, 16  ;;  %vm4664_vm1 = vmand %vm13382_vm14, %vm4642_vm3 }
 0x740   :  { %vm17469_vm10 = vnez %v17468_v6  ;;  %v4680_v6 = vsel %vm4664_vm1, 1, %v16344_v15 }
 0x741   :  { %v4806_v18 = vcvt.s32.f32 %v4804_v7  ;;  %v4793_v42 = vcvt.s32.f32 %v4791_v56  ;;  %vm4885_vm7 = vmand %vm17469_vm10, %vm17467_vm11  ;;  %vm4641_vm4 = vcmp.lt.s32.totalorder %v17358_v0, %v13539_v59  ;;  %v4815_v56 = vand.u32 65535, %v4678_v55  ;;  %v17475_v55 = vld [vmem:[#allocation26_spill] sm:$0xff] }
 0x742   :  { %v4901_v25 = vsel %vm4885_vm7, 1, %v16344_v15  ;;  %vm4663_vm12 = vmand %vm13382_vm14, %vm4641_vm4  ;;  %vm17476_vm9 = vcmp.lt.s32.totalorder %v17358_v0, %v17475_v55  ;;  %v4840_v30 = vshrl.u32 %v4680_v6, 16  ;;  %vm17481_vm7 = vcmp.lt.s32.totalorder %v17358_v0, %v17480_v4  ;;  %v17539_v4 = vld [vmem:[#allocation59_spill] sm:$0xff] }
 0x743   :  { %4785 = vadd.xlane.f32.xlu0 %v4782_v51  ;;  %4771 = vadd.xlane.f32.xlu1 %v4769_v49  ;;  %v5003_v51 = vand.u32 65535, %v4899_v22  ;;  %v5016_v49 = vshrl.u32 %v4900_v47, 16  ;;  %v4521_v22 = vpop.xlane.xlu0 %4520  ;;  %v4679_v14 = vsel %vm4663_vm12, 1, %v16344_v15  ;;  %vm4887_vm15 = vmand %vm17478_vm6, %vm17476_vm9 }
 0x744   :  { %v4522_v26 = vcvt.f32.s32 %v4521_v22  ;;  %v4828_v7 = vshrl.u32 %v4679_v14, 16  ;;  %v4903_v37 = vsel %vm4887_vm15, 1, %v16344_v15  ;;  %vm4888_vm4 = vmand %vm13229_vm2, %vm17481_vm7  ;;  %vm17483_vm2 = vcmp.lt.s32.totalorder %v17358_v0, %v17438_v1 }
 0x745   :  { %v5005_v61 = vcvt.s32.f32 %v5003_v51  ;;  %v5027_v51 = vand.u32 65535, %v4901_v25 }
 0x746   :  { %v13567_v47 = vadd.s32 %v4524_v29, %v4522_v26 }
 0x747   :  { %4983 = vadd.xlane.f32.xlu0 %v4981_v50  ;;  %4997 = vadd.xlane.f32.xlu1 %v4994_v5  ;;  %v5018_v50 = vcvt.s32.f32 %v5016_v49  ;;  %v4803_v5 = vand.u32 65535, %v4677_v31  ;;  %v17471_v31 = vld [vmem:[#allocation84_spill] sm:$0xff] }
 0x748   :  { %vm17472_vm0 = vcmp.lt.s32.totalorder %v17358_v0, %v17471_v31  ;;  %vm4643_vm11 = vcmp.lt.s32.totalorder %v17358_v0, %v13567_v47 }
 0x749   :  { %v4805_v58 = vcvt.s32.f32 %v4803_v5  ;;  %vm4886_vm5 = vmand %vm17474_vm8, %vm17472_vm0 }
 0x74a   :  { %v4902_v43 = vsel %vm4886_vm5, 1, %v16344_v15  ;;  %vm4665_vm10 = vmand %vm13382_vm14, %vm4643_vm11 }
 0x74b   :  { %4783 = vadd.xlane.f32.xlu0 %v4781_v46  ;;  %4797 = vadd.xlane.f32.xlu1 %v4794_v38  ;;  %v4818_v46 = vcvt.s32.f32 %v4816_v3  ;;  %v5028_v38 = vshrl.u32 %v4901_v25, 16  ;;  %v5040_v49 = vshrl.u32 %v4902_v43, 16  ;;  %v4827_v3 = vand.u32 65535, %v4679_v14 }
 0x74c   :  { %v4538_v25 = vshll.u32 %v4537_v48, 16  ;;  %v4681_v44 = vsel %vm4665_vm10, 1, %v16344_v15 }
 0x74d   :  { %v5042_v5 = vcvt.s32.f32 %v5040_v49 }
 0x74f   :  { %5009 = vadd.xlane.f32.xlu0 %v5006_v23  ;;  %4995 = vadd.xlane.f32.xlu1 %v4993_v9  ;;  %v5030_v23 = vcvt.s32.f32 %v5028_v38  ;;  %v5017_v9 = vcvt.s32.f32 %v5015_v32  ;;  %v5052_v38 = vshrl.u32 %v4903_v37, 16  ;;  %v5039_v32 = vand.u32 65535, %v4902_v43 }
 0x751   :  { %v5054_v26 = vcvt.s32.f32 %v5052_v38 }
 0x753   :  { %4809 = vadd.xlane.f32.xlu0 %v4806_v18  ;;  %4795 = vadd.xlane.f32.xlu1 %v4793_v42  ;;  %v4830_v18 = vcvt.s32.f32 %v4828_v7  ;;  %v4817_v42 = vcvt.s32.f32 %v4815_v56  ;;  %v4839_v7 = vand.u32 65535, %v4680_v6  ;;  %v4904_v56 = vsel %vm4888_vm4, 1, %v16344_v15 }
 0x754   :  { %v4851_v6 = vand.u32 65535, %v4681_v44 }
 0x755   :  { %v4841_v43 = vcvt.s32.f32 %v4839_v7 }
 0x757   :  { %5007 = vadd.xlane.f32.xlu0 %v5005_v61  ;;  %5021 = vadd.xlane.f32.xlu1 %v5018_v50  ;;  %v4536_v61 = vcvt.f32.s32 %v4535_v39  ;;  %v5029_v50 = vcvt.s32.f32 %v5027_v51  ;;  %v5051_v39 = vand.u32 65535, %v4903_v37  ;;  %v17484_v51 = vld [vmem:[#allocation29_spill] sm:$0xff] }
 0x758   :  { %vm17485_vm8 = vnez %v17484_v51 }
 0x759   :  { %v13581_v22 = vadd.s32 %v4538_v25, %v4536_v61  ;;  %vm4889_vm5 = vmand %vm17485_vm8, %vm17483_vm2  ;;  %v5053_v49 = vcvt.s32.f32 %v5051_v39  ;;  %v4853_v61 = vcvt.s32.f32 %v4851_v6 }
 0x75a   :  { %v4905_v57 = vsel %vm4889_vm5, 1, %v16344_v15 }
 0x75b   :  { %4807 = vadd.xlane.f32.xlu0 %v4805_v58  ;;  %4821 = vadd.xlane.f32.xlu1 %v4818_v46  ;;  %17479 = vst [vmem:[#allocation116_spill] sm:$0xff] %v13581_v22  ;;  %v4829_v58 = vcvt.s32.f32 %v4827_v3  ;;  %v4842_v46 = vcvt.s32.f32 %v4840_v30  ;;  %vm4644_vm12 = vcmp.lt.s32.totalorder %v17358_v0, %v13581_v22  ;;  %v5063_v3 = vand.u32 65535, %v4904_v56  ;;  %v17486_v30 = vld [vmem:[#allocation65_spill] sm:$0xff]  ;;  %v17528_v22 = vld [vmem:[#allocation136_spill] sm:$0xff] }
 0x75c   :  { %vm4666_vm0 = vmand %vm13382_vm14, %vm4644_vm12  ;;  %vm17487_vm14 = vcmp.lt.s32.totalorder %v17358_v0, %v17486_v30 }
 0x75d   :  { %vm4890_vm3 = vmand %vm13270_vm13, %vm17487_vm14 }
 0x75f   :  { %5033 = vadd.xlane.f32.xlu0 %v5030_v23  ;;  %5019 = vadd.xlane.f32.xlu1 %v5017_v9  ;;  %v5041_v23 = vcvt.s32.f32 %v5039_v32  ;;  %v4852_v9 = vshrl.u32 %v4681_v44, 16  ;;  %v4906_v32 = vsel %vm4890_vm3, 1, %v16344_v15 }
 0x761   :  { %v4854_v29 = vcvt.s32.f32 %v4852_v9  ;;  %v5087_v9 = vand.u32 65535, %v4906_v32 }
 0x763   :  { %4833 = vadd.xlane.f32.xlu0 %v4830_v18  ;;  %4819 = vadd.xlane.f32.xlu1 %v4817_v42  ;;  %v5064_v18 = vshrl.u32 %v4904_v56, 16  ;;  %v4682_v42 = vsel %vm4666_vm0, 1, %v16344_v15  ;;  %v5089_v7 = vcvt.s32.f32 %v5087_v9  ;;  %v17493_v9 = vmov 0 }
 0x764   :  { %v4864_v21 = vshrl.u32 %v4682_v42, 16  ;;  %v4863_v38 = vand.u32 65535, %v4682_v42 }
 0x765   :  { %v5066_v48 = vcvt.s32.f32 %v5064_v18 }
 0x766   :  { %v4865_v14 = vcvt.s32.f32 %v4863_v38 }
 0x767   :  { %5031 = vadd.xlane.f32.xlu0 %v5029_v50  ;;  %5045 = vadd.xlane.f32.xlu1 %v5042_v5  ;;  %v4866_v50 = vcvt.s32.f32 %v4864_v21  ;;  %v5076_v5 = vshrl.u32 %v4905_v57, 16 }
 0x769   :  { %v5078_v37 = vcvt.s32.f32 %v5076_v5 }
 0x76b   :  { %4831 = vadd.xlane.f32.xlu0 %v4829_v58  ;;  %4845 = vadd.xlane.f32.xlu1 %v4842_v46  ;;  %v5065_v58 = vcvt.s32.f32 %v5063_v3  ;;  %v5075_v46 = vand.u32 65535, %v4905_v57 }
 0x76d   :  { %v5077_v44 = vcvt.s32.f32 %v5075_v46  ;;  %v4690_v56 = vpop.xlane.xlu0 %4689 }
 0x76f   :  { %5057 = vadd.xlane.f32.xlu0 %v5054_v26  ;;  %5043 = vadd.xlane.f32.xlu1 %v5041_v23  ;;  %v5088_v26 = vshrl.u32 %v4906_v32, 16 }
 0x771   :  { %v5090_v23 = vcvt.s32.f32 %v5088_v26 }
 0x773   :  { %4857 = vadd.xlane.f32.xlu0 %v4854_v29  ;;  %4843 = vadd.xlane.f32.xlu1 %v4841_v43  ;;  %v4688_v29 = vpop.xlane.xlu0 %4687  ;;  %v4692_v43 = vcvt.f32.s32 %v4690_v56 }
 0x774   :  { %v4691_v42 = vcvt.f32.s32 %v4688_v29 }
 0x775   :  { %v4693_v51 = vshll.u32 %v4692_v43, 16 }
 0x777   :  { %5055 = vadd.xlane.f32.xlu0 %v5053_v49  ;;  %5069 = vadd.xlane.f32.xlu1 %v5066_v48  ;;  %v4914_v39 = vpop.xlane.xlu0 %4913  ;;  %v13607_v21 = vadd.s32 %v4693_v51, %v4691_v42 }
 0x778   :  { %v4916_v6 = vcvt.f32.s32 %v4914_v39 }
 0x779   :  { %17489 = vst [vmem:[#allocation33_spill] sm:$0xff] %v13607_v21  ;;  %vm15902_vm13 = vcmp.lt.s32.totalorder %v13607_v21, 32 }
 0x77a   :  { %v4917_v5 = vshll.u32 %v4916_v6, 16 }
 0x77b   :  { %4855 = vadd.xlane.f32.xlu0 %v4853_v61  ;;  %4869 = vadd.xlane.f32.xlu1 %v4866_v50 }
 0x77f   :  { %5081 = vadd.xlane.f32.xlu0 %v5078_v37  ;;  %5067 = vadd.xlane.f32.xlu1 %v5065_v58  ;;  %v5163_v58 = vmul.u32 8, %v13607_v21 }
 0x783   :  { %5079 = vadd.xlane.f32.xlu0 %v5077_v44  ;;  %4867 = vadd.xlane.f32.xlu1 %v4865_v14  ;;  %v17490_v14 = vld [vmem:[#allocation126_spill] sm:$0xff] }
 0x784   :  { %vm17491_vm1 = vnez %v17490_v14  ;;  %v17570_v14 = vld [vmem:[#allocation71_spill] sm:$0xff] }
 0x785   :  { %vm5115_vm9 = vmand %vm17491_vm1, %vm15902_vm13 }
 0x787   :  { %5093 = vadd.xlane.f32.xlu1 %v5090_v23 }
 0x78b   :  { %5091 = vadd.xlane.f32.xlu1 %v5089_v7 }
 0x79c   :  { %v4702_v18 = vpop.xlane.xlu1 %4701 }
 0x79d   :  { %v4704_v57 = vcvt.f32.s32 %v4702_v18 }
 0x79f   :  { %v4705_v46 = vshll.u32 %v4704_v57, 16 }
 0x7a0   :  { %v4714_v49 = vpop.xlane.xlu0 %4713  ;;  %v4700_v48 = vpop.xlane.xlu1 %4699 }
 0x7a1   :  { %v4703_v25 = vcvt.f32.s32 %v4700_v48  ;;  %v4716_v56 = vcvt.f32.s32 %v4714_v49 }
 0x7a3   :  { %v13615_v23 = vadd.s32 %v4705_v46, %v4703_v25  ;;  %v4717_v6 = vshll.u32 %v4716_v56, 16  ;;  %v17498_v25 = vmov 0 }
 0x7a4   :  { %v4912_v61 = vpop.xlane.xlu0 %4911  ;;  %v4926_v50 = vpop.xlane.xlu1 %4925 }
 0x7a5   :  { %v4915_v3 = vcvt.f32.s32 %v4912_v61  ;;  %v4928_v44 = vcvt.f32.s32 %v4926_v50  ;;  %17492 = vst [vmem:[#allocation34_spill] sm:$0xff] %v13615_v23  ;;  %vm15894_vm11 = vcmp.lt.s32.totalorder %v13615_v23, 32  ;;  %v5164_v48 = vmul.u32 8, %v13615_v23  ;;  %v17506_v23 = vld [vmem:[#allocation131_spill] sm:$0xff] }
 0x7a7   :  { %v4918_v37 = vadd.s32 %v4917_v5, %v4915_v3  ;;  %v4929_v39 = vshll.u32 %v4928_v44, 16  ;;  %v17495_v5 = vld [vmem:[#allocation69_spill] sm:$0xff] }
 0x7a8   :  { %v4712_v38 = vpop.xlane.xlu0 %4711  ;;  %v4726_v32 = vpop.xlane.xlu1 %4725  ;;  %vm17496_vm10 = vnez %v17495_v5 }
 0x7a9   :  { %vm5131_vm6 = vcmp.lt.s32.totalorder %v4918_v37, 8  ;;  %v5179_v26 = vadd.s32 %v5163_v58, %v4918_v37  ;;  %v4715_v42 = vcvt.f32.s32 %v4712_v38  ;;  %vm5116_vm7 = vmand %vm17496_vm10, %vm15894_vm11  ;;  %v4728_v58 = vcvt.f32.s32 %v4726_v32 }
 0x7aa   :  { %vm13617_vm15 = vmand %vm5115_vm9, %vm5131_vm6  ;;  %vm17507_vm9 = vnez %v17506_v23 }
 0x7ab   :  { %v17494_v9 = vsel %vm13617_vm15, 4294967295, %v17493_v9  ;;  %v5195_v7 = vsel %vm13617_vm15, %v5179_v26, 4294967295  ;;  %v13629_v3 = vadd.s32 %v4717_v6, %v4715_v42  ;;  %v17504_v6 = vmov 0 }
 0x7ac   :  { %5212 = vperm.xlu0 %7681, %v5195_v7   ;;  %v4938_v29 = vpop.xlane.xlu0 %4937  ;;  %v4924_v43 = vpop.xlane.xlu1 %4923 }
 0x7ad   :  { %v4927_v18 = vcvt.f32.s32 %v4924_v43  ;;  %v4940_v50 = vcvt.f32.s32 %v4938_v29  ;;  %17497 = vst [vmem:[#allocation110_spill] sm:$0xff] %v13629_v3  ;;  %vm15901_vm0 = vcmp.lt.s32.totalorder %v13629_v3, 32  ;;  %v5165_v29 = vmul.u32 8, %v13629_v3 }
 0x7ae   :  { %v4729_v43 = vshll.u32 %v4728_v58, 16 }
 0x7af   :  { %v4930_v51 = vadd.s32 %v4929_v39, %v4927_v18  ;;  %v4941_v44 = vshll.u32 %v4940_v50, 16 }
 0x7b0   :  { %v4738_v57 = vpop.xlane.xlu0 %4737  ;;  %v4724_v61 = vpop.xlane.xlu1 %4723 }
 0x7b1   :  { %vm5132_vm4 = vcmp.lt.s32.totalorder %v4930_v51, 8  ;;  %v5180_v49 = vadd.s32 %v5164_v48, %v4930_v51  ;;  %v4727_v7 = vcvt.f32.s32 %v4724_v61  ;;  %v17501_v51 = vld [vmem:[#allocation119_spill] sm:$0xff]  ;;  %v4740_v50 = vcvt.f32.s32 %v4738_v57 }
 0x7b2   :  { %vm13631_vm12 = vmand %vm5116_vm7, %vm5132_vm4  ;;  %vm17502_vm2 = vnez %v17501_v51 }
 0x7b3   :  { %v17499_v25 = vsel %vm13631_vm12, 4294967295, %v17498_v25  ;;  %v5196_v37 = vsel %vm13631_vm12, %v5180_v49, 4294967295  ;;  %vm5117_vm8 = vmand %vm17502_vm2, %vm15901_vm0  ;;  %v13643_v48 = vadd.s32 %v4729_v43, %v4727_v7  ;;  %v4741_v7 = vshll.u32 %v4740_v50, 16 }
 0x7b4   :  { %17500 = vst [vmem:[#allocation35_spill] sm:$0xff] %v17499_v25  ;;  %v4936_v46 = vpop.xlane.xlu0 %4935  ;;  %5215 = vperm.xlu1 %7682, %v5196_v37   ;;  %v4950_v38 = vpop.xlane.xlu1 %4949 }
 0x7b5   :  { %v4939_v26 = vcvt.f32.s32 %v4936_v46  ;;  %v4952_v42 = vcvt.f32.s32 %v4950_v38  ;;  %17503 = vst [vmem:[#allocation107_spill] sm:$0xff] %v13643_v48  ;;  %vm15895_vm3 = vcmp.lt.s32.totalorder %v13643_v48, 32 }
 0x7b6   :  { %vm5118_vm6 = vmand %vm17507_vm9, %vm15895_vm3 }
 0x7b7   :  { %v4942_v56 = vadd.s32 %v4941_v44, %v4939_v26  ;;  %v4953_v58 = vshll.u32 %v4952_v42, 16  ;;  %v5166_v26 = vmul.u32 8, %v13643_v48 }
 0x7b8   :  { %v4736_v39 = vpop.xlane.xlu0 %4735  ;;  %v4750_v18 = vpop.xlane.xlu1 %4749 }
 0x7b9   :  { %vm5133_vm5 = vcmp.lt.s32.totalorder %v4942_v56, 8  ;;  %v5181_v32 = vadd.s32 %v5165_v29, %v4942_v56  ;;  %v4739_v38 = vcvt.f32.s32 %v4736_v39  ;;  %v17509_v39 = vmov 0 }
 0x7ba   :  { %vm13645_vm14 = vmand %vm5117_vm8, %vm5133_vm5  ;;  %vm17513_vm5 = vnez %v17512_v17 }
 0x7bb   :  { %v17505_v6 = vsel %vm13645_vm14, 4294967295, %v17504_v6  ;;  %v5197_v61 = vsel %vm13645_vm14, %v5181_v32, 4294967295  ;;  %v13657_v32 = vadd.s32 %v4741_v7, %v4739_v38 }
 0x7bc   :  { %v4962_v49 = vpop.xlane.xlu0 %4961  ;;  %5218 = vperm.xlu1 %7682, %v5197_v61   ;;  %v4948_v37 = vpop.xlane.xlu1 %4947  ;;  %v4752_v61 = vcvt.f32.s32 %v4750_v18 }
 0x7bd   :  { %v4951_v46 = vcvt.f32.s32 %v4948_v37  ;;  %v4964_v43 = vcvt.f32.s32 %v4962_v49  ;;  %17508 = vst [vmem:[#allocation36_spill] sm:$0xff] %v13657_v32  ;;  %vm15909_vm8 = vcmp.lt.s32.totalorder %v13657_v32, 32  ;;  %v5167_v38 = vmul.u32 8, %v13657_v32 }
 0x7bf   :  { %v4954_v44 = vadd.s32 %v4953_v58, %v4951_v46  ;;  %v4965_v37 = vshll.u32 %v4964_v43, 16 }
 0x7c0   :  { %v4762_v56 = vpop.xlane.xlu0 %4761  ;;  %v4748_v29 = vpop.xlane.xlu1 %4747 }
 0x7c1   :  { %vm5134_vm7 = vcmp.lt.s32.totalorder %v4954_v44, 8  ;;  %v5182_v57 = vadd.s32 %v5166_v26, %v4954_v44  ;;  %v4751_v46 = vcvt.f32.s32 %v4748_v29  ;;  %v4753_v44 = vshll.u32 %v4752_v61, 16 }
 0x7c2   :  { %vm13659_vm4 = vmand %vm5118_vm6, %vm5134_vm7  ;;  %v17515_v29 = vmov 0 }
 0x7c3   :  { %v17510_v39 = vsel %vm13659_vm4, 4294967295, %v17509_v39  ;;  %v5198_v42 = vsel %vm13659_vm4, %v5182_v57, 4294967295  ;;  %vm5119_vm6 = vmand %vm17513_vm5, %vm15909_vm8  ;;  %v13671_v57 = vadd.s32 %v4753_v44, %v4751_v46 }
 0x7c4   :  { %17511 = vst [vmem:[#allocation38_spill] sm:$0xff] %v17510_v39  ;;  %v4960_v50 = vpop.xlane.xlu0 %4959  ;;  %5221 = vperm.xlu0 %7681, %v5198_v42   ;;  %v4974_v49 = vpop.xlane.xlu1 %4973  ;;  %v4764_v42 = vcvt.f32.s32 %v4762_v56  ;;  %v17517_v39 = vld [vmem:[#allocation135_spill] sm:$0xff] }
 0x7c5   :  { %v4963_v58 = vcvt.f32.s32 %v4960_v50  ;;  %v4976_v10 = vcvt.f32.s32 %v4974_v49  ;;  %17514 = vst [vmem:[#allocation138_spill] sm:$0xff] %v13671_v57  ;;  %vm15903_vm3 = vcmp.lt.s32.totalorder %v13671_v57, 32 }
 0x7c6   :  { %v4765_v46 = vshll.u32 %v4764_v42, 16 }
 0x7c7   :  { %v4966_v48 = vadd.s32 %v4965_v37, %v4963_v58  ;;  %v4977_v49 = vshll.u32 %v4976_v10, 16  ;;  %v17520_v10 = vmov 0 }
 0x7c8   :  { %v4760_v26 = vpop.xlane.xlu0 %4759  ;;  %v4774_v7 = vpop.xlane.xlu1 %4773 }
 0x7c9   :  { %vm5135_vm7 = vcmp.lt.s32.totalorder %v4966_v48, 8  ;;  %v5183_v18 = vadd.s32 %v5167_v38, %v4966_v48  ;;  %v4763_v58 = vcvt.f32.s32 %v4760_v26  ;;  %v5168_v48 = vmul.u32 8, %v13671_v57 }
 0x7ca   :  { %vm13673_vm11 = vmand %vm5119_vm6, %vm5135_vm7  ;;  %vm17518_vm6 = vnez %v17517_v39 }
 0x7cb   :  { %v17516_v29 = vsel %vm13673_vm11, 4294967295, %v17515_v29  ;;  %v5199_v43 = vsel %vm13673_vm11, %v5183_v18, 4294967295  ;;  %vm5120_vm7 = vmand %vm17518_vm6, %vm15903_vm3  ;;  %v13685_v18 = vadd.s32 %v4765_v46, %v4763_v58 }
 0x7cc   :  { %v4986_v61 = vpop.xlane.xlu0 %4985  ;;  %5224 = vperm.xlu1 %7682, %v5199_v43   ;;  %v4972_v50 = vpop.xlane.xlu1 %4971  ;;  %v4776_v43 = vcvt.f32.s32 %v4774_v7 }
 0x7cd   :  { %v4975_v37 = vcvt.f32.s32 %v4972_v50  ;;  %v4988_v3 = vcvt.f32.s32 %v4986_v61  ;;  %17519 = vst [vmem:[#allocation103_spill] sm:$0xff] %v13685_v18  ;;  %vm15911_vm3 = vcmp.lt.s32.totalorder %v13685_v18, 32 }
 0x7ce   :  { %v4777_v58 = vshll.u32 %v4776_v43, 16 }
 0x7cf   :  { %v4978_v32 = vadd.s32 %v4977_v49, %v4975_v37  ;;  %v4989_v50 = vshll.u32 %v4988_v3, 16  ;;  %v17526_v3 = vmov 0 }
 0x7d0   :  { %v4786_v38 = vpop.xlane.xlu0 %4785  ;;  %v4772_v44 = vpop.xlane.xlu1 %4771 }
 0x7d1   :  { %vm5136_vm0 = vcmp.lt.s32.totalorder %v4978_v32, 8  ;;  %v5184_v56 = vadd.s32 %v5168_v48, %v4978_v32  ;;  %v4775_v37 = vcvt.f32.s32 %v4772_v44  ;;  %v5169_v32 = vmul.u32 8, %v13685_v18 }
 0x7d2   :  { %vm13687_vm13 = vmand %vm5120_vm7, %vm5136_vm0 }
 0x7d3   :  { %v17521_v10 = vsel %vm13687_vm13, 4294967295, %v17520_v10  ;;  %v5200_v26 = vsel %vm13687_vm13, %v5184_v56, 4294967295  ;;  %v13699_v56 = vadd.s32 %v4777_v58, %v4775_v37 }
 0x7d4   :  { %17522 = vst [vmem:[#allocation10_spill] sm:$0xff] %v17521_v10  ;;  %v4984_v42 = vpop.xlane.xlu0 %4983  ;;  %5227 = vperm.xlu0 %7681, %v5200_v26   ;;  %v4998_v61 = vpop.xlane.xlu1 %4997  ;;  %v17523_v10 = vld [vmem:[#allocation85_spill] sm:$0xff]  ;;  %v4788_v26 = vcvt.f32.s32 %v4786_v38 }
 0x7d5   :  { %v4987_v49 = vcvt.f32.s32 %v4984_v42  ;;  %v5000_v21 = vcvt.f32.s32 %v4998_v61  ;;  %vm17524_vm0 = vnez %v17523_v10  ;;  %17525 = vst [vmem:[#allocation106_spill] sm:$0xff] %v13699_v56  ;;  %v17577_v10 = vld [vmem:[#allocation49_spill] sm:$0xff] }
 0x7d6   :  { %vm5121_vm7 = vmand %vm17524_vm0, %vm15911_vm3  ;;  %vm15918_vm3 = vcmp.lt.s32.totalorder %v13699_v56, 32  ;;  %v4789_v37 = vshll.u32 %v4788_v26, 16 }
 0x7d7   :  { %v4990_v57 = vadd.s32 %v4989_v50, %v4987_v49  ;;  %v5001_v61 = vshll.u32 %v5000_v21, 16  ;;  %v17531_v21 = vmov 0 }
 0x7d8   :  { %v4784_v48 = vpop.xlane.xlu0 %4783  ;;  %v4798_v46 = vpop.xlane.xlu1 %4797 }
 0x7d9   :  { %vm5137_vm8 = vcmp.lt.s32.totalorder %v4990_v57, 8  ;;  %v5185_v7 = vadd.s32 %v5169_v32, %v4990_v57  ;;  %v4787_v49 = vcvt.f32.s32 %v4784_v48  ;;  %v5170_v57 = vmul.u32 8, %v13699_v56 }
 0x7da   :  { %vm13701_vm13 = vmand %vm5121_vm7, %vm5137_vm8  ;;  %vm17529_vm8 = vnez %v17528_v22 }
 0x7db   :  { %v17527_v3 = vsel %vm13701_vm13, 4294967295, %v17526_v3  ;;  %v5201_v44 = vsel %vm13701_vm13, %v5185_v7, 4294967295  ;;  %vm5122_vm7 = vmand %vm17529_vm8, %vm15918_vm3  ;;  %v13713_v7 = vadd.s32 %v4789_v37, %v4787_v49 }
 0x7dc   :  { %v5010_v43 = vpop.xlane.xlu0 %5009  ;;  %5230 = vperm.xlu1 %7682, %v5201_v44   ;;  %v4996_v42 = vpop.xlane.xlu1 %4995  ;;  %v4800_v44 = vcvt.f32.s32 %v4798_v46 }
 0x7dd   :  { %v4999_v50 = vcvt.f32.s32 %v4996_v42  ;;  %v5012_v25 = vcvt.f32.s32 %v5010_v43  ;;  %17530 = vst [vmem:[#allocation112_spill] sm:$0xff] %v13713_v7  ;;  %vm15923_vm3 = vcmp.lt.s32.totalorder %v13713_v7, 32 }
 0x7de   :  { %v4801_v49 = vshll.u32 %v4800_v44, 16 }
 0x7df   :  { %v5002_v18 = vadd.s32 %v5001_v61, %v4999_v50  ;;  %v5013_v42 = vshll.u32 %v5012_v25, 16  ;;  %v17537_v25 = vmov 0 }
 0x7e0   :  { %v4810_v32 = vpop.xlane.xlu0 %4809  ;;  %v4796_v58 = vpop.xlane.xlu1 %4795 }
 0x7e1   :  { %vm5138_vm4 = vcmp.lt.s32.totalorder %v5002_v18, 8  ;;  %v5186_v38 = vadd.s32 %v5170_v57, %v5002_v18  ;;  %v4799_v50 = vcvt.f32.s32 %v4796_v58  ;;  %v5171_v18 = vmul.u32 8, %v13713_v7 }
 0x7e2   :  { %vm13715_vm12 = vmand %vm5122_vm7, %vm5138_vm4 }
 0x7e3   :  { %v17532_v21 = vsel %vm13715_vm12, 4294967295, %v17531_v21  ;;  %v5202_v48 = vsel %vm13715_vm12, %v5186_v38, 4294967295  ;;  %v13727_v38 = vadd.s32 %v4801_v49, %v4799_v50 }
 0x7e4   :  { %17533 = vst [vmem:[#allocation104_spill] sm:$0xff] %v17532_v21  ;;  %v5008_v26 = vpop.xlane.xlu0 %5007  ;;  %5233 = vperm.xlu0 %7681, %v5202_v48   ;;  %v5022_v43 = vpop.xlane.xlu1 %5021  ;;  %v17534_v21 = vld [vmem:[#allocation91_spill] sm:$0xff]  ;;  %v4812_v48 = vcvt.f32.s32 %v4810_v32 }
 0x7e5   :  { %v5011_v61 = vcvt.f32.s32 %v5008_v26  ;;  %v5024_v30 = vcvt.f32.s32 %v5022_v43  ;;  %vm17535_vm4 = vnez %v17534_v21  ;;  %17536 = vst [vmem:[#allocation124_spill] sm:$0xff] %v13727_v38 }
 0x7e6   :  { %vm5123_vm7 = vmand %vm17535_vm4, %vm15923_vm3  ;;  %vm15927_vm3 = vcmp.lt.s32.totalorder %v13727_v38, 32  ;;  %v4813_v50 = vshll.u32 %v4812_v48, 16 }
 0x7e7   :  { %v5014_v56 = vadd.s32 %v5013_v42, %v5011_v61  ;;  %v5025_v43 = vshll.u32 %v5024_v30, 16  ;;  %v17542_v30 = vmov 0 }
 0x7e8   :  { %v4808_v57 = vpop.xlane.xlu0 %4807  ;;  %v4822_v37 = vpop.xlane.xlu1 %4821 }
 0x7e9   :  { %vm5139_vm12 = vcmp.lt.s32.totalorder %v5014_v56, 8  ;;  %v5187_v46 = vadd.s32 %v5171_v18, %v5014_v56  ;;  %v4811_v61 = vcvt.f32.s32 %v4808_v57  ;;  %v5172_v56 = vmul.u32 8, %v13727_v38 }
 0x7ea   :  { %vm13729_vm8 = vmand %vm5123_vm7, %vm5139_vm12  ;;  %vm17540_vm12 = vnez %v17539_v4  ;;  %v17550_v4 = vld [vmem:[#allocation139_spill] sm:$0xff] }
 0x7eb   :  { %v17538_v25 = vsel %vm13729_vm8, 4294967295, %v17537_v25  ;;  %v5203_v58 = vsel %vm13729_vm8, %v5187_v46, 4294967295  ;;  %vm5124_vm7 = vmand %vm17540_vm12, %vm15927_vm3  ;;  %v13741_v46 = vadd.s32 %v4813_v50, %v4811_v61 }
 0x7ec   :  { %v5034_v44 = vpop.xlane.xlu0 %5033  ;;  %5236 = vperm.xlu1 %7682, %v5203_v58   ;;  %v5020_v26 = vpop.xlane.xlu1 %5019  ;;  %v4824_v58 = vcvt.f32.s32 %v4822_v37 }
 0x7ed   :  { %v5023_v42 = vcvt.f32.s32 %v5020_v26  ;;  %v5036_v27 = vcvt.f32.s32 %v5034_v44  ;;  %17541 = vst [vmem:[#allocation100_spill] sm:$0xff] %v13741_v46  ;;  %vm15933_vm3 = vcmp.lt.s32.totalorder %v13741_v46, 32 }
 0x7ee   :  { %v4825_v61 = vshll.u32 %v4824_v58, 16 }
 0x7ef   :  { %v5026_v7 = vadd.s32 %v5025_v43, %v5023_v42  ;;  %v5037_v26 = vshll.u32 %v5036_v27, 16  ;;  %v17548_v27 = vmov 0 }
 0x7f0   :  { %v4834_v18 = vpop.xlane.xlu0 %4833  ;;  %v4820_v49 = vpop.xlane.xlu1 %4819 }
 0x7f1   :  { %vm5140_vm6 = vcmp.lt.s32.totalorder %v5026_v7, 8  ;;  %v5188_v32 = vadd.s32 %v5172_v56, %v5026_v7  ;;  %v4823_v42 = vcvt.f32.s32 %v4820_v49  ;;  %v5173_v7 = vmul.u32 8, %v13741_v46 }
 0x7f2   :  { %vm13743_vm9 = vmand %vm5124_vm7, %vm5140_vm6 }
 0x7f3   :  { %v17543_v30 = vsel %vm13743_vm9, 4294967295, %v17542_v30  ;;  %v5204_v57 = vsel %vm13743_vm9, %v5188_v32, 4294967295  ;;  %v13755_v32 = vadd.s32 %v4825_v61, %v4823_v42 }
 0x7f4   :  { %17544 = vst [vmem:[#allocation61_spill] sm:$0xff] %v17543_v30  ;;  %v5032_v48 = vpop.xlane.xlu0 %5031  ;;  %5239 = vperm.xlu0 %7681, %v5204_v57   ;;  %v5046_v44 = vpop.xlane.xlu1 %5045  ;;  %v17545_v30 = vld [vmem:[#allocation128_spill] sm:$0xff]  ;;  %v4836_v57 = vcvt.f32.s32 %v4834_v18 }
 0x7f5   :  { %v5035_v43 = vcvt.f32.s32 %v5032_v48  ;;  %v5048_v45 = vcvt.f32.s32 %v5046_v44  ;;  %vm17546_vm6 = vnez %v17545_v30  ;;  %17547 = vst [vmem:[#allocation134_spill] sm:$0xff] %v13755_v32 }
 0x7f6   :  { %vm5125_vm7 = vmand %vm17546_vm6, %vm15933_vm3  ;;  %vm15937_vm3 = vcmp.lt.s32.totalorder %v13755_v32, 32  ;;  %v4837_v42 = vshll.u32 %v4836_v57, 16 }
 0x7f7   :  { %v5038_v38 = vadd.s32 %v5037_v26, %v5035_v43  ;;  %v5049_v44 = vshll.u32 %v5048_v45, 16  ;;  %v17553_v45 = vmov 0 }
 0x7f8   :  { %v4832_v56 = vpop.xlane.xlu0 %4831  ;;  %v4846_v50 = vpop.xlane.xlu1 %4845 }
 0x7f9   :  { %vm5141_vm9 = vcmp.lt.s32.totalorder %v5038_v38, 8  ;;  %v5189_v37 = vadd.s32 %v5173_v7, %v5038_v38  ;;  %v4835_v43 = vcvt.f32.s32 %v4832_v56  ;;  %v5174_v38 = vmul.u32 8, %v13755_v32 }
 0x7fa   :  { %vm13757_vm12 = vmand %vm5125_vm7, %vm5141_vm9  ;;  %vm17551_vm9 = vnez %v17550_v4 }
 0x7fb   :  { %v17549_v27 = vsel %vm13757_vm12, 4294967295, %v17548_v27  ;;  %v5205_v49 = vsel %vm13757_vm12, %v5189_v37, 4294967295  ;;  %vm5126_vm7 = vmand %vm17551_vm9, %vm15937_vm3  ;;  %v13769_v37 = vadd.s32 %v4837_v42, %v4835_v43 }
 0x7fc   :  { %v5058_v58 = vpop.xlane.xlu0 %5057  ;;  %5242 = vperm.xlu1 %7682, %v5205_v49   ;;  %v5044_v48 = vpop.xlane.xlu1 %5043  ;;  %v4848_v49 = vcvt.f32.s32 %v4846_v50 }
 0x7fd   :  { %v5047_v26 = vcvt.f32.s32 %v5044_v48  ;;  %v5060_v31 = vcvt.f32.s32 %v5058_v58  ;;  %17552 = vst [vmem:[#allocation120_spill] sm:$0xff] %v13769_v37  ;;  %vm15946_vm3 = vcmp.lt.s32.totalorder %v13769_v37, 32 }
 0x7fe   :  { %v4849_v43 = vshll.u32 %v4848_v49, 16 }
 0x7ff   :  { %v5050_v46 = vadd.s32 %v5049_v44, %v5047_v26  ;;  %v5061_v48 = vshll.u32 %v5060_v31, 16 }
 0x800   :  { %v4858_v7 = vpop.xlane.xlu0 %4857  ;;  %v4844_v61 = vpop.xlane.xlu1 %4843 }
 0x801   :  { %vm5142_vm10 = vcmp.lt.s32.totalorder %v5050_v46, 8  ;;  %v5190_v18 = vadd.s32 %v5174_v38, %v5050_v46  ;;  %v4847_v26 = vcvt.f32.s32 %v4844_v61  ;;  %v5175_v46 = vmul.u32 8, %v13769_v37 }
 0x802   :  { %vm13771_vm12 = vmand %vm5126_vm7, %vm5142_vm10  ;;  %v4860_v38 = vcvt.f32.s32 %v4858_v7 }
 0x803   :  { %v17554_v45 = vsel %vm13771_vm12, 4294967295, %v17553_v45  ;;  %v5206_v56 = vsel %vm13771_vm12, %v5190_v18, 4294967295  ;;  %v17556_v18 = vld [vmem:[#allocation140_spill] sm:$0xff]  ;;  %v13783_v31 = vadd.s32 %v4849_v43, %v4847_v26 }
 0x804   :  { %17555 = vst [vmem:[#allocation99_spill] sm:$0xff] %v17554_v45  ;;  %v5056_v57 = vpop.xlane.xlu0 %5055  ;;  %5245 = vperm.xlu0 %7681, %v5206_v56   ;;  %v5070_v58 = vpop.xlane.xlu1 %5069  ;;  %vm17557_vm10 = vnez %v17556_v18  ;;  %v17559_v56 = vmov 0  ;;  %v4861_v49 = vshll.u32 %v4860_v38, 16  ;;  %v17561_v38 = vld [vmem:[#allocation117_spill] sm:$0xff]  ;;  %v17581_v18 = vld [vmem:[#allocation8_spill] sm:$0xff] }
 0x805   :  { %v5059_v44 = vcvt.f32.s32 %v5056_v57  ;;  %v5072_v36 = vcvt.f32.s32 %v5070_v58  ;;  %vm5127_vm7 = vmand %vm17557_vm10, %vm15946_vm3  ;;  %17558 = vst [vmem:[#allocation14_spill] sm:$0xff] %v13783_v31  ;;  %vm15950_vm3 = vcmp.lt.s32.totalorder %v13783_v31, 32  ;;  %v5176_v26 = vmul.u32 8, %v13783_v31 }
 0x807   :  { %v5062_v32 = vadd.s32 %v5061_v48, %v5059_v44  ;;  %v5073_v48 = vshll.u32 %v5072_v36, 16 }
 0x808   :  { %v4856_v42 = vpop.xlane.xlu0 %4855  ;;  %v4870_v4 = vpop.xlane.xlu1 %4869 }
 0x809   :  { %vm5143_vm12 = vcmp.lt.s32.totalorder %v5062_v32, 8  ;;  %v5191_v50 = vadd.s32 %v5175_v46, %v5062_v32  ;;  %v4859_v61 = vcvt.f32.s32 %v4856_v42  ;;  %v4872_v46 = vcvt.f32.s32 %v4870_v4 }
 0x80a   :  { %vm13785_vm9 = vmand %vm5127_vm7, %vm5143_vm12  ;;  %vm17562_vm12 = vnez %v17561_v38 }
 0x80b   :  { %v17560_v56 = vsel %vm13785_vm9, 4294967295, %v17559_v56  ;;  %v5207_v7 = vsel %vm13785_vm9, %v5191_v50, 4294967295  ;;  %v13791_v45 = vadd.s32 %v4861_v49, %v4859_v61  ;;  %vm5128_vm7 = vmand %vm17562_vm12, %vm15950_vm3  ;;  %v17563_v61 = vmov 0 }
 0x80c   :  { %v5082_v57 = vpop.xlane.xlu0 %5081  ;;  %5248 = vperm.xlu1 %7682, %v5207_v7   ;;  %v5068_v58 = vpop.xlane.xlu1 %5067  ;;  %v4873_v49 = vshll.u32 %v4872_v46, 16  ;;  %vm4595_vm12 = vcmp.eq.s32.totalorder %v13380_v54, %v17352_v20 }
 0x80d   :  { %v5084_v44 = vcvt.f32.s32 %v5082_v57  ;;  %v5071_v37 = vcvt.f32.s32 %v5068_v58  ;;  %vm15953_vm13 = vcmp.lt.s32.totalorder %v13791_v45, 32  ;;  %v5177_v7 = vmul.u32 8, %v13791_v45 }
 0x80f   :  { %v5074_v32 = vadd.s32 %v5073_v48, %v5071_v37  ;;  %v5085_v2 = vshll.u32 %v5084_v44, 16  ;;  %v17565_v48 = vld [vmem:[#allocation122_spill] sm:$0xff] }
 0x810   :  { %v5080_v43 = vpop.xlane.xlu0 %5079  ;;  %v4868_v42 = vpop.xlane.xlu1 %4867  ;;  %vm17566_vm3 = vnez %v17565_v48  ;;  %v17586_v48 = vmov 0 }
 0x811   :  { %v5083_v22 = vcvt.f32.s32 %v5080_v43  ;;  %vm5144_vm9 = vcmp.lt.s32.totalorder %v5074_v32, 8  ;;  %v5192_v36 = vadd.s32 %v5176_v26, %v5074_v32  ;;  %v4871_v50 = vcvt.f32.s32 %v4868_v42 }
 0x812   :  { %vm13799_vm8 = vmand %vm5128_vm7, %vm5144_vm9 }
 0x813   :  { %v17564_v61 = vsel %vm13799_vm8, 4294967295, %v17563_v61  ;;  %v5086_v37 = vadd.s32 %v5085_v2, %v5083_v22  ;;  %v5208_v4 = vsel %vm13799_vm8, %v5192_v36, 4294967295  ;;  %vm5129_vm9 = vmand %vm17566_vm3, %vm15953_vm13  ;;  %v13813_v2 = vadd.s32 %v4873_v49, %v4871_v50  ;;  %v17580_v49 = vld [vmem:[#allocation6_spill] sm:$0xff] }
 0x814   :  { %5251 = vperm.xlu0 %7681, %v5208_v4   ;;  %v5094_v57 = vpop.xlane.xlu1 %5093  ;;  %v17568_v22 = vmov 0  ;;  %vm4611_vm8 = vmand %vm17491_vm1, %vm4595_vm12  ;;  %vm4597_vm13 = vcmp.eq.s32.totalorder %v13407_v28, %v17413_v16  ;;  %vm17571_vm1 = vnez %v17570_v14  ;;  %v17700_v14 = vmov 0 }
 0x815   :  { %v5096_v58 = vcvt.f32.s32 %v5094_v57  ;;  %vm5145_vm7 = vcmp.lt.s32.totalorder %v5086_v37, 8  ;;  %v5193_v44 = vadd.s32 %v5177_v7, %v5086_v37  ;;  %17567 = vst [vmem:[#allocation137_spill] sm:$0xff] %v13813_v2  ;;  %vm15981_vm14 = vcmp.lt.s32.totalorder %v13813_v2, 32 }
 0x816   :  { %vm13815_vm11 = vmand %vm5129_vm9, %vm5145_vm7  ;;  %v6229_v42 = vsel %vm4611_vm8, 1, %v16344_v15  ;;  %v5178_v36 = vmul.u32 8, %v13813_v2  ;;  %v17781_v16 = vmov 0 }
 0x817   :  { %v17569_v22 = vsel %vm13815_vm11, 4294967295, %v17568_v22  ;;  %v5209_v32 = vsel %vm13815_vm11, %v5193_v44, 4294967295  ;;  %v5097_v46 = vshll.u32 %v5096_v58, 16  ;;  %vm4613_vm9 = vmand %vm17502_vm2, %vm4597_vm13  ;;  %vm4599_vm11 = vcmp.eq.s32.totalorder %v13427_v62, %v17385_v8  ;;  %v17575_v62 = vld [vmem:[#allocation93_spill] sm:$0xff] }
 0x818   :  { %5254 = vperm.xlu1 %7682, %v5209_v32   ;;  %v5092_v26 = vpop.xlane.xlu1 %5091  ;;  %vm5130_vm12 = vmand %vm17571_vm1, %vm15981_vm14  ;;  %v6231_v28 = vsel %vm4613_vm9, 1, %v16344_v15  ;;  %vm4601_vm2 = vcmp.eq.s32.totalorder %v13455_v19, %v17414_v11  ;;  %v17574_v8 = vmov 2   ;;  %vm4603_vm9 = vcmp.eq.s32.totalorder %v13483_v63, %v17458_v60  ;;  %v17576_v11 = vld [vmem:[#allocation3_spill] sm:$0xff]  ;;  %v17578_v63 = vld [vmem:[#allocation4_spill] sm:$0xff] }
 0x819   :  { %v5095_v43 = vcvt.f32.s32 %v5092_v26  ;;  %vm4615_vm13 = vmand %vm17513_vm5, %vm4599_vm11  ;;  %vm4605_vm5 = vcmp.eq.s32.totalorder %v13511_v53, %v17466_v13  ;;  %v17579_v60 = vmov 0.0   ;;  %v17585_v32 = vmov 1.0|1.0  }
 0x81a   :  { %v6233_v37 = vsel %vm4615_vm13, 1, %v16344_v15  ;;  %vm4617_vm8 = vmand %vm17524_vm0, %vm4601_vm2  ;;  %vm4609_vm13 = vcmp.eq.s32.totalorder %v13567_v47, %v17438_v1  ;;  %v17582_v1 = vmov 0 }
 0x81b   :  { %v5098_v54 = vadd.s32 %v5097_v46, %v5095_v43  ;;  %v6235_v4 = vsel %vm4617_vm8, 1, %v16344_v15  ;;  %vm4619_vm11 = vmand %vm17535_vm4, %vm4603_vm9  ;;  %vm4607_vm4 = vcmp.eq.s32.totalorder %v13539_v59, %v17475_v55 }
 0x81c   :  { %6246 = vperm.xlu1 %7682, %v6229_v42   ;;  %v6237_v19 = vsel %vm4619_vm11, 1, %v16344_v15  ;;  %vm4621_vm0 = vmand %vm17546_vm6, %vm4605_vm5  ;;  %vm17592_vm11 = vnez %v17494_v9 }
 0x81d   :  { %vm5146_vm7 = vcmp.lt.s32.totalorder %v5098_v54, 8  ;;  %v5194_v50 = vadd.s32 %v5178_v36, %v5098_v54  ;;  %v6239_v21 = vsel %vm4621_vm0, 1, %v16344_v15  ;;  %vm4623_vm6 = vmand %vm17557_vm10, %vm4607_vm4 }
 0x81e   :  { %vm13836_vm15 = vmand %vm5130_vm12, %vm5146_vm7  ;;  %v6241_v55 = vsel %vm4623_vm6, 1, %v16344_v15 }
 0x81f   :  { %v5210_v51 = vsel %vm13836_vm15, %v5194_v50, 4294967295  ;;  %vm4625_vm10 = vmand %vm17566_vm3, %vm4609_vm13 }
 0x820   :  { %6252 = vperm.xlu1 %7682, %v6231_v28   ;;  %5257 = vperm.xlu0 %7681, %v5210_v51   ;;  %v6243_v54 = vsel %vm4625_vm10, 1, %v16344_v15  ;;  %vm17609_vm10 = vnez %v17538_v25  ;;  %v17626_v28 = vld [vmem:[#allocation17_spill] sm:$0xff] }
 0x824   :  { %6258 = vperm.xlu1 %7682, %v6233_v37   ;;  %7684 = vset.pattern.permute.xlu0 %v17574_v8  ;;  %v17589_v37 = vld [vmem:[#allocation12_spill] sm:$0xff] }
 0x825   :  { %6510 = vperm.xlu0 %7684, %v17575_v62  }
 0x828   :  { %6264 = vperm.xlu1 %7682, %v6235_v4  }
 0x829   :  { %6519 = vperm.xlu0 %7684, %v17576_v11  }
 0x82b   :  { %v5213_v17 = vpop.permute.xlu0 %5212 }
 0x82c   :  { %6270 = vperm.xlu1 %7682, %v6237_v19   ;;  %vm5260_vm12 = vcmp.eq.s32.totalorder %v17577_v10, %v5213_v17  ;;  %vm5259_vm7 = vcmp.eq.s32.totalorder %v17358_v0, %v5213_v17 }
 0x82d   :  { %6525 = vperm.xlu0 %7684, %v17578_v63   ;;  %v6979_v53 = vsel %vm5260_vm12, 1.0, %v17579_v60  ;;  %v6978_v13 = vsel %vm5259_vm7, 1.0, %v17579_v60 }
 0x82e   :  { %v13875_v30 = vsub.f32 %v6979_v53, %v6979_v53  ;;  %v13877_v7 = vsub.f32 %v6978_v13, %v6978_v13  ;;  %v6373_v53 = vsel %vm17592_vm11, 1, %v16344_v15 }
 0x830   :  { %6276 = vperm.xlu1 %7682, %v6239_v21   ;;  %v5471_v57 = vand.u32 4294901760, %v13877_v7  ;;  %v5465_v58 = vand.u32 4294901760, %v13875_v30 }
 0x831   :  { %6531 = vperm.xlu0 %7684, %v17580_v49  }
 0x832   :  { %v5472_v43 = vsub.f32 %v13877_v7, %v5471_v57  ;;  %v5466_v42 = vsub.f32 %v13875_v30, %v5465_v58 }
 0x833   :  { %v5216_v59 = vpop.permute.xlu1 %5215 }
 0x834   :  { %6282 = vperm.xlu1 %7682, %v6241_v55   ;;  %vm5262_vm2 = vcmp.eq.s32.totalorder %v17577_v10, %v5216_v59  ;;  %vm5261_vm8 = vcmp.eq.s32.totalorder %v17358_v0, %v5216_v59  ;;  %v5473_v19 = vand.u32 4294901760, %v5472_v43  ;;  %v5467_v13 = vand.u32 4294901760, %v5466_v42 }
 0x835   :  { %6537 = vperm.xlu0 %7684, %v17581_v18   ;;  %v6981_v44 = vsel %vm5262_vm2, 1.0, %v17579_v60  ;;  %vm13895_vm9 = vmpackc.low %vm5262_vm2, %vm5260_vm12  ;;  %v6980_v47 = vsel %vm5261_vm8, 1.0, %v17579_v60  ;;  %vm17594_vm12 = vnez %v17505_v6  ;;  %v17595_v43 = vmov 1  }
 0x836   :  { %v17583_v1 = vsel %vm13895_vm9, 4294967295, %v17582_v1  ;;  %7302 = vmatprep.subr.msk.bf16.mxu1 %vm13895_vm9, %v17585_v32  ;;  %v13903_v26 = vsub.f32 %v6981_v44, %v6981_v44  ;;  %vm13907_vm3 = vmpackc.low %vm5261_vm8, %vm5259_vm7  ;;  %v13911_v46 = vsub.f32 %v6980_v47, %v6980_v47  ;;  %v6375_v47 = vsel %vm17594_vm12, 1, %v16344_v15 }
 0x837   :  { %17584 = vst [vmem:[#allocation41_spill] sm:$0xff] %v17583_v1  ;;  %v17587_v48 = vsel %vm13907_vm3, 4294967295, %v17586_v48  ;;  %7304 = vmatpush1.bf16.msk.msra.mxu1 %vm13907_vm3, %v17585_v32  ;;  %vm17597_vm7 = vnez %v17516_v29  ;;  %vm17605_vm8 = vnez %v17527_v3  ;;  %vm17615_vm12 = vnez %v17560_v56 }
 0x838   :  { %17588 = vst [vmem:[#allocation74_spill] sm:$0xff] %v17587_v48  ;;  %v5483_v36 = vand.u32 4294901760, %v13911_v46  ;;  %6288 = vperm.xlu1 %7682, %v6243_v54   ;;  %v5477_v50 = vand.u32 4294901760, %v13903_v26  ;;  %v17596_v54 = vld [vmem:[#allocation5_spill] sm:$0xff] }
 0x839   :  { %6543 = vperm.xlu0 %7684, %v17589_v37  }
 0x83a   :  { %v5484_v62 = vsub.f32 %v13911_v46, %v5483_v36  ;;  %v5478_v4 = vsub.f32 %v13903_v26, %v5477_v50  ;;  %v13928_v11 = vpack.c.bf16 %v5477_v50, %v5465_v58  ;;  %v13930_v17 = vpack.c.bf16 %v5483_v36, %v5471_v57  ;;  %v17593_v57 = vld [vmem:[#allocation16_spill] sm:$0xff] }
 0x83b   :  { %v5219_v63 = vpop.permute.xlu1 %5218  ;;  %v6377_v50 = vsel %vm17597_vm7, 1, %v16344_v15 }
 0x83c   :  { %17590 = vst [vmem:[#allocation90_spill] sm:$0xff] %v13928_v11  ;;  %17591 = vst [vmem:[#allocation141_spill] sm:$0xff] %v13930_v17  ;;  %v5485_v21 = vand.u32 4294901760, %v5484_v62  ;;  %vm5263_vm5 = vcmp.eq.s32.totalorder %v17358_v0, %v5219_v63  ;;  %vm5264_vm0 = vcmp.eq.s32.totalorder %v17577_v10, %v5219_v63  ;;  %6390 = vperm.xlu1 %7682, %v6373_v53   ;;  %v5479_v49 = vand.u32 4294901760, %v5478_v4  ;;  %v17601_v53 = vld [vmem:[#allocation7_spill] sm:$0xff] }
 0x83d   :  { %v6982_v59 = vsel %vm5263_vm5, 1.0, %v17579_v60  ;;  %v6983_v55 = vsel %vm5264_vm0, 1.0, %v17579_v60  ;;  %6549 = vperm.xlu0 %7684, %v17593_v57   ;;  %v17598_v4 = vmov 0 }
 0x83e   :  { %v13944_v9 = vpack.c.bf16 %v5479_v49, %v5467_v13  ;;  %v13946_v58 = vpack.c.bf16 %v5485_v21, %v5473_v19  ;;  %v13948_v18 = vsub.f32 %v6983_v55, %v6983_v55  ;;  %v13950_v44 = vsub.f32 %v6982_v59, %v6982_v59 }
 0x83f   :  { %v17602_v13 = vmov 0  ;;  %v6379_v49 = vsel %vm17605_vm8, 1, %v16344_v15 }
 0x840   :  { %6396 = vperm.xlu1 %7682, %v6375_v47   ;;  %v5495_v42 = vand.u32 4294901760, %v13950_v44  ;;  %v5489_v37 = vand.u32 4294901760, %v13948_v18 }
 0x841   :  { %7685 = vset.pattern.permute.xlu0 %v17595_v43 }
 0x842   :  { %3220 = vperm.xlu0 %7685, %v17596_v54   ;;  %v5496_v21 = vsub.f32 %v13950_v44, %v5495_v42  ;;  %v5490_v59 = vsub.f32 %v13948_v18, %v5489_v37 }
 0x843   :  { %v5222_v36 = vpop.permute.xlu0 %5221 }
 0x844   :  { %vm5265_vm4 = vcmp.eq.s32.totalorder %v17358_v0, %v5222_v36  ;;  %vm5266_vm6 = vcmp.eq.s32.totalorder %v17577_v10, %v5222_v36  ;;  %6402 = vperm.xlu1 %7682, %v6377_v50   ;;  %v17606_v36 = vld [vmem:[#allocation9_spill] sm:$0xff]  ;;  %v5497_v57 = vand.u32 4294901760, %v5496_v21 }
 0x845   :  { %v6984_v6 = vsel %vm5265_vm4, 1.0, %v17579_v60  ;;  %v6985_v62 = vsel %vm5266_vm6, 1.0, %v17579_v60  ;;  %vm13968_vm13 = vmpackc.low %vm5266_vm6, %vm5264_vm0  ;;  %vm17613_vm0 = vnez %v17549_v27 }
 0x846   :  { %v17599_v4 = vsel %vm13968_vm13, 4294967295, %v17598_v4  ;;  %v13972_v19 = vsub.f32 %v6985_v62, %v6985_v62  ;;  %v13974_v29 = vsub.f32 %v6984_v6, %v6984_v6  ;;  %3229 = vperm.xlu0 %7685, %v17601_v53   ;;  %7306 = vmatprep.subr.msk.bf16.mxu1 %vm13968_vm13, %v17585_v32  ;;  %vm13982_vm2 = vmpackc.low %vm5265_vm4, %vm5263_vm5  ;;  %v6381_v53 = vsel %vm17609_vm10, 1, %v16344_v15 }
 0x847   :  { %17600 = vst [vmem:[#allocation88_spill] sm:$0xff] %v17599_v4  ;;  %v17603_v13 = vsel %vm13982_vm2, 4294967295, %v17602_v13  ;;  %7308 = vmatpush1.bf16.msk.msra.mxu1 %vm13982_vm2, %v17585_v32  ;;  %vm17625_vm10 = vnez %v17569_v22 }
 0x848   :  { %17604 = vst [vmem:[#allocation32_spill] sm:$0xff] %v17603_v13  ;;  %v5507_v55 = vand.u32 4294901760, %v13974_v29  ;;  %6408 = vperm.xlu1 %7682, %v6379_v49   ;;  %v5501_v63 = vand.u32 4294901760, %v13972_v19  ;;  %v5491_v49 = vand.u32 4294901760, %v5490_v59 }
 0x84a   :  { %v5508_v54 = vsub.f32 %v13974_v29, %v5507_v55  ;;  %3235 = vperm.xlu0 %7685, %v17606_v36   ;;  %v5502_v3 = vsub.f32 %v13972_v19, %v5501_v63  ;;  %v14003_v50 = vpack.c.bf16 %v5501_v63, %v5489_v37  ;;  %v14005_v6 = vpack.c.bf16 %v5507_v55, %v5495_v42  ;;  %v17610_v55 = vld [vmem:[#allocation11_spill] sm:$0xff] }
 0x84b   :  { %v5225_v62 = vpop.permute.xlu1 %5224 }
 0x84c   :  { %17607 = vst [vmem:[#allocation81_spill] sm:$0xff] %v14003_v50  ;;  %17608 = vst [vmem:[#allocation80_spill] sm:$0xff] %v14005_v6  ;;  %vm5267_vm11 = vcmp.eq.s32.totalorder %v17358_v0, %v5225_v62  ;;  %vm5268_vm5 = vcmp.eq.s32.totalorder %v17577_v10, %v5225_v62  ;;  %6414 = vperm.xlu1 %7682, %v6381_v53   ;;  %v5503_v47 = vand.u32 4294901760, %v5502_v3  ;;  %v5509_v36 = vand.u32 4294901760, %v5508_v54  ;;  %v17614_v3 = vld [vmem:[#allocation13_spill] sm:$0xff] }
 0x84d   :  { %v6986_v37 = vsel %vm5267_vm11, 1.0, %v17579_v60  ;;  %v6987_v42 = vsel %vm5268_vm5, 1.0, %v17579_v60  ;;  %v6383_v54 = vsel %vm17613_vm0, 1, %v16344_v15 }
 0x84e   :  { %3241 = vperm.xlu0 %7685, %v17610_v55   ;;  %v14019_v25 = vpack.c.bf16 %v5503_v47, %v5491_v49  ;;  %v14021_v21 = vpack.c.bf16 %v5509_v36, %v5497_v57  ;;  %v14023_v59 = vsub.f32 %v6987_v42, %v6987_v42  ;;  %v14025_v63 = vsub.f32 %v6986_v37, %v6986_v37  ;;  %v17621_v42 = vld [vmem:[#allocation15_spill] sm:$0xff] }
 0x84f   :  { %v6385_v47 = vsel %vm17615_vm12, 1, %v16344_v15  ;;  %v17616_v36 = vmov 0 }
 0x850   :  { %17611 = vst [vmem:[#allocation70_spill] sm:$0xff] %v14023_v59  ;;  %17612 = vst [vmem:[#allocation20_spill] sm:$0xff] %v14025_v63  ;;  %6420 = vperm.xlu1 %7682, %v6383_v54   ;;  %v5519_v53 = vand.u32 4294901760, %v14025_v63  ;;  %v5513_v57 = vand.u32 4294901760, %v14023_v59  ;;  %v6387_v54 = vsel %vm17625_vm10, 1, %v16344_v15 }
 0x852   :  { %3247 = vperm.xlu0 %7685, %v17614_v3   ;;  %v5520_v55 = vsub.f32 %v14025_v63, %v5519_v53  ;;  %v5514_v3 = vsub.f32 %v14023_v59, %v5513_v57 }
 0x853   :  { %v5228_v51 = vpop.permute.xlu0 %5227 }
 0x854   :  { %vm5269_vm7 = vcmp.eq.s32.totalorder %v17358_v0, %v5228_v51  ;;  %vm5270_vm4 = vcmp.eq.s32.totalorder %v17577_v10, %v5228_v51  ;;  %6426 = vperm.xlu1 %7682, %v6385_v47   ;;  %v17622_v51 = vmov 0  ;;  %v5521_v50 = vand.u32 4294901760, %v5520_v55 }
 0x855   :  { %v6988_v27 = vsel %vm5269_vm7, 1.0, %v17579_v60  ;;  %v6989_v49 = vsel %vm5270_vm4, 1.0, %v17579_v60  ;;  %vm14042_vm6 = vmpackc.low %vm5270_vm4, %vm5268_vm5 }
 0x856   :  { %v17617_v36 = vsel %vm14042_vm6, 4294967295, %v17616_v36  ;;  %v14046_v37 = vsub.f32 %v6989_v49, %v6989_v49  ;;  %v14048_v56 = vsub.f32 %v6988_v27, %v6988_v27  ;;  %3253 = vperm.xlu0 %7685, %v17621_v42   ;;  %7310 = vmatprep.subr.msk.bf16.mxu1 %vm14042_vm6, %v17585_v32  ;;  %vm14056_vm8 = vmpackc.low %vm5269_vm7, %vm5267_vm11 }
 0x857   :  { %17618 = vst [vmem:[#allocation86_spill] sm:$0xff] %v17617_v36  ;;  %v17623_v51 = vsel %vm14056_vm8, 4294967295, %v17622_v51  ;;  %7312 = vmatpush1.bf16.msk.msra.mxu1 %vm14056_vm8, %v17585_v32  ;;  %v17646_v36 = vld [vmem:[#allocation57_spill] sm:$0xff]  ;;  %vm4602_vm8 = vcmp.eq.s32.totalorder %v13469_v12, %v17397_v41  ;;  %v17672_v41 = vld [vmem:[#allocation79_spill] sm:$0xff]  ;;  %v17673_v12 = vld [vmem:[#allocation98_spill] sm:$0xff] }
 0x858   :  { %17619 = vst [vmem:[#allocation51_spill] sm:$0xff] %v14046_v37  ;;  %17620 = vst [vmem:[#allocation68_spill] sm:$0xff] %v14048_v56  ;;  %v5531_v47 = vand.u32 4294901760, %v14048_v56  ;;  %6432 = vperm.xlu1 %7682, %v6387_v54   ;;  %v5525_v62 = vand.u32 4294901760, %v14046_v37  ;;  %v5515_v54 = vand.u32 4294901760, %v5514_v3  ;;  %v17630_v3 = vld [vmem:[#allocation42_spill] sm:$0xff] }
 0x859   :  { %17624 = vst [vmem:[#allocation24_spill] sm:$0xff] %v17623_v51 }
 0x85a   :  { %v5532_v42 = vsub.f32 %v14048_v56, %v5531_v47  ;;  %3259 = vperm.xlu0 %7685, %v17626_v28   ;;  %v5526_v22 = vsub.f32 %v14046_v37, %v5525_v62  ;;  %v14077_v2 = vpack.c.bf16 %v5525_v62, %v5513_v57  ;;  %v14079_v31 = vpack.c.bf16 %v5531_v47, %v5519_v53  ;;  %v17629_v57 = vld [vmem:[#allocation83_spill] sm:$0xff] }
 0x85b   :  { %v5231_v6 = vpop.permute.xlu1 %5230 }
 0x85c   :  { %17627 = vst [vmem:[#allocation56_spill] sm:$0xff] %v14077_v2  ;;  %17628 = vst [vmem:[#allocation46_spill] sm:$0xff] %v14079_v31  ;;  %vm5271_vm11 = vcmp.eq.s32.totalorder %v17358_v0, %v5231_v6  ;;  %vm5272_vm5 = vcmp.eq.s32.totalorder %v17577_v10, %v5231_v6  ;;  %7683 = vset.pattern.permute.xlu1 %v17574_v8  ;;  %v5527_v49 = vand.u32 4294901760, %v5526_v22  ;;  %v5533_v27 = vand.u32 4294901760, %v5532_v42  ;;  %v17633_v42 = vld [vmem:[#allocation37_spill] sm:$0xff]  ;;  %v17634_v22 = vld [vmem:[#allocation48_spill] sm:$0xff] }
 0x85d   :  { %v6990_v28 = vsel %vm5271_vm11, 1.0, %v17579_v60  ;;  %v6991_v53 = vsel %vm5272_vm5, 1.0, %v17579_v60  ;;  %6507 = vperm.xlu1 %7683, %v17629_v57   ;;  %v17641_v57 = vld [vmem:[#allocation92_spill] sm:$0xff] }
 0x85e   :  { %6592 = vperm.xlu0 %7685, %v17630_v3   ;;  %v14092_v55 = vpack.c.bf16 %v5527_v49, %v5515_v54  ;;  %v14094_v47 = vpack.c.bf16 %v5533_v27, %v5521_v50  ;;  %v14096_v62 = vsub.f32 %v6991_v53, %v6991_v53  ;;  %v14098_v8 = vsub.f32 %v6990_v28, %v6990_v28  ;;  %v17635_v49 = vld [vmem:[#allocation94_spill] sm:$0xff] }
 0x85f   :  { %v17636_v54 = vmov 0 }
 0x860   :  { %17631 = vst [vmem:[#allocation82_spill] sm:$0xff] %v14096_v62  ;;  %17632 = vst [vmem:[#allocation53_spill] sm:$0xff] %v14098_v8  ;;  %v5537_v31 = vand.u32 4294901760, %v14096_v62  ;;  %v5543_v2 = vand.u32 4294901760, %v14098_v8 }
 0x861   :  { %6513 = vperm.xlu1 %7683, %v17633_v42  }
 0x862   :  { %6601 = vperm.xlu0 %7685, %v17634_v22   ;;  %v5544_v42 = vsub.f32 %v14098_v8, %v5543_v2 }
 0x863   :  { %v5234_v17 = vpop.permute.xlu0 %5233 }
 0x864   :  { %vm5273_vm0 = vcmp.eq.s32.totalorder %v17358_v0, %v5234_v17  ;;  %vm5274_vm12 = vcmp.eq.s32.totalorder %v17577_v10, %v5234_v17  ;;  %v17642_v17 = vmov 0  ;;  %v5545_v48 = vand.u32 4294901760, %v5544_v42 }
 0x865   :  { %v6992_v50 = vsel %vm5273_vm0, 1.0, %v17579_v60  ;;  %v6993_v27 = vsel %vm5274_vm12, 1.0, %v17579_v60  ;;  %6516 = vperm.xlu1 %7683, %v17635_v49   ;;  %vm14111_vm7 = vmpackc.low %vm5274_vm12, %vm5272_vm5  ;;  %v17653_v42 = vmov 0 }
 0x866   :  { %v17637_v54 = vsel %vm14111_vm7, 4294967295, %v17636_v54  ;;  %v14115_v28 = vsub.f32 %v6993_v27, %v6993_v27  ;;  %v14117_v53 = vsub.f32 %v6992_v50, %v6992_v50  ;;  %6607 = vperm.xlu0 %7685, %v17641_v57   ;;  %7314 = vmatprep.subr.msk.bf16.mxu1 %vm14111_vm7, %v17585_v32  ;;  %vm14125_vm4 = vmpackc.low %vm5273_vm0, %vm5271_vm11  ;;  %v5538_v50 = vsub.f32 %v14096_v62, %v5537_v31  ;;  %v17649_v62 = vld [vmem:[#allocation96_spill] sm:$0xff] }
 0x867   :  { %17638 = vst [vmem:[#allocation125_spill] sm:$0xff] %v17637_v54  ;;  %v17643_v17 = vsel %vm14125_vm4, 4294967295, %v17642_v17  ;;  %7316 = vmatpush1.bf16.msk.msra.mxu1 %vm14125_vm4, %v17585_v32  ;;  %v17645_v54 = vld [vmem:[#allocation95_spill] sm:$0xff]  ;;  %vm17668_vm4 = vnez %v17517_v39  ;;  %v17670_v39 = vld [vmem:[#allocation136_spill] sm:$0xff] }
 0x868   :  { %17639 = vst [vmem:[#allocation63_spill] sm:$0xff] %v14115_v28  ;;  %17640 = vst [vmem:[#allocation115_spill] sm:$0xff] %v14117_v53  ;;  %v5555_v27 = vand.u32 4294901760, %v14117_v53  ;;  %v5549_v49 = vand.u32 4294901760, %v14115_v28  ;;  %v5539_v1 = vand.u32 4294901760, %v5538_v50  ;;  %v17656_v50 = vld [vmem:[#allocation101_spill] sm:$0xff] }
 0x869   :  { %17644 = vst [vmem:[#allocation109_spill] sm:$0xff] %v17643_v17  ;;  %6522 = vperm.xlu1 %7683, %v17645_v54   ;;  %v17650_v54 = vld [vmem:[#allocation67_spill] sm:$0xff] }
 0x86a   :  { %v5556_v51 = vsub.f32 %v14117_v53, %v5555_v27  ;;  %6613 = vperm.xlu0 %7685, %v17646_v36   ;;  %v5550_v17 = vsub.f32 %v14115_v28, %v5549_v49  ;;  %v14144_v13 = vpack.c.bf16 %v5549_v49, %v5537_v31  ;;  %v14146_v4 = vpack.c.bf16 %v5555_v27, %v5543_v2 }
 0x86b   :  { %v5237_v20 = vpop.permute.xlu1 %5236  ;;  %v17657_v27 = vmov 0 }
 0x86c   :  { %17647 = vst [vmem:[#allocation21_spill] sm:$0xff] %v14144_v13  ;;  %17648 = vst [vmem:[#allocation113_spill] sm:$0xff] %v14146_v4  ;;  %v5551_v63 = vand.u32 4294901760, %v5550_v17  ;;  %v5557_v11 = vand.u32 4294901760, %v5556_v51  ;;  %vm5275_vm10 = vcmp.eq.s32.totalorder %v17358_v0, %v5237_v20  ;;  %vm5276_vm11 = vcmp.eq.s32.totalorder %v17577_v10, %v5237_v20  ;;  %v17651_v51 = vld [vmem:[#allocation97_spill] sm:$0xff]  ;;  %v17688_v4 = vld [vmem:[#allocation78_spill] sm:$0xff] }
 0x86d   :  { %6528 = vperm.xlu1 %7683, %v17649_v62   ;;  %v6994_v31 = vsel %vm5275_vm10, 1.0, %v17579_v60  ;;  %v6995_v2 = vsel %vm5276_vm11, 1.0, %v17579_v60  ;;  %v17652_v62 = vld [vmem:[#allocation72_spill] sm:$0xff] }
 0x86e   :  { %6619 = vperm.xlu0 %7685, %v17650_v54   ;;  %v14152_v6 = vpack.c.bf16 %v5551_v63, %v5539_v1  ;;  %v14154_v8 = vpack.c.bf16 %v5557_v11, %v5545_v48  ;;  %v14166_v1 = vsub.f32 %v6995_v2, %v6995_v2  ;;  %v14168_v48 = vsub.f32 %v6994_v31, %v6994_v31  ;;  %v17660_v2 = vld [vmem:[#allocation44_spill] sm:$0xff] }
 0x870   :  { %v15994_v20 = vand.u32 4294901760, %v14166_v1 }
 0x871   :  { %6534 = vperm.xlu1 %7683, %v17651_v51   ;;  %v15992_v51 = vand.u32 4294901760, %v14168_v48 }
 0x872   :  { %6625 = vperm.xlu0 %7685, %v17652_v62  }
 0x873   :  { %v5240_v17 = vpop.permute.xlu0 %5239 }
 0x874   :  { %vm5277_vm0 = vcmp.eq.s32.totalorder %v17358_v0, %v5240_v17  ;;  %vm5278_vm12 = vcmp.eq.s32.totalorder %v17577_v10, %v5240_v17 }
 0x875   :  { %v6996_v11 = vsel %vm5277_vm0, 1.0, %v17579_v60  ;;  %v6997_v63 = vsel %vm5278_vm12, 1.0, %v17579_v60  ;;  %vm14176_vm14 = vmpackc.low %vm5278_vm12, %vm5276_vm11  ;;  %6540 = vperm.xlu1 %7683, %v17656_v50   ;;  %vm17662_vm11 = vnez %v17495_v5  ;;  %vm4598_vm12 = vcmp.eq.s32.totalorder %v13409_v33, %v17396_v24  ;;  %v17667_v5 = vld [vmem:[#allocation114_spill] sm:$0xff] }
 0x876   :  { %v17654_v42 = vsel %vm14176_vm14, 4294967295, %v17653_v42  ;;  %vm14183_vm5 = vmpackc.low %vm5277_vm0, %vm5275_vm10  ;;  %v14187_v49 = vsub.f32 %v6997_v63, %v6997_v63  ;;  %v14189_v31 = vsub.f32 %v6996_v11, %v6996_v11  ;;  %6634 = vperm.xlu0 %7685, %v17660_v2   ;;  %7318 = vmatprep.subr.msk.bf16.mxu1 %vm14176_vm14, %v17585_v32  ;;  %vm17661_vm10 = vcmp.eq.s32.totalorder %v13400_v52, %v17405_v40  ;;  %v17663_v63 = vld [vmem:[#allocation102_spill] sm:$0xff] }
 0x877   :  { %17655 = vst [vmem:[#allocation60_spill] sm:$0xff] %v17654_v42  ;;  %v17658_v27 = vsel %vm14183_vm5, 4294967295, %v17657_v27  ;;  %7320 = vmatpush1.bf16.msk.msra.mxu1 %vm14183_vm5, %v17585_v32  ;;  %vm4612_vm0 = vmand %vm17662_vm11, %vm17661_vm10  ;;  %vm17666_vm10 = vnez %v17506_v23 }
 0x878   :  { %17659 = vst [vmem:[#allocation26_spill] sm:$0xff] %v17658_v27  ;;  %v15995_v17 = vand.u32 4294901760, %v14187_v49  ;;  %v15993_v11 = vand.u32 4294901760, %v14189_v31  ;;  %v6230_v40 = vsel %vm4612_vm0, 1, %v16344_v15  ;;  %vm4614_vm11 = vmand %vm17666_vm10, %vm4598_vm12  ;;  %vm4600_vm0 = vcmp.eq.s32.totalorder %v13441_v34, %v17406_v35  ;;  %v17669_v34 = vld [vmem:[#allocation62_spill] sm:$0xff] }
 0x879   :  { %6546 = vperm.xlu1 %7683, %v17663_v63   ;;  %v6232_v50 = vsel %vm4614_vm11, 1, %v16344_v15  ;;  %vm4616_vm7 = vmand %vm17668_vm4, %vm4600_vm0  ;;  %vm17671_vm4 = vnez %v17670_v39  ;;  %vm4604_vm10 = vcmp.eq.s32.totalorder %v17673_v12, %v17672_v41 }
 0x87a   :  { %7689 = vset.pattern.permute.xlu0 %v16344_v15  ;;  %v14216_v52 = vpack.c.bf16 %v15995_v17, %v15994_v20  ;;  %v14222_v24 = vpack.c.bf16 %v15993_v11, %v15992_v51  ;;  %v6234_v63 = vsel %vm4616_vm7, 1, %v16344_v15  ;;  %vm4618_vm12 = vmand %vm17671_vm4, %vm4602_vm8 }
 0x87b   :  { %6249 = vperm.xlu0 %7689, %v6230_v40   ;;  %v5243_v33 = vpop.permute.xlu1 %5242  ;;  %v6236_v20 = vsel %vm4618_vm12, 1, %v16344_v15 }
 0x87c   :  { %17664 = vst [vmem:[#allocation108_spill] sm:$0xff] %v14216_v52  ;;  %17665 = vst [vmem:[#allocation28_spill] sm:$0xff] %v14222_v24  ;;  %vm5279_vm5 = vcmp.eq.s32.totalorder %v17358_v0, %v5243_v33  ;;  %vm5280_vm14 = vcmp.eq.s32.totalorder %v17577_v10, %v5243_v33  ;;  %v17687_v33 = vld [vmem:[#allocation105_spill] sm:$0xff] }
 0x87d   :  { %6552 = vperm.xlu1 %7683, %v17667_v5   ;;  %v6998_v23 = vsel %vm5279_vm5, 1.0, %v17579_v60  ;;  %v6999_v35 = vsel %vm5280_vm14, 1.0, %v17579_v60 }
 0x87e   :  { %v14249_v5 = vsub.f32 %v6999_v35, %v6999_v35  ;;  %v17678_v35 = vmov 0 }
 0x87f   :  { %6255 = vperm.xlu0 %7689, %v6232_v50   ;;  %v14251_v50 = vsub.f32 %v6998_v23, %v6998_v23 }
 0x880   :  { %v16008_v17 = vand.u32 4294901760, %v14249_v5 }
 0x881   :  { %7686 = vset.pattern.permute.xlu1 %v17595_v43  ;;  %17674 = vst [vmem:[#allocation29_spill] sm:$0xff] %v14251_v50  ;;  %v16004_v24 = vand.u32 4294901760, %v14251_v50 }
 0x882   :  { %6595 = vperm.xlu1 %7686, %v17669_v34  }
 0x883   :  { %v5246_v40 = vpop.permute.xlu0 %5245  ;;  %6261 = vperm.xlu0 %7689, %v6234_v63   ;;  %v17675_v63 = vmov 0 }
 0x884   :  { %vm5281_vm11 = vcmp.eq.s32.totalorder %v17358_v0, %v5246_v40  ;;  %vm5282_vm0 = vcmp.eq.s32.totalorder %v17577_v10, %v5246_v40  ;;  %v17683_v40 = vld [vmem:[#allocation22_spill] sm:$0xff] }
 0x885   :  { %v7000_v51 = vsel %vm5281_vm11, 1.0, %v17579_v60  ;;  %v7001_v11 = vsel %vm5282_vm0, 1.0, %v17579_v60  ;;  %vm14259_vm7 = vmpackc.low %vm5282_vm0, %vm5280_vm14 }
 0x886   :  { %v17676_v63 = vsel %vm14259_vm7, 4294967295, %v17675_v63  ;;  %vm14265_vm8 = vmpackc.low %vm5281_vm11, %vm5279_vm5  ;;  %v14269_v23 = vsub.f32 %v7001_v11, %v7001_v11  ;;  %v14271_v39 = vsub.f32 %v7000_v51, %v7000_v51  ;;  %6598 = vperm.xlu1 %7686, %v17683_v40   ;;  %7322 = vmatprep.subr.msk.bf16.mxu1 %vm14259_vm7, %v17585_v32  ;;  %v17684_v11 = vld [vmem:[#allocation59_spill] sm:$0xff]  ;;  %v17686_v51 = vld [vmem:[#allocation84_spill] sm:$0xff] }
 0x887   :  { %17677 = vst [vmem:[#allocation25_spill] sm:$0xff] %v17676_v63  ;;  %v17679_v35 = vsel %vm14265_vm8, 4294967295, %v17678_v35  ;;  %6267 = vperm.xlu0 %7689, %v6236_v20   ;;  %7324 = vmatpush1.bf16.msk.msra.mxu1 %vm14265_vm8, %v17585_v32  ;;  %vm17685_vm14 = vnez %v17684_v11  ;;  %vm4606_vm4 = vcmp.eq.s32.totalorder %v17687_v33, %v17686_v51  ;;  %v17691_v11 = vld [vmem:[#allocation139_spill] sm:$0xff]  ;;  %v17693_v33 = vld [vmem:[#allocation58_spill] sm:$0xff] }
 0x888   :  { %17680 = vst [vmem:[#allocation126_spill] sm:$0xff] %v17679_v35  ;;  %17681 = vst [vmem:[#allocation69_spill] sm:$0xff] %v14269_v23  ;;  %v16009_v52 = vand.u32 4294901760, %v14269_v23  ;;  %v16007_v20 = vand.u32 4294901760, %v14271_v39  ;;  %vm17692_vm12 = vnez %v17691_v11  ;;  %v17694_v35 = vld [vmem:[#allocation31_spill] sm:$0xff]  ;;  %v17695_v63 = vld [vmem:[#allocation54_spill] sm:$0xff] }
 0x889   :  { %17682 = vst [vmem:[#allocation119_spill] sm:$0xff] %v14271_v39  ;;  %vm4620_vm5 = vmand %vm17685_vm14, %vm4604_vm10  ;;  %vm4608_vm11 = vcmp.eq.s32.totalorder %v17694_v35, %v17693_v33  ;;  %v17699_v33 = vld [vmem:[#allocation47_spill] sm:$0xff] }
 0x88a   :  { %6604 = vperm.xlu1 %7686, %v17688_v4   ;;  %v6238_v13 = vsel %vm4620_vm5, 1, %v16344_v15  ;;  %v14298_v41 = vpack.c.bf16 %v16009_v52, %v16008_v17  ;;  %v14304_v12 = vpack.c.bf16 %v16007_v20, %v16004_v24  ;;  %vm4622_vm10 = vmand %vm17692_vm12, %vm4606_vm4  ;;  %vm17696_vm5 = vnez %v17561_v38  ;;  %v17698_v24 = vld [vmem:[#allocation116_spill] sm:$0xff]  ;;  %v7692_v38 = vld [vmem:[%s15239_s1 + $0x8] sm:$0xff] }
 0x88b   :  { %6273 = vperm.xlu0 %7689, %v6238_v13   ;;  %v5249_v51 = vpop.permute.xlu1 %5248  ;;  %v6240_v27 = vsel %vm4622_vm10, 1, %v16344_v15  ;;  %vm4624_vm8 = vmand %vm17696_vm5, %vm4608_vm11  ;;  %v17697_v13 = vld [vmem:[#allocation65_spill] sm:$0xff] }
 0x88c   :  { %17689 = vst [vmem:[#allocation131_spill] sm:$0xff] %v14298_v41  ;;  %17690 = vst [vmem:[#allocation133_spill] sm:$0xff] %v14304_v12  ;;  %vm5283_vm0 = vcmp.eq.s32.totalorder %v17358_v0, %v5249_v51  ;;  %vm5284_vm14 = vcmp.eq.s32.totalorder %v17577_v10, %v5249_v51  ;;  %vm4610_vm7 = vcmp.eq.s32.totalorder %v17698_v24, %v17697_v13  ;;  %v6242_v20 = vsel %vm4624_vm8, 1, %v16344_v15 }
 0x88d   :  { %v7002_v11 = vsel %vm5283_vm0, 1.0, %v17579_v60  ;;  %v7003_v35 = vsel %vm5284_vm14, 1.0, %v17579_v60  ;;  %vm4626_vm4 = vmand %vm17571_vm1, %vm4610_vm7  ;;  %v17703_v12 = vmov 0 }
 0x88e   :  { %6610 = vperm.xlu1 %7686, %v17695_v63   ;;  %v14335_v24 = vsub.f32 %v7003_v35, %v7003_v35  ;;  %v14337_v13 = vsub.f32 %v7002_v11, %v7002_v11  ;;  %v17707_v35 = vld [vmem:[#allocation18_spill] sm:$0xff]  ;;  %v6244_v41 = vsel %vm4626_vm4, 1, %v16344_v15 }
 0x88f   :  { %6279 = vperm.xlu0 %7689, %v6240_v27   ;;  %v14331_v27 = vand.u32 4294901760, %v7692_v38 }
 0x890   :  { %v16021_v53 = vand.u32 4294901760, %v14335_v24 }
 0x891   :  { %v14366_v42 = vsub.f32 %v7692_v38, %v14331_v27 }
 0x892   :  { %6616 = vperm.xlu1 %7686, %v17699_v33  }
 0x893   :  { %v5252_v17 = vpop.permute.xlu0 %5251  ;;  %6285 = vperm.xlu0 %7689, %v6242_v20   ;;  %17708 = vst [vmem:[#allocation128_spill] sm:$0xff] %v14366_v42 }
 0x894   :  { %vm5285_vm12 = vcmp.eq.s32.totalorder %v17358_v0, %v5252_v17  ;;  %vm5286_vm10 = vcmp.eq.s32.totalorder %v17577_v10, %v5252_v17 }
 0x895   :  { %v7004_v52 = vsel %vm5285_vm12, 1.0, %v17579_v60  ;;  %v7005_v20 = vsel %vm5286_vm10, 1.0, %v17579_v60  ;;  %vm14343_vm1 = vmpackc.low %vm5286_vm10, %vm5284_vm14 }
 0x896   :  { %v17701_v14 = vsel %vm14343_vm1, 4294967295, %v17700_v14  ;;  %vm14349_vm7 = vmpackc.low %vm5285_vm12, %vm5283_vm0  ;;  %v14353_v17 = vsub.f32 %v7005_v20, %v7005_v20  ;;  %v14355_v11 = vsub.f32 %v7004_v52, %v7004_v52  ;;  %6622 = vperm.xlu1 %7686, %v17707_v35   ;;  %7326 = vmatprep.subr.msk.bf16.mxu1 %vm14343_vm1, %v17585_v32 }
 0x897   :  { %17702 = vst [vmem:[#allocation135_spill] sm:$0xff] %v17701_v14  ;;  %v17704_v12 = vsel %vm14349_vm7, 4294967295, %v17703_v12  ;;  %6291 = vperm.xlu0 %7689, %v6244_v41   ;;  %7328 = vmatpush1.bf16.msk.msra.mxu1 %vm14349_vm7, %v17585_v32  ;;  %v5255_v51 = vpop.permute.xlu1 %5254  ;;  %v16020_v14 = vand.u32 4294901760, %v14337_v13  ;;  %v17709_v41 = vld [vmem:[#allocation40_spill] sm:$0xff] }
 0x898   :  { %17705 = vst [vmem:[#allocation85_spill] sm:$0xff] %v17704_v12  ;;  %17706 = vst [vmem:[#allocation91_spill] sm:$0xff] %v14353_v17  ;;  %vm5288_vm8 = vcmp.eq.s32.totalorder %v17577_v10, %v5255_v51  ;;  %vm5287_vm11 = vcmp.eq.s32.totalorder %v17358_v0, %v5255_v51  ;;  %v17710_v12 = vld [vmem:[#allocation35_spill] sm:$0xff]  ;;  %v17712_v20 = vand.u32 4294901760, %v14353_v17  ;;  %v17714_v56 = vand.u32 4294901760, %v14355_v11 }
 0x899   :  { %vm17711_vm0 = vnez %v17710_v12  ;;  %v7007_v12 = vsel %vm5288_vm8, 1.0, %v17579_v60  ;;  %v7006_v52 = vsel %vm5287_vm11, 1.0, %v17579_v60 }
 0x89a   :  { %6628 = vperm.xlu1 %7686, %v17709_v41   ;;  %v6374_v2 = vsel %vm17711_vm0, 1, %v16344_v15  ;;  %v14383_v28 = vpack.c.bf16 %v17712_v20, %v16021_v53  ;;  %v14389_v59 = vpack.c.bf16 %v17714_v56, %v16020_v14  ;;  %v17717_v20 = vmov 0  ;;  %v17720_v56 = vld [vmem:[#allocation38_spill] sm:$0xff] }
 0x89b   :  { %6393 = vperm.xlu0 %7689, %v6374_v2   ;;  %v6247_v38 = vpop.permute.xlu1 %6246  ;;  %v17716_v2 = vld [vmem:[#allocation33_spill] sm:$0xff]  ;;  %vm17721_vm12 = vnez %v17720_v56  ;;  %v14410_v53 = vsub.f32 %v7007_v12, %v7007_v12  ;;  %v14416_v37 = vsub.f32 %v7006_v52, %v7006_v52 }
 0x89c   :  { %17713 = vst [vmem:[#allocation140_spill] sm:$0xff] %v14383_v28  ;;  %17715 = vst [vmem:[#allocation117_spill] sm:$0xff] %v14389_v59  ;;  %vm16023_vm14 = vcmp.eq.s32.totalorder %v17716_v2, %v17358_v0  ;;  %vm6293_vm5 = vcmp.eq.s32.totalorder %v6247_v38, 1  ;;  %v6376_v14 = vsel %vm17721_vm12, 1, %v16344_v15  ;;  %v17722_v28 = vand.u32 4294901760, %v14366_v42 }
 0x89d   :  { %vm14402_vm4 = vmand %vm6293_vm5, %vm16023_vm14 }
 0x89e   :  { %v17718_v20 = vsel %vm14402_vm4, 4294967295, %v17717_v20  ;;  %7687 = vset.pattern.permute.xlu1 %v16344_v15  ;;  %v5455_v41 = vsub.f32 %v14366_v42, %v17722_v28  ;;  %v17726_v28 = vmov 0 }
 0x89f   :  { %17719 = vst [vmem:[#allocation122_spill] sm:$0xff] %v17718_v20  ;;  %6680 = vperm.xlu1 %7687, %v17669_v34   ;;  %6399 = vperm.xlu0 %7689, %v6376_v14   ;;  %v5258_v38 = vpop.permute.xlu0 %5257  ;;  %v6253_v59 = vpop.permute.xlu1 %6252  ;;  %v17723_v34 = vmov 0 }
 0x8a0   :  { %vm5289_vm10 = vcmp.eq.s32.totalorder %v17358_v0, %v5258_v38  ;;  %vm5290_vm0 = vcmp.eq.s32.totalorder %v17577_v10, %v5258_v38  ;;  %vm6295_vm5 = vcmp.eq.s32.totalorder %v6253_v59, 1  ;;  %v17729_v59 = vld [vmem:[#allocation110_spill] sm:$0xff]  ;;  %v5456_v42 = vand.u32 4294901760, %v5455_v41 }
 0x8a1   :  { %v7008_v56 = vsel %vm5289_vm10, 1.0, %v17579_v60  ;;  %v7009_v12 = vsel %vm5290_vm0, 1.0, %v17579_v60  ;;  %vm14424_vm12 = vmpackc.low %vm5290_vm0, %vm5288_vm8  ;;  %vm16033_vm7 = vcmp.eq.s32.totalorder %v17729_v59, %v17358_v0  ;;  %v17730_v10 = vld [vmem:[#allocation10_spill] sm:$0xff] }
 0x8a2   :  { %v17724_v34 = vsel %vm14424_vm12, 4294967295, %v17723_v34  ;;  %vm14430_vm14 = vmpackc.low %vm5289_vm10, %vm5287_vm11  ;;  %v14434_v14 = vsub.f32 %v7009_v12, %v7009_v12  ;;  %v14436_v52 = vsub.f32 %v7008_v56, %v7008_v56  ;;  %7330 = vmatprep.subr.msk.bf16.mxu1 %vm14424_vm12, %v17585_v32  ;;  %vm17731_vm8 = vnez %v17730_v10  ;;  %v17735_v56 = vld [vmem:[#allocation36_spill] sm:$0xff] }
 0x8a3   :  { %17725 = vst [vmem:[#allocation71_spill] sm:$0xff] %v17724_v34  ;;  %v17727_v28 = vsel %vm14430_vm14, 4294967295, %v17726_v28  ;;  %v6378_v38 = vsel %vm17731_vm8, 1, %v16344_v15  ;;  %vm14450_vm11 = vmand %vm6295_vm5, %vm16033_vm7  ;;  %v17732_v12 = vmov 0  ;;  %6683 = vperm.xlu1 %7687, %v17683_v40   ;;  %vm16032_vm10 = vcmp.eq.s32.totalorder %v17735_v56, %v17358_v0  ;;  %v6259_v34 = vpop.permute.xlu1 %6258  ;;  %7332 = vmatpush1.bf16.msk.msra.mxu1 %vm14430_vm14, %v17585_v32  ;;  %v17737_v40 = vld [vmem:[#allocation104_spill] sm:$0xff] }
 0x8a4   :  { %17728 = vst [vmem:[#allocation93_spill] sm:$0xff] %v17727_v28  ;;  %v17733_v12 = vsel %vm14450_vm11, 4294967295, %v17732_v12  ;;  %6405 = vperm.xlu0 %7689, %v6378_v38   ;;  %v16040_v10 = vand.u32 4294901760, %v14416_v37  ;;  %v16034_v20 = vand.u32 4294901760, %v14434_v14  ;;  %vm6297_vm0 = vcmp.eq.s32.totalorder %v6259_v34, 1  ;;  %7334 = vmatprep.subr.bf16.mxu1 %v13944_v9 }
 0x8a5   :  { %17734 = vst [vmem:[#allocation3_spill] sm:$0xff] %v17733_v12  ;;  %v14463_v12 = vpop.permute.xlu0 %6510  ;;  %vm6313_vm5 = vmand %vm6297_vm0, %vm16032_vm10  ;;  %vm17738_vm8 = vnez %v17737_v40  ;;  %v17739_v38 = vand.u32 4294901760, %v14410_v53  ;;  %v17741_v34 = vand.u32 4294901760, %v14436_v52  ;;  %vm17743_vm0 = vcmp.lt.s32.totalorder %v17735_v56, 32 }
 0x8a6   :  { %17736 = vst [vmem:[#allocation49_spill] sm:$0xff] %v14463_v12  ;;  %v6380_v41 = vsel %vm17738_vm8, 1, %v16344_v15  ;;  %vm14487_vm10 = vmand %vm6313_vm5, %vm17743_vm0  ;;  %v17744_v40 = vmov 0  ;;  %5457 = vmatmul.mubr.f32.vlgmr.msra.gmra.mrb[0].mxu1 %v5456_v42  ;;  %v17748_v42 = vld [vmem:[#allocation61_spill] sm:$0xff]  ;;  %v17769_v28 = vand.u32 4294901760, %v14249_v5  ;;  %v17770_v32 = vand.u32 4294901760, %v14271_v39 }
 0x8a7   :  { %v14476_v51 = vpack.c.bf16 %v16034_v20, %v17739_v38  ;;  %v14482_v12 = vpack.c.bf16 %v17741_v34, %v16040_v10  ;;  %6689 = vperm.xlu1 %7687, %v17688_v4   ;;  %v6265_v9 = vpop.permute.xlu1 %6264  ;;  %v17745_v40 = vsel %vm14487_vm10, 4294967295, %v17744_v40  ;;  %v17747_v38 = vld [vmem:[#allocation103_spill] sm:$0xff]  ;;  %7336 = vmatpush1.bf16.msra.mxu1 %v13946_v58  ;;  %vm17749_vm5 = vnez %v17748_v42 }
 0x8a8   :  { %6411 = vperm.xlu0 %7689, %v6380_v41   ;;  %17746 = vst [vmem:[#allocation8_spill] sm:$0xff] %v17745_v40  ;;  %vm16039_vm8 = vcmp.eq.s32.totalorder %v17747_v38, %v17358_v0  ;;  %vm6299_vm7 = vcmp.eq.s32.totalorder %v6265_v9, 1  ;;  %5687 = vmatprep.mubr.f32.mxu1 %v17579_v60  ;;  %v6382_v41 = vsel %vm17749_vm5, 1, %v16344_v15  ;;  %vm17750_vm0 = vcmp.lt.s32.totalorder %v17747_v38, 32  ;;  %v17756_v10 = vld [vmem:[#allocation99_spill] sm:$0xff] }
 0x8a9   :  { %17740 = vst [vmem:[#allocation4_spill] sm:$0xff] %v14476_v51  ;;  %17742 = vst [vmem:[#allocation6_spill] sm:$0xff] %v14482_v12  ;;  %v6520_v20 = vpop.permute.xlu0 %6519  ;;  %7338 = vmatprep.subr.bf16.mxu1 %v14019_v25  ;;  %v17751_v58 = vmov 0  ;;  %v17755_v25 = vand.u32 4294901760, %v14187_v49  ;;  %v17758_v12 = vand.u32 4294901760, %v14166_v1 }
 0x8aa   :  { %vm6315_vm14 = vmand %vm6299_vm7, %vm16039_vm8  ;;  %v6558_v4 = vsel %vm14487_vm10, %v6520_v20, 0  ;;  %v17754_v20 = vld [vmem:[#allocation112_spill] sm:$0xff] }
 0x8ab   :  { %6695 = vperm.xlu1 %7687, %v17695_v63   ;;  %v6271_v34 = vpop.permute.xlu1 %6270  ;;  %vm14507_vm12 = vmand %vm6315_vm14, %vm17750_vm0  ;;  %vm16043_vm7 = vcmp.eq.s32.totalorder %v17754_v20, %v17358_v0  ;;  %v5574_v42 = vsub.f32 %v14187_v49, %v17755_v25  ;;  %7340 = vmatpush1.bf16.msra.mxu1 %v14021_v21  ;;  %vm17757_vm14 = vnez %v17756_v10  ;;  %v5562_v25 = vsub.f32 %v14166_v1, %v17758_v12  ;;  %v17764_v10 = vld [vmem:[#allocation100_spill] sm:$0xff] }
 0x8ac   :  { %6417 = vperm.xlu0 %7689, %v6382_v41   ;;  %v17752_v58 = vsel %vm14507_vm12, 4294967295, %v17751_v58  ;;  %vm6301_vm8 = vcmp.eq.s32.totalorder %v6271_v34, 1  ;;  %7342 = vmatprep.subr.bf16.mxu1 %v14092_v55  ;;  %v6384_v34 = vsel %vm17757_vm14, 1, %v16344_v15  ;;  %v17759_v21 = vand.u32 4294901760, %v14189_v31 }
 0x8ad   :  { %17753 = vst [vmem:[#allocation12_spill] sm:$0xff] %v17752_v58  ;;  %v6526_v9 = vpop.permute.xlu0 %6525  ;;  %vm6317_vm5 = vmand %vm6301_vm8, %vm16043_vm7  ;;  %vm17760_vm8 = vcmp.lt.s32.totalorder %v17754_v20, 32  ;;  %v17761_v55 = vmov 0  ;;  %vm16050_vm14 = vcmp.eq.s32.totalorder %v17764_v10, %v17358_v0 }
 0x8ae   :  { %v6560_v63 = vsel %vm14507_vm12, %v6526_v9, 0  ;;  %v5580_v51 = vsub.f32 %v14189_v31, %v17759_v21  ;;  %vm14535_vm0 = vmand %vm6317_vm5, %vm17760_vm8  ;;  %v5575_v9 = vand.u32 4294901760, %v5574_v42  ;;  %vm17768_vm8 = vnez %v17564_v61 }
 0x8af   :  { %v6570_v41 = vadd.s32 %v6560_v63, %v6558_v4  ;;  %7688 = vset.pattern.permute.xlu1 %v17595_v43  ;;  %v6277_v58 = vpop.permute.xlu1 %6276  ;;  %v17762_v55 = vsel %vm14535_vm0, 4294967295, %v17761_v55  ;;  %v17765_v4 = vld [vmem:[#allocation23_spill] sm:$0xff]  ;;  %v17766_v63 = vand.u32 4294901760, %v14269_v23  ;;  %7344 = vmatpush1.bf16.msra.mxu1 %v14094_v47  ;;  %v6386_v42 = vsel %vm17768_vm8, 1, %v16344_v15 }
 0x8b0   :  { %6423 = vperm.xlu0 %7689, %v6384_v34   ;;  %17763 = vst [vmem:[#allocation16_spill] sm:$0xff] %v17762_v55  ;;  %vm6303_vm7 = vcmp.eq.s32.totalorder %v6277_v58, 1  ;;  %6631 = vperm.xlu1 %7688, %v17765_v4   ;;  %v17767_v34 = vand.u32 4294901760, %v14168_v48  ;;  %v5581_v47 = vand.u32 4294901760, %v5580_v51  ;;  %v17773_v61 = vmov 0 }
 0x8b1   :  { %v6532_v12 = vpop.permute.xlu0 %6531  ;;  %v5598_v43 = vsub.f32 %v14269_v23, %v17766_v63  ;;  %vm6319_vm5 = vmand %vm6303_vm7, %vm16050_vm14  ;;  %7346 = vmatprep.subr.bf16.mxu1 %v14152_v6  ;;  %v5563_v63 = vand.u32 4294901760, %v5562_v25  ;;  %v5604_v23 = vsub.f32 %v14271_v39, %v17770_v32  ;;  %vm17772_vm14 = vcmp.lt.s32.totalorder %v17764_v10, 32  ;;  %v17775_v6 = vld [vmem:[#allocation45_spill] sm:$0xff] }
 0x8b2   :  { %v5568_v21 = vsub.f32 %v14168_v48, %v17767_v34  ;;  %v6562_v58 = vsel %vm14535_vm0, %v6532_v12, 0  ;;  %v5586_v34 = vsub.f32 %v14249_v5, %v17769_v28  ;;  %v17771_v12 = vld [vmem:[#allocation120_spill] sm:$0xff]  ;;  %vm14568_vm0 = vmand %vm6319_vm5, %vm17772_vm14  ;;  %v17777_v55 = vand.u32 4294901760, %v14251_v50 }
 0x8b3   :  { %v6574_v40 = vadd.s32 %v6570_v41, %v6562_v58  ;;  %vm16058_vm7 = vcmp.eq.s32.totalorder %v17771_v12, %v17358_v0  ;;  %v6283_v41 = vpop.permute.xlu1 %6282  ;;  %v17774_v61 = vsel %vm14568_vm0, 4294967295, %v17773_v61  ;;  %v7349_v51 = vpack.c.bf16 %v5575_v9, %v5563_v63  ;;  %7348 = vmatpush1.bf16.msra.mxu1 %v14154_v8 }
 0x8b4   :  { %6429 = vperm.xlu0 %7689, %v6386_v42   ;;  %vm6305_vm8 = vcmp.eq.s32.totalorder %v6283_v41, 1  ;;  %6637 = vperm.xlu1 %7688, %v17775_v6   ;;  %v5599_v25 = vand.u32 4294901760, %v5598_v43  ;;  %v17776_v58 = vand.u32 4294901760, %v14353_v17  ;;  %v5569_v42 = vand.u32 4294901760, %v5568_v21 }
 0x8b5   :  { %v6538_v28 = vpop.permute.xlu0 %6537  ;;  %v5592_v39 = vsub.f32 %v14251_v50, %v17777_v55  ;;  %vm6321_vm14 = vmand %vm6305_vm8, %vm16058_vm7  ;;  %7350 = vmatprep.subr.bf16.mxu1 %v7349_v51  ;;  %v6388_v43 = vsel %vm13836_vm15, 1, %v16344_v15  ;;  %v5587_v21 = vand.u32 4294901760, %v5586_v34  ;;  %v17778_v63 = vand.u32 4294901760, %v14335_v24 }
 0x8b6   :  { %v5622_v32 = vsub.f32 %v14353_v17, %v17776_v58  ;;  %v6564_v41 = vsel %vm14568_vm0, %v6538_v28, 0  ;;  %v5605_v58 = vand.u32 4294901760, %v5604_v23  ;;  %v17779_v8 = vand.u32 4294901760, %v14355_v11 }
 0x8b7   :  { %v6578_v9 = vadd.s32 %v6574_v40, %v6564_v41  ;;  %v5610_v55 = vsub.f32 %v14335_v24, %v17778_v63  ;;  %v7351_v50 = vpack.c.bf16 %v5581_v47, %v5569_v42  ;;  %vm16059_vm5 = vcmp.eq.s32.totalorder %v13791_v45, %v17358_v0  ;;  %v6289_v40 = vpop.permute.xlu1 %6288 }
 0x8b8   :  { %v5628_v17 = vsub.f32 %v14355_v11, %v17779_v8  ;;  %6435 = vperm.xlu0 %7689, %v6388_v43   ;;  %vm17780_vm8 = vcmp.lt.s32.totalorder %v17771_v12, 32  ;;  %vm6307_vm15 = vcmp.eq.s32.totalorder %v6289_v40, 1  ;;  %7690 = vset.pattern.permute.xlu1 %v16344_v15  ;;  %v7353_v34 = vpack.c.bf16 %v5599_v25, %v5587_v21 }
 0x8b9   :  { %vm14598_vm7 = vmand %vm6321_vm14, %vm17780_vm8  ;;  %v6544_v23 = vpop.permute.xlu0 %6543  ;;  %v5623_v28 = vand.u32 4294901760, %v5622_v32  ;;  %v17783_v51 = vand.u32 4294901760, %v14434_v14  ;;  %v5593_v42 = vand.u32 4294901760, %v5592_v39  ;;  %v17784_v41 = vand.u32 4294901760, %v14337_v13  ;;  %7352 = vmatpush1.bf16.msra.mxu1 %v7351_v50  ;;  %6701 = vperm.xlu1 %7690, %v17699_v33  }
 0x8ba   :  { %v17782_v16 = vsel %vm14598_vm7, 4294967295, %v17781_v16  ;;  %vm6323_vm14 = vmand %vm6307_vm15, %vm16059_vm5  ;;  %v6566_v63 = vsel %vm14598_vm7, %v6544_v23, 0  ;;  %7354 = vmatprep.subr.bf16.mxu1 %v7353_v34  ;;  %v5611_v32 = vand.u32 4294901760, %v5610_v55  ;;  %v17785_v21 = vand.u32 4294901760, %v14410_v53 }
 0x8bb   :  { %v5646_v47 = vsub.f32 %v14434_v14, %v17783_v51  ;;  %v5616_v43 = vsub.f32 %v14337_v13, %v17784_v41  ;;  %v6572_v25 = vadd.s32 %v6578_v9, %v6566_v63  ;;  %v5629_v8 = vand.u32 4294901760, %v5628_v17  ;;  %v6391_v41 = vpop.permute.xlu1 %6390 }
 0x8bc   :  { %v5634_v39 = vsub.f32 %v14410_v53, %v17785_v21  ;;  %v17786_v40 = vand.u32 4294901760, %v14436_v52  ;;  %6677 = vperm.xlu0 %7689, %v17630_v3   ;;  %v7355_v51 = vpack.c.bf16 %v5605_v58, %v5593_v42  ;;  %vm17787_vm8 = vcmp.lt.s32.totalorder %v13791_v45, 32 }
 0x8bd   :  { %vm14624_vm15 = vmand %vm6323_vm14, %vm17787_vm8  ;;  %v17788_v33 = vmov 0  ;;  %vm6437_vm5 = vcmp.eq.s32.totalorder %v6391_v41, 1  ;;  %v6550_v9 = vpop.permute.xlu0 %6549  ;;  %v7357_v55 = vpack.c.bf16 %v5623_v28, %v5611_v32  ;;  %v5647_v23 = vand.u32 4294901760, %v5646_v47  ;;  %6707 = vperm.xlu1 %7690, %v17707_v35  }
 0x8be   :  { %v5652_v50 = vsub.f32 %v14436_v52, %v17786_v40  ;;  %v17789_v33 = vsel %vm14624_vm15, 4294967295, %v17788_v33  ;;  %v5617_v34 = vand.u32 4294901760, %v5616_v43  ;;  %v17791_v17 = vand.u32 4294901760, %v14416_v37  ;;  %7356 = vmatpush1.bf16.msra.mxu1 %v7355_v51 }
 0x8bf   :  { %17790 = vst [vmem:[#allocation5_spill] sm:$0xff] %v17789_v33  ;;  %vm17792_vm7 = vcmp.eq.s32.totalorder %v17716_v2, %v17358_v0  ;;  %v6568_v58 = vsel %vm14624_vm15, %v6550_v9, 0  ;;  %7358 = vmatprep.subr.bf16.mxu1 %v7357_v55  ;;  %v5635_v47 = vand.u32 4294901760, %v5634_v39  ;;  %v6397_v32 = vpop.permute.xlu1 %6396  ;;  %v17799_v39 = vld [vmem:[#allocation2_spill] sm:$0xff] }
 0x8c0   :  { %v5640_v63 = vsub.f32 %v14416_v37, %v17791_v17  ;;  %vm14634_vm0 = vmand %vm6437_vm5, %vm17792_vm7  ;;  %v14641_v28 = vadd.s32 %v6572_v25, %v6568_v58  ;;  %v5653_v42 = vand.u32 4294901760, %v5652_v50  ;;  %6686 = vperm.xlu0 %7689, %v17634_v22   ;;  %v7359_v43 = vpack.c.bf16 %v5629_v8, %v5617_v34  ;;  %v17798_v25 = vld [vmem:[#allocation43_spill] sm:$0xff]  ;;  %v17801_v8 = vld [vmem:[#allocation30_spill] sm:$0xff] }
 0x8c1   :  { %vm6439_vm14 = vcmp.eq.s32.totalorder %v6397_v32, 1  ;;  %v7361_v21 = vpack.c.bf16 %v5647_v23, %v5635_v47  ;;  %vm17795_vm7 = vcmp.eq.s32.totalorder %v17729_v59, %v17358_v0  ;;  %v3221_v35 = vpop.permute.xlu0 %3220  ;;  %6710 = vperm.xlu1 %7690, %v17652_v62   ;;  %vm17800_vm8 = vnez %v17799_v39  ;;  %v17803_v23 = vld [vmem:[#allocation73_spill] sm:$0xff]  ;;  %v17804_v34 = vld [vmem:[#allocation55_spill] sm:$0xff] }
 0x8c2   :  { %v5641_v40 = vand.u32 4294901760, %v5640_v63  ;;  %7360 = vmatpush1.bf16.msra.mxu1 %v7359_v43  ;;  %vm14647_vm5 = vmand %vm6439_vm14, %vm17795_vm7  ;;  %v3269_v22 = vsel %vm17800_vm8, %v17798_v25, 0  ;;  %vm17802_vm12 = vnez %v17801_v8  ;;  %vm17805_vm14 = vnez %v17804_v34  ;;  %v17806_v63 = vld [vmem:[#allocation89_spill] sm:$0xff]  ;;  %v17807_v62 = vld [vmem:[#allocation19_spill] sm:$0xff] }
 0x8c3   :  { %7362 = vmatprep.subr.bf16.mxu1 %v7361_v21  ;;  %v3265_v50 = vsel %vm17802_vm12, %v3221_v35, 0  ;;  %v6403_v55 = vpop.permute.xlu1 %6402  ;;  %v3273_v17 = vsel %vm17805_vm14, %v17803_v23, 0  ;;  %vm17808_vm10 = vnez %v17807_v62  ;;  %vm17809_vm8 = vcmp.eq.s32.totalorder %v17735_v56, %v17358_v0  ;;  %v17811_v21 = vld [vmem:[#allocation76_spill] sm:$0xff]  ;;  %v17814_v25 = vld [vmem:[#allocation111_spill] sm:$0xff] }
 0x8c4   :  { %v3281_v41 = vadd.s32 %v3269_v22, %v3265_v50  ;;  %6692 = vperm.xlu0 %7689, %v17641_v57   ;;  %v7363_v9 = vpack.c.bf16 %v5653_v42, %v5641_v40  ;;  %vm6441_vm7 = vcmp.eq.s32.totalorder %v6403_v55, 1  ;;  %v3277_v58 = vsel %vm17808_vm10, %v17806_v63, 0  ;;  %v17812_v40 = vld [vmem:[#allocation127_spill] sm:$0xff] }
 0x8c5   :  { %vm6457_vm12 = vmand %vm6441_vm7, %vm17809_vm8  ;;  %v3230_v43 = vpop.permute.xlu0 %3229  ;;  %6716 = vperm.xlu1 %7690, %v17765_v4   ;;  %v6469_v57 = vsel %vm14634_vm0, 1, %v16344_v15  ;;  %v17810_v32 = vpack.c.bf16 %v13903_v26, %v13875_v30  ;;  %vm17813_vm10 = vnez %v17812_v40  ;;  %vm17815_vm14 = vnez %v17814_v25  ;;  %v17826_v34 = vld [vmem:[#allocation51_spill] sm:$0xff]  ;;  %v17837_v40 = vld [vmem:[#allocation82_spill] sm:$0xff] }
 0x8c6   :  { %v3285_v47 = vadd.s32 %v3281_v41, %v3273_v17  ;;  %7364 = vmatpush1.bf16.msra.mxu1 %v7363_v9  ;;  %v6473_v42 = vsel %vm6457_vm12, 1, %v16344_v15  ;;  %v3264_v35 = vsel %vm17813_vm10, %v17811_v21, 0  ;;  %v3268_v56 = vsel %vm17815_vm14, %v3230_v43, 0  ;;  %v17819_v41 = vld [vmem:[#allocation87_spill] sm:$0xff]  ;;  %v17822_v9 = vld [vmem:[#allocation121_spill] sm:$0xff]  ;;  %v17827_v17 = vld [vmem:[#allocation70_spill] sm:$0xff] }
 0x8c7   :  { %7366 = vmatprep.subr.bf16.mxu1 %v17810_v32  ;;  %v6485_v39 = vadd.s32 %v6473_v42, %v6469_v57  ;;  %v3280_v22 = vadd.s32 %v3268_v56, %v3264_v35  ;;  %v6409_v4 = vpop.permute.xlu1 %6408  ;;  %v17816_v30 = vpack.c.bf16 %v13911_v46, %v13877_v7  ;;  %vm17817_vm7 = vcmp.eq.s32.totalorder %v17747_v38, %v17358_v0  ;;  %v17820_v7 = vld [vmem:[#allocation118_spill] sm:$0xff]  ;;  %v17829_v62 = vld [vmem:[#allocation123_spill] sm:$0xff]  ;;  %v17831_v43 = vld [vmem:[#allocation40_spill] sm:$0xff] }
 0x8c8   :  { %6698 = vperm.xlu0 %7689, %v17646_v36   ;;  %v3289_v3 = vadd.s32 %v3285_v47, %v3277_v58  ;;  %vm6443_vm0 = vcmp.eq.s32.totalorder %v6409_v4, 1  ;;  %v6471_v36 = vsel %vm14647_vm5, 1, %v16344_v15  ;;  %v17818_v50 = vpack.c.bf16 %v13972_v19, %v13948_v18  ;;  %v17833_v57 = vld [vmem:[#allocation20_spill] sm:$0xff]  ;;  %v17836_v21 = vld [vmem:[#allocation63_spill] sm:$0xff]  ;;  %v17839_v25 = vld [vmem:[#allocation130_spill] sm:$0xff] }
 0x8c9   :  { %5689 = vmatmul.mubr.f32.vlgmr.msra.gmra.mrb[0].mxu1 %v14331_v27  ;;  %vm6459_vm8 = vmand %vm6443_vm0, %vm17817_vm7  ;;  %v3236_v26 = vpop.permute.xlu0 %3235  ;;  %6722 = vperm.xlu1 %7690, %v17775_v6   ;;  %vm17821_vm12 = vnez %v17820_v7  ;;  %vm17823_vm10 = vnez %v17822_v9  ;;  %v17824_v23 = vpack.c.bf16 %v13974_v29, %v13950_v44  ;;  %vm17825_vm14 = vcmp.eq.s32.totalorder %v17754_v20, %v17358_v0  ;;  %v17832_v29 = vld [vmem:[#allocation68_spill] sm:$0xff] }
 0x8ca   :  { %7368 = vmatpush1.bf16.msra.mxu1 %v17816_v30  ;;  %v6475_v8 = vsel %vm6459_vm8, 1, %v16344_v15  ;;  %v3266_v46 = vsel %vm17821_vm12, %v17819_v41, 0  ;;  %v3270_v38 = vsel %vm17823_vm10, %v3236_v26, 0  ;;  %5823 = vmatprep.mubr.f32.mxu1 %v17579_v60  ;;  %v17828_v63 = vpack.c.bf16 %v17826_v34, %v17827_v17  ;;  %v17841_v4 = vld [vmem:[#allocation44_spill] sm:$0xff]  ;;  %v17842_v26 = vld [vmem:[#allocation142_spill] sm:$0xff] }
 0x8cb   :  { %7370 = vmatprep.subr.bf16.mxu1 %v17818_v50  ;;  %v6487_v6 = vadd.s32 %v6475_v8, %v6471_v36  ;;  %v3282_v55 = vadd.s32 %v3270_v38, %v3266_v46  ;;  %v6415_v51 = vpop.permute.xlu1 %6414  ;;  %vm17830_vm7 = vnez %v17829_v62  ;;  %v17834_v20 = vpack.c.bf16 %v17832_v29, %v17833_v57  ;;  %v17843_v8 = vld [vmem:[#allocation115_spill] sm:$0xff]  ;;  %v17844_v50 = vld [vmem:[#allocation53_spill] sm:$0xff]  ;;  %v17847_v9 = vld [vmem:[#allocation132_spill] sm:$0xff] }
 0x8cc   :  { %6704 = vperm.xlu0 %7689, %v17650_v54   ;;  %vm6445_vm5 = vcmp.eq.s32.totalorder %v6415_v51, 1  ;;  %vm17835_vm12 = vcmp.eq.s32.totalorder %v17764_v10, %v17358_v0  ;;  %v17838_v35 = vpack.c.bf16 %v17836_v21, %v17837_v40  ;;  %v7381_v10 = vpack.c.bf16 %v14187_v49, %v14166_v1  ;;  %v17857_v29 = vld [vmem:[#allocation39_spill] sm:$0xff] }
 0x8cd   :  { %vm6461_vm0 = vmand %vm6445_vm5, %vm17825_vm14  ;;  %v3242_v18 = vpop.permute.xlu0 %3241  ;;  %vm17840_vm5 = vnez %v17839_v25  ;;  %v3210_v36 = vrot.slane %v17842_v26, 4  ;;  %v17845_v41 = vpack.c.bf16 %v17843_v8, %v17844_v50  ;;  %v7383_v51 = vpack.c.bf16 %v14189_v31, %v14168_v48  ;;  %v17853_v48 = vld [vmem:[#allocation75_spill] sm:$0xff]  ;;  %v17863_v25 = vld [vmem:[#allocation50_spill] sm:$0xff] }
 0x8ce   :  { %7372 = vmatpush1.bf16.msra.mxu1 %v17824_v23  ;;  %v6477_v19 = vsel %vm6461_vm0, 1, %v16344_v15  ;;  %v3272_v54 = vsel %vm17830_vm7, %v3242_v18, 0  ;;  %vm17846_vm0 = vcmp.eq.s32.totalorder %v17771_v12, %v17358_v0  ;;  %v17850_v12 = vld [vmem:[#allocation69_spill] sm:$0xff]  ;;  %v3397_v57 = vcvt.f32.s32 %v17857_v29 }
 0x8cf   :  { %7374 = vmatprep.subr.bf16.mxu1 %v17828_v63  ;;  %v6489_v58 = vadd.s32 %v6485_v39, %v6477_v19  ;;  %v3284_v47 = vadd.s32 %v3280_v22, %v3272_v54  ;;  %v6421_v44 = vpop.permute.xlu1 %6420  ;;  %v7385_v18 = vpack.c.bf16 %v17850_v12, %v14249_v5  ;;  %v17851_v19 = vld [vmem:[#allocation129_spill] sm:$0xff]  ;;  %v3211_v17 = vadd.s32 %v3210_v36, %v17842_v26  ;;  %v17879_v36 = vld [vmem:[#allocation66_spill] sm:$0xff] }
 0x8d0   :  { %6713 = vperm.xlu0 %7689, %v17831_v43   ;;  %vm6447_vm8 = vcmp.eq.s32.totalorder %v6421_v44, 1  ;;  %v3125_v34 = vrot.slane %v17851_v19, 4  ;;  %v17855_v43 = vld [vmem:[#allocation29_spill] sm:$0xff]  ;;  %v17856_v44 = vld [vmem:[#allocation119_spill] sm:$0xff]  ;;  %v3398_v26 = vshll.u32 %v3397_v57, 16  ;;  %v17875_v57 = vld [vmem:[#allocation64_spill] sm:$0xff] }
 0x8d1   :  { %vm6463_vm10 = vmand %vm6447_vm8, %vm17835_vm12  ;;  %v3248_v42 = vpop.permute.xlu0 %3247  ;;  %vm17848_vm8 = vnez %v17847_v9  ;;  %v17868_v9 = vld [vmem:[#allocation27_spill] sm:$0xff] }
 0x8d2   :  { %7376 = vmatpush1.bf16.msra.mxu1 %v17834_v20  ;;  %v6479_v32 = vsel %vm6463_vm10, 1, %v16344_v15  ;;  %v3274_v56 = vsel %vm17840_vm5, %v3248_v42, 0  ;;  %vm17852_vm10 = vcmp.eq.s32.totalorder %v13791_v45, %v17358_v0  ;;  %v17860_v20 = vmov 0  ;;  %v17862_v42 = vld [vmem:[#allocation91_spill] sm:$0xff] }
 0x8d3   :  { %7378 = vmatprep.subr.bf16.mxu1 %v17838_v35  ;;  %v6491_v39 = vadd.s32 %v6487_v6, %v6479_v32  ;;  %v3286_v22 = vadd.s32 %v3282_v55, %v3274_v56  ;;  %v6427_v30 = vpop.permute.xlu1 %6426  ;;  %v17849_v6 = vld [vmem:[#allocation52_spill] sm:$0xff]  ;;  %v7389_v32 = vpack.c.bf16 %v17862_v42, %v14335_v24  ;;  %v3126_v40 = vadd.s32 %v3125_v34, %v17851_v19 }
 0x8d4   :  { %6719 = vperm.xlu0 %7689, %v17841_v4   ;;  %vm6449_vm14 = vcmp.eq.s32.totalorder %v6427_v30, 1  ;;  %v3380_v55 = vrot.slane %v17849_v6, 4  ;;  %v3212_v35 = vrot.slane %v3211_v17, 2 }
 0x8d5   :  { %vm6465_vm7 = vmand %vm6449_vm14, %vm17846_vm0  ;;  %v3254_v7 = vpop.permute.xlu0 %3253  ;;  %vm17854_vm14 = vnez %v17853_v48  ;;  %vm17858_vm0 = vcmp.lt.s32.totalorder %v17716_v2, 32 }
 0x8d6   :  { %7380 = vmatpush1.bf16.msra.mxu1 %v17845_v41  ;;  %v6481_v46 = vsel %vm6465_vm7, 1, %v16344_v15  ;;  %v3276_v38 = vsel %vm17848_vm8, %v3254_v7, 0  ;;  %vm14766_vm7 = vmand %vm14402_vm4, %vm17858_vm0  ;;  %vm17864_vm4 = vcmp.lt.s32.totalorder %v17729_v59, 32  ;;  %v3127_v41 = vrot.slane %v3126_v40, 2 }
 0x8d7   :  { %7382 = vmatprep.subr.bf16.mxu1 %v7381_v10  ;;  %v14742_v1 = vadd.s32 %v6489_v58, %v6481_v46  ;;  %v3288_v49 = vadd.s32 %v3284_v47, %v3276_v38  ;;  %v6433_v23 = vpop.permute.xlu1 %6432  ;;  %v3381_v58 = vadd.s32 %v3380_v55, %v17849_v6  ;;  %v17861_v20 = vsel %vm14766_vm7, 4294967295, %v17860_v20  ;;  %vm14788_vm8 = vmand %vm14450_vm11, %vm17864_vm4 }
 0x8d8   :  { %vm6451_vm12 = vcmp.eq.s32.totalorder %v6433_v23, 1  ;;  %v7391_v10 = vpack.c.bf16 %v14355_v11, %v14337_v13  ;;  %v3213_v7 = vadd.s32 %v3212_v35, %v3211_v17  ;;  %v3396_v38 = vcvt.f32.s32 %v17868_v9  ;;  %v2831_v23 = vpop.f32.mrb[0].mxu0 }
 0x8d9   :  { %v3292_v63 = vadd.s32 %v3289_v3, %v3288_v49  ;;  %vm6467_vm5 = vmand %vm6451_vm12, %vm17852_vm10  ;;  %v3260_v62 = vpop.permute.xlu0 %3259  ;;  %v7387_v3 = vpack.c.bf16 %v17856_v44, %v17855_v43  ;;  %v3382_v24 = vrot.slane %v3381_v58, 2  ;;  %v17869_v49 = vld [vmem:[#allocation77_spill] sm:$0xff]  ;;  %vm17870_vm11 = vcmask 1040384   ;;  %2836 = vst [vmem:[%s15240_s2] sm:$0xff] %v2831_v23 }
 0x8da   :  { %7384 = vmatpush1.bf16.msra.mxu1 %v7383_v51  ;;  %v6483_v54 = vsel %vm6467_vm5, 1, %v16344_v15  ;;  %v3278_v31 = vsel %vm17854_vm14, %v3260_v62, 0  ;;  %v6761_v51 = vsel %vm17870_vm11, %v17869_v49, 0  ;;  %v3399_v12 = vadd.s32 %v3398_v26, %v3396_v38  ;;  %v17884_v23 = vld [vmem:[#allocation109_spill] sm:$0xff] }
 0x8db   :  { %7386 = vmatprep.subr.bf16.mxu1 %v7385_v18  ;;  %v14757_v5 = vadd.s32 %v6491_v39, %v6483_v54  ;;  %v3290_v47 = vadd.s32 %v3286_v22, %v3278_v31  ;;  %v3383_v6 = vadd.s32 %v3382_v24, %v3381_v58  ;;  %v3128_v18 = vadd.s32 %v3127_v41, %v3126_v40  ;;  %v17873_v31 = vld [vmem:[#allocation128_spill] sm:$0xff] }
 0x8dc   :  { %v6508_v21 = vpop.permute.xlu1 %6507  ;;  %v3214_v19 = vrot.slane %v3213_v7, 1  ;;  %v17871_v62 = vmov 1.0|1.0   ;;  %v6762_v48 = vand.u32 65535, %v6761_v51  ;;  %vm3400_vm12 = vcmp.lt.s32.totalorder %v3399_v12, 32 }
 0x8dd   :  { %v3293_v56 = vadd.s32 %v17863_v25, %v3290_v47  ;;  %v6554_v39 = vsel %vm14766_vm7, %v6508_v21, 0  ;;  %v14776_v2 = vpop.permute.xlu0 %6592  ;;  %v3129_v47 = vrot.slane %v3128_v18, 1  ;;  %vm16071_vm10 = vcmp.eq.s32.totalorder %v17875_v57, 0 }
 0x8de   :  { %7388 = vmatpush1.bf16.msra.mxu1 %v7387_v3  ;;  %v6580_v22 = vadd.s32 %v14641_v28, %v6554_v39  ;;  %v6639_v4 = vsel %vm14766_vm7, %v14776_v2, 0  ;;  %v7393_v28 = vpack.c.bf16 %v14434_v14, %v14410_v53  ;;  %v7395_v53 = vpack.c.bf16 %v14436_v52, %v14416_v37 }
 0x8df   :  { %7390 = vmatprep.subr.bf16.mxu1 %v7389_v32  ;;  %v3294_v30 = vadd.s32 %v3293_v56, %v3292_v63  ;;  %v2833_v63 = vpop.f32.mrb[1].mxu0  ;;  %v3384_v52 = vrot.slane %v3383_v6, 1  ;;  %v3215_v43 = vadd.s32 %v3214_v19, %v3213_v7  ;;  %vm16072_vm5 = vcmp.eq.s32.totalorder %v17875_v57, 1  ;;  %v17918_v19 = vld [vmem:[#allocation106_spill] sm:$0xff] }
 0x8e0   :  { %v6514_v50 = vpop.permute.xlu1 %6513  ;;  %2837 = vst [vmem:[%s15240_s2 + $0x8] sm:$0xff] %v2833_v63  ;;  %v6764_v32 = vcvt.s32.f32 %v6762_v48  ;;  %v3401_v40 = vsel %vm3400_vm12, %v3399_v12, 32  ;;  %v6763_v25 = vshrl.u32 %v6761_v51, 16  ;;  %vm16068_vm14 = vcmp.eq.s32.totalorder %v17875_v57, 2  ;;  %v17888_v63 = vld [vmem:[#allocation26_spill] sm:$0xff] }
 0x8e1   :  { %v3295_v46 = vrot.slane %v3294_v30, 4  ;;  %v6556_v13 = vsel %vm14788_vm8, %v6514_v50, 0  ;;  %v14796_v11 = vpop.permute.xlu0 %6601  ;;  %v3385_v21 = vadd.s32 %v3384_v52, %v3383_v6  ;;  %v3130_v56 = vadd.s32 %v3129_v47, %v3128_v18  ;;  %v17882_v6 = vld [vmem:[#allocation125_spill] sm:$0xff]  ;;  %v17886_v18 = vld [vmem:[#allocation60_spill] sm:$0xff]  ;;  %v17892_v48 = vld [vmem:[#allocation34_spill] sm:$0xff] }
 0x8e2   :  { %7392 = vmatpush1.bf16.msra.mxu1 %v7391_v10  ;;  %v14798_v59 = vadd.s32 %v6580_v22, %v6556_v13  ;;  %v3403_v39 = vsel %vm16071_vm10, %v3215_v43, 0  ;;  %vm16069_vm0 = vcmp.eq.s32.totalorder %v17875_v57, 3  ;;  %v6765_v7 = vcvt.s32.f32 %v6763_v25  ;;  %v17880_v13 = vld [vmem:[#allocation24_spill] sm:$0xff]  ;;  %v17890_v52 = vld [vmem:[#allocation25_spill] sm:$0xff]  ;;  %v17917_v47 = vld [vmem:[#allocation90_spill] sm:$0xff] }
 0x8e3   :  { %7394 = vmatprep.subr.bf16.mxu1 %v7393_v28  ;;  %v3296_v55 = vadd.s32 %v3295_v46, %v3294_v30  ;;  %v3417_v28 = vrot.slane %v3401_v40, %v17879_v36  ;;  %v3408_v50 = vsel %vm16068_vm14, %v3385_v21, 0  ;;  %vm16070_vm4 = vcmp.eq.s32.totalorder %v17875_v57, 4  ;;  %v17898_v21 = vld [vmem:[#allocation107_spill] sm:$0xff]  ;;  %v17903_v25 = vld [vmem:[#allocation85_spill] sm:$0xff] }
 0x8e4   :  { %v14803_v14 = vpop.permute.xlu1 %6516  ;;  %vm17881_vm11 = vnez %v17880_v13  ;;  %v3411_v38 = vsel %vm16069_vm0, %v3130_v56, 0  ;;  %vm17883_vm12 = vnez %v17882_v6  ;;  %vm17885_vm14 = vnez %v17884_v23 }
 0x8e5   :  { %v3297_v34 = vrot.slane %v3296_v55, 2  ;;  %v14807_v17 = vpop.permute.xlu0 %6607  ;;  %vm17887_vm0 = vnez %v17886_v18  ;;  %vm17891_vm10 = vnez %v17890_v52  ;;  %v17900_v40 = vmov 0 }
 0x8e6   :  { %7396 = vmatpush1.bf16.msra.mxu1 %v7395_v53  ;;  %v3418_v53 = vsel %vm16070_vm4, %v3417_v28, 0  ;;  %vm17889_vm4 = vnez %v17888_v63 }
 0x8e7   :  { %7398 = vmatprep.subr.msk.bf16.mxu1 %vm13895_vm9, %v17871_v62  ;;  %v3298_v54 = vadd.s32 %v3297_v34, %v3296_v55 }
 0x8e8   :  { %v14819_v58 = vpop.permute.xlu1 %6522 }
 0x8e9   :  { %5826 = vmatmul.mubr.f32.vlgmr.msra.gmra.mrb[0].mxu1 %v17873_v31  ;;  %v3299_v44 = vrot.slane %v3298_v54, 1  ;;  %v14824_v29 = vpop.permute.xlu0 %6613 }
 0x8ea   :  { %7400 = vmatpush1.bf16.msk.msra.mxu1 %vm13907_vm3, %v17871_v62  ;;  %5928 = vmatprep.mubr.f32.mxu1 %v17579_v60 }
 0x8eb   :  { %7402 = vmatprep.subr.msk.bf16.mxu1 %vm13968_vm13, %v17871_v62  ;;  %v3300_v42 = vadd.s32 %v3299_v44, %v3298_v54  ;;  %v17895_v44 = vld [vmem:[#allocation126_spill] sm:$0xff] }
 0x8ec   :  { %v14832_v35 = vpop.permute.xlu1 %6528 }
 0x8ed   :  { %v3405_v22 = vsel %vm16072_vm5, %v3300_v42, 0  ;;  %v14842_v30 = vpop.permute.xlu0 %6619  ;;  %6766 = vadd.xlane.f32.xlu1 %v6764_v32  ;;  %vm16073_vm5 = vcmp.eq.s32.totalorder %v17892_v48, %v17358_v0  ;;  %v17897_v42 = vld [vmem:[#allocation135_spill] sm:$0xff] }
 0x8ee   :  { %7404 = vmatpush1.bf16.msk.msra.mxu1 %vm13982_vm2, %v17871_v62  ;;  %v3406_v10 = vadd.s32 %v3405_v22, %v3403_v39 }
 0x8ef   :  { %7406 = vmatprep.subr.msk.bf16.mxu1 %vm14042_vm6, %v17871_v62 }
 0x8f0   :  { %v14851_v41 = vpop.permute.xlu1 %6534  ;;  %v3409_v46 = vadd.s32 %v3408_v50, %v3406_v10  ;;  %v17905_v10 = vld [vmem:[#allocation71_spill] sm:$0xff]  ;;  %v17908_v50 = vmov 0 }
 0x8f1   :  { %v14857_v9 = vpop.permute.xlu0 %6625 }
 0x8f2   :  { %7408 = vmatpush1.bf16.msk.msra.mxu1 %vm17881_vm11, %v17871_v62  ;;  %v3412_v55 = vadd.s32 %v3411_v38, %v3409_v46  ;;  %v17916_v38 = vld [vmem:[#allocation49_spill] sm:$0xff] }
 0x8f3   :  { %7410 = vmatprep.subr.msk.bf16.mxu1 %vm17883_vm12, %v17871_v62  ;;  %6768 = vadd.xlane.f32.xlu0 %v6765_v7  ;;  %v17910_v7 = vld [vmem:[#allocation138_spill] sm:$0xff] }
 0x8f4   :  { %v14866_v49 = vpop.permute.xlu1 %6540  ;;  %v3419_v51 = vadd.s32 %v3418_v53, %v3412_v55  ;;  %vm17965_vm7 = vcmp.eq.s32.totalorder %v17910_v7, %v17358_v0 }
 0x8f5   :  { %v14871_v12 = vpop.permute.xlu0 %6634 }
 0x8f6   :  { %7412 = vmatpush1.bf16.msk.msra.mxu1 %vm17885_vm14, %v17871_v62  ;;  %3420 = vst [vmem:[%s15241_s3] sm:$0xff] %v3419_v51 }
 0x8f7   :  { %7414 = vmatprep.subr.msk.bf16.mxu1 %vm17887_vm0, %v17871_v62 }
 0x8f8   :  { %v14882_v34 = vpop.permute.xlu1 %6546 }
 0x8fa   :  { %7416 = vmatpush1.bf16.msk.msra.mxu1 %vm17889_vm4, %v17871_v62  ;;  %v6250_v54 = vpop.permute.xlu0 %6249  ;;  %vm17896_vm4 = vnez %v17895_v44 }
 0x8fb   :  { %7418 = vmatprep.subr.msk.bf16.mxu1 %vm17891_vm10, %v17871_v62  ;;  %vm6294_vm0 = vcmp.eq.s32.totalorder %v6250_v54, 1  ;;  %vm16074_vm10 = vcmp.eq.s32.totalorder %v17898_v21, %v17358_v0 }
 0x8fc   :  { %vm14895_vm14 = vmand %vm6294_vm0, %vm16073_vm5  ;;  %v14899_v43 = vpop.permute.xlu1 %6552  ;;  %vm17899_vm5 = vcmp.lt.s32.totalorder %v17898_v21, 32 }
 0x8fe   :  { %7420 = vmatpush1.bf16.msk.msra.mxu1 %vm17896_vm4, %v17871_v62  ;;  %v6256_v32 = vpop.permute.xlu0 %6255  ;;  %vm17904_vm4 = vnez %v17903_v25 }
 0x8ff   :  { %7422 = vmatprep.subr.msk.bf16.mxu1 %vm14343_vm1, %v17871_v62  ;;  %vm6296_vm12 = vcmp.eq.s32.totalorder %v6256_v32, 1  ;;  %vm17911_vm1 = vcmp.lt.s32.totalorder %v17910_v7, 32 }
 0x900   :  { %vm6312_vm0 = vmand %vm6296_vm12, %vm16074_vm10  ;;  %vm17906_vm12 = vnez %v17905_v10  ;;  %vm16077_vm10 = vcmp.eq.s32.totalorder %v17910_v7, %v17358_v0 }
 0x901   :  { %vm14914_vm11 = vmand %vm6312_vm0, %vm17899_vm5  ;;  %v6596_v56 = vpop.permute.xlu1 %6595  ;;  %vm17907_vm5 = vcmp.lt.s32.totalorder %v17892_v48, 32 }
 0x902   :  { %v17901_v40 = vsel %vm14914_vm11, 4294967295, %v17900_v40  ;;  %7424 = vmatpush1.bf16.msk.msra.mxu1 %vm17904_vm4, %v17871_v62  ;;  %v6557_v39 = vsel %vm14914_vm11, %v14803_v14, 0  ;;  %v6642_v22 = vsel %vm14914_vm11, %v14796_v11, 0  ;;  %v6262_v28 = vpop.permute.xlu0 %6261  ;;  %vm14934_vm0 = vmand %vm14895_vm14, %vm17907_vm5  ;;  %v17912_v11 = vmov 0  ;;  %v17914_v14 = vld [vmem:[#allocation93_spill] sm:$0xff] }
 0x903   :  { %17902 = vst [vmem:[#allocation7_spill] sm:$0xff] %v17901_v40  ;;  %7426 = vmatprep.subr.msk.bf16.mxu1 %vm17906_vm12, %v17871_v62  ;;  %v17909_v50 = vsel %vm14934_vm0, 4294967295, %v17908_v50  ;;  %vm6298_vm4 = vcmp.eq.s32.totalorder %v6262_v28, 1  ;;  %vm17915_vm14 = vnez %v17914_v14  ;;  %v6555_v55 = vsel %vm14934_vm0, %v17916_v38, 0 }
 0x904   :  { %vm6314_vm11 = vmand %vm6298_vm4, %vm16077_vm10  ;;  %v6640_v53 = vsel %vm14934_vm0, %v6596_v56, 0  ;;  %v17919_v56 = vand.u32 4294901760, %v17873_v31  ;;  %vm17920_vm5 = vcmp.lt.s32.totalorder %v17918_v19, 32 }
 0x905   :  { %vm14945_vm12 = vmand %vm6314_vm11, %vm17911_vm1  ;;  %v6599_v46 = vpop.permute.xlu1 %6598  ;;  %vm16078_vm1 = vcmp.eq.s32.totalorder %v17918_v19, %v17358_v0 }
 0x906   :  { %v17913_v11 = vsel %vm14945_vm12, 4294967295, %v17912_v11  ;;  %7428 = vmatpush1.bf16.msk.msra.mxu1 %vm17915_vm14, %v17871_v62  ;;  %v6559_v51 = vsel %vm14945_vm12, %v14819_v58, 0  ;;  %v6644_v54 = vsel %vm14945_vm12, %v14807_v17, 0  ;;  %v6268_v32 = vpop.permute.xlu0 %6267  ;;  %v17921_v17 = vmov 0  ;;  %v17924_v58 = vld [vmem:[#allocation141_spill] sm:$0xff] }
 0x907   :  { %7430 = vmatprep.subr.bf16.mxu1 %v17917_v47  ;;  %v6571_v28 = vadd.s32 %v6559_v51, %v6555_v55  ;;  %vm6300_vm4 = vcmp.eq.s32.totalorder %v6268_v32, 1  ;;  %v6656_v38 = vadd.s32 %v6644_v54, %v6640_v53  ;;  %v17925_v51 = vld [vmem:[#allocation81_spill] sm:$0xff]  ;;  %v17926_v54 = vld [vmem:[#allocation8_spill] sm:$0xff]  ;;  %v6641_v2 = vsel %vm14788_vm8, %v6599_v46, 0  ;;  %v17941_v46 = vld [vmem:[#allocation46_spill] sm:$0xff] }
 0x908   :  { %vm6316_vm11 = vmand %vm6300_vm4, %vm16078_vm1  ;;  %vm17927_vm4 = vnez %v17926_v54  ;;  %v17928_v32 = vld [vmem:[#allocation124_spill] sm:$0xff] }
 0x909   :  { %5932 = vmatmul.mubr.f32.vlgmr.msra.gmra.mrb[0].mxu1 %v17919_v56  ;;  %vm14973_vm10 = vmand %vm6316_vm11, %vm17920_vm5  ;;  %v6605_v55 = vpop.permute.xlu1 %6604  ;;  %vm16083_vm11 = vcmp.eq.s32.totalorder %v17928_v32, %v17358_v0 }
 0x90a   :  { %v17922_v17 = vsel %vm14973_vm10, 4294967295, %v17921_v17  ;;  %7432 = vmatpush1.bf16.msra.mxu1 %v17924_v58  ;;  %6098 = vmatprep.mubr.f32.mxu1 %v17579_v60  ;;  %v6561_v53 = vsel %vm14973_vm10, %v14832_v35, 0  ;;  %v6646_v31 = vsel %vm14973_vm10, %v14824_v29, 0  ;;  %v6643_v47 = vsel %vm17927_vm4, %v6605_v55, 0  ;;  %v6274_v56 = vpop.permute.xlu0 %6273  ;;  %v17933_v55 = vld [vmem:[#allocation80_spill] sm:$0xff] }
 0x90b   :  { %17923 = vst [vmem:[#allocation9_spill] sm:$0xff] %v17922_v17  ;;  %7434 = vmatprep.subr.bf16.mxu1 %v17925_v51  ;;  %v6573_v58 = vadd.s32 %v6561_v53, %v6557_v39  ;;  %v6655_v36 = vadd.s32 %v6643_v47, %v6639_v4  ;;  %vm6302_vm5 = vcmp.eq.s32.totalorder %v6274_v56, 1  ;;  %v6658_v35 = vadd.s32 %v6646_v31, %v6642_v22  ;;  %v17934_v53 = vld [vmem:[#allocation134_spill] sm:$0xff]  ;;  %v17935_v22 = vld [vmem:[#allocation56_spill] sm:$0xff] }
 0x90c   :  { %vm6318_vm1 = vmand %vm6302_vm5, %vm16083_vm11  ;;  %vm17929_vm10 = vcmp.lt.s32.totalorder %v17928_v32, 32  ;;  %v17930_v29 = vmov 0  ;;  %vm16086_vm12 = vcmp.eq.s32.totalorder %v17934_v53, %v17358_v0  ;;  %v17936_v31 = vld [vmem:[#allocation12_spill] sm:$0xff]  ;;  %vm17938_vm11 = vcmp.lt.s32.totalorder %v17934_v53, 32 }
 0x90d   :  { %vm14999_vm14 = vmand %vm6318_vm1, %vm17929_vm10  ;;  %v6611_v39 = vpop.permute.xlu1 %6610  ;;  %vm17937_vm10 = vnez %v17936_v31 }
 0x90e   :  { %v17931_v29 = vsel %vm14999_vm14, 4294967295, %v17930_v29  ;;  %7436 = vmatpush1.bf16.msra.mxu1 %v17933_v55  ;;  %v6563_v4 = vsel %vm14999_vm14, %v14851_v41, 0  ;;  %v6645_v51 = vsel %vm17937_vm10, %v6611_v39, 0  ;;  %v6280_v47 = vpop.permute.xlu0 %6279  ;;  %v6648_v56 = vsel %vm14999_vm14, %v14842_v30, 0 }
 0x90f   :  { %17932 = vst [vmem:[#allocation11_spill] sm:$0xff] %v17931_v29  ;;  %7438 = vmatprep.subr.bf16.mxu1 %v17935_v22  ;;  %v6575_v55 = vadd.s32 %v6571_v28, %v6563_v4  ;;  %v6657_v17 = vadd.s32 %v6645_v51, %v6641_v2  ;;  %vm6304_vm1 = vcmp.eq.s32.totalorder %v6280_v47, 1  ;;  %v15017_v40 = vadd.s32 %v6656_v38, %v6648_v56  ;;  %v17942_v28 = vld [vmem:[#allocation21_spill] sm:$0xff]  ;;  %v17943_v38 = vld [vmem:[#allocation16_spill] sm:$0xff]  ;;  %v17945_v4 = vld [vmem:[#allocation14_spill] sm:$0xff] }
 0x910   :  { %vm6320_vm5 = vmand %vm6304_vm1, %vm16086_vm12  ;;  %v17939_v41 = vmov 0  ;;  %vm17944_vm14 = vnez %v17943_v38  ;;  %vm16088_vm1 = vcmp.eq.s32.totalorder %v17945_v4, %v17358_v0  ;;  %vm17946_vm12 = vcmp.lt.s32.totalorder %v17945_v4, 32  ;;  %v17962_v29 = vld [vmem:[#allocation117_spill] sm:$0xff] }
 0x911   :  { %vm15024_vm0 = vmand %vm6320_vm5, %vm17938_vm11  ;;  %v6617_v39 = vpop.permute.xlu1 %6616 }
 0x912   :  { %v17940_v41 = vsel %vm15024_vm0, 4294967295, %v17939_v41  ;;  %7440 = vmatpush1.bf16.msra.mxu1 %v17941_v46  ;;  %v6565_v30 = vsel %vm15024_vm0, %v14866_v49, 0  ;;  %v6647_v2 = vsel %vm17944_vm14, %v6617_v39, 0  ;;  %v6286_v22 = vpop.permute.xlu0 %6285  ;;  %v6650_v51 = vsel %vm15024_vm0, %v14857_v9, 0  ;;  %v17949_v39 = vld [vmem:[#allocation113_spill] sm:$0xff]  ;;  %v17950_v9 = vld [vmem:[#allocation108_spill] sm:$0xff] }
 0x913   :  { %7442 = vmatprep.subr.bf16.mxu1 %v17942_v28  ;;  %v6577_v47 = vadd.s32 %v6573_v58, %v6565_v30  ;;  %v6659_v56 = vadd.s32 %v6655_v36, %v6647_v2  ;;  %vm6306_vm11 = vcmp.eq.s32.totalorder %v6286_v22, 1  ;;  %v15040_v46 = vadd.s32 %v6658_v35, %v6650_v51  ;;  %v17952_v22 = vld [vmem:[#allocation137_spill] sm:$0xff] }
 0x914   :  { %vm6322_vm5 = vmand %vm6306_vm11, %vm16088_vm1  ;;  %vm17951_vm0 = vnez %v17774_v61  ;;  %vm17954_vm1 = vcmp.lt.s32.totalorder %v17952_v22, 32 }
 0x915   :  { %vm15047_vm14 = vmand %vm6322_vm5, %vm17946_vm12  ;;  %v6623_v28 = vpop.permute.xlu1 %6622  ;;  %vm16091_vm12 = vcmp.eq.s32.totalorder %v17952_v22, %v17358_v0 }
 0x916   :  { %7444 = vmatpush1.bf16.msra.mxu1 %v17949_v39  ;;  %v6567_v36 = vsel %vm15047_vm14, %v14882_v34, 0  ;;  %v6649_v58 = vsel %vm17951_vm0, %v6623_v28, 0  ;;  %v6292_v35 = vpop.permute.xlu0 %6291  ;;  %v17953_v34 = vsel %vm14624_vm15, %v14871_v12, 0 }
 0x917   :  { %7446 = vmatprep.subr.bf16.mxu1 %v17950_v9  ;;  %v6579_v30 = vadd.s32 %v6575_v55, %v6567_v36  ;;  %v6661_v2 = vadd.s32 %v6657_v17, %v6649_v58  ;;  %vm6308_vm11 = vcmp.eq.s32.totalorder %v6292_v35, 1  ;;  %v17955_v17 = vmov 0  ;;  %v17957_v55 = vld [vmem:[#allocation28_spill] sm:$0xff] }
 0x918   :  { %vm6324_vm5 = vmand %vm6308_vm11, %vm16091_vm12  ;;  %vm17959_vm11 = vnez %v17782_v16 }
 0x919   :  { %v6583_v51 = vadd.s32 %v14798_v59, %v6579_v30  ;;  %v15068_v39 = vadd.s32 %v6661_v2, %v17953_v34  ;;  %vm15072_vm0 = vmand %vm6324_vm5, %vm17954_vm1  ;;  %v6629_v28 = vpop.permute.xlu1 %6628  ;;  %v17958_v59 = vld [vmem:[#allocation131_spill] sm:$0xff]  ;;  %v17960_v2 = vld [vmem:[#allocation133_spill] sm:$0xff]  ;;  %vm17963_vm5 = vcmp.eq.s32.totalorder %v17892_v48, %v17358_v0 }
 0x91a   :  { %v17956_v17 = vsel %vm15072_vm0, 4294967295, %v17955_v17  ;;  %7448 = vmatpush1.bf16.msra.mxu1 %v17957_v55  ;;  %v6569_v36 = vsel %vm15072_vm0, %v14899_v43, 0  ;;  %v6651_v12 = vsel %vm17959_vm11, %v6629_v28, 0  ;;  %v6394_v9 = vpop.permute.xlu0 %6393  ;;  %v17961_v34 = vld [vmem:[#allocation140_spill] sm:$0xff]  ;;  %vm17967_vm0 = vcmp.eq.s32.totalorder %v17898_v21, %v17358_v0 }
 0x91b   :  { %7450 = vmatprep.subr.bf16.mxu1 %v17958_v59  ;;  %v6581_v58 = vadd.s32 %v6577_v47, %v6569_v36  ;;  %v6663_v35 = vadd.s32 %v6659_v56, %v6651_v12  ;;  %vm6438_vm1 = vcmp.eq.s32.totalorder %v6394_v9, 1  ;;  %v17964_v43 = vld [vmem:[#allocation4_spill] sm:$0xff]  ;;  %v17966_v36 = vld [vmem:[#allocation6_spill] sm:$0xff] }
 0x91c   :  { %vm6454_vm12 = vmand %vm6438_vm1, %vm17963_vm5 }
 0x91d   :  { %v6584_v30 = vadd.s32 %v6583_v51, %v6581_v58  ;;  %v6470_v56 = vsel %vm6454_vm12, 1, %v16344_v15 }
 0x91e   :  { %7452 = vmatpush1.bf16.msra.mxu1 %v17960_v2  ;;  %v6400_v33 = vpop.permute.xlu0 %6399  ;;  %v15085_v55 = vpop.permute.xlu1 %6680 }
 0x91f   :  { %7454 = vmatprep.subr.bf16.mxu1 %v17961_v34  ;;  %vm6440_vm15 = vcmp.eq.s32.totalorder %v6400_v33, 1  ;;  %v6585_v58 = vrot.slane %v6584_v30, 4 }
 0x920   :  { %vm6456_vm1 = vmand %vm6440_vm15, %vm17967_vm0  ;;  %vm17969_vm15 = vcmp.eq.s32.totalorder %v17928_v32, %v17358_v0 }
 0x921   :  { %v6472_v7 = vsel %vm6456_vm1, 1, %v16344_v15  ;;  %vm17974_vm1 = vnez %v17956_v17 }
 0x922   :  { %7456 = vmatpush1.bf16.msra.mxu1 %v17962_v29  ;;  %v6684_v47 = vpop.permute.xlu1 %6683 }
 0x923   :  { %7458 = vmatprep.subr.bf16.mxu1 %v17964_v43  ;;  %v6406_v28 = vpop.permute.xlu0 %6405  ;;  %v6726_v12 = vsel %vm14788_vm8, %v6684_v47, 0  ;;  %vm17970_vm8 = vcmp.eq.s32.totalorder %v17934_v53, %v17358_v0  ;;  %v6586_v43 = vadd.s32 %v6585_v58, %v6584_v30 }
 0x924   :  { %vm6442_vm11 = vcmp.eq.s32.totalorder %v6406_v28, 1 }
 0x925   :  { %vm6458_vm4 = vmand %vm6442_vm11, %vm17965_vm7  ;;  %vm17968_vm7 = vcmp.eq.s32.totalorder %v17918_v19, %v17358_v0  ;;  %v6587_v30 = vrot.slane %v6586_v43, 2 }
 0x926   :  { %v6474_v51 = vsel %vm6458_vm4, 1, %v16344_v15  ;;  %7460 = vmatpush1.bf16.msra.mxu1 %v17966_v36  ;;  %v15104_v29 = vpop.permute.xlu1 %6689 }
 0x927   :  { %v6486_v48 = vadd.s32 %v6474_v51, %v6470_v56  ;;  %7462 = vmatprep.subr.msk.bf16.mxu1 %vm13895_vm9, %v17871_v62  ;;  %v6412_v33 = vpop.permute.xlu0 %6411  ;;  %v6588_v36 = vadd.s32 %v6587_v30, %v6586_v43  ;;  %v18001_v30 = vld [vmem:[#allocation5_spill] sm:$0xff] }
 0x928   :  { %vm6444_vm5 = vcmp.eq.s32.totalorder %v6412_v33, 1 }
 0x929   :  { %vm6460_vm12 = vmand %vm6444_vm5, %vm17968_vm7  ;;  %6100 = vmatmul.mubr.f32.vlgmr.msra.gmra.mrb[0].mxu1 %v14331_v27  ;;  %vm17975_vm5 = vnez %v17884_v23  ;;  %vm17976_vm7 = vnez %v17886_v18 }
 0x92a   :  { %v6476_v21 = vsel %vm6460_vm12, 1, %v16344_v15  ;;  %7464 = vmatpush1.bf16.msk.msra.mxu1 %vm13907_vm3, %v17871_v62  ;;  %6202 = vmatprep.mubr.f32.mxu1 %v17579_v60  ;;  %v6696_v19 = vpop.permute.xlu1 %6695 }
 0x92b   :  { %v6488_v37 = vadd.s32 %v6476_v21, %v6472_v7  ;;  %7466 = vmatprep.subr.msk.bf16.mxu1 %vm13968_vm13, %v17871_v62  ;;  %v6418_v59 = vpop.permute.xlu0 %6417  ;;  %v6730_v9 = vsel %vm17937_vm10, %v6696_v19, 0  ;;  %vm17973_vm10 = vcmp.eq.s32.totalorder %v17945_v4, %v17358_v0  ;;  %v6589_v21 = vrot.slane %v6588_v36, 1 }
 0x92c   :  { %vm6446_vm9 = vcmp.eq.s32.totalorder %v6418_v59, 1  ;;  %v6742_v3 = vadd.s32 %v6730_v9, %v6726_v12 }
 0x92d   :  { %vm6462_vm3 = vmand %vm6446_vm9, %vm17969_vm15  ;;  %vm17977_vm9 = vcmp.eq.s32.totalorder %v17952_v22, %v17358_v0 }
 0x92e   :  { %v6478_v60 = vsel %vm6462_vm3, 1, %v16344_v15  ;;  %7468 = vmatpush1.bf16.msk.msra.mxu1 %vm13982_vm2, %v17871_v62  ;;  %vm17971_vm2 = vnez %v17880_v13  ;;  %vm17978_vm3 = vnez %v17888_v63 }
 0x92f   :  { %v6490_v45 = vadd.s32 %v6486_v48, %v6478_v60  ;;  %7470 = vmatprep.subr.msk.bf16.mxu1 %vm14042_vm6, %v17871_v62  ;;  %v6424_v8 = vpop.permute.xlu0 %6423  ;;  %v6632_v31 = vpop.permute.xlu1 %6631  ;;  %vm17972_vm6 = vnez %v17882_v6 }
 0x930   :  { %vm6448_vm13 = vcmp.eq.s32.totalorder %v6424_v8, 1  ;;  %v6652_v32 = vsel %vm15047_vm14, %v6632_v31, 0 }
 0x931   :  { %vm6464_vm0 = vmand %vm6448_vm13, %vm17970_vm8  ;;  %v6664_v24 = vadd.s32 %v15017_v40, %v6652_v32  ;;  %vm17979_vm13 = vnez %v17890_v52  ;;  %vm17980_vm8 = vnez %v17926_v54 }
 0x932   :  { %v6480_v2 = vsel %vm6464_vm0, 1, %v16344_v15  ;;  %7472 = vmatpush1.bf16.msk.msra.mxu1 %vm17971_vm2, %v17871_v62  ;;  %v6728_v0 = vsel %vm17980_vm8, %v15104_v29, 0  ;;  %vm17981_vm0 = vnez %v17861_v20  ;;  %vm17982_vm2 = vnez %v17943_v38 }
 0x933   :  { %v6492_v26 = vadd.s32 %v6488_v37, %v6480_v2  ;;  %7474 = vmatprep.subr.msk.bf16.mxu1 %vm17972_vm6, %v17871_v62  ;;  %v6430_v34 = vpop.permute.xlu0 %6429  ;;  %v6667_v53 = vadd.s32 %v6664_v24, %v6663_v35  ;;  %v6638_v28 = vpop.permute.xlu1 %6637  ;;  %vm17983_vm6 = vnez %v17895_v44  ;;  %v6590_v44 = vadd.s32 %v6589_v21, %v6588_v36 }
 0x934   :  { %vm6450_vm4 = vcmp.eq.s32.totalorder %v6430_v34, 1  ;;  %v6654_v13 = vsel %vm17974_vm1, %v6638_v28, 0  ;;  %vm17996_vm8 = vcmp.eq.s32.totalorder %v17875_v57, 0 }
 0x935   :  { %vm6466_vm11 = vmand %vm6450_vm4, %vm17973_vm10  ;;  %v6666_v6 = vadd.s32 %v15040_v46, %v6654_v13  ;;  %vm17984_vm4 = vnez %v17774_v61  ;;  %vm17985_vm10 = vnez %v17897_v42 }
 0x936   :  { %v6482_v47 = vsel %vm6466_vm11, 1, %v16344_v15  ;;  %7476 = vmatpush1.bf16.msk.msra.mxu1 %vm17975_vm5, %v17871_v62  ;;  %vm17986_vm11 = vnez %v17903_v25  ;;  %vm17987_vm5 = vnez %v17905_v10 }
 0x937   :  { %v6494_v40 = vadd.s32 %v6490_v45, %v6482_v47  ;;  %7478 = vmatprep.subr.msk.bf16.mxu1 %vm17976_vm7, %v17871_v62  ;;  %v6436_v35 = vpop.permute.xlu0 %6435  ;;  %v6668_v4 = vadd.s32 %v6666_v6, %v15068_v39  ;;  %vm17988_vm7 = vnez %v17909_v50  ;;  %v17992_v45 = vld [vmem:[#allocation7_spill] sm:$0xff]  ;;  %v17994_v50 = vld [vmem:[#allocation9_spill] sm:$0xff] }
 0x938   :  { %vm6452_vm12 = vcmp.eq.s32.totalorder %v6436_v35, 1  ;;  %v6702_v23 = vpop.permute.xlu1 %6701  ;;  %v6725_v42 = vsel %vm17988_vm7, %v15085_v55, 0 }
 0x939   :  { %v6497_v56 = vadd.s32 %v6494_v40, %v14742_v1  ;;  %vm6468_vm15 = vmand %vm6452_vm12, %vm17977_vm9  ;;  %v6669_v51 = vadd.s32 %v6668_v4, %v6667_v53  ;;  %v6732_v7 = vsel %vm17982_vm2, %v6702_v23, 0  ;;  %vm17989_vm12 = vnez %v17913_v11 }
 0x93a   :  { %v6484_v46 = vsel %vm6468_vm15, 1, %v16344_v15  ;;  %7480 = vmatpush1.bf16.msk.msra.mxu1 %vm17978_vm3, %v17871_v62  ;;  %vm17990_vm9 = vnez %v17914_v14  ;;  %vm17991_vm15 = vcmp.eq.s32.totalorder %v17875_v57, 1  ;;  %vm17993_vm3 = vnez %v17992_v45 }
 0x93b   :  { %v6496_v18 = vadd.s32 %v6492_v26, %v6484_v46  ;;  %7482 = vmatprep.subr.msk.bf16.mxu1 %vm17979_vm13, %v17871_v62  ;;  %v6678_v39 = vpop.permute.xlu0 %6677  ;;  %v6670_v1 = vrot.slane %v6669_v51, 4  ;;  %vm17995_vm13 = vnez %v17994_v50  ;;  %v6776_v11 = vsel %vm17996_vm8, %v6590_v44, 0  ;;  %v17998_v26 = vld [vmem:[#allocation11_spill] sm:$0xff] }
 0x93c   :  { %v6724_v22 = vsel %vm17981_vm0, %v6678_v39, 0  ;;  %v6708_v63 = vpop.permute.xlu1 %6707  ;;  %vm17997_vm0 = vnez %v17940_v41  ;;  %vm17999_vm2 = vnez %v17998_v26 }
 0x93d   :  { %v6498_v15 = vadd.s32 %v6496_v18, %v14757_v5  ;;  %v6740_v48 = vadd.s32 %v6728_v0, %v6724_v22  ;;  %v6671_v33 = vadd.s32 %v6670_v1, %v6669_v51  ;;  %v6734_v52 = vsel %vm17984_vm4, %v6708_v63, 0 }
 0x93e   :  { %7484 = vmatpush1.bf16.msk.msra.mxu1 %vm17983_vm6, %v17871_v62  ;;  %v6746_v20 = vadd.s32 %v6742_v3, %v6734_v52  ;;  %vm18000_vm6 = vnez %v17782_v16  ;;  %vm18002_vm4 = vnez %v18001_v30 }
 0x93f   :  { %v6499_v54 = vadd.s32 %v6498_v15, %v6497_v56  ;;  %7486 = vmatprep.subr.msk.bf16.mxu1 %vm17985_vm10, %v17871_v62  ;;  %v6687_v5 = vpop.permute.xlu0 %6686  ;;  %v6744_v29 = vadd.s32 %v6740_v48, %v6732_v7  ;;  %v6672_v37 = vrot.slane %v6671_v33, 2 }
 0x940   :  { %v6711_v59 = vpop.permute.xlu1 %6710  ;;  %v6727_v8 = vsel %vm17993_vm3, %v6687_v5, 0 }
 0x941   :  { %v6673_v38 = vadd.s32 %v6672_v37, %v6671_v33  ;;  %v6500_v41 = vrot.slane %v6499_v54, 4 }
 0x942   :  { %7488 = vmatpush1.bf16.msk.msra.mxu1 %vm17986_vm11, %v17871_v62  ;;  %vm18006_vm11 = vcmp.eq.s32.totalorder %v17875_v57, 4 }
 0x943   :  { %7490 = vmatprep.subr.msk.bf16.mxu1 %vm17987_vm5, %v17871_v62  ;;  %v6693_v61 = vpop.permute.xlu0 %6692  ;;  %v6674_v19 = vrot.slane %v6673_v38, 1  ;;  %v6501_v4 = vadd.s32 %v6500_v41, %v6499_v54 }
 0x944   :  { %v6729_v12 = vsel %vm17989_vm12, %v6693_v61, 0  ;;  %v6717_v3 = vpop.permute.xlu1 %6716 }
 0x945   :  { %v6741_v9 = vadd.s32 %v6729_v12, %v6725_v42  ;;  %v6675_v60 = vadd.s32 %v6674_v19, %v6673_v38  ;;  %v6737_v28 = vsel %vm15047_vm14, %v6717_v3, 0  ;;  %v6502_v51 = vrot.slane %v6501_v4, 2 }
 0x946   :  { %7492 = vmatpush1.bf16.msk.msra.mxu1 %vm17990_vm9, %v17871_v62  ;;  %v6735_v62 = vsel %vm17997_vm0, %v6711_v59, 0  ;;  %vm18003_vm14 = vcmp.eq.s32.totalorder %v17875_v57, 2  ;;  %v18005_v59 = vld [vmem:[#allocation66_spill] sm:$0xff] }
 0x947   :  { %v6699_v25 = vpop.permute.xlu0 %6698  ;;  %v6777_v10 = vsel %vm17991_vm15, %v6675_v60, 0  ;;  %v6503_v49 = vadd.s32 %v6502_v51, %v6501_v4 }
 0x948   :  { %v6731_v55 = vsel %vm17995_vm13, %v6699_v25, 0  ;;  %v6723_v31 = vpop.permute.xlu1 %6722  ;;  %v6778_v32 = vadd.s32 %v6777_v10, %v6776_v11 }
 0x949   :  { %v6743_v58 = vadd.s32 %v6731_v55, %v6727_v8  ;;  %6204 = vmatmul.mubr.f32.vlgmr.msra.gmra.mrb[0].mxu1 %v14331_v27  ;;  %v6739_v24 = vsel %vm17974_vm1, %v6723_v31, 0  ;;  %v6504_v0 = vrot.slane %v6503_v49, 1  ;;  %vm18004_vm1 = vcmp.eq.s32.totalorder %v17875_v57, 3 }
 0x94b   :  { %v6747_v14 = vadd.s32 %v6743_v58, %v6735_v62  ;;  %v6705_v2 = vpop.permute.xlu0 %6704  ;;  %v6505_v15 = vadd.s32 %v6504_v0, %v6503_v49 }
 0x94c   :  { %v6733_v34 = vsel %vm17999_vm2, %v6705_v2, 0 }
 0x94d   :  { %v6751_v43 = vadd.s32 %v6747_v14, %v6739_v24  ;;  %v6745_v53 = vadd.s32 %v6741_v9, %v6733_v34  ;;  %v6781_v33 = vsel %vm18004_vm1, %v6505_v15, 0 }
 0x94f   :  { %v6749_v13 = vadd.s32 %v6745_v53, %v6737_v28  ;;  %v6714_v27 = vpop.permute.xlu0 %6713 }
 0x950   :  { %v6736_v47 = vsel %vm18000_vm6, %v6714_v27, 0 }
 0x951   :  { %v6748_v6 = vadd.s32 %v6744_v29, %v6736_v47 }
 0x953   :  { %v6752_v40 = vadd.s32 %v6749_v13, %v6748_v6  ;;  %v6720_v35 = vpop.permute.xlu0 %6719 }
 0x954   :  { %v6738_v17 = vsel %vm18002_vm4, %v6720_v35, 0 }
 0x955   :  { %v6750_v56 = vadd.s32 %v6746_v20, %v6738_v17 }
 0x957   :  { %v6753_v23 = vadd.s32 %v6751_v43, %v6750_v56 }
 0x959   :  { %v6754_v46 = vadd.s32 %v6753_v23, %v6752_v40 }
 0x95b   :  { %v6755_v18 = vrot.slane %v6754_v46, 4 }
 0x95d   :  { %v6756_v39 = vadd.s32 %v6755_v18, %v6754_v46 }
 0x95f   :  { %v6757_v36 = vrot.slane %v6756_v39, 2 }
 0x961   :  { %v6758_v1 = vadd.s32 %v6757_v36, %v6756_v39 }
 0x963   :  { %v6759_v16 = vrot.slane %v6758_v1, 1 }
 0x965   :  { %v6760_v22 = vadd.s32 %v6759_v16, %v6758_v1 }
 0x967   :  { %v6779_v48 = vsel %vm18003_vm14, %v6760_v22, 0 }
 0x968   :  { %v6780_v63 = vadd.s32 %v6779_v48, %v6778_v32 }
 0x96a   :  { %v6782_v7 = vadd.s32 %v6781_v33, %v6780_v63 }
 0x97a   :  { %v6767_v52 = vpop.xlane.xlu1 %6766 }
 0x97b   :  { %v6770_v5 = vcvt.f32.s32 %v6767_v52 }
 0x980   :  { %v6769_v54 = vpop.xlane.xlu0 %6768 }
 0x981   :  { %v6771_v20 = vcvt.f32.s32 %v6769_v54 }
 0x983   :  { %v6772_v29 = vshll.u32 %v6771_v20, 16 }
 0x985   :  { %v6773_v21 = vadd.s32 %v6772_v29, %v6770_v5 }
 0x987   :  { %vm6774_vm10 = vcmp.lt.s32.totalorder %v6773_v21, 32 }
 0x988   :  { %v6775_v37 = vsel %vm6774_vm10, %v6773_v21, 32 }
 0x989   :  { %v6786_v38 = vrot.slane %v6775_v37, %v18005_v59 }
 0x98b   :  { %v6787_v61 = vsel %vm18006_vm11, %v6786_v38, 0 }
 0x98c   :  { %v6788_v44 = vadd.s32 %v6787_v61, %v6782_v7 }
 0x98e   :  { %7108 = vst [vmem:[%s15241_s3 + $0x8] sm:$0xff] %v6788_v44 }
 0xa1c   :  { %v6205_v42 = vpop.f32.mrb[0].mxu1 }
 0xa1d   :  { %7106 = vst [vmem:[%s15240_s2 + $0x10] sm:$0xff] %v6205_v42  ;;  %v6207_v19 = vpop.f32.mrb[1].mxu1 }
 0xa1e   :  { %7107 = vst [vmem:[%s15240_s2 + $0x18] sm:$0xff] %v6207_v19 }

</bundles_post_ra>
